<compile_context>
chip_gen: v5e
topology: v5e:2x2
jax: 0.10.0
libtpu: 0.0.40
codegen_flags: <defaults>
</compile_context>

<pallas_src>
import functools

import jax
import jax.numpy as jnp
from jax import lax
from jax.experimental import pallas as pl
from jax.experimental.pallas import tpu as pltpu

NCLASSES = 10
BN_EPS = 1e-5
N_ITERS = 3  # the PyTorch forward runs the a->pool->b->pool->c block 3 times


# --------------------------- fused Pallas kernel ------------------------------

def _fused_forward_kernel(x_ref, wa_ref, sa_ref, wb_ref, sb_ref, wc_ref, sc_ref,
                          wl_loop_ref, wl_res_ref, lmask_ref, lsel_ref, bl_ref,
                          o_ref, cols_ref, *, hw, w0, offs_b, cin, c2, ncls):
    """Whole forward pass for one image; activations/weights stay in VMEM/vregs.

    x_ref      : (cin, H*W)        channels on sublanes, flat spatial on lanes
    wa/wb/wc   : (Cout, K*Cin)     lane-dense conv weights (BN scale folded), bf16
    sa/sb/sc   : (Cout, 1)         folded BN shift (f32)
    wl_loop    : (cin*ncls, H*W)   Linear weight scatter-embedded on the full grid
    wl_res     : (cin*ncls, H*W)   (Wd o Conv13) composed weight on the full grid
    lmask      : (cin, cin*ncls)   block-diagonal selection mask
    lsel       : (cin*ncls, ncls)  class-selection matrix
    bl         : (1, ncls)         d_b + Wd.vec(res_b)
    o_ref      : (1, ncls)         per-image logits
    cols_ref   : (9*c2, H*W) bf16  VMEM im2col buffer for the 3x3 conv
    """

    def shifted(v, d):
        # shifted(v, d)[:, p] == v[:, p + d]; wrap-around only reaches positions
        # outside the shrinking valid window, which never feed a valid output
        # (statically asserted in the wrapper).
        if d == 0:
            return v
        return pltpu.roll(v, shift=hw - d, axis=1)

    def pool(x):
        # MaxPool2d(2, stride=1), separable: 2 rolls + 2 maxes.
        m1 = jnp.maximum(x, shifted(x, 1))
        return jnp.maximum(m1, shifted(m1, w0))

    x0 = x_ref[...]                                    # (cin, hw) f32
    a = x0
    for _ in range(N_ITERS):
        # --- a: 1x1 conv (BN scale folded) -> BN shift -> ReLU -> pool ---
        t = jnp.dot(wa_ref[...], a.astype(jnp.bfloat16),
                    preferred_element_type=jnp.float32)
        a = pool(jnp.maximum(t + sa_ref[...], 0.0))

        # --- b: grouped 3x3 conv as ONE stacked-K matmul (im2col in VMEM) ---
        for k, d in enumerate(offs_b):
            cols_ref[k * c2:(k + 1) * c2, :] = shifted(a, d).astype(jnp.bfloat16)
        t = jnp.dot(wb_ref[...], cols_ref[...],
                    preferred_element_type=jnp.float32)
        a = pool(jnp.maximum(t + sb_ref[...], 0.0))

        # --- c: 1x1 conv -> BN shift -> ReLU ---
        t = jnp.dot(wc_ref[...], a.astype(jnp.bfloat16),
                    preferred_element_type=jnp.float32)
        a = jnp.maximum(t + sc_ref[...], 0.0)

    # --- final Linear with the 13x13 residual conv + bias folded in ---
    #   logits = Wd.vec(a_loop) + (Wd o Conv13).vec(x0) + (Wd.vec(b_res) + b_d)
    # Stage 1: contract the spatial axis for every (channel, class) pair
    #          (both operands lane-dense, K = H*W on lanes).
    dims = (((1,), (1,)), ((), ()))
    prod = (lax.dot_general(a, wl_loop_ref[...], dimension_numbers=dims,
                            preferred_element_type=jnp.float32) +
            lax.dot_general(x0, wl_res_ref[...], dimension_numbers=dims,
                            preferred_element_type=jnp.float32))   # (cin, cin*ncls)
    # Stage 2: keep each channel's own class block and fold channels together.
    folded = jnp.sum(prod * lmask_ref[...], axis=0, keepdims=True)  # (1, cin*ncls)
    o_ref[...] = bl_ref[...] + jnp.dot(folded, lsel_ref[...],
                                       preferred_element_type=jnp.float32)


# --------------------------- wrapper / weight prep ----------------------------

def bn_fold(gamma, beta, mean, var, eps=BN_EPS):
    scale = gamma / jnp.sqrt(var + eps)
    shift = beta - mean * scale
    return scale, shift


def _stack_conv_weight(w_oihw):
    """(Cout, Cin, kh, kw) -> lane-dense (Cout, kh*kw*Cin), tap order k = dy*kw+dx."""
    cout, cin, kh, kw = w_oihw.shape
    return jnp.transpose(w_oihw, (0, 2, 3, 1)).reshape(cout, kh * kw * cin)


def _fold_residual_into_linear(d_w, d_b, res_w, res_b, cin, h0, w0, hv, wv):
    """Compose the final Linear with the 13x13 residual conv (wrapper-level)."""
    ncls = d_w.shape[0]
    wds = d_w.reshape(ncls, cin, hv, wv).astype(jnp.float32)   # NCHW-flatten order
    # loop branch: scatter-embed onto the full grid (zeros at invalid positions)
    wd_loop = jnp.pad(wds, ((0, 0), (0, 0), (0, h0 - hv), (0, w0 - wv)))
    # residual branch: (Wd o Conv13) == adjoint of the VALID conv applied to Wd,
    # i.e. a "full" convolution with the spatially-flipped, I/O-transposed kernel.
    kh, kw = res_w.shape[2], res_w.shape[3]
    kt = jnp.flip(jnp.transpose(res_w, (1, 0, 2, 3)), axis=(2, 3)).astype(jnp.float32)
    wd_res = lax.conv_general_dilated(
        wds, kt, (1, 1), ((kh - 1, kh - 1), (kw - 1, kw - 1)),
        dimension_numbers=('NCHW', 'OIHW', 'NCHW'),
        precision=lax.Precision.HIGHEST)                       # (ncls, cin, h0, w0)
    b_extra = jnp.einsum('kcyx,c->k', wds, res_b.astype(jnp.float32))

    def lane_dense(w):  # (ncls, cin, h0, w0) -> (cin*ncls, h0*w0)
        return jnp.transpose(w.reshape(ncls, cin, h0 * w0),
                             (1, 0, 2)).reshape(cin * ncls, h0 * w0)

    return (lane_dense(wd_loop), lane_dense(wd_res),
            (d_b.astype(jnp.float32) + b_extra).reshape(1, ncls))


def my_class_forward(x_nchw, params):
    x = x_nchw.astype(jnp.float32)
    n, cin, h0, w0 = x.shape
    hw = h0 * w0
    c2 = params['a_w'].shape[0]
    ncls = params['d_b'].shape[0]

    # Static geometry checks: every stage's valid window must be at least as
    # large as its kernel, so valid outputs never read rolled-wrapped garbage.
    h, w = h0, w0
    for _ in range(N_ITERS):
        for k in (1, 2, 3, 2, 1):      # conv a, pool, conv b, pool, conv c
            assert h >= k and w >= k, "valid window smaller than kernel"
            h, w = h - k + 1, w - k + 1
    hv, wv = h, w
    assert hv >= 1 and wv >= 1
    assert (h0 - 12, w0 - 12) == (hv, wv)              # residual output matches loop
    assert params['d_w'].shape == (ncls, cin * hv * wv)

    # Fold BN scale into conv weights (inference-mode BN); shifts become biases.
    wa = _stack_conv_weight(
        params['a_w'] * params['a_scale'][:, None, None, None]).astype(jnp.bfloat16)
    wb = _stack_conv_weight(
        params['b_w_full'] * params['b_scale'][:, None, None, None]).astype(jnp.bfloat16)
    wc = _stack_conv_weight(
        params['c_w'] * params['c_scale'][:, None, None, None]).astype(jnp.bfloat16)
    sa = params['a_shift'].reshape(c2, 1).astype(jnp.float32)
    sb = params['b_shift'].reshape(c2, 1).astype(jnp.float32)
    sc = params['c_shift'].reshape(cin, 1).astype(jnp.float32)

    wl_loop, wl_res, bl = _fold_residual_into_linear(
        params['d_w'].astype(jnp.float32), params['d_b'],
        params['res_w'].astype(jnp.float32), params['res_b'],
        cin, h0, w0, hv, wv)
    lmask = jnp.repeat(jnp.eye(cin, dtype=jnp.float32), ncls, axis=1)  # (cin, cin*ncls)
    lsel = jnp.tile(jnp.eye(ncls, dtype=jnp.float32), (cin, 1))        # (cin*ncls, ncls)

    x_flat = x.reshape(n, cin, hw)     # channels on sublanes, flat spatial on lanes
    offs_b = tuple(dy * w0 + dx for dy in range(3) for dx in range(3))

    kernel = functools.partial(_fused_forward_kernel, hw=hw, w0=w0,
                               offs_b=offs_b, cin=cin, c2=c2, ncls=ncls)

    def resident(arr):
        nd = arr.ndim
        return pl.BlockSpec(arr.shape, lambda i: (0,) * nd)   # VMEM-resident weight

    out = pl.pallas_call(
        kernel,
        out_shape=jax.ShapeDtypeStruct((n, 1, ncls), jnp.float32),
        grid=(n,),
        in_specs=[
            pl.BlockSpec((None, cin, hw), lambda i: (i, 0, 0)),   # per-image input
            resident(wa), resident(sa), resident(wb), resident(sb),
            resident(wc), resident(sc),
            resident(wl_loop), resident(wl_res),
            resident(lmask), resident(lsel), resident(bl),
        ],
        out_specs=pl.BlockSpec((None, 1, ncls), lambda i: (i, 0, 0)),
        scratch_shapes=[pltpu.VMEM((len(offs_b) * c2, hw), jnp.bfloat16)],
        compiler_params=pltpu.CompilerParams(
            dimension_semantics=("parallel",),   # batch axis -> both TCs on v7x
        ),
    )(x_flat, wa, sa, wb, sb, wc, sc, wl_loop, wl_res, lmask, lsel, bl)
    return out.reshape(n, ncls)


# --------------------------- parameter init -----------------------------------

def expand_grouped_weight(w_g, groups):
    """(Cout, Cin//groups, k, k) grouped weight -> block-diagonal (Cout, Cin, k, k)."""
    cout, cin_g, k, _ = w_g.shape
    cin = cin_g * groups
    cout_g = cout // groups
    w_full = jnp.zeros((cout, cin, k, k), w_g.dtype)
    for g in range(groups):
        w_full = w_full.at[g * cout_g:(g + 1) * cout_g,
                           g * cin_g:(g + 1) * cin_g].set(
            w_g[g * cout_g:(g + 1) * cout_g])
    return w_full


def init_params(key, in_channels, out_channels):
    c2 = out_channels * 2
    keys = iter(jax.random.split(key, 24))

    def nrm(shape, scale=0.1):
        return scale * jax.random.normal(next(keys), shape, jnp.float32)

    p = {}
    # a: custom_conv(in, c2, k=1)
    p['a_w'] = nrm((c2, in_channels, 1, 1), 0.3)
    p['a_scale'], p['a_shift'] = bn_fold(1.0 + nrm((c2,)), nrm((c2,)),
                                         nrm((c2,)), 0.5 + jnp.abs(nrm((c2,), 0.5)))
    # b: custom_conv(c2, c2, k=3, groups=4)
    p['b_w_g'] = nrm((c2, c2 // 4, 3, 3), 0.2)
    p['b_w_full'] = expand_grouped_weight(p['b_w_g'], 4)
    p['b_scale'], p['b_shift'] = bn_fold(1.0 + nrm((c2,)), nrm((c2,)),
                                         nrm((c2,)), 0.5 + jnp.abs(nrm((c2,), 0.5)))
    # c: custom_conv(c2, in, k=1)
    p['c_w'] = nrm((in_channels, c2, 1, 1), 0.3)
    p['c_scale'], p['c_shift'] = bn_fold(
        1.0 + nrm((in_channels,)), nrm((in_channels,)),
        nrm((in_channels,)), 0.5 + jnp.abs(nrm((in_channels,), 0.5)))
    # residual: Conv2d(in, in, k=13, bias=True)
    p['res_w'] = nrm((in_channels, in_channels, 13, 13), 0.05)
    p['res_b'] = nrm((in_channels,))
    # d: Linear(1200, 10)
    p['d_w'] = nrm((NCLASSES, 1200), 0.05)
    p['d_b'] = nrm((NCLASSES,))
    return p


# --------------------------- pure-JAX reference -------------------------------

def reference_forward(x_nchw, params):
    hp = lax.Precision.HIGHEST

    def conv(x, w, groups=1):
        return lax.conv_general_dilated(
            x, w, (1, 1), 'VALID', feature_group_count=groups,
            dimension_numbers=('NCHW', 'OIHW', 'NCHW'), precision=hp)

    def bn(x, scale, shift):
        return x * scale[None, :, None, None] + shift[None, :, None, None]

    def pool(x):
        return lax.reduce_window(x, -jnp.inf, lax.max,
                                 (1, 1, 2, 2), (1, 1, 1, 1), 'VALID')

    a = x_nchw
    for _ in range(N_ITERS):
        a = jax.nn.relu(bn(conv(a, params['a_w']), params['a_scale'], params['a_shift']))
        a = pool(a)
        a = jax.nn.relu(bn(conv(a, params['b_w_g'], groups=4),
                           params['b_scale'], params['b_shift']))
        a = pool(a)
        a = jax.nn.relu(bn(conv(a, params['c_w']), params['c_scale'], params['c_shift']))
    res = conv(x_nchw, params['res_w']) + params['res_b'][None, :, None, None]
    a = a + res
    flat = a.reshape(a.shape[0], -1)
    return jnp.matmul(flat, params['d_w'].T, precision=hp) + params['d_b']


# --------------------------- main ---------------------------------------------

if __name__ == "__main__":
    # Linear(1200, 10) with in_channels=3 implies 3*(H-12)*(W-12)=1200 -> H=W=32.
    in_channels, out_channels = 3, 8      # out_channels*2 = 16, divisible by groups=4
    key = jax.random.PRNGKey(0)
    pkey, xkey = jax.random.split(key)
    params = init_params(pkey, in_channels, out_channels)
    x = jax.random.normal(xkey, (2, in_channels, 32, 32), jnp.float32)

    forward = jax.jit(my_class_forward)
    out = jax.block_until_ready(forward(x, params))
    assert out.shape == (2, NCLASSES), out.shape

    ref = jax.block_until_ready(reference_forward(x, params))
    max_err = float(jnp.max(jnp.abs(out - ref)))
    # bf16 MXU operands (per perf review) with f32 accumulation; the residual /
    # Linear path is exact f32, so a 2e-2 tolerance leaves ample headroom.
    assert jnp.allclose(out, ref, rtol=2e-2, atol=2e-2), f"max abs err {max_err}"

    print("KERNEL_OK")
</pallas_src>

<mosaic_0001>
module attributes {stable_mosaic.version = 11 : i64} {
  func.func @_fused_forward_kernel(%arg0: i32, %arg1: memref<1x3x1024xf32, #tpu.memory_space<vmem>>, %arg2: memref<16x3xbf16, #tpu.memory_space<vmem>>, %arg3: memref<16x1xf32, #tpu.memory_space<vmem>>, %arg4: memref<16x144xbf16, #tpu.memory_space<vmem>>, %arg5: memref<16x1xf32, #tpu.memory_space<vmem>>, %arg6: memref<3x16xbf16, #tpu.memory_space<vmem>>, %arg7: memref<3x1xf32, #tpu.memory_space<vmem>>, %arg8: memref<30x1024xf32, #tpu.memory_space<vmem>>, %arg9: memref<30x1024xf32, #tpu.memory_space<vmem>>, %arg10: memref<3x30xf32, #tpu.memory_space<vmem>>, %arg11: memref<30x10xf32, #tpu.memory_space<vmem>>, %arg12: memref<1x10xf32, #tpu.memory_space<vmem>>, %arg13: memref<1x1x10xf32, #tpu.memory_space<vmem>>, %arg14: memref<144x1024xbf16, #tpu.memory_space<vmem>>) attributes {dimension_semantics = [#tpu.dimension_semantics<parallel>], iteration_bounds = array<i64: 2>, scalar_prefetch = 0 : i64, scratch_operands = 1 : i64, tpu.core_type = #tpu.core_type<tc>, window_params = [{transform_indices = @transform_0, window_bounds = array<i64: 1, 3, 1024>}, {pipeline_mode = #tpu.pipeline_mode<synchronous>, transform_indices = @transform_1, window_bounds = array<i64: 16, 3>}, {pipeline_mode = #tpu.pipeline_mode<synchronous>, transform_indices = @transform_2, window_bounds = array<i64: 16, 1>}, {pipeline_mode = #tpu.pipeline_mode<synchronous>, transform_indices = @transform_3, window_bounds = array<i64: 16, 144>}, {pipeline_mode = #tpu.pipeline_mode<synchronous>, transform_indices = @transform_4, window_bounds = array<i64: 16, 1>}, {pipeline_mode = #tpu.pipeline_mode<synchronous>, transform_indices = @transform_5, window_bounds = array<i64: 3, 16>}, {pipeline_mode = #tpu.pipeline_mode<synchronous>, transform_indices = @transform_6, window_bounds = array<i64: 3, 1>}, {pipeline_mode = #tpu.pipeline_mode<synchronous>, transform_indices = @transform_7, window_bounds = array<i64: 30, 1024>}, {pipeline_mode = #tpu.pipeline_mode<synchronous>, transform_indices = @transform_8, window_bounds = array<i64: 30, 1024>}, {pipeline_mode = #tpu.pipeline_mode<synchronous>, transform_indices = @transform_9, window_bounds = array<i64: 3, 30>}, {pipeline_mode = #tpu.pipeline_mode<synchronous>, transform_indices = @transform_10, window_bounds = array<i64: 30, 10>}, {pipeline_mode = #tpu.pipeline_mode<synchronous>, transform_indices = @transform_11, window_bounds = array<i64: 1, 10>}, {transform_indices = @transform_12, window_bounds = array<i64: 1, 1, 10>}]} {
    %c0 = arith.constant 0 : index
    %c0_0 = arith.constant 0 : index
    %c0_1 = arith.constant 0 : index
    %0 = vector.load %arg1[%c0, %c0_0, %c0_1] : memref<1x3x1024xf32, #tpu.memory_space<vmem>>, vector<1x3x1024xf32>
    %1 = vector.shape_cast %0 : vector<1x3x1024xf32> to vector<3x1024xf32>
    %c0_2 = arith.constant 0 : index
    %c0_3 = arith.constant 0 : index
    %2 = vector.load %arg2[%c0_2, %c0_3] : memref<16x3xbf16, #tpu.memory_space<vmem>>, vector<16x3xbf16>
    %3 = arith.truncf %1 : vector<3x1024xf32> to vector<3x1024xbf16>
    %cst = arith.constant dense<0.000000e+00> : vector<16x1024xf32>
    %4 = tpu.matmul %2, %3, %cst {dimension_numbers = #tpu.dot_dimension_numbers<[1], [0], [0], [1], [0, 0, 1, 1], [], []>} : vector<16x3xbf16>, vector<3x1024xbf16>, vector<16x1024xf32> -> vector<16x1024xf32>
    %c0_4 = arith.constant 0 : index
    %c0_5 = arith.constant 0 : index
    %5 = vector.load %arg3[%c0_4, %c0_5] : memref<16x1xf32, #tpu.memory_space<vmem>>, vector<16x1xf32>
    %6 = vector.broadcast %5 : vector<16x1xf32> to vector<16x1024xf32>
    %7 = arith.addf %4, %6 : vector<16x1024xf32>
    %cst_6 = arith.constant 0.000000e+00 : f32
    %8 = vector.broadcast %cst_6 : f32 to vector<16x1024xf32>
    %9 = arith.maximumf %7, %8 : vector<16x1024xf32>
    %c1023_i32 = arith.constant 1023 : i32
    %10 = tpu.dynamic_rotate %9 by %c1023_i32 dim 1 : vector<16x1024xf32>, i32 -> vector<16x1024xf32>
    %11 = arith.maximumf %9, %10 : vector<16x1024xf32>
    %c992_i32 = arith.constant 992 : i32
    %12 = tpu.dynamic_rotate %11 by %c992_i32 dim 1 : vector<16x1024xf32>, i32 -> vector<16x1024xf32>
    %13 = arith.maximumf %11, %12 : vector<16x1024xf32>
    %14 = arith.truncf %13 : vector<16x1024xf32> to vector<16x1024xbf16>
    %c0_7 = arith.constant 0 : index
    %c0_8 = arith.constant 0 : index
    %15 = vector.load %arg14[%c0_7, %c0_8] : memref<144x1024xbf16, #tpu.memory_space<vmem>>, vector<16x1024xbf16>
    tpu.vector_store %arg14[%c0_7, %c0_8], %14 {strides = array<i32>} : memref<144x1024xbf16, #tpu.memory_space<vmem>>, vector<16x1024xbf16>,
    %c1023_i32_9 = arith.constant 1023 : i32
    %16 = tpu.dynamic_rotate %13 by %c1023_i32_9 dim 1 : vector<16x1024xf32>, i32 -> vector<16x1024xf32>
    %17 = arith.truncf %16 : vector<16x1024xf32> to vector<16x1024xbf16>
    %c16 = arith.constant 16 : index
    %c0_10 = arith.constant 0 : index
    %18 = vector.load %arg14[%c16, %c0_10] : memref<144x1024xbf16, #tpu.memory_space<vmem>>, vector<16x1024xbf16>
    tpu.vector_store %arg14[%c16, %c0_10], %17 {strides = array<i32>} : memref<144x1024xbf16, #tpu.memory_space<vmem>>, vector<16x1024xbf16>,
    %c1022_i32 = arith.constant 1022 : i32
    %19 = tpu.dynamic_rotate %13 by %c1022_i32 dim 1 : vector<16x1024xf32>, i32 -> vector<16x1024xf32>
    %20 = arith.truncf %19 : vector<16x1024xf32> to vector<16x1024xbf16>
    %c32 = arith.constant 32 : index
    %c0_11 = arith.constant 0 : index
    %21 = vector.load %arg14[%c32, %c0_11] : memref<144x1024xbf16, #tpu.memory_space<vmem>>, vector<16x1024xbf16>
    tpu.vector_store %arg14[%c32, %c0_11], %20 {strides = array<i32>} : memref<144x1024xbf16, #tpu.memory_space<vmem>>, vector<16x1024xbf16>,
    %c992_i32_12 = arith.constant 992 : i32
    %22 = tpu.dynamic_rotate %13 by %c992_i32_12 dim 1 : vector<16x1024xf32>, i32 -> vector<16x1024xf32>
    %23 = arith.truncf %22 : vector<16x1024xf32> to vector<16x1024xbf16>
    %c48 = arith.constant 48 : index
    %c0_13 = arith.constant 0 : index
    %24 = vector.load %arg14[%c48, %c0_13] : memref<144x1024xbf16, #tpu.memory_space<vmem>>, vector<16x1024xbf16>
    tpu.vector_store %arg14[%c48, %c0_13], %23 {strides = array<i32>} : memref<144x1024xbf16, #tpu.memory_space<vmem>>, vector<16x1024xbf16>,
    %c991_i32 = arith.constant 991 : i32
    %25 = tpu.dynamic_rotate %13 by %c991_i32 dim 1 : vector<16x1024xf32>, i32 -> vector<16x1024xf32>
    %26 = arith.truncf %25 : vector<16x1024xf32> to vector<16x1024xbf16>
    %c64 = arith.constant 64 : index
    %c0_14 = arith.constant 0 : index
    %27 = vector.load %arg14[%c64, %c0_14] : memref<144x1024xbf16, #tpu.memory_space<vmem>>, vector<16x1024xbf16>
    tpu.vector_store %arg14[%c64, %c0_14], %26 {strides = array<i32>} : memref<144x1024xbf16, #tpu.memory_space<vmem>>, vector<16x1024xbf16>,
    %c990_i32 = arith.constant 990 : i32
    %28 = tpu.dynamic_rotate %13 by %c990_i32 dim 1 : vector<16x1024xf32>, i32 -> vector<16x1024xf32>
    %29 = arith.truncf %28 : vector<16x1024xf32> to vector<16x1024xbf16>
    %c80 = arith.constant 80 : index
    %c0_15 = arith.constant 0 : index
    %30 = vector.load %arg14[%c80, %c0_15] : memref<144x1024xbf16, #tpu.memory_space<vmem>>, vector<16x1024xbf16>
    tpu.vector_store %arg14[%c80, %c0_15], %29 {strides = array<i32>} : memref<144x1024xbf16, #tpu.memory_space<vmem>>, vector<16x1024xbf16>,
    %c960_i32 = arith.constant 960 : i32
    %31 = tpu.dynamic_rotate %13 by %c960_i32 dim 1 : vector<16x1024xf32>, i32 -> vector<16x1024xf32>
    %32 = arith.truncf %31 : vector<16x1024xf32> to vector<16x1024xbf16>
    %c96 = arith.constant 96 : index
    %c0_16 = arith.constant 0 : index
    %33 = vector.load %arg14[%c96, %c0_16] : memref<144x1024xbf16, #tpu.memory_space<vmem>>, vector<16x1024xbf16>
    tpu.vector_store %arg14[%c96, %c0_16], %32 {strides = array<i32>} : memref<144x1024xbf16, #tpu.memory_space<vmem>>, vector<16x1024xbf16>,
    %c959_i32 = arith.constant 959 : i32
    %34 = tpu.dynamic_rotate %13 by %c959_i32 dim 1 : vector<16x1024xf32>, i32 -> vector<16x1024xf32>
    %35 = arith.truncf %34 : vector<16x1024xf32> to vector<16x1024xbf16>
    %c112 = arith.constant 112 : index
    %c0_17 = arith.constant 0 : index
    %36 = vector.load %arg14[%c112, %c0_17] : memref<144x1024xbf16, #tpu.memory_space<vmem>>, vector<16x1024xbf16>
    tpu.vector_store %arg14[%c112, %c0_17], %35 {strides = array<i32>} : memref<144x1024xbf16, #tpu.memory_space<vmem>>, vector<16x1024xbf16>,
    %c958_i32 = arith.constant 958 : i32
    %37 = tpu.dynamic_rotate %13 by %c958_i32 dim 1 : vector<16x1024xf32>, i32 -> vector<16x1024xf32>
    %38 = arith.truncf %37 : vector<16x1024xf32> to vector<16x1024xbf16>
    %c128 = arith.constant 128 : index
    %c0_18 = arith.constant 0 : index
    %39 = vector.load %arg14[%c128, %c0_18] : memref<144x1024xbf16, #tpu.memory_space<vmem>>, vector<16x1024xbf16>
    tpu.vector_store %arg14[%c128, %c0_18], %38 {strides = array<i32>} : memref<144x1024xbf16, #tpu.memory_space<vmem>>, vector<16x1024xbf16>,
    %c0_19 = arith.constant 0 : index
    %c0_20 = arith.constant 0 : index
    %40 = vector.load %arg4[%c0_19, %c0_20] : memref<16x144xbf16, #tpu.memory_space<vmem>>, vector<16x144xbf16>
    %c0_21 = arith.constant 0 : index
    %c0_22 = arith.constant 0 : index
    %41 = vector.load %arg14[%c0_21, %c0_22] : memref<144x1024xbf16, #tpu.memory_space<vmem>>, vector<144x1024xbf16>
    %cst_23 = arith.constant dense<0.000000e+00> : vector<16x1024xf32>
    %42 = tpu.matmul %40, %41, %cst_23 {dimension_numbers = #tpu.dot_dimension_numbers<[1], [0], [0], [1], [0, 0, 1, 1], [], []>} : vector<16x144xbf16>, vector<144x1024xbf16>, vector<16x1024xf32> -> vector<16x1024xf32>
    %c0_24 = arith.constant 0 : index
    %c0_25 = arith.constant 0 : index
    %43 = vector.load %arg5[%c0_24, %c0_25] : memref<16x1xf32, #tpu.memory_space<vmem>>, vector<16x1xf32>
    %44 = vector.broadcast %43 : vector<16x1xf32> to vector<16x1024xf32>
    %45 = arith.addf %42, %44 : vector<16x1024xf32>
    %cst_26 = arith.constant 0.000000e+00 : f32
    %46 = vector.broadcast %cst_26 : f32 to vector<16x1024xf32>
    %47 = arith.maximumf %45, %46 : vector<16x1024xf32>
    %c1023_i32_27 = arith.constant 1023 : i32
    %48 = tpu.dynamic_rotate %47 by %c1023_i32_27 dim 1 : vector<16x1024xf32>, i32 -> vector<16x1024xf32>
    %49 = arith.maximumf %47, %48 : vector<16x1024xf32>
    %c992_i32_28 = arith.constant 992 : i32
    %50 = tpu.dynamic_rotate %49 by %c992_i32_28 dim 1 : vector<16x1024xf32>, i32 -> vector<16x1024xf32>
    %51 = arith.maximumf %49, %50 : vector<16x1024xf32>
    %c0_29 = arith.constant 0 : index
    %c0_30 = arith.constant 0 : index
    %52 = vector.load %arg6[%c0_29, %c0_30] : memref<3x16xbf16, #tpu.memory_space<vmem>>, vector<3x16xbf16>
    %53 = arith.truncf %51 : vector<16x1024xf32> to vector<16x1024xbf16>
    %cst_31 = arith.constant dense<0.000000e+00> : vector<3x1024xf32>
    %54 = tpu.matmul %52, %53, %cst_31 {dimension_numbers = #tpu.dot_dimension_numbers<[1], [0], [0], [1], [0, 0, 1, 1], [], []>} : vector<3x16xbf16>, vector<16x1024xbf16>, vector<3x1024xf32> -> vector<3x1024xf32>
    %c0_32 = arith.constant 0 : index
    %c0_33 = arith.constant 0 : index
    %55 = vector.load %arg7[%c0_32, %c0_33] : memref<3x1xf32, #tpu.memory_space<vmem>>, vector<3x1xf32>
    %56 = vector.broadcast %55 : vector<3x1xf32> to vector<3x1024xf32>
    %57 = arith.addf %54, %56 : vector<3x1024xf32>
    %cst_34 = arith.constant 0.000000e+00 : f32
    %58 = vector.broadcast %cst_34 : f32 to vector<3x1024xf32>
    %59 = arith.maximumf %57, %58 : vector<3x1024xf32>
    %c0_35 = arith.constant 0 : index
    %c0_36 = arith.constant 0 : index
    %60 = vector.load %arg2[%c0_35, %c0_36] : memref<16x3xbf16, #tpu.memory_space<vmem>>, vector<16x3xbf16>
    %61 = arith.truncf %59 : vector<3x1024xf32> to vector<3x1024xbf16>
    %cst_37 = arith.constant dense<0.000000e+00> : vector<16x1024xf32>
    %62 = tpu.matmul %60, %61, %cst_37 {dimension_numbers = #tpu.dot_dimension_numbers<[1], [0], [0], [1], [0, 0, 1, 1], [], []>} : vector<16x3xbf16>, vector<3x1024xbf16>, vector<16x1024xf32> -> vector<16x1024xf32>
    %c0_38 = arith.constant 0 : index
    %c0_39 = arith.constant 0 : index
    %63 = vector.load %arg3[%c0_38, %c0_39] : memref<16x1xf32, #tpu.memory_space<vmem>>, vector<16x1xf32>
    %64 = vector.broadcast %63 : vector<16x1xf32> to vector<16x1024xf32>
    %65 = arith.addf %62, %64 : vector<16x1024xf32>
    %cst_40 = arith.constant 0.000000e+00 : f32
    %66 = vector.broadcast %cst_40 : f32 to vector<16x1024xf32>
    %67 = arith.maximumf %65, %66 : vector<16x1024xf32>
    %c1023_i32_41 = arith.constant 1023 : i32
    %68 = tpu.dynamic_rotate %67 by %c1023_i32_41 dim 1 : vector<16x1024xf32>, i32 -> vector<16x1024xf32>
    %69 = arith.maximumf %67, %68 : vector<16x1024xf32>
    %c992_i32_42 = arith.constant 992 : i32
    %70 = tpu.dynamic_rotate %69 by %c992_i32_42 dim 1 : vector<16x1024xf32>, i32 -> vector<16x1024xf32>
    %71 = arith.maximumf %69, %70 : vector<16x1024xf32>
    %72 = arith.truncf %71 : vector<16x1024xf32> to vector<16x1024xbf16>
    %c0_43 = arith.constant 0 : index
    %c0_44 = arith.constant 0 : index
    %73 = vector.load %arg14[%c0_43, %c0_44] : memref<144x1024xbf16, #tpu.memory_space<vmem>>, vector<16x1024xbf16>
    tpu.vector_store %arg14[%c0_43, %c0_44], %72 {strides = array<i32>} : memref<144x1024xbf16, #tpu.memory_space<vmem>>, vector<16x1024xbf16>,
    %c1023_i32_45 = arith.constant 1023 : i32
    %74 = tpu.dynamic_rotate %71 by %c1023_i32_45 dim 1 : vector<16x1024xf32>, i32 -> vector<16x1024xf32>
    %75 = arith.truncf %74 : vector<16x1024xf32> to vector<16x1024xbf16>
    %c16_46 = arith.constant 16 : index
    %c0_47 = arith.constant 0 : index
    %76 = vector.load %arg14[%c16_46, %c0_47] : memref<144x1024xbf16, #tpu.memory_space<vmem>>, vector<16x1024xbf16>
    tpu.vector_store %arg14[%c16_46, %c0_47], %75 {strides = array<i32>} : memref<144x1024xbf16, #tpu.memory_space<vmem>>, vector<16x1024xbf16>,
    %c1022_i32_48 = arith.constant 1022 : i32
    %77 = tpu.dynamic_rotate %71 by %c1022_i32_48 dim 1 : vector<16x1024xf32>, i32 -> vector<16x1024xf32>
    %78 = arith.truncf %77 : vector<16x1024xf32> to vector<16x1024xbf16>
    %c32_49 = arith.constant 32 : index
    %c0_50 = arith.constant 0 : index
    %79 = vector.load %arg14[%c32_49, %c0_50] : memref<144x1024xbf16, #tpu.memory_space<vmem>>, vector<16x1024xbf16>
    tpu.vector_store %arg14[%c32_49, %c0_50], %78 {strides = array<i32>} : memref<144x1024xbf16, #tpu.memory_space<vmem>>, vector<16x1024xbf16>,
    %c992_i32_51 = arith.constant 992 : i32
    %80 = tpu.dynamic_rotate %71 by %c992_i32_51 dim 1 : vector<16x1024xf32>, i32 -> vector<16x1024xf32>
    %81 = arith.truncf %80 : vector<16x1024xf32> to vector<16x1024xbf16>
    %c48_52 = arith.constant 48 : index
    %c0_53 = arith.constant 0 : index
    %82 = vector.load %arg14[%c48_52, %c0_53] : memref<144x1024xbf16, #tpu.memory_space<vmem>>, vector<16x1024xbf16>
    tpu.vector_store %arg14[%c48_52, %c0_53], %81 {strides = array<i32>} : memref<144x1024xbf16, #tpu.memory_space<vmem>>, vector<16x1024xbf16>,
    %c991_i32_54 = arith.constant 991 : i32
    %83 = tpu.dynamic_rotate %71 by %c991_i32_54 dim 1 : vector<16x1024xf32>, i32 -> vector<16x1024xf32>
    %84 = arith.truncf %83 : vector<16x1024xf32> to vector<16x1024xbf16>
    %c64_55 = arith.constant 64 : index
    %c0_56 = arith.constant 0 : index
    %85 = vector.load %arg14[%c64_55, %c0_56] : memref<144x1024xbf16, #tpu.memory_space<vmem>>, vector<16x1024xbf16>
    tpu.vector_store %arg14[%c64_55, %c0_56], %84 {strides = array<i32>} : memref<144x1024xbf16, #tpu.memory_space<vmem>>, vector<16x1024xbf16>,
    %c990_i32_57 = arith.constant 990 : i32
    %86 = tpu.dynamic_rotate %71 by %c990_i32_57 dim 1 : vector<16x1024xf32>, i32 -> vector<16x1024xf32>
    %87 = arith.truncf %86 : vector<16x1024xf32> to vector<16x1024xbf16>
    %c80_58 = arith.constant 80 : index
    %c0_59 = arith.constant 0 : index
    %88 = vector.load %arg14[%c80_58, %c0_59] : memref<144x1024xbf16, #tpu.memory_space<vmem>>, vector<16x1024xbf16>
    tpu.vector_store %arg14[%c80_58, %c0_59], %87 {strides = array<i32>} : memref<144x1024xbf16, #tpu.memory_space<vmem>>, vector<16x1024xbf16>,
    %c960_i32_60 = arith.constant 960 : i32
    %89 = tpu.dynamic_rotate %71 by %c960_i32_60 dim 1 : vector<16x1024xf32>, i32 -> vector<16x1024xf32>
    %90 = arith.truncf %89 : vector<16x1024xf32> to vector<16x1024xbf16>
    %c96_61 = arith.constant 96 : index
    %c0_62 = arith.constant 0 : index
    %91 = vector.load %arg14[%c96_61, %c0_62] : memref<144x1024xbf16, #tpu.memory_space<vmem>>, vector<16x1024xbf16>
    tpu.vector_store %arg14[%c96_61, %c0_62], %90 {strides = array<i32>} : memref<144x1024xbf16, #tpu.memory_space<vmem>>, vector<16x1024xbf16>,
    %c959_i32_63 = arith.constant 959 : i32
    %92 = tpu.dynamic_rotate %71 by %c959_i32_63 dim 1 : vector<16x1024xf32>, i32 -> vector<16x1024xf32>
    %93 = arith.truncf %92 : vector<16x1024xf32> to vector<16x1024xbf16>
    %c112_64 = arith.constant 112 : index
    %c0_65 = arith.constant 0 : index
    %94 = vector.load %arg14[%c112_64, %c0_65] : memref<144x1024xbf16, #tpu.memory_space<vmem>>, vector<16x1024xbf16>
    tpu.vector_store %arg14[%c112_64, %c0_65], %93 {strides = array<i32>} : memref<144x1024xbf16, #tpu.memory_space<vmem>>, vector<16x1024xbf16>,
    %c958_i32_66 = arith.constant 958 : i32
    %95 = tpu.dynamic_rotate %71 by %c958_i32_66 dim 1 : vector<16x1024xf32>, i32 -> vector<16x1024xf32>
    %96 = arith.truncf %95 : vector<16x1024xf32> to vector<16x1024xbf16>
    %c128_67 = arith.constant 128 : index
    %c0_68 = arith.constant 0 : index
    %97 = vector.load %arg14[%c128_67, %c0_68] : memref<144x1024xbf16, #tpu.memory_space<vmem>>, vector<16x1024xbf16>
    tpu.vector_store %arg14[%c128_67, %c0_68], %96 {strides = array<i32>} : memref<144x1024xbf16, #tpu.memory_space<vmem>>, vector<16x1024xbf16>,
    %c0_69 = arith.constant 0 : index
    %c0_70 = arith.constant 0 : index
    %98 = vector.load %arg4[%c0_69, %c0_70] : memref<16x144xbf16, #tpu.memory_space<vmem>>, vector<16x144xbf16>
    %c0_71 = arith.constant 0 : index
    %c0_72 = arith.constant 0 : index
    %99 = vector.load %arg14[%c0_71, %c0_72] : memref<144x1024xbf16, #tpu.memory_space<vmem>>, vector<144x1024xbf16>
    %cst_73 = arith.constant dense<0.000000e+00> : vector<16x1024xf32>
    %100 = tpu.matmul %98, %99, %cst_73 {dimension_numbers = #tpu.dot_dimension_numbers<[1], [0], [0], [1], [0, 0, 1, 1], [], []>} : vector<16x144xbf16>, vector<144x1024xbf16>, vector<16x1024xf32> -> vector<16x1024xf32>
    %c0_74 = arith.constant 0 : index
    %c0_75 = arith.constant 0 : index
    %101 = vector.load %arg5[%c0_74, %c0_75] : memref<16x1xf32, #tpu.memory_space<vmem>>, vector<16x1xf32>
    %102 = vector.broadcast %101 : vector<16x1xf32> to vector<16x1024xf32>
    %103 = arith.addf %100, %102 : vector<16x1024xf32>
    %cst_76 = arith.constant 0.000000e+00 : f32
    %104 = vector.broadcast %cst_76 : f32 to vector<16x1024xf32>
    %105 = arith.maximumf %103, %104 : vector<16x1024xf32>
    %c1023_i32_77 = arith.constant 1023 : i32
    %106 = tpu.dynamic_rotate %105 by %c1023_i32_77 dim 1 : vector<16x1024xf32>, i32 -> vector<16x1024xf32>
    %107 = arith.maximumf %105, %106 : vector<16x1024xf32>
    %c992_i32_78 = arith.constant 992 : i32
    %108 = tpu.dynamic_rotate %107 by %c992_i32_78 dim 1 : vector<16x1024xf32>, i32 -> vector<16x1024xf32>
    %109 = arith.maximumf %107, %108 : vector<16x1024xf32>
    %c0_79 = arith.constant 0 : index
    %c0_80 = arith.constant 0 : index
    %110 = vector.load %arg6[%c0_79, %c0_80] : memref<3x16xbf16, #tpu.memory_space<vmem>>, vector<3x16xbf16>
    %111 = arith.truncf %109 : vector<16x1024xf32> to vector<16x1024xbf16>
    %cst_81 = arith.constant dense<0.000000e+00> : vector<3x1024xf32>
    %112 = tpu.matmul %110, %111, %cst_81 {dimension_numbers = #tpu.dot_dimension_numbers<[1], [0], [0], [1], [0, 0, 1, 1], [], []>} : vector<3x16xbf16>, vector<16x1024xbf16>, vector<3x1024xf32> -> vector<3x1024xf32>
    %c0_82 = arith.constant 0 : index
    %c0_83 = arith.constant 0 : index
    %113 = vector.load %arg7[%c0_82, %c0_83] : memref<3x1xf32, #tpu.memory_space<vmem>>, vector<3x1xf32>
    %114 = vector.broadcast %113 : vector<3x1xf32> to vector<3x1024xf32>
    %115 = arith.addf %112, %114 : vector<3x1024xf32>
    %cst_84 = arith.constant 0.000000e+00 : f32
    %116 = vector.broadcast %cst_84 : f32 to vector<3x1024xf32>
    %117 = arith.maximumf %115, %116 : vector<3x1024xf32>
    %c0_85 = arith.constant 0 : index
    %c0_86 = arith.constant 0 : index
    %118 = vector.load %arg2[%c0_85, %c0_86] : memref<16x3xbf16, #tpu.memory_space<vmem>>, vector<16x3xbf16>
    %119 = arith.truncf %117 : vector<3x1024xf32> to vector<3x1024xbf16>
    %cst_87 = arith.constant dense<0.000000e+00> : vector<16x1024xf32>
    %120 = tpu.matmul %118, %119, %cst_87 {dimension_numbers = #tpu.dot_dimension_numbers<[1], [0], [0], [1], [0, 0, 1, 1], [], []>} : vector<16x3xbf16>, vector<3x1024xbf16>, vector<16x1024xf32> -> vector<16x1024xf32>
    %c0_88 = arith.constant 0 : index
    %c0_89 = arith.constant 0 : index
    %121 = vector.load %arg3[%c0_88, %c0_89] : memref<16x1xf32, #tpu.memory_space<vmem>>, vector<16x1xf32>
    %122 = vector.broadcast %121 : vector<16x1xf32> to vector<16x1024xf32>
    %123 = arith.addf %120, %122 : vector<16x1024xf32>
    %cst_90 = arith.constant 0.000000e+00 : f32
    %124 = vector.broadcast %cst_90 : f32 to vector<16x1024xf32>
    %125 = arith.maximumf %123, %124 : vector<16x1024xf32>
    %c1023_i32_91 = arith.constant 1023 : i32
    %126 = tpu.dynamic_rotate %125 by %c1023_i32_91 dim 1 : vector<16x1024xf32>, i32 -> vector<16x1024xf32>
    %127 = arith.maximumf %125, %126 : vector<16x1024xf32>
    %c992_i32_92 = arith.constant 992 : i32
    %128 = tpu.dynamic_rotate %127 by %c992_i32_92 dim 1 : vector<16x1024xf32>, i32 -> vector<16x1024xf32>
    %129 = arith.maximumf %127, %128 : vector<16x1024xf32>
    %130 = arith.truncf %129 : vector<16x1024xf32> to vector<16x1024xbf16>
    %c0_93 = arith.constant 0 : index
    %c0_94 = arith.constant 0 : index
    %131 = vector.load %arg14[%c0_93, %c0_94] : memref<144x1024xbf16, #tpu.memory_space<vmem>>, vector<16x1024xbf16>
    tpu.vector_store %arg14[%c0_93, %c0_94], %130 {strides = array<i32>} : memref<144x1024xbf16, #tpu.memory_space<vmem>>, vector<16x1024xbf16>,
    %c1023_i32_95 = arith.constant 1023 : i32
    %132 = tpu.dynamic_rotate %129 by %c1023_i32_95 dim 1 : vector<16x1024xf32>, i32 -> vector<16x1024xf32>
    %133 = arith.truncf %132 : vector<16x1024xf32> to vector<16x1024xbf16>
    %c16_96 = arith.constant 16 : index
    %c0_97 = arith.constant 0 : index
    %134 = vector.load %arg14[%c16_96, %c0_97] : memref<144x1024xbf16, #tpu.memory_space<vmem>>, vector<16x1024xbf16>
    tpu.vector_store %arg14[%c16_96, %c0_97], %133 {strides = array<i32>} : memref<144x1024xbf16, #tpu.memory_space<vmem>>, vector<16x1024xbf16>,
    %c1022_i32_98 = arith.constant 1022 : i32
    %135 = tpu.dynamic_rotate %129 by %c1022_i32_98 dim 1 : vector<16x1024xf32>, i32 -> vector<16x1024xf32>
    %136 = arith.truncf %135 : vector<16x1024xf32> to vector<16x1024xbf16>
    %c32_99 = arith.constant 32 : index
    %c0_100 = arith.constant 0 : index
    %137 = vector.load %arg14[%c32_99, %c0_100] : memref<144x1024xbf16, #tpu.memory_space<vmem>>, vector<16x1024xbf16>
    tpu.vector_store %arg14[%c32_99, %c0_100], %136 {strides = array<i32>} : memref<144x1024xbf16, #tpu.memory_space<vmem>>, vector<16x1024xbf16>,
    %c992_i32_101 = arith.constant 992 : i32
    %138 = tpu.dynamic_rotate %129 by %c992_i32_101 dim 1 : vector<16x1024xf32>, i32 -> vector<16x1024xf32>
    %139 = arith.truncf %138 : vector<16x1024xf32> to vector<16x1024xbf16>
    %c48_102 = arith.constant 48 : index
    %c0_103 = arith.constant 0 : index
    %140 = vector.load %arg14[%c48_102, %c0_103] : memref<144x1024xbf16, #tpu.memory_space<vmem>>, vector<16x1024xbf16>
    tpu.vector_store %arg14[%c48_102, %c0_103], %139 {strides = array<i32>} : memref<144x1024xbf16, #tpu.memory_space<vmem>>, vector<16x1024xbf16>,
    %c991_i32_104 = arith.constant 991 : i32
    %141 = tpu.dynamic_rotate %129 by %c991_i32_104 dim 1 : vector<16x1024xf32>, i32 -> vector<16x1024xf32>
    %142 = arith.truncf %141 : vector<16x1024xf32> to vector<16x1024xbf16>
    %c64_105 = arith.constant 64 : index
    %c0_106 = arith.constant 0 : index
    %143 = vector.load %arg14[%c64_105, %c0_106] : memref<144x1024xbf16, #tpu.memory_space<vmem>>, vector<16x1024xbf16>
    tpu.vector_store %arg14[%c64_105, %c0_106], %142 {strides = array<i32>} : memref<144x1024xbf16, #tpu.memory_space<vmem>>, vector<16x1024xbf16>,
    %c990_i32_107 = arith.constant 990 : i32
    %144 = tpu.dynamic_rotate %129 by %c990_i32_107 dim 1 : vector<16x1024xf32>, i32 -> vector<16x1024xf32>
    %145 = arith.truncf %144 : vector<16x1024xf32> to vector<16x1024xbf16>
    %c80_108 = arith.constant 80 : index
    %c0_109 = arith.constant 0 : index
    %146 = vector.load %arg14[%c80_108, %c0_109] : memref<144x1024xbf16, #tpu.memory_space<vmem>>, vector<16x1024xbf16>
    tpu.vector_store %arg14[%c80_108, %c0_109], %145 {strides = array<i32>} : memref<144x1024xbf16, #tpu.memory_space<vmem>>, vector<16x1024xbf16>,
    %c960_i32_110 = arith.constant 960 : i32
    %147 = tpu.dynamic_rotate %129 by %c960_i32_110 dim 1 : vector<16x1024xf32>, i32 -> vector<16x1024xf32>
    %148 = arith.truncf %147 : vector<16x1024xf32> to vector<16x1024xbf16>
    %c96_111 = arith.constant 96 : index
    %c0_112 = arith.constant 0 : index
    %149 = vector.load %arg14[%c96_111, %c0_112] : memref<144x1024xbf16, #tpu.memory_space<vmem>>, vector<16x1024xbf16>
    tpu.vector_store %arg14[%c96_111, %c0_112], %148 {strides = array<i32>} : memref<144x1024xbf16, #tpu.memory_space<vmem>>, vector<16x1024xbf16>,
    %c959_i32_113 = arith.constant 959 : i32
    %150 = tpu.dynamic_rotate %129 by %c959_i32_113 dim 1 : vector<16x1024xf32>, i32 -> vector<16x1024xf32>
    %151 = arith.truncf %150 : vector<16x1024xf32> to vector<16x1024xbf16>
    %c112_114 = arith.constant 112 : index
    %c0_115 = arith.constant 0 : index
    %152 = vector.load %arg14[%c112_114, %c0_115] : memref<144x1024xbf16, #tpu.memory_space<vmem>>, vector<16x1024xbf16>
    tpu.vector_store %arg14[%c112_114, %c0_115], %151 {strides = array<i32>} : memref<144x1024xbf16, #tpu.memory_space<vmem>>, vector<16x1024xbf16>,
    %c958_i32_116 = arith.constant 958 : i32
    %153 = tpu.dynamic_rotate %129 by %c958_i32_116 dim 1 : vector<16x1024xf32>, i32 -> vector<16x1024xf32>
    %154 = arith.truncf %153 : vector<16x1024xf32> to vector<16x1024xbf16>
    %c128_117 = arith.constant 128 : index
    %c0_118 = arith.constant 0 : index
    %155 = vector.load %arg14[%c128_117, %c0_118] : memref<144x1024xbf16, #tpu.memory_space<vmem>>, vector<16x1024xbf16>
    tpu.vector_store %arg14[%c128_117, %c0_118], %154 {strides = array<i32>} : memref<144x1024xbf16, #tpu.memory_space<vmem>>, vector<16x1024xbf16>,
    %c0_119 = arith.constant 0 : index
    %c0_120 = arith.constant 0 : index
    %156 = vector.load %arg4[%c0_119, %c0_120] : memref<16x144xbf16, #tpu.memory_space<vmem>>, vector<16x144xbf16>
    %c0_121 = arith.constant 0 : index
    %c0_122 = arith.constant 0 : index
    %157 = vector.load %arg14[%c0_121, %c0_122] : memref<144x1024xbf16, #tpu.memory_space<vmem>>, vector<144x1024xbf16>
    %cst_123 = arith.constant dense<0.000000e+00> : vector<16x1024xf32>
    %158 = tpu.matmul %156, %157, %cst_123 {dimension_numbers = #tpu.dot_dimension_numbers<[1], [0], [0], [1], [0, 0, 1, 1], [], []>} : vector<16x144xbf16>, vector<144x1024xbf16>, vector<16x1024xf32> -> vector<16x1024xf32>
    %c0_124 = arith.constant 0 : index
    %c0_125 = arith.constant 0 : index
    %159 = vector.load %arg5[%c0_124, %c0_125] : memref<16x1xf32, #tpu.memory_space<vmem>>, vector<16x1xf32>
    %160 = vector.broadcast %159 : vector<16x1xf32> to vector<16x1024xf32>
    %161 = arith.addf %158, %160 : vector<16x1024xf32>
    %cst_126 = arith.constant 0.000000e+00 : f32
    %162 = vector.broadcast %cst_126 : f32 to vector<16x1024xf32>
    %163 = arith.maximumf %161, %162 : vector<16x1024xf32>
    %c1023_i32_127 = arith.constant 1023 : i32
    %164 = tpu.dynamic_rotate %163 by %c1023_i32_127 dim 1 : vector<16x1024xf32>, i32 -> vector<16x1024xf32>
    %165 = arith.maximumf %163, %164 : vector<16x1024xf32>
    %c992_i32_128 = arith.constant 992 : i32
    %166 = tpu.dynamic_rotate %165 by %c992_i32_128 dim 1 : vector<16x1024xf32>, i32 -> vector<16x1024xf32>
    %167 = arith.maximumf %165, %166 : vector<16x1024xf32>
    %c0_129 = arith.constant 0 : index
    %c0_130 = arith.constant 0 : index
    %168 = vector.load %arg6[%c0_129, %c0_130] : memref<3x16xbf16, #tpu.memory_space<vmem>>, vector<3x16xbf16>
    %169 = arith.truncf %167 : vector<16x1024xf32> to vector<16x1024xbf16>
    %cst_131 = arith.constant dense<0.000000e+00> : vector<3x1024xf32>
    %170 = tpu.matmul %168, %169, %cst_131 {dimension_numbers = #tpu.dot_dimension_numbers<[1], [0], [0], [1], [0, 0, 1, 1], [], []>} : vector<3x16xbf16>, vector<16x1024xbf16>, vector<3x1024xf32> -> vector<3x1024xf32>
    %c0_132 = arith.constant 0 : index
    %c0_133 = arith.constant 0 : index
    %171 = vector.load %arg7[%c0_132, %c0_133] : memref<3x1xf32, #tpu.memory_space<vmem>>, vector<3x1xf32>
    %172 = vector.broadcast %171 : vector<3x1xf32> to vector<3x1024xf32>
    %173 = arith.addf %170, %172 : vector<3x1024xf32>
    %cst_134 = arith.constant 0.000000e+00 : f32
    %174 = vector.broadcast %cst_134 : f32 to vector<3x1024xf32>
    %175 = arith.maximumf %173, %174 : vector<3x1024xf32>
    %c0_135 = arith.constant 0 : index
    %c0_136 = arith.constant 0 : index
    %176 = vector.load %arg8[%c0_135, %c0_136] : memref<30x1024xf32, #tpu.memory_space<vmem>>, vector<30x1024xf32>
    %cst_137 = arith.constant dense<0.000000e+00> : vector<3x30xf32>
    %177 = tpu.matmul %175, %176, %cst_137 {dimension_numbers = #tpu.dot_dimension_numbers<[1], [1], [0], [0], [0, 0, 1, 0], [], []>} : vector<3x1024xf32>, vector<30x1024xf32>, vector<3x30xf32> -> vector<3x30xf32>
    %c0_138 = arith.constant 0 : index
    %c0_139 = arith.constant 0 : index
    %178 = vector.load %arg9[%c0_138, %c0_139] : memref<30x1024xf32, #tpu.memory_space<vmem>>, vector<30x1024xf32>
    %cst_140 = arith.constant dense<0.000000e+00> : vector<3x30xf32>
    %179 = tpu.matmul %1, %178, %cst_140 {dimension_numbers = #tpu.dot_dimension_numbers<[1], [1], [0], [0], [0, 0, 1, 0], [], []>} : vector<3x1024xf32>, vector<30x1024xf32>, vector<3x30xf32> -> vector<3x30xf32>
    %180 = arith.addf %177, %179 : vector<3x30xf32>
    %c0_141 = arith.constant 0 : index
    %c0_142 = arith.constant 0 : index
    %181 = vector.load %arg10[%c0_141, %c0_142] : memref<3x30xf32, #tpu.memory_space<vmem>>, vector<3x30xf32>
    %182 = arith.mulf %180, %181 : vector<3x30xf32>
    %cst_143 = arith.constant dense<0.000000e+00> : vector<30xf32>
    %183 = vector.multi_reduction <add>, %182, %cst_143 [0] : vector<3x30xf32> to vector<30xf32>
    %184 = vector.shape_cast %183 : vector<30xf32> to vector<1x30xf32>
    %c0_144 = arith.constant 0 : index
    %c0_145 = arith.constant 0 : index
    %185 = vector.load %arg12[%c0_144, %c0_145] : memref<1x10xf32, #tpu.memory_space<vmem>>, vector<1x10xf32>
    %c0_146 = arith.constant 0 : index
    %c0_147 = arith.constant 0 : index
    %186 = vector.load %arg11[%c0_146, %c0_147] : memref<30x10xf32, #tpu.memory_space<vmem>>, vector<30x10xf32>
    %cst_148 = arith.constant dense<0.000000e+00> : vector<1x10xf32>
    %187 = tpu.matmul %184, %186, %cst_148 {dimension_numbers = #tpu.dot_dimension_numbers<[1], [0], [0], [1], [0, 0, 1, 1], [], []>} : vector<1x30xf32>, vector<30x10xf32>, vector<1x10xf32> -> vector<1x10xf32>
    %188 = arith.addf %185, %187 : vector<1x10xf32>
    %c0_149 = arith.constant 0 : index
    %c0_150 = arith.constant 0 : index
    %c0_151 = arith.constant 0 : index
    %189 = vector.load %arg13[%c0_149, %c0_150, %c0_151] : memref<1x1x10xf32, #tpu.memory_space<vmem>>, vector<1x1x10xf32>
    %190 = vector.shape_cast %189 : vector<1x1x10xf32> to vector<1x10xf32>
    %191 = vector.shape_cast %188 : vector<1x10xf32> to vector<1x1x10xf32>
    tpu.vector_store %arg13[%c0_149, %c0_150, %c0_151], %191 {strides = array<i32>} : memref<1x1x10xf32, #tpu.memory_space<vmem>>, vector<1x1x10xf32>,
    return
  }
  func.func @transform_0(%arg0: i32) -> (i32, i32, i32) {
    %c0_i32 = arith.constant 0 : i32
    %c0_i32_0 = arith.constant 0 : i32
    %c0_i32_1 = arith.constant 0 : i32
    return %arg0, %c0_i32, %c0_i32_0 : i32, i32, i32
  }
  func.func @transform_1(%arg0: i32) -> (i32, i32) {
    %c0_i32 = arith.constant 0 : i32
    %c0_i32_0 = arith.constant 0 : i32
    %c0_i32_1 = arith.constant 0 : i32
    return %c0_i32, %c0_i32_0 : i32, i32
  }
  func.func @transform_2(%arg0: i32) -> (i32, i32) {
    %c0_i32 = arith.constant 0 : i32
    %c0_i32_0 = arith.constant 0 : i32
    %c0_i32_1 = arith.constant 0 : i32
    return %c0_i32, %c0_i32_0 : i32, i32
  }
  func.func @transform_3(%arg0: i32) -> (i32, i32) {
    %c0_i32 = arith.constant 0 : i32
    %c0_i32_0 = arith.constant 0 : i32
    %c0_i32_1 = arith.constant 0 : i32
    return %c0_i32, %c0_i32_0 : i32, i32
  }
  func.func @transform_4(%arg0: i32) -> (i32, i32) {
    %c0_i32 = arith.constant 0 : i32
    %c0_i32_0 = arith.constant 0 : i32
    %c0_i32_1 = arith.constant 0 : i32
    return %c0_i32, %c0_i32_0 : i32, i32
  }
  func.func @transform_5(%arg0: i32) -> (i32, i32) {
    %c0_i32 = arith.constant 0 : i32
    %c0_i32_0 = arith.constant 0 : i32
    %c0_i32_1 = arith.constant 0 : i32
    return %c0_i32, %c0_i32_0 : i32, i32
  }
  func.func @transform_6(%arg0: i32) -> (i32, i32) {
    %c0_i32 = arith.constant 0 : i32
    %c0_i32_0 = arith.constant 0 : i32
    %c0_i32_1 = arith.constant 0 : i32
    return %c0_i32, %c0_i32_0 : i32, i32
  }
  func.func @transform_7(%arg0: i32) -> (i32, i32) {
    %c0_i32 = arith.constant 0 : i32
    %c0_i32_0 = arith.constant 0 : i32
    %c0_i32_1 = arith.constant 0 : i32
    return %c0_i32, %c0_i32_0 : i32, i32
  }
  func.func @transform_8(%arg0: i32) -> (i32, i32) {
    %c0_i32 = arith.constant 0 : i32
    %c0_i32_0 = arith.constant 0 : i32
    %c0_i32_1 = arith.constant 0 : i32
    return %c0_i32, %c0_i32_0 : i32, i32
  }
  func.func @transform_9(%arg0: i32) -> (i32, i32) {
    %c0_i32 = arith.constant 0 : i32
    %c0_i32_0 = arith.constant 0 : i32
    %c0_i32_1 = arith.constant 0 : i32
    return %c0_i32, %c0_i32_0 : i32, i32
  }
  func.func @transform_10(%arg0: i32) -> (i32, i32) {
    %c0_i32 = arith.constant 0 : i32
    %c0_i32_0 = arith.constant 0 : i32
    %c0_i32_1 = arith.constant 0 : i32
    return %c0_i32, %c0_i32_0 : i32, i32
  }
  func.func @transform_11(%arg0: i32) -> (i32, i32) {
    %c0_i32 = arith.constant 0 : i32
    %c0_i32_0 = arith.constant 0 : i32
    %c0_i32_1 = arith.constant 0 : i32
    return %c0_i32, %c0_i32_0 : i32, i32
  }
  func.func @transform_12(%arg0: i32) -> (i32, i32, i32) {
    %c0_i32 = arith.constant 0 : i32
    %c0_i32_0 = arith.constant 0 : i32
    %c0_i32_1 = arith.constant 0 : i32
    return %arg0, %c0_i32, %c0_i32_0 : i32, i32, i32
  }
}

</mosaic_0001>

<bundles_post_ra>
// kernel: tile.9
= control target key start
LH: loop header
LB: loop body
LE: loop exit
PB: predicated region body
PF: predicated region fallthrough
CT: control target
= control target key end

     0   :  { %vm44_vm0 = vcmask 1047556   ;;  %vm46_vm1 = vcmask 80896   ;;  %s105_s28 = smov 10   ;;  %s65_s29 = smov 3  ;;  %vm62_vm2 = vcmask 244896   ;;  %vm80_vm3 = vcmask 162896   ;;  %s166_s0 = inlined_call_operand.vmem [shape: f32[3,10,10], index: 0, kind: input, shape index: {}]   ;;  %s167_s1 = inlined_call_operand.vmem [shape: f32[30,10], index: 1, kind: output, shape index: {}]  }
   0x1   :  { %v92_v0 = vld [vmem:[%s166_s0 + $0x1c] sm:$0xf]  ;;  %v93_v1 = vld [vmem:[%s166_s0 + $0x18] sm:$0xf]  ;;  %v94_v2 = vld [vmem:[%s166_s0 + $0x14] sm:$0xf] }
   0x2   :  { %15 = vst [vmem:[#allocation0 + $0x38] sm:$0xf] %v92_v0  ;;  %v95_v3 = vld [vmem:[%s166_s0 + $0x10] sm:$0xf]  ;;  %v96_v4 = vld [vmem:[%s166_s0 + $0xc] sm:$0xf] }
   0x3   :  { %19 = vst [vmem:[#allocation0 + $0x30] sm:$0xf] %v93_v1  ;;  %v97_v5 = vld [vmem:[%s166_s0 + $0x8] sm:$0xf]  ;;  %v98_v6 = vld [vmem:[%s166_s0 + $0x4] sm:$0xf] }
   0x4   :  { %23 = vst [vmem:[#allocation0 + $0x28] sm:$0xf] %v94_v2  ;;  %v40_v7 = vld [vmem:[%s166_s0] sm:$0xf]  ;;  %v90_v8 = vld [vmem:[%s166_s0 + $0x24] sm:$0xf] }
   0x5   :  { %27 = vst [vmem:[#allocation0 + $0x20] sm:$0xf] %v95_v3  ;;  %v91_v9 = vld [vmem:[%s166_s0 + $0x20] sm:$0xf]  ;;  %s104_s0 = smov 20   ;;  %s83_s30 = smov 3 }
   0x6   :  { %31 = vst [vmem:[#allocation0 + $0x18] sm:$0xf] %v96_v4  ;;  %s49_s2 = smov 3 }
   0x7   :  { %35 = vst [vmem:[#allocation0 + $0x10] sm:$0xf] %v97_v5 }
   0x8   :  { %39 = vst [vmem:[#allocation0 + $0x8] sm:$0xf] %v98_v6 }
   0x9   :  { %41 = vst [vmem:[#allocation0] sm:$0xf] %v40_v7 }
   0xa   :  { %7 = vst [vmem:[#allocation0 + $0x48] sm:$0xf] %v90_v8 }
   0xb   :  { %11 = vst [vmem:[#allocation0 + $0x40] sm:$0xf] %v91_v9 }
   0xc   :  { %v57_v10 = vld [vmem:[#allocation0 + $0x2] ss:$8 sm:$0xf0]   ;;  %v43_v11 = vld [vmem:[#allocation0] ss:$8 sm:$0xf0]  }
   0xd   :  { %v75_v12 = vld [vmem:[#allocation0 + $0x1] ss:$8 sm:$0xf0]  }
  0x10   :  { %v55_v13 = vld [vmem:[#allocation0 + $0x2] ss:$8 sm:$0xf]   ;;  %v42_v14 = vld [vmem:[#allocation0] ss:$8 sm:$0xf]  }
  0x11   :  { %v59_v15 = vsel %vm44_vm0, %v57_v10, %v55_v13  ;;  %v73_v16 = vld [vmem:[#allocation0 + $0x1] ss:$8 sm:$0xf]   ;;  %v45_v17 = vsel %vm44_vm0, %v43_v11, %v42_v14 }
  0x12   :  { %60 = vrot.lane.b32.xlu0 %v59_v15, %s104_s0  ;;  %v77_v18 = vsel %vm44_vm0, %v75_v12, %v73_v16  ;;  %47 = vst.msk [vmem:[%s167_s1] sm:$0xff] %vm46_vm1, %v45_v17   ;;  %v66_v19 = vld [vmem:[#allocation0 + $0x42] ss:$8 sm:%s65_s29]   ;;  %v84_v20 = vld [vmem:[#allocation0 + $0x41] ss:$8 sm:%s83_s30]  }
  0x13   :  { %78 = vrot.lane.b32.xlu1 %v77_v18, %s105_s28  ;;  %v50_v21 = vld [vmem:[#allocation0 + $0x40] ss:$8 sm:%s49_s2]  }
  0x14   :  { %99 = vst.msk [vmem:[%s167_s1 + $0x8] sm:$0x3] %vm46_vm1, %v50_v21  }
  0x1a   :  { %67 = vrot.lane.b32.xlu0 %v66_v19, %s104_s0 }
  0x1b   :  { %85 = vrot.lane.b32.xlu1 %v84_v20, %s105_s28 }
  0x84   :  { %v61_v22 = vpop.permute.xlu0 %60  }
  0x85   :  { %63 = vst.msk [vmem:[%s167_s1] sm:$0xff] %vm62_vm2, %v61_v22   ;;  %v79_v23 = vpop.permute.xlu1 %78  }
  0x86   :  { %81 = vst.msk [vmem:[%s167_s1] sm:$0xff] %vm80_vm3, %v79_v23  }
  0x8c   :  { %v68_v24 = vpop.permute.xlu0 %67  }
  0x8d   :  { %100 = vst.msk [vmem:[%s167_s1 + $0x8] sm:$0x3] %vm62_vm2, %v68_v24   ;;  %v86_v25 = vpop.permute.xlu1 %85  }
  0x8e   :  { %101 = vst.msk [vmem:[%s167_s1 + $0x8] sm:$0x3] %vm80_vm3, %v86_v25  }

// kernel: my_class_forward.1
= control target key start
LH: loop header
LB: loop body
LE: loop exit
PB: predicated region body
PF: predicated region fallthrough
CT: control target
= control target key end

     0   :  { %s13795_s0 = inlined_call_operand.vmem [shape: f32[2,3,1024], index: 0, kind: input, shape index: {}]   ;;  %s13796_s1 = inlined_call_operand.vmem [shape: bf16[16,3], index: 1, kind: input, shape index: {}]   ;;  %s13797_s2 = inlined_call_operand.vmem [shape: f32[16,1], index: 2, kind: input, shape index: {}]   ;;  %s13798_s3 = inlined_call_operand.vmem [shape: bf16[16,144], index: 3, kind: input, shape index: {}]   ;;  %s13799_s4 = inlined_call_operand.vmem [shape: f32[16,1], index: 4, kind: input, shape index: {}]   ;;  %s13800_s5 = inlined_call_operand.vmem [shape: bf16[3,16], index: 5, kind: input, shape index: {}]   ;;  %s13801_s6 = inlined_call_operand.vmem [shape: f32[3,1], index: 6, kind: input, shape index: {}]   ;;  %s13802_s7 = inlined_call_operand.vmem [shape: f32[30,1024], index: 7, kind: input, shape index: {}]   ;;  %s13803_s8 = inlined_call_operand.vmem [shape: f32[30,1024], index: 8, kind: input, shape index: {}]   ;;  %s13804_s9 = inlined_call_operand.vmem [shape: f32[3,30], index: 9, kind: input, shape index: {}]   ;;  %s13805_s10 = inlined_call_operand.vmem [shape: f32[30,10], index: 10, kind: input, shape index: {}]   ;;  %s13806_s11 = inlined_call_operand.vmem [shape: f32[1,10], index: 11, kind: input, shape index: {}]   ;;  %s13807_s12 = inlined_call_operand.hbm [shape: f32[2,1,10], index: 12, kind: output, shape index: {}]  }
   0x1   :  { %13882 = sst [smem:[#allocation7_spill]] %s13795_s0 }
   0x2   :  { %13883 = sst [smem:[#allocation8_spill]] %s13796_s1 }
   0x3   :  { %17 = vsyncpa [#allocation4], 0 }
   0x4   :  { %19 = vsyncpa [#allocation4 + $0x1], 0  ;;  %s9201_s21 = smov 0   ;;  %s9203_s22 = smov 0  }
   0x5   :  { %s9205_s23 = smov 0   ;;  %s9207_s24 = smov 0  }
   0x6 LB: > { %s9222_s25 = sadd.s32 4294967295, %s9124_s24   ;;  %s6362_s26 = sadd.s32 4294967294, %s9124_s24   ;;  %s9124_s24 = sphi %s9207_s24, %s13959_s24   ;;  %s9120_s23 = sphi %s9205_s23, %s13958_s23   ;;  %s9116_s22 = sphi %s9203_s22, %s13957_s22   ;;  %s9112_s21 = sphi %s9201_s21, %s13956_s21  }
   0x7   : > { %s9226_s27 = sadd.s32 1, %s9124_s24   ;;  %s289_s28 = sadd.s32 1, %s9120_s23 }
   0x8   : > { %s286_s29 = ssub.s32 %s9124_s24, %s9226_s27  ;;  %p299_p0 = scmp.ne.s32.totalorder %s9120_s23, %s9116_s22 }
   0x9   : > { %p287_p1 = scmp.eq.s32.totalorder %s286_s29, 0  ;;  %p300_p2 = scmp.eq.s32.totalorder %s9222_s25, 1 }
   0xa   : > { %p305_p3 = scmp.ne.s32.totalorder %s9116_s22, %s9112_s21  ;;  %p306_p4 = scmp.eq.s32.totalorder %s6362_s26, 1 }
   0xb   : > { %s9237_s30 = scalar_select %p287_p1, %s9120_s23, %s289_s28  }
   0xc   : > { %p9239_p5 = por %p300_p2, %p299_p0  ;;  %p9243_p6 = por %p306_p4, %p305_p3 }
   0xd   : > { %13884 = sst [smem:[#allocation6_spill]] %s9237_s30  ;;  %p6365_p7 = scmp.ge.s32.totalorder %s9124_s24, 1 }
   0xe   : > { %p365_p8 = scmp.lt.s32.totalorder %s9124_s24, 3 }
  0x10   : > { %p366_p9 = pnand %p6365_p7, %p365_p8 }
  0x11   : > { %p406_p10 = scmp.lt.s32.totalorder (!%p366_p9), %s9222_s25, 1  ;;  %s13887_s0 = sld [smem:[#allocation7_spill]] (!%p366_p9) }
  0x12   : > { %369 = sbr.rel (%p366_p9) target bundleno = 3959 (0xf77), region = 68  ;;  %s13888_s1 = sld [smem:[#allocation8_spill]] (!%p366_p9) }
  0x13   : > { %s13834_s19 = smov (!%p366_p9), 63   ;;  %s13832_s20 = smov (!%p366_p9), 64  }
  0x14   : > { %s13836_s28 = smov (!%p366_p9), 126   ;;  %s13813_s29 = smov (!%p366_p9), 95  }
  0x15   : > { %s13811_s15 = smov (!%p366_p9), 62   ;;  %s13908_s16 = smov (!%p366_p9), 64  }
  0x17   : > { %v453_v0 = vld [vmem:[%s13797_s2] sm:$0xff]  ;;  %s407_s17 = scalar_select %p406_p10, %s9222_s25, 1  ;;  %v9126_v1 = vmov 0   ;;  %vm474_vm0 = vcmask 1040384   ;;  %v454_v6 = vld [vmem:[%s13797_s2 + $0x8] sm:$0xff]  ;;  %vm475_vm1 = vcmask 1041408  }
  0x18   : > { %7619 = vset.pattern.permute.xlu0 %v9126_v1  ;;  %8020 = vset.pattern.permute.xlu1 %v9126_v1  ;;  %v9127_v7 = vmov 65535   ;;  %v7345_v24 = vld [vmem:[%s13888_s1] sm:$0xff]  ;;  %vm470_vm2 = vcmask 23552   ;;  %vm1751_vm11 = vcmask 130048   ;;  %vm6267_vm12 = vcmask 1045504  }
  0x19   : > { %457 = vperm.xlu0 %7619, %v453_v0   ;;  %8021 = vset.pattern.permute.xlu2 %v9126_v1  ;;  %s7344_s18 = sshll.u32 %s407_s17, 5  ;;  %v476_v8 = vsel %vm474_vm0, 4294967295, %v9127_v7  ;;  %s13857_s17 = smov 127   ;;  %vm6250_vm13 = vcmask 239616   ;;  %vm6263_vm14 = vcmask 244736   ;;  %vm6292_vm15 = vcmask 73728  }
  0x1a   : > { %s410_s26 = scalar_lea.vmem %s13887_s0, %s7344_s18  ;;  %v9260_v9 = vsel %vm475_vm1, %v476_v8, 0  ;;  %s13855_s18 = smov 96  }
  0x1b   : > { %v412_v2 = vld [vmem:[%s410_s26] sm:$0x77]  ;;  %v413_v3 = vld [vmem:[%s410_s26 + $0x8] sm:$0x77]  ;;  %v414_v4 = vld [vmem:[%s410_s26 + $0x10] sm:$0x77] }
  0x1c   : > { %422 = vst [vmem:[#allocation1] ss:$2 sm:$0xff] %v412_v2  ;;  %v415_v5 = vld [vmem:[%s410_s26 + $0x18] sm:$0x77]  ;;  %s13815_s26 = smov 94   ;;  %s13937_s0 = smov 126  }
  0x1d   : > { %424 = vst [vmem:[#allocation1 + $0x10] ss:$2 sm:$0xff] %v413_v3 }
  0x1e   : > { %426 = vst [vmem:[#allocation1 + $0x20] ss:$2 sm:$0xff] %v414_v4 }
  0x1f   : > { %428 = vst [vmem:[#allocation1 + $0x30] ss:$2 sm:$0xff] %v415_v5 }
  0x21   : > { %462 = vperm.xlu0 %7619, %v454_v6  }
  0x23   : > { %v429_v10 = vld.sshfl [vmem:[#allocation1] sm:$0xff pattern:$0x75316420]  ;;  %v430_v11 = vld.sshfl [vmem:[#allocation1 + $0x8] sm:$0xff pattern:$0x75316420] }
  0x24   : > { %v445_v12 = vpack.c.bf16 %v429_v10, %v429_v10  ;;  %v446_v13 = vpack.c.bf16 %v430_v11, %v430_v11  ;;  %5905 = vst [vmem:[#allocation1] ss:$2 sm:$0xff] %v412_v2  ;;  %v431_v14 = vld.sshfl [vmem:[#allocation1 + $0x10] sm:$0xff pattern:$0x75316420] }
  0x25   : > { %v447_v15 = vpack.c.bf16 %v431_v14, %v431_v14  ;;  %v432_v16 = vld.sshfl [vmem:[#allocation1 + $0x18] sm:$0xff pattern:$0x75316420]  ;;  %v433_v17 = vld.sshfl [vmem:[#allocation1 + $0x20] sm:$0xff pattern:$0x75316420] }
  0x26   : > { %v479_v18 = vand.u32 %v9260_v9, %v445_v12  ;;  %v482_v19 = vand.u32 %v9260_v9, %v446_v13  ;;  %v448_v20 = vpack.c.bf16 %v432_v16, %v432_v16  ;;  %5907 = vst [vmem:[#allocation1 + $0x10] ss:$2 sm:$0xff] %v413_v3  ;;  %v449_v21 = vpack.c.bf16 %v433_v17, %v433_v17  ;;  %v434_v22 = vld.sshfl [vmem:[#allocation1 + $0x28] sm:$0xff pattern:$0x75316420] }
  0x27   : > { %v485_v23 = vand.u32 %v9260_v9, %v447_v15  ;;  %v450_v25 = vpack.c.bf16 %v434_v22, %v434_v22  ;;  %5909 = vst [vmem:[#allocation1 + $0x20] ss:$2 sm:$0xff] %v414_v4  ;;  %v435_v26 = vld.sshfl [vmem:[#allocation1 + $0x30] sm:$0xff pattern:$0x75316420] }
  0x28   : > { %509 = vmatpush.bf16.msra.mxu0 %v479_v18  ;;  %523 = vmatpush.bf16.msra.mxu1 %v482_v19  ;;  %v488_v27 = vand.u32 %v9260_v9, %v448_v20  ;;  %v491_v28 = vand.u32 %v9260_v9, %v449_v21  ;;  %v451_v29 = vpack.c.bf16 %v435_v26, %v435_v26  ;;  %v436_v30 = vld.sshfl [vmem:[#allocation1 + $0x38] sm:$0xff pattern:$0x75316420] }
  0x29   : > { %537 = vmatpush.bf16.msra.mxu2 %v485_v23  ;;  %v494_v31 = vand.u32 %v9260_v9, %v450_v25  ;;  %v452_v32 = vpack.c.bf16 %v436_v30, %v436_v30  ;;  %5911 = vst [vmem:[#allocation1 + $0x30] ss:$2 sm:$0xff] %v415_v5 }
  0x2a   : > { %551 = vmatpush.bf16.msra.mxu3 %v488_v27  ;;  %v497_v33 = vand.u32 %v9260_v9, %v451_v29 }
  0x2b   : > { %6372 = vmatmul.msk.bf16.vlgmr.msra.gmra.mxu0 %vm470_vm2, %v7345_v24  ;;  %6373 = vmatmul.msk.bf16.vlgmr.msra.gmra.mxu1 %vm470_vm2, %v7345_v24  ;;  %v500_v34 = vand.u32 %v9260_v9, %v452_v32 }
  0x2c   : > { %565 = vmatpush.bf16.msrb.mxu0 %v491_v28  ;;  %6374 = vmatmul.msk.bf16.vlgmr.msra.gmra.mxu2 %vm470_vm2, %v7345_v24 }
  0x2d   : > { %579 = vmatpush.bf16.msrb.mxu1 %v494_v31  ;;  %6375 = vmatmul.msk.bf16.vlgmr.msra.gmra.mxu3 %vm470_vm2, %v7345_v24  ;;  %v662_v31 = vlaneseq }
  0x2e   : > { %593 = vmatpush.bf16.msrb.mxu2 %v497_v33  ;;  %607 = vmatpush.bf16.msrb.mxu3 %v500_v34 }
  0x2f   : > { %v9362_v32 = vand.u32 127, %v662_v31 }
  0x31   : > { %vm664_vm3 = vcmp.lt.s32.totalorder %v9362_v32, 127  ;;  %vm729_vm4 = vcmp.lt.s32.totalorder %v9362_v32, 96  ;;  %vm1198_vm5 = vcmp.lt.s32.totalorder %v9362_v32, 63  ;;  %vm1133_vm6 = vcmp.lt.s32.totalorder %v9362_v32, 64 }
  0x32   : > { %vm1068_vm7 = vcmp.lt.s32.totalorder %v9362_v32, 94  ;;  %vm1003_vm8 = vcmp.lt.s32.totalorder %v9362_v32, 95  ;;  %vm874_vm9 = vcmp.lt.s32.totalorder %v9362_v32, 126  ;;  %vm1263_vm10 = vcmp.lt.s32.totalorder %v9362_v32, 62  ;;  %v5887_v32 = vld [vmem:[%s13803_s8 + $0x70] sm:$0xff] }
  0x3b   : > { %6376 = vmatmul.msk.bf16.vlgmr.msrb.gmra.mxu0 %vm470_vm2, %v7345_v24  ;;  %6377 = vmatmul.msk.bf16.vlgmr.msrb.gmra.mxu1 %vm470_vm2, %v7345_v24 }
  0x3c   : > { %6378 = vmatmul.msk.bf16.vlgmr.msrb.gmra.mxu2 %vm470_vm2, %v7345_v24 }
  0x3d   : > { %6379 = vmatmul.msk.bf16.vlgmr.msrb.gmra.mxu3 %vm470_vm2, %v7345_v24 }
  0x8b   : > { %v458_v35 = vpop.permute.xlu0 %457 }
  0x93   : > { %v463_v38 = vpop.permute.xlu0 %462 }
  0xa8   : > { %v511_v36 = vpop.f32.mrf.mxu0  ;;  %v525_v37 = vpop.f32.mrf.mxu1 }
  0xa9   : > { %v9281_v39 = vadd.f32 %v511_v36, %v458_v35  ;;  %v9295_v50 = vadd.f32 %v525_v37, %v458_v35 }
  0xab   : > { %v614_v45 = vmax.f32 %v9281_v39, 0.0  ;;  %v615_v59 = vmax.f32 %v9295_v50, 0.0 }
  0xaf   : > { %v539_v40 = vpop.f32.mrf.mxu2 }
  0xb0   : > { %v553_v41 = vpop.f32.mrf.mxu3  ;;  %v513_v42 = vpop.f32.mrf.mxu0  ;;  %v9293_v49 = vadd.f32 %v539_v40, %v458_v35 }
  0xb1   : > { %v9283_v43 = vadd.f32 %v513_v42, %v463_v38  ;;  %v527_v44 = vpop.f32.mrf.mxu1  ;;  %v9307_v63 = vadd.f32 %v553_v41, %v458_v35 }
  0xb2   : > { %v9287_v47 = vadd.f32 %v527_v44, %v463_v38  ;;  %v616_v57 = vmax.f32 %v9293_v49, 0.0 }
  0xb3   : > { %v622_v46 = vmax.f32 %v9283_v43, 0.0  ;;  %v617_v8 = vmax.f32 %v9307_v63, 0.0 }
  0xb4   : > { %v623_v55 = vmax.f32 %v9287_v47, 0.0 }
  0xb5   : > { %v7620_v48 = vpack.i.bf16 %v622_v46, %v614_v45 }
  0xb6   : > { %v7625_v62 = vpack.i.bf16 %v623_v55, %v615_v59 }
  0xb7   : > { %v541_v51 = vpop.f32.mrf.mxu2  ;;  %7621 = vrot.lane.b32.xlu1 %v7620_v48, %s13857_s17 }
  0xb8   : > { %v542_v52 = vadd.f32 %v541_v51, %v463_v38  ;;  %v555_v53 = vpop.f32.mrf.mxu3  ;;  %v567_v54 = vpop.f32.mrf.mxu0 }
  0xb9   : > { %v581_v56 = vpop.f32.mrf.mxu1  ;;  %v9301_v60 = vadd.f32 %v555_v53, %v463_v38  ;;  %v9310_v0 = vadd.f32 %v567_v54, %v458_v35 }
  0xba   : > { %v624_v58 = vmax.f32 %v542_v52, 0.0  ;;  %v9314_v3 = vadd.f32 %v581_v56, %v458_v35 }
  0xbb   : > { %v625_v2 = vmax.f32 %v9301_v60, 0.0  ;;  %v618_v11 = vmax.f32 %v9310_v0, 0.0 }
  0xbc   : > { %v7630_v61 = vpack.i.bf16 %v624_v58, %v616_v57  ;;  %v619_v13 = vmax.f32 %v9314_v3, 0.0 }
  0xbd   : > { %v7635_v15 = vpack.i.bf16 %v625_v2, %v617_v8 }
  0xbe   : > { %7631 = vrot.lane.b32.xlu2 %v7630_v61, %s13857_s17 }
  0xbf   : > { %v595_v1 = vpop.f32.mrf.mxu2  ;;  %7626 = vrot.lane.b32.xlu1 %v7625_v62, %s13857_s17 }
  0xc0   : > { %v609_v4 = vpop.f32.mrf.mxu3  ;;  %v569_v5 = vpop.f32.mrf.mxu0  ;;  %v9333_v17 = vadd.f32 %v595_v1, %v458_v35 }
  0xc1   : > { %v9316_v6 = vadd.f32 %v569_v5, %v463_v38  ;;  %v583_v7 = vpop.f32.mrf.mxu1  ;;  %v9340_v19 = vadd.f32 %v609_v4, %v458_v35 }
  0xc2   : > { %v9319_v10 = vadd.f32 %v583_v7, %v463_v38  ;;  %v620_v24 = vmax.f32 %v9333_v17, 0.0 }
  0xc3   : > { %v626_v12 = vmax.f32 %v9316_v6, 0.0  ;;  %v621_v26 = vmax.f32 %v9340_v19, 0.0 }
  0xc4   : > { %v627_v14 = vmax.f32 %v9319_v10, 0.0 }
  0xc5   : > { %v7640_v16 = vpack.i.bf16 %v626_v12, %v618_v11 }
  0xc6   : > { %7636 = vrot.lane.b32.xlu2 %v7635_v15, %s13857_s17  ;;  %v7645_v18 = vpack.i.bf16 %v627_v14, %v619_v13 }
  0xc7   : > { %v597_v20 = vpop.f32.mrf.mxu2  ;;  %7641 = vrot.lane.b32.xlu0 %v7640_v16, %s13857_s17 }
  0xc8   : > { %v9343_v21 = vadd.f32 %v597_v20, %v463_v38  ;;  %v611_v22 = vpop.f32.mrf.mxu3  ;;  %7646 = vrot.lane.b32.xlu1 %v7645_v18, %s13857_s17 }
  0xc9   : > { %v9346_v23 = vadd.f32 %v611_v22, %v463_v38 }
  0xca   : > { %v628_v25 = vmax.f32 %v9343_v21, 0.0 }
  0xcb   : > { %v629_v27 = vmax.f32 %v9346_v23, 0.0 }
  0xcc   : > { %v7650_v28 = vpack.i.bf16 %v628_v25, %v620_v24 }
  0xcd   : > { %v7655_v29 = vpack.i.bf16 %v629_v27, %v621_v26 }
  0xce   : > { %7651 = vrot.lane.b32.xlu2 %v7650_v28, %s13857_s17 }
  0xcf   : > { %7656 = vrot.lane.b32.xlu0 %v7655_v29, %s13857_s17 }
 0x118   : > { %v7632_v30 = vpop.permute.xlu2 %7631 }
 0x119   : > { %v7634_v34 = vunpack.i.h.bf16 %v7632_v30  ;;  %v7633_v35 = vunpack.i.l.bf16 %v7632_v30 }
 0x120   : > { %v7637_v33 = vpop.permute.xlu2 %7636 }
 0x121   : > { %v7639_v36 = vunpack.i.h.bf16 %v7637_v33  ;;  %v7638_v37 = vunpack.i.l.bf16 %v7637_v33 }
 0x123   : > { %v673_v38 = vsel %vm664_vm3, %v7633_v35, %v7638_v37  ;;  %v674_v40 = vsel %vm664_vm3, %v7634_v34, %v7639_v36 }
 0x124   : > { %v9369_v41 = vmax.f32 %v616_v57, %v673_v38  ;;  %v9371_v42 = vmax.f32 %v624_v58, %v674_v40 }
 0x126   : > { %v7670_v44 = vpack.i.bf16 %v9371_v42, %v9369_v41 }
 0x128   : > { %7671 = vrot.lane.b32.xlu0 %v7670_v44, %s13855_s18  ;;  %v7652_v16 = vpop.permute.xlu2 %7651 }
 0x129   : > { %v7622_v48 = vpop.permute.xlu1 %7621  ;;  %v7654_v39 = vunpack.i.h.bf16 %v7652_v16 }
 0x12a   : > { %v7624_v51 = vunpack.i.h.bf16 %v7622_v48  ;;  %v7623_v52 = vunpack.i.l.bf16 %v7622_v48 }
 0x131   : > { %v7627_v49 = vpop.permute.xlu1 %7626 }
 0x132   : > { %v7629_v53 = vunpack.i.h.bf16 %v7627_v49  ;;  %v7628_v54 = vunpack.i.l.bf16 %v7627_v49 }
 0x134   : > { %v675_v56 = vsel %vm664_vm3, %v7628_v54, %v7633_v35  ;;  %v676_v57 = vsel %vm664_vm3, %v7629_v53, %v7634_v34  ;;  %v677_v58 = vsel %vm664_vm3, %v7623_v52, %v7628_v54  ;;  %v678_v61 = vsel %vm664_vm3, %v7624_v51, %v7629_v53 }
 0x135   : > { %v682_v62 = vmax.f32 %v615_v59, %v675_v56  ;;  %v690_v1 = vmax.f32 %v623_v55, %v676_v57  ;;  %v9390_v4 = vmax.f32 %v614_v45, %v677_v58  ;;  %v9394_v5 = vmax.f32 %v622_v46, %v678_v61 }
 0x136   : > { %v7653_v45 = vunpack.i.l.bf16 %v7652_v16 }
 0x137   : > { %v7665_v7 = vpack.i.bf16 %v690_v1, %v682_v62  ;;  %v7660_v15 = vpack.i.bf16 %v9394_v5, %v9390_v4 }
 0x139   : > { %v7642_v18 = vpop.permute.xlu0 %7641  ;;  %7666 = vrot.lane.b32.xlu2 %v7665_v7, %s13855_s18  ;;  %7661 = vrot.lane.b32.xlu1 %v7660_v15, %s13855_s18 }
 0x13a   : > { %v7644_v47 = vunpack.i.h.bf16 %v7642_v18  ;;  %v7643_v50 = vunpack.i.l.bf16 %v7642_v18  ;;  %v7647_v55 = vpop.permute.xlu1 %7646 }
 0x13b   : > { %v7649_v59 = vunpack.i.h.bf16 %v7647_v55  ;;  %v7648_v20 = vunpack.i.l.bf16 %v7647_v55 }
 0x13c   : > { %v671_v43 = vsel %vm664_vm3, %v7638_v37, %v7643_v50  ;;  %v672_v46 = vsel %vm664_vm3, %v7639_v36, %v7644_v47 }
 0x13d   : > { %v667_v22 = vsel %vm664_vm3, %v7648_v20, %v7653_v45  ;;  %v668_v28 = vsel %vm664_vm3, %v7649_v59, %v7654_v39  ;;  %v669_v29 = vsel %vm664_vm3, %v7643_v50, %v7648_v20  ;;  %v670_v30 = vsel %vm664_vm3, %v7644_v47, %v7649_v59 }
 0x13e   : > { %v9414_v31 = vmax.f32 %v619_v13, %v667_v22  ;;  %v9418_v33 = vmax.f32 %v627_v14, %v668_v28  ;;  %v9422_v34 = vmax.f32 %v618_v11, %v669_v29  ;;  %v9426_v35 = vmax.f32 %v626_v12, %v670_v30 }
 0x13f   : > { %v9430_v36 = vmax.f32 %v617_v8, %v671_v43  ;;  %v9434_v3 = vmax.f32 %v625_v2, %v672_v46 }
 0x140   : > { %v7685_v10 = vpack.i.bf16 %v9418_v33, %v9414_v31  ;;  %v7680_v0 = vpack.i.bf16 %v9426_v35, %v9422_v34 }
 0x141   : > { %v7657_v11 = vpop.permute.xlu0 %7656  ;;  %v7675_v6 = vpack.i.bf16 %v9434_v3, %v9430_v36 }
 0x142   : > { %v7659_v12 = vunpack.i.h.bf16 %v7657_v11  ;;  %v7658_v13 = vunpack.i.l.bf16 %v7657_v11  ;;  %7686 = vrot.lane.b32.xlu0 %v7685_v10, %s13855_s18  ;;  %7681 = vrot.lane.b32.xlu2 %v7680_v0, %s13855_s18 }
 0x143   : > { %7676 = vrot.lane.b32.xlu1 %v7675_v6, %s13855_s18 }
 0x144   : > { %v679_v60 = vsel %vm664_vm3, %v7658_v13, %v7623_v52  ;;  %v680_v63 = vsel %vm664_vm3, %v7659_v12, %v7624_v51  ;;  %v665_v2 = vsel %vm664_vm3, %v7653_v45, %v7658_v13  ;;  %v666_v8 = vsel %vm664_vm3, %v7654_v39, %v7659_v12 }
 0x145   : > { %v688_v14 = vmax.f32 %v621_v26, %v679_v60  ;;  %v696_v37 = vmax.f32 %v629_v27, %v680_v63  ;;  %v9459_v38 = vmax.f32 %v620_v24, %v665_v2  ;;  %v9463_v40 = vmax.f32 %v628_v25, %v666_v8 }
 0x147   : > { %v7695_v44 = vpack.i.bf16 %v696_v37, %v688_v14  ;;  %v7690_v48 = vpack.i.bf16 %v9463_v40, %v9459_v38 }
 0x14a   : > { %7696 = vrot.lane.b32.xlu2 %v7695_v44, %s13855_s18 }
 0x14b   : > { %7691 = vrot.lane.b32.xlu1 %v7690_v48, %s13855_s18 }
 0x193   : > { %v7667_v19 = vpop.permute.xlu2 %7666 }
 0x194   : > { %v7669_v26 = vunpack.i.h.bf16 %v7667_v19  ;;  %v7668_v17 = vunpack.i.l.bf16 %v7667_v19 }
 0x19a   : > { %v7672_v23 = vpop.permute.xlu0 %7671 }
 0x19b   : > { %v7674_v24 = vunpack.i.h.bf16 %v7672_v23  ;;  %v7673_v27 = vunpack.i.l.bf16 %v7672_v23 }
 0x19c   : > { %v7682_v52 = vpop.permute.xlu2 %7681 }
 0x19d   : > { %v740_v21 = vsel %vm729_vm4, %v7668_v17, %v7673_v27  ;;  %v741_v25 = vsel %vm729_vm4, %v7669_v26, %v7674_v24  ;;  %v7684_v45 = vunpack.i.h.bf16 %v7682_v52  ;;  %v7683_v59 = vunpack.i.l.bf16 %v7682_v52 }
 0x19e   : > { %v747_v49 = vmax.f32 %v682_v62, %v740_v21  ;;  %v755_v51 = vmax.f32 %v690_v1, %v741_v25 }
 0x1a0   : > { %v9474_v53 = vpack.i.bf16 %v755_v51, %v747_v49 }
 0x1a2   : > { %7706 = vrot.lane.b32.xlu1 %v9474_v53, %s13834_s19 }
 0x1a4   : > { %v7697_v54 = vpop.permute.xlu2 %7696 }
 0x1a5   : > { %v7699_v57 = vunpack.i.h.bf16 %v7697_v54  ;;  %v7698_v58 = vunpack.i.l.bf16 %v7697_v54 }
 0x1aa   : > { %7716 = vrot.lane.b32.xlu1 %v9474_v53, %s13832_s20 }
 0x1ab   : > { %v7662_v56 = vpop.permute.xlu1 %7661 }
 0x1ac   : > { %v7664_v61 = vunpack.i.h.bf16 %v7662_v56  ;;  %v7663_v7 = vunpack.i.l.bf16 %v7662_v56 }
 0x1ae   : > { %v743_v62 = vsel %vm729_vm4, %v7664_v61, %v7669_v26  ;;  %v745_v1 = vsel %vm729_vm4, %v7699_v57, %v7664_v61  ;;  %v742_v15 = vsel %vm729_vm4, %v7663_v7, %v7668_v17  ;;  %v744_v16 = vsel %vm729_vm4, %v7698_v58, %v7663_v7 }
 0x1af   : > { %v754_v18 = vmax.f32 %v9394_v5, %v743_v62  ;;  %v9489_v47 = vmax.f32 %v696_v37, %v745_v1  ;;  %v746_v50 = vmax.f32 %v9390_v4, %v742_v15  ;;  %v9492_v55 = vmax.f32 %v688_v14, %v744_v16 }
 0x1b1   : > { %v9494_v39 = vpack.i.bf16 %v754_v18, %v746_v50  ;;  %v9504_v4 = vpack.i.bf16 %v9489_v47, %v9492_v55  ;;  %v762_v22 = vpack.c.bf16 %v747_v49, %v746_v50  ;;  %v766_v30 = vpack.c.bf16 %v755_v51, %v754_v18 }
 0x1b2   : > { %7726 = vrot.lane.b32.xlu1 %v9474_v53, %s13815_s26 }
 0x1b3   : > { %7751 = vrot.lane.b32.xlu2 %v9494_v39, %s13836_s28  ;;  %7701 = vrot.lane.b32.xlu0 %v9494_v39, %s13834_s19  ;;  %770 = vst [vmem:[#allocation2] sm:$0xff] %v762_v22 }
 0x1b4   : > { %v7687_v5 = vpop.permute.xlu0 %7686  ;;  %774 = vst [vmem:[#allocation2 + $0x20] sm:$0xff] %v766_v30 }
 0x1b5   : > { %v7689_v20 = vunpack.i.h.bf16 %v7687_v5  ;;  %v7688_v43 = vunpack.i.l.bf16 %v7687_v5  ;;  %v7677_v46 = vpop.permute.xlu1 %7676 }
 0x1b6   : > { %v7679_v28 = vunpack.i.h.bf16 %v7677_v46  ;;  %v7678_v29 = vunpack.i.l.bf16 %v7677_v46 }
 0x1b7   : > { %v734_v10 = vsel %vm729_vm4, %v7683_v59, %v7688_v43  ;;  %v735_v0 = vsel %vm729_vm4, %v7684_v45, %v7689_v20 }
 0x1b8   : > { %v750_v11 = vmax.f32 %v9422_v34, %v734_v10  ;;  %v758_v6 = vmax.f32 %v9426_v35, %v735_v0  ;;  %v739_v12 = vsel %vm729_vm4, %v7674_v24, %v7679_v28  ;;  %v738_v13 = vsel %vm729_vm4, %v7673_v27, %v7678_v29 }
 0x1b9   : > { %v756_v60 = vmax.f32 %v9371_v42, %v739_v12  ;;  %v748_v63 = vmax.f32 %v9369_v41, %v738_v13  ;;  %v737_v14 = vsel %vm729_vm4, %v7679_v28, %v7684_v45  ;;  %v736_v37 = vsel %vm729_vm4, %v7678_v29, %v7683_v59 }
 0x1ba   : > { %7736 = vrot.lane.b32.xlu1 %v9474_v53, %s13813_s29  ;;  %v9524_v34 = vpack.i.bf16 %v758_v6, %v750_v11  ;;  %v757_v27 = vmax.f32 %v9434_v3, %v737_v14  ;;  %v749_v21 = vmax.f32 %v9430_v36, %v736_v37 }
 0x1bb   : > { %7766 = vrot.lane.b32.xlu2 %v9474_v53, %s13857_s17  ;;  %7711 = vrot.lane.b32.xlu0 %v9494_v39, %s13832_s20  ;;  %v7780_v42 = vpack.i.bf16 %v756_v60, %v748_v63 }
 0x1bc   : > { %v7825_v51 = vpack.i.bf16 %v757_v27, %v749_v21 }
 0x1bd   : > { %v7692_v35 = vpop.permute.xlu1 %7691 }
 0x1be   : > { %v7694_v2 = vunpack.i.h.bf16 %v7692_v35  ;;  %v7693_v8 = vunpack.i.l.bf16 %v7692_v35 }
 0x1c0   : > { %v731_v41 = vsel %vm729_vm4, %v7694_v2, %v7699_v57  ;;  %v733_v44 = vsel %vm729_vm4, %v7689_v20, %v7694_v2  ;;  %v730_v48 = vsel %vm729_vm4, %v7693_v8, %v7698_v58  ;;  %v732_v19 = vsel %vm729_vm4, %v7688_v43, %v7693_v8 }
 0x1c1   : > { %v759_v23 = vmax.f32 %v9418_v33, %v733_v44  ;;  %v760_v26 = vmax.f32 %v9463_v40, %v731_v41  ;;  %v751_v17 = vmax.f32 %v9414_v31, %v732_v19  ;;  %v752_v24 = vmax.f32 %v9459_v38, %v730_v48 }
 0x1c2   : > { %7746 = vrot.lane.b32.xlu1 %v9474_v53, %s13855_s18  ;;  %v763_v40 = vpack.c.bf16 %v749_v21, %v748_v63  ;;  %v767_v31 = vpack.c.bf16 %v757_v27, %v756_v60 }
 0x1c3   : > { %7781 = vrot.lane.b32.xlu2 %v7780_v42, %s13834_s19  ;;  %7721 = vrot.lane.b32.xlu0 %v9494_v39, %s13815_s26  ;;  %v9549_v25 = vpack.i.bf16 %v759_v23, %v751_v17  ;;  %v9551_v33 = vpack.i.bf16 %v760_v26, %v752_v24  ;;  %v764_v49 = vpack.c.bf16 %v751_v17, %v750_v11 }
 0x1c4   : > { %v768_v38 = vpack.c.bf16 %v759_v23, %v758_v6  ;;  %771 = vst [vmem:[#allocation2 + $0x8] sm:$0xff] %v763_v40  ;;  %v765_v3 = vpack.c.bf16 %v9492_v55, %v752_v24  ;;  %v769_v36 = vpack.c.bf16 %v9489_v47, %v760_v26 }
 0x1c5   : > { %775 = vst [vmem:[#allocation2 + $0x28] sm:$0xff] %v767_v31 }
 0x1c6   : > { %772 = vst [vmem:[#allocation2 + $0x10] sm:$0xff] %v764_v49 }
 0x1c7   : > { %776 = vst [vmem:[#allocation2 + $0x30] sm:$0xff] %v768_v38 }
 0x1c8   : > { %773 = vst [vmem:[#allocation2 + $0x18] sm:$0xff] %v765_v3 }
 0x1c9   : > { %777 = vst [vmem:[#allocation2 + $0x38] sm:$0xff] %v769_v36 }
 0x1ca   : > { %7761 = vrot.lane.b32.xlu1 %v9494_v39, %s13857_s17 }
 0x1cb   : > { %7786 = vrot.lane.b32.xlu2 %v7780_v42, %s13832_s20  ;;  %7731 = vrot.lane.b32.xlu0 %v9494_v39, %s13813_s29 }
 0x1d2   : > { %7776 = vrot.lane.b32.xlu1 %v9474_v53, %s13811_s15 }
 0x1d3   : > { %7791 = vrot.lane.b32.xlu2 %v7780_v42, %s13815_s26  ;;  %7741 = vrot.lane.b32.xlu0 %v9494_v39, %s13855_s18 }
 0x1da   : > { %7811 = vrot.lane.b32.xlu1 %v7780_v42, %s13836_s28 }
 0x1db   : > { %7796 = vrot.lane.b32.xlu2 %v7780_v42, %s13813_s29  ;;  %7756 = vrot.lane.b32.xlu0 %v9474_v53, %s13836_s28 }
 0x1e2   : > { %7826 = vrot.lane.b32.xlu1 %v7825_v51, %s13815_s26 }
 0x1e3   : > { %7801 = vrot.lane.b32.xlu2 %v7780_v42, %s13855_s18  ;;  %7771 = vrot.lane.b32.xlu0 %v9494_v39, %s13811_s15 }
 0x1ea   : > { %7841 = vrot.lane.b32.xlu1 %v7825_v51, %s13855_s18 }
 0x1eb   : > { %7816 = vrot.lane.b32.xlu2 %v7825_v51, %s13832_s20  ;;  %7806 = vrot.lane.b32.xlu0 %v7825_v51, %s13834_s19 }
 0x1f2   : > { %7856 = vrot.lane.b32.xlu1 %v7825_v51, %s13811_s15 }
 0x1f3   : > { %7831 = vrot.lane.b32.xlu2 %v7780_v42, %s13811_s15  ;;  %7821 = vrot.lane.b32.xlu0 %v7780_v42, %s13857_s17 }
 0x1fa   : > { %7861 = vrot.lane.b32.xlu1 %v9524_v34, %s13834_s19 }
 0x1fb   : > { %7846 = vrot.lane.b32.xlu2 %v7825_v51, %s13836_s28  ;;  %7836 = vrot.lane.b32.xlu0 %v7825_v51, %s13813_s29 }
 0x202   : > { %7876 = vrot.lane.b32.xlu1 %v9524_v34, %s13813_s29 }
 0x203   : > { %7871 = vrot.lane.b32.xlu2 %v9524_v34, %s13815_s26  ;;  %7851 = vrot.lane.b32.xlu0 %v7825_v51, %s13857_s17 }
 0x20a   : > { %7901 = vrot.lane.b32.xlu1 %v9551_v33, %s13832_s20 }
 0x20b   : > { %7881 = vrot.lane.b32.xlu2 %v9549_v25, %s13834_s19  ;;  %7866 = vrot.lane.b32.xlu0 %v9524_v34, %s13832_s20 }
 0x20d   : > { %v9594_v52 = vpop.permute.xlu2 %7751 }
 0x212   : > { %7911 = vrot.lane.b32.xlu1 %v9549_v25, %s13815_s26 }
 0x213   : > { %7891 = vrot.lane.b32.xlu2 %v9524_v34, %s13855_s18  ;;  %7886 = vrot.lane.b32.xlu0 %v9551_v33, %s13834_s19 }
 0x214   : > { %v7707_v53 = vpop.permute.xlu1 %7706 }
 0x215   : > { %v9602_v54 = vpop.permute.xlu2 %7766  ;;  %v7709_v15 = vunpack.i.h.bf16 %v7707_v53  ;;  %v7708_v16 = vunpack.i.l.bf16 %v7707_v53 }
 0x21a   : > { %7921 = vrot.lane.b32.xlu1 %v9524_v34, %s13857_s17 }
 0x21b   : > { %7916 = vrot.lane.b32.xlu2 %v9551_v33, %s13815_s26  ;;  %7896 = vrot.lane.b32.xlu0 %v9549_v25, %s13832_s20 }
 0x21c   : > { %v7717_v56 = vpop.permute.xlu1 %7716 }
 0x21d   : > { %v9610_v57 = vpop.permute.xlu2 %7781  ;;  %v7719_v29 = vunpack.i.h.bf16 %v7717_v56  ;;  %v7718_v30 = vunpack.i.l.bf16 %v7717_v56 }
 0x21e   : > { %v7784_v58 = vunpack.i.h.bf16 %v9610_v57  ;;  %v7783_v61 = vunpack.i.l.bf16 %v9610_v57 }
 0x220   : > { %v1210_v50 = vsel %vm1198_vm5, %v7709_v15, %v7784_v58  ;;  %v1209_v55 = vsel %vm1198_vm5, %v7708_v16, %v7783_v61 }
 0x222   : > { %7946 = vrot.lane.b32.xlu1 %v9551_v33, %s13855_s18 }
 0x223   : > { %7926 = vrot.lane.b32.xlu2 %v9549_v25, %s13813_s29  ;;  %7906 = vrot.lane.b32.xlu0 %v9524_v34, %s13836_s28 }
 0x224   : > { %v9620_v7 = vpop.permute.xlu1 %7726 }
 0x225   : > { %v9623_v62 = vpop.permute.xlu2 %7786  ;;  %v9625_v1 = vpop.permute.xlu0 %7701  ;;  %v7729_v23 = vunpack.i.h.bf16 %v9620_v7  ;;  %v7728_v26 = vunpack.i.l.bf16 %v9620_v7 }
 0x226   : > { %v7704_v18 = vunpack.i.h.bf16 %v9625_v1  ;;  %v7703_v47 = vunpack.i.l.bf16 %v9625_v1  ;;  %v7789_v20 = vunpack.i.h.bf16 %v9623_v62  ;;  %v7788_v43 = vunpack.i.l.bf16 %v9623_v62 }
 0x228   : > { %v1212_v39 = vsel %vm1198_vm5, %v7704_v18, %v7709_v15  ;;  %v1211_v45 = vsel %vm1198_vm5, %v7703_v47, %v7708_v16  ;;  %v1145_v11 = vsel %vm1133_vm6, %v7719_v29, %v7789_v20  ;;  %v1144_v6 = vsel %vm1133_vm6, %v7718_v30, %v7788_v43 }
 0x229   : > { %v1219_v59 = vpack.c.bf16 %v1210_v50, %v1212_v39  ;;  %v1215_v5 = vpack.c.bf16 %v1209_v55, %v1211_v45 }
 0x22a   : > { %7961 = vrot.lane.b32.xlu1 %v9504_v4, %s13834_s19  ;;  %s13909_s19 = smov 94  }
 0x22b   : > { %1227 = vst [vmem:[#allocation2 + $0x1e0] sm:$0xff] %v1219_v59  ;;  %7936 = vrot.lane.b32.xlu2 %v9524_v34, %s13811_s15  ;;  %7931 = vrot.lane.b32.xlu0 %v9551_v33, %s13813_s29 }
 0x22c   : > { %1223 = vst [vmem:[#allocation2 + $0x1c0] sm:$0xff] %v1215_v5  ;;  %v9653_v46 = vpop.permute.xlu1 %7736 }
 0x22d   : > { %v9656_v22 = vpop.permute.xlu2 %7791  ;;  %v9658_v28 = vpop.permute.xlu0 %7711  ;;  %v7738_v45 = vunpack.i.l.bf16 %v9653_v46 }
 0x22e   : > { %v13825_v10 = vunpack.i.h.bf16 %v9658_v28  ;;  %v13827_v0 = vunpack.i.l.bf16 %v9658_v28  ;;  %v7794_v14 = vunpack.i.h.bf16 %v9656_v22  ;;  %v7793_v37 = vunpack.i.l.bf16 %v9656_v22 }
 0x230   : > { %v1147_v12 = vsel %vm1133_vm6, %v13825_v10, %v7719_v29  ;;  %v1146_v13 = vsel %vm1133_vm6, %v13827_v0, %v7718_v30  ;;  %v1080_v27 = vsel %vm1068_vm7, %v7729_v23, %v7794_v14  ;;  %v1079_v21 = vsel %vm1068_vm7, %v7728_v26, %v7793_v37  ;;  %v7348_v10 = vld [vmem:[#allocation2 + $0x4] sm:$0xf] }
 0x231   : > { %v1154_v60 = vpack.c.bf16 %v1145_v11, %v1147_v12  ;;  %v1150_v63 = vpack.c.bf16 %v1144_v6, %v1146_v13 }
 0x232   : > { %7976 = vrot.lane.b32.xlu1 %v9504_v4, %s13832_s20  ;;  %v7408_v34 = vld [vmem:[#allocation2 + $0x1dc] sm:$0xf0]  ;;  %v6616_v35 = vld [vmem:[#allocation2 + $0x1e0] sm:$0xf0]  ;;  %s13910_s20 = smov 95  }
 0x233   : > { %1162 = vst [vmem:[#allocation2 + $0x1a0] sm:$0xff] %v1154_v60  ;;  %7951 = vrot.lane.b32.xlu2 %v9549_v25, %s13836_s28  ;;  %7941 = vrot.lane.b32.xlu0 %v9549_v25, %s13855_s18  ;;  %v6614_v2 = vld [vmem:[#allocation2 + $0x1c0] sm:$0xf]  ;;  %v7404_v8 = vld [vmem:[#allocation2 + $0x1c4] sm:$0xf] }
 0x234   : > { %1158 = vst [vmem:[#allocation2 + $0x180] sm:$0xff] %v1150_v63  ;;  %v9686_v42 = vpop.permute.xlu1 %7746  ;;  %v6615_v41 = vor.u32 %v7408_v34, %v6614_v2  ;;  %v6619_v44 = vor.u32 %v7404_v8, %v6616_v35 }
 0x235   : > { %v9689_v48 = vpop.permute.xlu2 %7796  ;;  %v9691_v19 = vpop.permute.xlu0 %7721 }
 0x236   : > { %v13828_v17 = vunpack.i.h.bf16 %v9691_v19  ;;  %v13829_v24 = vunpack.i.l.bf16 %v9691_v19  ;;  %1755 = vmatpush.bf16.msra.mxu0 %v6615_v41  ;;  %1783 = vmatpush.bf16.msra.mxu2 %v6619_v44  ;;  %v7799_v56 = vunpack.i.h.bf16 %v9689_v48  ;;  %v7798_v7 = vunpack.i.l.bf16 %v9689_v48  ;;  %v7347_v48 = vld [vmem:[%s13798_s3 + $0x4] sm:$0xf0] }
 0x237   : > { %v13889_v1 = vunpack.i.l.bf16 %v9691_v19 }
 0x238   : > { %v1082_v40 = vsel %vm1068_vm7, %v13828_v17, %v7729_v23  ;;  %v1081_v31 = vsel %vm1068_vm7, %v13829_v24, %v7728_v26  ;;  %v1014_v30 = vsel %vm1003_vm8, %v7738_v45, %v7798_v7 }
 0x239   : > { %v1089_v49 = vpack.c.bf16 %v1080_v27, %v1082_v40  ;;  %v1085_v38 = vpack.c.bf16 %v1079_v21, %v1081_v31  ;;  %v7749_v27 = vunpack.i.h.bf16 %v9686_v42  ;;  %v7748_v21 = vunpack.i.l.bf16 %v9686_v42 }
 0x23a   : > { %7991 = vrot.lane.b32.xlu1 %v9549_v25, %s13811_s15  ;;  %v7400_v3 = vld [vmem:[#allocation2 + $0x19c] sm:$0xf0]  ;;  %v6584_v36 = vld [vmem:[#allocation2 + $0x1a0] sm:$0xf0] }
 0x23b   : > { %1097 = vst [vmem:[#allocation2 + $0x160] sm:$0xff] %v1089_v49  ;;  %7966 = vrot.lane.b32.xlu2 %v9549_v25, %s13857_s17  ;;  %7956 = vrot.lane.b32.xlu0 %v9551_v33, %s13836_s28  ;;  %v6582_v51 = vld [vmem:[#allocation2 + $0x180] sm:$0xf]  ;;  %v7396_v53 = vld [vmem:[#allocation2 + $0x184] sm:$0xf]  ;;  %v7739_v25 = vunpack.i.h.bf16 %v9653_v46 }
 0x23c   : > { %1093 = vst [vmem:[#allocation2 + $0x140] sm:$0xff] %v1085_v38  ;;  %v9721_v15 = vpop.permute.xlu1 %7761  ;;  %v6583_v16 = vor.u32 %v7400_v3, %v6582_v51  ;;  %v6587_v50 = vor.u32 %v7396_v53, %v6584_v36 }
 0x23d   : > { %v9724_v55 = vpop.permute.xlu2 %7801  ;;  %v9726_v39 = vpop.permute.xlu0 %7731  ;;  %v1015_v29 = vsel %vm1003_vm8, %v7739_v25, %v7799_v56 }
 0x23e   : > { %v13818_v59 = vunpack.i.h.bf16 %v9726_v39  ;;  %v13819_v5 = vunpack.i.l.bf16 %v9726_v39  ;;  %1756 = vmatpush.bf16.msra.mxu0 %v6583_v16  ;;  %1784 = vmatpush.bf16.msra.mxu2 %v6587_v50  ;;  %v7804_v35 = vunpack.i.h.bf16 %v9724_v55  ;;  %v7803_v2 = vunpack.i.l.bf16 %v9724_v55 }
 0x240   : > { %v1017_v46 = vsel %vm1003_vm8, %v13818_v59, %v7739_v25  ;;  %v1016_v11 = vsel %vm1003_vm8, %v13819_v5, %v7738_v45  ;;  %v950_v49 = vsel %vm729_vm4, %v7749_v27, %v7804_v35  ;;  %v949_v38 = vsel %vm729_vm4, %v7748_v21, %v7803_v2 }
 0x241   : > { %v1024_v6 = vpack.c.bf16 %v1015_v29, %v1017_v46  ;;  %v1020_v12 = vpack.c.bf16 %v1014_v30, %v1016_v11 }
 0x242   : > { %8006 = vrot.lane.b32.xlu1 %v9504_v4, %s13836_s28  ;;  %v7392_v13 = vld [vmem:[#allocation2 + $0x15c] sm:$0xf0]  ;;  %v6552_v60 = vld [vmem:[#allocation2 + $0x160] sm:$0xf0] }
 0x243   : > { %1032 = vst [vmem:[#allocation2 + $0x120] sm:$0xff] %v1024_v6  ;;  %7981 = vrot.lane.b32.xlu2 %v9504_v4, %s13815_s26  ;;  %7971 = vrot.lane.b32.xlu0 %v9551_v33, %s13857_s17  ;;  %v6550_v63 = vld [vmem:[#allocation2 + $0x140] sm:$0xf]  ;;  %v7388_v34 = vld [vmem:[#allocation2 + $0x144] sm:$0xf]  ;;  %v13821_v6 = vunpack.i.h.bf16 %v9594_v52  ;;  %s13911_s26 = smov 62  }
 0x244   : > { %1028 = vst [vmem:[#allocation2 + $0x100] sm:$0xff] %v1020_v12  ;;  %v9756_v8 = vpop.permute.xlu1 %7776  ;;  %v6551_v41 = vor.u32 %v7392_v13, %v6550_v63  ;;  %v6555_v44 = vor.u32 %v7388_v34, %v6552_v60  ;;  %v13822_v60 = vunpack.i.l.bf16 %v9594_v52 }
 0x245   : > { %v9758_v23 = vpop.permute.xlu2 %7816  ;;  %v9760_v26 = vpop.permute.xlu0 %7741 }
 0x246   : > { %v13808_v40 = vunpack.i.h.bf16 %v9760_v26  ;;  %v13810_v31 = vunpack.i.l.bf16 %v9760_v26  ;;  %1757 = vmatpush.bf16.msra.mxu0 %v6551_v41  ;;  %1785 = vmatpush.bf16.msra.mxu2 %v6555_v44  ;;  %v7819_v0 = vunpack.i.h.bf16 %v9758_v23  ;;  %v7818_v17 = vunpack.i.l.bf16 %v9758_v23 }
 0x248   : > { %v952_v42 = vsel %vm729_vm4, %v13808_v40, %v7749_v27  ;;  %v951_v3 = vsel %vm729_vm4, %v13810_v31, %v7748_v21  ;;  %v1142_v23 = vsel %vm1133_vm6, %v7788_v43, %v7818_v17 }
 0x249   : > { %v959_v36 = vpack.c.bf16 %v950_v49, %v952_v42  ;;  %v955_v51 = vpack.c.bf16 %v949_v38, %v951_v3 }
 0x24a   : > { %v7384_v53 = vld [vmem:[#allocation2 + $0x11c] sm:$0xf0]  ;;  %v6520_v16 = vld [vmem:[#allocation2 + $0x120] sm:$0xf0] }
 0x24b   : > { %967 = vst [vmem:[#allocation2 + $0xe0] sm:$0xff] %v959_v36  ;;  %7996 = vrot.lane.b32.xlu2 %v9551_v33, %s13811_s15  ;;  %7986 = vrot.lane.b32.xlu0 %v9504_v4, %s13813_s29  ;;  %v6518_v50 = vld [vmem:[#allocation2 + $0x100] sm:$0xf]  ;;  %v7380_v25 = vld [vmem:[#allocation2 + $0x104] sm:$0xf] }
 0x24c   : > { %963 = vst [vmem:[#allocation2 + $0xc0] sm:$0xff] %v955_v51  ;;  %v9786_v45 = vpop.permute.xlu1 %7811  ;;  %v6519_v29 = vor.u32 %v7384_v53, %v6518_v50  ;;  %v6523_v30 = vor.u32 %v7380_v25, %v6520_v16 }
 0x24d   : > { %v9788_v46 = vpop.permute.xlu2 %7831  ;;  %v7757_v11 = vpop.permute.xlu0 %7756  ;;  %v7814_v12 = vunpack.i.h.bf16 %v9786_v45  ;;  %v7813_v63 = vunpack.i.l.bf16 %v9786_v45 }
 0x24e   : > { %v7759_v33 = vunpack.i.h.bf16 %v7757_v11  ;;  %v7758_v13 = vunpack.i.l.bf16 %v7757_v11  ;;  %1758 = vmatpush.bf16.msra.mxu0 %v6519_v29  ;;  %1786 = vmatpush.bf16.msra.mxu2 %v6523_v30  ;;  %v7834_v51 = vunpack.i.h.bf16 %v9788_v46  ;;  %v7833_v53 = vunpack.i.l.bf16 %v9788_v46 }
 0x24f   : > { %v7779_v11 = vunpack.i.h.bf16 %v9756_v8 }
 0x250   : > { %v886_v34 = vsel %vm874_vm9, %v7759_v33, %v7814_v12  ;;  %v888_v41 = vsel %vm874_vm9, %v13821_v6, %v7759_v33  ;;  %v885_v27 = vsel %vm874_vm9, %v7758_v13, %v7813_v63  ;;  %v887_v21 = vsel %vm874_vm9, %v13822_v60, %v7758_v13 }
 0x251   : > { %v895_v44 = vpack.c.bf16 %v886_v34, %v888_v41  ;;  %v891_v49 = vpack.c.bf16 %v885_v27, %v887_v21  ;;  %v7778_v33 = vunpack.i.l.bf16 %v9756_v8  ;;  %v1275_v41 = vsel %vm1263_vm10, %v7779_v11, %v7834_v51 }
 0x252   : > { %v7376_v38 = vld [vmem:[#allocation2 + $0xdc] sm:$0xf0]  ;;  %v6488_v42 = vld [vmem:[#allocation2 + $0xe0] sm:$0xf0] }
 0x253   : > { %903 = vst [vmem:[#allocation2 + $0xa0] sm:$0xff] %v895_v44  ;;  %8011 = vrot.lane.b32.xlu2 %v9504_v4, %s13857_s17  ;;  %8001 = vrot.lane.b32.xlu0 %v9504_v4, %s13855_s18  ;;  %v6486_v3 = vld [vmem:[#allocation2 + $0xc0] sm:$0xf]  ;;  %v7372_v36 = vld [vmem:[#allocation2 + $0xc4] sm:$0xf]  ;;  %v1274_v44 = vsel %vm1263_vm10, %v7778_v33, %v7833_v53 }
 0x254   : > { %899 = vst [vmem:[#allocation2 + $0x80] sm:$0xff] %v891_v49  ;;  %v7827_v16 = vpop.permute.xlu1 %7826  ;;  %v6487_v50 = vor.u32 %v7376_v38, %v6486_v3  ;;  %v6491_v25 = vor.u32 %v7372_v36, %v6488_v42 }
 0x255   : > { %v9818_v29 = vpop.permute.xlu2 %7846  ;;  %v9820_v30 = vpop.permute.xlu0 %7771 }
 0x256   : > { %v13809_v13 = vunpack.i.h.bf16 %v9820_v30  ;;  %v13817_v34 = vunpack.i.l.bf16 %v9820_v30  ;;  %1759 = vmatpush.bf16.msra.mxu0 %v6487_v50  ;;  %1787 = vmatpush.bf16.msra.mxu2 %v6491_v25  ;;  %v7829_v50 = vunpack.i.h.bf16 %v7827_v16  ;;  %v7828_v25 = vunpack.i.l.bf16 %v7827_v16 }
 0x258   : > { %v1277_v8 = vsel %vm1263_vm10, %v13809_v13, %v7779_v11  ;;  %v1276_v27 = vsel %vm1263_vm10, %v13817_v34, %v7778_v33  ;;  %v1078_v16 = vsel %vm1068_vm7, %v7794_v14, %v7829_v50  ;;  %v13820_v14 = vunpack.i.l.bf16 %v9721_v15 }
 0x259   : > { %v1284_v21 = vpack.c.bf16 %v1275_v41, %v1277_v8  ;;  %v1280_v49 = vpack.c.bf16 %v1274_v44, %v1276_v27 }
 0x25a   : > { %v7368_v38 = vld [vmem:[#allocation2 + $0x9c] sm:$0xf0]  ;;  %v6456_v42 = vld [vmem:[#allocation2 + $0xa0] sm:$0xf0] }
 0x25b   : > { %1292 = vst [vmem:[#allocation2 + $0x220] sm:$0xff] %v1284_v21  ;;  %8016 = vrot.lane.b32.xlu0 %v9504_v4, %s13811_s15  ;;  %v6454_v3 = vld [vmem:[#allocation2 + $0x80] sm:$0xf]  ;;  %v7364_v36 = vld [vmem:[#allocation2 + $0x84] sm:$0xf]  ;;  %v1077_v4 = vsel %vm1068_vm7, %v7793_v37, %v7828_v25  ;;  %s13907_s15 = smov 63  }
 0x25c   : > { %1288 = vst [vmem:[#allocation2 + $0x200] sm:$0xff] %v1280_v49  ;;  %v9844_v40 = vpop.permute.xlu1 %7841  ;;  %v6455_v11 = vor.u32 %v7368_v38, %v6454_v3  ;;  %v6459_v13 = vor.u32 %v7364_v36, %v6456_v42  ;;  %v13823_v42 = vunpack.i.h.bf16 %v9721_v15 }
 0x25d   : > { %v9846_v31 = vpop.permute.xlu2 %7871  ;;  %v7807_v33 = vpop.permute.xlu0 %7806 }
 0x25e   : > { %v7874_v41 = vunpack.i.h.bf16 %v9846_v31  ;;  %v7873_v44 = vunpack.i.l.bf16 %v9846_v31  ;;  %1760 = vmatpush.bf16.msra.mxu0 %v6455_v11  ;;  %1788 = vmatpush.bf16.msra.mxu2 %v6459_v13  ;;  %v6384_v11 = vld [vmem:[%s13798_s3 + $0x8] sm:$0xf0]  ;;  %v7809_v34 = vunpack.i.h.bf16 %v7807_v33  ;;  %v7808_v59 = vunpack.i.l.bf16 %v7807_v33 }
 0x260   : > { %v1076_v8 = vsel %vm1068_vm7, %v7829_v50, %v7874_v41  ;;  %v1075_v13 = vsel %vm1068_vm7, %v7828_v25, %v7873_v44  ;;  %v7346_v25 = vld [vmem:[%s13798_s3 + $0x4] sm:$0xf]  ;;  %v1207_v5 = vsel %vm1198_vm5, %v7783_v61, %v7808_v59 }
 0x261   : > { %v1086_v27 = vpack.c.bf16 %v1075_v13, %v1077_v4  ;;  %v1090_v21 = vpack.c.bf16 %v1076_v8, %v1078_v16  ;;  %v7769_v4 = vunpack.i.h.bf16 %v9602_v54  ;;  %v9881_v13 = vor.u32 %v7346_v25, %v6384_v11 }
 0x262   : > { %v7416_v49 = vld [vmem:[#allocation2 + $0x21c] sm:$0xf0]  ;;  %v6648_v38 = vld [vmem:[#allocation2 + $0x220] sm:$0xf0]  ;;  %v7844_v25 = vunpack.i.h.bf16 %v9844_v40  ;;  %v7843_v11 = vunpack.i.l.bf16 %v9844_v40 }
 0x263   : > { %1094 = vst [vmem:[#allocation2 + $0x148] sm:$0xff] %v1086_v27  ;;  %v6646_v37 = vld [vmem:[#allocation2 + $0x200] sm:$0xf]  ;;  %v7412_v22 = vld [vmem:[#allocation2 + $0x204] sm:$0xf]  ;;  %v7768_v27 = vunpack.i.l.bf16 %v9602_v54 }
 0x264   : > { %1098 = vst [vmem:[#allocation2 + $0x168] sm:$0xff] %v1090_v21  ;;  %v9868_v3 = vpop.permute.xlu1 %7856  ;;  %v6647_v36 = vor.u32 %v7416_v49, %v6646_v37  ;;  %v6651_v50 = vor.u32 %v7412_v22, %v6648_v38  ;;  %v823_v37 = vsel %vm664_vm3, %v13823_v42, %v7769_v4  ;;  %v948_v40 = vsel %vm729_vm4, %v7804_v35, %v7844_v25 }
 0x265   : > { %v9877_v16 = vpop.permute.xlu2 %7881  ;;  %v9879_v8 = vpop.permute.xlu0 %7821  ;;  %v822_v38 = vsel %vm664_vm3, %v13820_v14, %v7768_v27 }
 0x266   : > { %v7824_v21 = vunpack.i.h.bf16 %v9879_v8  ;;  %v7823_v49 = vunpack.i.l.bf16 %v9879_v8  ;;  %1776 = vmatpush.bf16.msra.mxu1 %v6647_v36  ;;  %1804 = vmatpush.bf16.msra.mxu3 %v6651_v50  ;;  %v7884_v62 = vunpack.i.h.bf16 %v9877_v16 }
 0x268   : > { %v821_v54 = vsel %vm664_vm3, %v7769_v4, %v7824_v21  ;;  %v820_v22 = vsel %vm664_vm3, %v7768_v27, %v7823_v49 }
 0x269   : > { %v830_v36 = vpack.c.bf16 %v821_v54, %v823_v37  ;;  %v826_v50 = vpack.c.bf16 %v820_v22, %v822_v38  ;;  %6677 = vmatmul.msk.bf16.vlgmr.msra.gmra.mxu3 %vm1751_vm11, %v9881_v13  ;;  %6676 = vmatmul.msk.bf16.vlgmr.msra.gmra.mxu1 %vm1751_vm11, %v9881_v13  ;;  %v947_v22 = vsel %vm729_vm4, %v7803_v2, %v7843_v11 }
 0x26b   : > { %838 = vst [vmem:[#allocation2 + $0x60] sm:$0xff] %v830_v36 }
 0x26c   : > { %834 = vst [vmem:[#allocation2 + $0x40] sm:$0xff] %v826_v50  ;;  %v9908_v4 = vpop.permute.xlu1 %7861  ;;  %v1208_v50 = vsel %vm1198_vm5, %v7784_v58, %v7809_v34 }
 0x26d   : > { %v7864_v27 = vunpack.i.h.bf16 %v9908_v4  ;;  %v7863_v38 = vunpack.i.l.bf16 %v9908_v4  ;;  %v9912_v37 = vpop.permute.xlu2 %7891  ;;  %v7837_v54 = vpop.permute.xlu0 %7836 }
 0x26e   : > { %v13824_v33 = vunpack.i.h.bf16 %v9912_v37  ;;  %v13826_v36 = vunpack.i.l.bf16 %v9912_v37  ;;  %v7839_v42 = vunpack.i.h.bf16 %v7837_v54 }
 0x26f   : > { %v1205_v55 = vsel %vm1198_vm5, %v7808_v59, %v7863_v38  ;;  %v1206_v35 = vsel %vm1198_vm5, %v7809_v34, %v7864_v27  ;;  %v7838_v34 = vunpack.i.l.bf16 %v7837_v54  ;;  %v6392_v54 = vld [vmem:[#allocation2 + $0x20] sm:$0xf0] }
 0x270   : > { %v1216_v2 = vpack.c.bf16 %v1205_v55, %v1207_v5  ;;  %v1220_v14 = vpack.c.bf16 %v1206_v35, %v1208_v50  ;;  %v946_v57 = vsel %vm729_vm4, %v7844_v25, %v13824_v33  ;;  %v945_v58 = vsel %vm729_vm4, %v7843_v11, %v13826_v36  ;;  %v6390_v33 = vld [vmem:[#allocation2] sm:$0xf] }
 0x271   : > { %v956_v61 = vpack.c.bf16 %v945_v58, %v947_v22  ;;  %v960_v6 = vpack.c.bf16 %v946_v57, %v948_v40  ;;  %v1370_v57 = vld [vmem:[%s13799_s4] sm:$0xff] }
 0x272   : > { %1224 = vst [vmem:[#allocation2 + $0x1c8] sm:$0xff] %v1216_v2  ;;  %v7360_v59 = vld [vmem:[#allocation2 + $0x5c] sm:$0xf0]  ;;  %v6424_v60 = vld [vmem:[#allocation2 + $0x60] sm:$0xf0]  ;;  %1374 = vperm.xlu1 %8020, %v1370_v57  }
 0x273   : > { %1228 = vst [vmem:[#allocation2 + $0x1e8] sm:$0xff] %v1220_v14  ;;  %v6422_v5 = vld [vmem:[#allocation2 + $0x40] sm:$0xf]  ;;  %v7356_v50 = vld [vmem:[#allocation2 + $0x44] sm:$0xf] }
 0x274   : > { %964 = vst [vmem:[#allocation2 + $0xc8] sm:$0xff] %v956_v61  ;;  %v9948_v55 = vpop.permute.xlu1 %7876  ;;  %v6423_v35 = vor.u32 %v7360_v59, %v6422_v5  ;;  %v6427_v25 = vor.u32 %v7356_v50, %v6424_v60  ;;  %v7352_v14 = vld [vmem:[#allocation2 + $0x1c] sm:$0xf0]  ;;  %v1012_v60 = vsel %vm1003_vm8, %v7798_v7, %v7838_v34  ;;  %v6382_v59 = vld [vmem:[%s13798_s3] sm:$0xf]  ;;  %v6395_v50 = vor.u32 %v7348_v10, %v6392_v54 }
 0x275   : > { %968 = vst [vmem:[#allocation2 + $0xe8] sm:$0xff] %v960_v6  ;;  %v7879_v11 = vunpack.i.h.bf16 %v9948_v55  ;;  %v7878_v22 = vunpack.i.l.bf16 %v9948_v55  ;;  %v9952_v40 = vpop.permute.xlu2 %7916  ;;  %v9954_v2 = vpop.permute.xlu0 %7851  ;;  %v1013_v6 = vsel %vm1003_vm8, %v7799_v56, %v7839_v42  ;;  %v6391_v5 = vor.u32 %v7352_v14, %v6390_v33 }
 0x276   : > { %1761 = vmatpush.bf16.msra.mxu0 %v6423_v35  ;;  %1789 = vmatpush.bf16.msra.mxu2 %v6427_v25  ;;  %v9981_v36 = vor.u32 %v7347_v48, %v6382_v59 }
 0x277   : > { %v1010_v58 = vsel %vm1003_vm8, %v7838_v34, %v7878_v22  ;;  %v1011_v61 = vsel %vm1003_vm8, %v7839_v42, %v7879_v11 }
 0x278   : > { %v1021_v56 = vpack.c.bf16 %v1010_v58, %v1012_v60  ;;  %v1025_v7 = vpack.c.bf16 %v1011_v61, %v1013_v6  ;;  %v7859_v6 = vunpack.i.h.bf16 %v9868_v3  ;;  %v7858_v58 = vunpack.i.l.bf16 %v9868_v3 }
 0x279   : > { %v6622_v35 = vld [vmem:[#allocation2 + $0x1c8] sm:$0xf]  ;;  %v7405_v34 = vld [vmem:[#allocation2 + $0x1cc] sm:$0xf]  ;;  %v7883_v3 = vunpack.i.l.bf16 %v9877_v16 }
 0x27a   : > { %1029 = vst [vmem:[#allocation2 + $0x108] sm:$0xff] %v1021_v56  ;;  %1762 = vmatpush.bf16.msra.mxu0 %v6391_v5  ;;  %1790 = vmatpush.bf16.msra.mxu2 %v6395_v50  ;;  %v7409_v25 = vld [vmem:[#allocation2 + $0x1e4] sm:$0xf0]  ;;  %v6624_v42 = vld [vmem:[#allocation2 + $0x1e8] sm:$0xf0]  ;;  %v7918_v5 = vunpack.i.l.bf16 %v9952_v40 }
 0x27b   : > { %1033 = vst [vmem:[#allocation2 + $0x128] sm:$0xff] %v1025_v7  ;;  %v6623_v24 = vor.u32 %v7409_v25, %v6622_v35  ;;  %v6627_v57 = vor.u32 %v7405_v34, %v6624_v42  ;;  %v7919_v7 = vunpack.i.h.bf16 %v9952_v40 }
 0x27c   : > { %v9985_v60 = vpop.permute.xlu1 %7901 }
 0x27d   : > { %1811 = vmatpush.bf16.msrb.mxu1 %v6623_v24  ;;  %v9987_v10 = vpop.permute.xlu2 %7926  ;;  %v9989_v33 = vpop.permute.xlu0 %7866  ;;  %1791 = vmatmul.bf16.vlgmr.msra.gmra.mxu2 %v9981_v36  ;;  %v1143_v24 = vsel %vm1133_vm6, %v7789_v20, %v7819_v0  ;;  %v1272_v20 = vsel %vm1263_vm10, %v7833_v53, %v7858_v58 }
 0x27e   : > { %1839 = vmatpush.bf16.msrb.mxu0 %v6627_v57  ;;  %v7869_v14 = vunpack.i.h.bf16 %v9989_v33  ;;  %v7868_v54 = vunpack.i.l.bf16 %v9989_v33  ;;  %v6496_v33 = vld [vmem:[#allocation2 + $0xe8] sm:$0xf0] }
 0x27f   : > { %1763 = vmatmul.bf16.vlgmr.msra.gmra.mxu0 %v9981_v36 }
 0x280   : > { %v1141_v61 = vsel %vm1133_vm6, %v7819_v0, %v7869_v14  ;;  %v1140_v59 = vsel %vm1133_vm6, %v7818_v17, %v7868_v54  ;;  %v1273_v0 = vsel %vm1263_vm10, %v7834_v51, %v7859_v6  ;;  %v1204_v17 = vsel %vm1198_vm5, %v7864_v27, %v7884_v62 }
 0x281   : > { %v1155_v43 = vpack.c.bf16 %v1141_v61, %v1143_v24  ;;  %v1151_v48 = vpack.c.bf16 %v1140_v59, %v1142_v23 }
 0x283   : > { %1163 = vst [vmem:[#allocation2 + $0x1a8] sm:$0xff] %v1155_v43 }
 0x284   : > { %1159 = vst [vmem:[#allocation2 + $0x188] sm:$0xff] %v1151_v48  ;;  %v7912_v56 = vpop.permute.xlu1 %7911  ;;  %v6558_v48 = vld [vmem:[#allocation2 + $0x148] sm:$0xf] }
 0x285   : > { %v7914_v50 = vunpack.i.h.bf16 %v7912_v56  ;;  %v7913_v53 = vunpack.i.l.bf16 %v7912_v56  ;;  %v10029_v35 = vpop.permute.xlu2 %7936  ;;  %v10031_v46 = vpop.permute.xlu0 %7886 }
 0x286   : > { %v13830_v51 = vunpack.i.h.bf16 %v10029_v35  ;;  %v13831_v16 = vunpack.i.l.bf16 %v10029_v35  ;;  %v7889_v34 = vunpack.i.h.bf16 %v10031_v46  ;;  %v7888_v27 = vunpack.i.l.bf16 %v10031_v46 }
 0x287   : > { %v1071_v25 = vsel %vm1068_vm7, %v7913_v53, %v7918_v5  ;;  %v1072_v42 = vsel %vm1068_vm7, %v7914_v50, %v7919_v7  ;;  %v1073_v57 = vsel %vm1068_vm7, %v7873_v44, %v7913_v53  ;;  %v1074_v23 = vsel %vm1068_vm7, %v7874_v41, %v7914_v50  ;;  %v7393_v50 = vld [vmem:[#allocation2 + $0x164] sm:$0xf0]  ;;  %v6560_v53 = vld [vmem:[#allocation2 + $0x168] sm:$0xf0] }
 0x288   : > { %v1087_v24 = vpack.c.bf16 %v1071_v25, %v1073_v57  ;;  %v1091_v61 = vpack.c.bf16 %v1072_v42, %v1074_v23  ;;  %v1271_v59 = vsel %vm1263_vm10, %v7859_v6, %v13830_v51  ;;  %v1270_v43 = vsel %vm1263_vm10, %v7858_v58, %v13831_v16  ;;  %v7389_v6 = vld [vmem:[#allocation2 + $0x14c] sm:$0xf] }
 0x289   : > { %v1281_v56 = vpack.c.bf16 %v1270_v43, %v1272_v20  ;;  %v1285_v44 = vpack.c.bf16 %v1271_v59, %v1273_v0  ;;  %v1202_v31 = vsel %vm1198_vm5, %v7884_v62, %v7889_v34  ;;  %v1201_v41 = vsel %vm1198_vm5, %v7883_v3, %v7888_v27 }
 0x28a   : > { %v1203_v58 = vsel %vm1198_vm5, %v7863_v38, %v7883_v3  ;;  %1095 = vst [vmem:[#allocation2 + $0x150] sm:$0xff] %v1087_v24  ;;  %v1221_v20 = vpack.c.bf16 %v1202_v31, %v1204_v17  ;;  %v7401_v0 = vld [vmem:[#allocation2 + $0x1a4] sm:$0xf0]  ;;  %v6592_v25 = vld [vmem:[#allocation2 + $0x1a8] sm:$0xf0]  ;;  %v7854_v42 = vunpack.i.h.bf16 %v9954_v2  ;;  %v7853_v62 = vunpack.i.l.bf16 %v9954_v2 }
 0x28b   : > { %1099 = vst [vmem:[#allocation2 + $0x170] sm:$0xff] %v1091_v61  ;;  %v1217_v57 = vpack.c.bf16 %v1201_v41, %v1203_v58  ;;  %v6590_v23 = vld [vmem:[#allocation2 + $0x188] sm:$0xf]  ;;  %v7397_v59 = vld [vmem:[#allocation2 + $0x18c] sm:$0xf]  ;;  %v6559_v31 = vor.u32 %v7393_v50, %v6558_v48  ;;  %v6563_v16 = vor.u32 %v7389_v6, %v6560_v53  ;;  %v7904_v2 = vunpack.i.h.bf16 %v9985_v60 }
 0x28c   : > { %1289 = vst [vmem:[#allocation2 + $0x208] sm:$0xff] %v1281_v56  ;;  %v10075_v43 = vpop.permute.xlu1 %7921  ;;  %v6591_v51 = vor.u32 %v7401_v0, %v6590_v23  ;;  %v6595_v4 = vor.u32 %v7397_v59, %v6592_v25  ;;  %v7903_v61 = vunpack.i.l.bf16 %v9985_v60  ;;  %v819_v48 = vsel %vm664_vm3, %v7824_v21, %v7854_v42  ;;  %v7385_v0 = vld [vmem:[#allocation2 + $0x124] sm:$0xf0]  ;;  %v7381_v25 = vld [vmem:[#allocation2 + $0x10c] sm:$0xf] }
 0x28d   : > { %1293 = vst [vmem:[#allocation2 + $0x228] sm:$0xff] %v1285_v44  ;;  %v7924_v38 = vunpack.i.h.bf16 %v10075_v43  ;;  %v7923_v3 = vunpack.i.l.bf16 %v10075_v43  ;;  %v10079_v17 = vpop.permute.xlu2 %7951  ;;  %v7897_v24 = vpop.permute.xlu0 %7896  ;;  %v818_v44 = vsel %vm664_vm3, %v7823_v49, %v7853_v62  ;;  %v6526_v49 = vld [vmem:[#allocation2 + $0x108] sm:$0xf] }
 0x28e   : > { %1229 = vst [vmem:[#allocation2 + $0x1f0] sm:$0xff] %v1221_v20  ;;  %v7899_v56 = vunpack.i.h.bf16 %v7897_v24  ;;  %v7898_v41 = vunpack.i.l.bf16 %v7897_v24  ;;  %1812 = vmatpush.bf16.msrb.mxu1 %v6591_v51  ;;  %1840 = vmatpush.bf16.msrb.mxu0 %v6595_v4  ;;  %v6494_v59 = vld [vmem:[#allocation2 + $0xc8] sm:$0xf] }
 0x28f   : > { %1225 = vst [vmem:[#allocation2 + $0x1d0] sm:$0xff] %v1217_v57  ;;  %v816_v50 = vsel %vm664_vm3, %v7853_v62, %v7923_v3  ;;  %v817_v51 = vsel %vm664_vm3, %v7854_v42, %v7924_v38  ;;  %v6528_v42 = vld [vmem:[#allocation2 + $0x128] sm:$0xf0]  ;;  %v7849_v62 = vunpack.i.h.bf16 %v9818_v29  ;;  %v7377_v4 = vld [vmem:[#allocation2 + $0xe4] sm:$0xf0] }
 0x290   : > { %v827_v6 = vpack.c.bf16 %v816_v50, %v818_v44  ;;  %v831_v53 = vpack.c.bf16 %v817_v51, %v819_v48  ;;  %v1137_v8 = vsel %vm1133_vm6, %v7899_v56, %v7904_v2  ;;  %v1136_v21 = vsel %vm1133_vm6, %v7898_v41, %v7903_v61 }
 0x291   : > { %v1138_v58 = vsel %vm1133_vm6, %v7868_v54, %v7898_v41  ;;  %v1139_v20 = vsel %vm1133_vm6, %v7869_v14, %v7899_v56  ;;  %v7373_v41 = vld [vmem:[#allocation2 + $0xcc] sm:$0xf]  ;;  %v1371_v14 = vld [vmem:[%s13799_s4 + $0x8] sm:$0xff]  ;;  %v6527_v44 = vor.u32 %v7385_v0, %v6526_v49  ;;  %v6531_v50 = vor.u32 %v7381_v25, %v6528_v42 }
 0x292   : > { %835 = vst [vmem:[#allocation2 + $0x48] sm:$0xff] %v827_v6  ;;  %v1152_v57 = vpack.c.bf16 %v1136_v21, %v1138_v58  ;;  %v1156_v23 = vpack.c.bf16 %v1137_v8, %v1139_v20  ;;  %1813 = vmatpush.bf16.msrb.mxu1 %v6559_v31  ;;  %1841 = vmatpush.bf16.msrb.mxu0 %v6563_v16  ;;  %v7848_v16 = vunpack.i.l.bf16 %v9818_v29 }
 0x293   : > { %839 = vst [vmem:[#allocation2 + $0x68] sm:$0xff] %v831_v53  ;;  %v6654_v24 = vld [vmem:[#allocation2 + $0x208] sm:$0xf]  ;;  %v7413_v54 = vld [vmem:[#allocation2 + $0x20c] sm:$0xf]  ;;  %1379 = vperm.xlu2 %8021, %v1371_v14   ;;  %v884_v49 = vsel %vm874_vm9, %v7814_v12, %v7849_v62  ;;  %v6499_v14 = vor.u32 %v7373_v41, %v6496_v33 }
 0x294   : > { %1160 = vst [vmem:[#allocation2 + $0x190] sm:$0xff] %v1152_v57  ;;  %v10119_v56 = vpop.permute.xlu1 %7946  ;;  %v7417_v48 = vld [vmem:[#allocation2 + $0x224] sm:$0xf0]  ;;  %v6656_v51 = vld [vmem:[#allocation2 + $0x228] sm:$0xf0] }
 0x295   : > { %1164 = vst [vmem:[#allocation2 + $0x1b0] sm:$0xff] %v1156_v23  ;;  %v10122_v31 = vpop.permute.xlu2 %7966  ;;  %v10124_v6 = vpop.permute.xlu0 %7906  ;;  %v6655_v53 = vor.u32 %v7417_v48, %v6654_v24  ;;  %v6659_v8 = vor.u32 %v7413_v54, %v6656_v51  ;;  %v7410_v21 = vld [vmem:[#allocation2 + $0x1ec] sm:$0xf0]  ;;  %v6632_v58 = vld [vmem:[#allocation2 + $0x1f0] sm:$0xf0]  ;;  %v6495_v23 = vor.u32 %v7377_v4, %v6494_v59  ;;  %v7929_v24 = vunpack.i.h.bf16 %v9987_v10 }
 0x296   : > { %v7909_v20 = vunpack.i.h.bf16 %v10124_v6  ;;  %v7908_v0 = vunpack.i.l.bf16 %v10124_v6  ;;  %1814 = vmatpush.bf16.msrb.mxu1 %v6527_v44  ;;  %1842 = vmatpush.bf16.msrb.mxu0 %v6531_v50  ;;  %v6630_v29 = vld [vmem:[#allocation2 + $0x1d0] sm:$0xf]  ;;  %v7406_v25 = vld [vmem:[#allocation2 + $0x1d4] sm:$0xf]  ;;  %v7928_v54 = vunpack.i.l.bf16 %v9987_v10  ;;  %v883_v44 = vsel %vm874_vm9, %v7813_v63, %v7848_v16 }
 0x297   : > { %1832 = vmatpush.bf16.msrb.mxu3 %v6655_v53  ;;  %1860 = vmatpush.bf16.msrb.mxu2 %v6659_v8  ;;  %v6631_v42 = vor.u32 %v7410_v21, %v6630_v29  ;;  %v6635_v57 = vor.u32 %v7406_v25, %v6632_v58  ;;  %v6566_v10 = vld [vmem:[#allocation2 + $0x150] sm:$0xf]  ;;  %v1009_v45 = vsel %vm1003_vm8, %v7879_v11, %v7929_v24 }
 0x298   : > { %v882_v12 = vsel %vm874_vm9, %v7849_v62, %v7909_v20  ;;  %v881_v59 = vsel %vm874_vm9, %v7848_v16, %v7908_v0  ;;  %v7394_v4 = vld [vmem:[#allocation2 + $0x16c] sm:$0xf0]  ;;  %v10158_v63 = vsel %vm1003_vm8, %v7878_v22, %v7928_v54 }
 0x299   : > { %v896_v48 = vpack.c.bf16 %v882_v12, %v884_v49  ;;  %v892_v50 = vpack.c.bf16 %v881_v59, %v883_v44  ;;  %v6567_v53 = vor.u32 %v7394_v4, %v6566_v10  ;;  %v7390_v44 = vld [vmem:[#allocation2 + $0x154] sm:$0xf] }
 0x29a   : > { %1815 = vmatpush.bf16.msrb.mxu1 %v6495_v23  ;;  %1843 = vmatpush.bf16.msrb.mxu0 %v6499_v14  ;;  %v7361_v4 = vld [vmem:[#allocation2 + $0x64] sm:$0xf0] }
 0x29b   : > { %1867 = vmatpush.bf16.msra.mxu3 %v6631_v42  ;;  %1895 = vmatpush.bf16.msra.mxu2 %v6635_v57  ;;  %904 = vst [vmem:[#allocation2 + $0xa8] sm:$0xff] %v896_v48  ;;  %v6598_v62 = vld [vmem:[#allocation2 + $0x190] sm:$0xf]  ;;  %v7398_v41 = vld [vmem:[#allocation2 + $0x194] sm:$0xf] }
 0x29c   : > { %6678 = vmatmul.msk.bf16.vlgmr.msrb.gmra.mxu3 %vm1751_vm11, %v9881_v13  ;;  %6679 = vmatmul.msk.bf16.vlgmr.msrb.gmra.mxu2 %vm1751_vm11, %v9881_v13  ;;  %900 = vst [vmem:[#allocation2 + $0x88] sm:$0xff] %v892_v50  ;;  %v7962_v33 = vpop.permute.xlu1 %7961  ;;  %v7402_v51 = vld [vmem:[#allocation2 + $0x1ac] sm:$0xf0]  ;;  %v6600_v16 = vld [vmem:[#allocation2 + $0x1b0] sm:$0xf0] }
 0x29d   : > { %v7964_v8 = vunpack.i.h.bf16 %v7962_v33  ;;  %v7963_v21 = vunpack.i.l.bf16 %v7962_v33  ;;  %v7982_v58 = vpop.permute.xlu2 %7981  ;;  %v10160_v49 = vpop.permute.xlu0 %7931  ;;  %v6599_v29 = vor.u32 %v7402_v51, %v6598_v62  ;;  %v6603_v25 = vor.u32 %v7398_v41, %v6600_v16  ;;  %v6568_v48 = vld [vmem:[#allocation2 + $0x170] sm:$0xf0]  ;;  %v7357_v50 = vld [vmem:[#allocation2 + $0x4c] sm:$0xf] }
 0x29e   : > { %v7984_v42 = vunpack.i.h.bf16 %v7982_v58  ;;  %v7983_v11 = vunpack.i.l.bf16 %v7982_v58  ;;  %v7934_v55 = vunpack.i.h.bf16 %v10160_v49  ;;  %v7933_v57 = vunpack.i.l.bf16 %v10160_v49  ;;  %v6432_v62 = vld [vmem:[#allocation2 + $0x68] sm:$0xf0] }
 0x29f   : > { %v1199_v22 = vsel %vm1198_vm5, %v7888_v27, %v7963_v21  ;;  %v1200_v23 = vsel %vm1198_vm5, %v7889_v34, %v7964_v8  ;;  %v1213_v12 = vsel %vm1198_vm5, %v7963_v21, %v7703_v47  ;;  %v1214_v14 = vsel %vm1198_vm5, %v7964_v8, %v7704_v18  ;;  %1868 = vmatpush.bf16.msra.mxu3 %v6599_v29 }
 0x2a0   : > { %v1218_v59 = vpack.c.bf16 %v1213_v12, %v1199_v22  ;;  %v1222_v27 = vpack.c.bf16 %v1214_v14, %v1200_v23  ;;  %v1069_v46 = vsel %vm1068_vm7, %v7918_v5, %v7983_v11  ;;  %v1070_v47 = vsel %vm1068_vm7, %v7919_v7, %v7984_v42  ;;  %1896 = vmatpush.bf16.msra.mxu2 %v6603_v25  ;;  %v6430_v7 = vld [vmem:[#allocation2 + $0x48] sm:$0xf] }
 0x2a1   : > { %v1083_v18 = vsel %vm1068_vm7, %v7983_v11, %v13889_v1  ;;  %v13890_v34 = vunpack.i.h.bf16 %v9691_v19  ;;  %v1007_v5 = vsel %vm1003_vm8, %v7929_v24, %v7934_v55  ;;  %v1006_v40 = vsel %vm1003_vm8, %v7928_v54, %v7933_v57 }
 0x2a2   : > { %1226 = vst [vmem:[#allocation2 + $0x1d8] sm:$0xff] %v1218_v59  ;;  %v1088_v41 = vpack.c.bf16 %v1083_v18, %v1069_v46  ;;  %v1026_v33 = vpack.c.bf16 %v1007_v5, %v1009_v45  ;;  %v6571_v51 = vor.u32 %v7390_v44, %v6568_v48  ;;  %v7369_v16 = vld [vmem:[#allocation2 + $0xa4] sm:$0xf0]  ;;  %v6464_v8 = vld [vmem:[#allocation2 + $0xa8] sm:$0xf0]  ;;  %v1022_v21 = vpack.c.bf16 %v1006_v40, %v10158_v63 }
 0x2a3   : > { %v1084_v10 = vsel %vm1068_vm7, %v7984_v42, %v13890_v34  ;;  %1230 = vst [vmem:[#allocation2 + $0x1f8] sm:$0xff] %v1222_v27  ;;  %1869 = vmatpush.bf16.msra.mxu3 %v6567_v53  ;;  %v6462_v24 = vld [vmem:[#allocation2 + $0x88] sm:$0xf]  ;;  %v7365_v58 = vld [vmem:[#allocation2 + $0x8c] sm:$0xf]  ;;  %v7949_v42 = vunpack.i.h.bf16 %v10119_v56  ;;  %v7948_v11 = vunpack.i.l.bf16 %v10119_v56  ;;  %v6431_v14 = vor.u32 %v7361_v4, %v6430_v7 }
 0x2a4   : > { %v1092_v19 = vpack.c.bf16 %v1084_v10, %v1070_v47  ;;  %1096 = vst [vmem:[#allocation2 + $0x158] sm:$0xff] %v1088_v41  ;;  %1897 = vmatpush.bf16.msra.mxu2 %v6571_v51  ;;  %v7977_v54 = vpop.permute.xlu1 %7976  ;;  %v6463_v29 = vor.u32 %v7369_v16, %v6462_v24  ;;  %v6467_v25 = vor.u32 %v7365_v58, %v6464_v8  ;;  %v13891_v27 = vunpack.i.l.bf16 %v9658_v28  ;;  %v6398_v10 = vld [vmem:[#allocation2 + $0x8] sm:$0xf] }
 0x2a5   : > { %v7979_v45 = vunpack.i.h.bf16 %v7977_v54  ;;  %v7978_v22 = vunpack.i.l.bf16 %v7977_v54  ;;  %v10207_v23 = vpop.permute.xlu2 %7996  ;;  %v7942_v12 = vpop.permute.xlu0 %7941  ;;  %1034 = vst [vmem:[#allocation2 + $0x130] sm:$0xff] %v1026_v33  ;;  %v6435_v44 = vor.u32 %v7357_v50, %v6432_v62  ;;  %v13892_v47 = vunpack.i.h.bf16 %v9658_v28  ;;  %v7353_v4 = vld [vmem:[#allocation2 + $0x24] sm:$0xf0]  ;;  %v7349_v50 = vld [vmem:[#allocation2 + $0xc] sm:$0xf] }
 0x2a6   : > { %1100 = vst [vmem:[#allocation2 + $0x178] sm:$0xff] %v1092_v19  ;;  %v7944_v63 = vunpack.i.h.bf16 %v7942_v12  ;;  %v7943_v53 = vunpack.i.l.bf16 %v7942_v12  ;;  %1816 = vmatpush.bf16.msrb.mxu1 %v6463_v29  ;;  %1844 = vmatpush.bf16.msrb.mxu0 %v6467_v25  ;;  %v13894_v40 = vunpack.i.l.bf16 %v9912_v37  ;;  %v6400_v62 = vld [vmem:[#allocation2 + $0x28] sm:$0xf0]  ;;  %v7954_v19 = vunpack.i.h.bf16 %v10079_v17 }
 0x2a7   : > { %1030 = vst [vmem:[#allocation2 + $0x110] sm:$0xff] %v1022_v21  ;;  %v1134_v48 = vsel %vm1133_vm6, %v7903_v61, %v7978_v22  ;;  %v1135_v59 = vsel %vm1133_vm6, %v7904_v2, %v7979_v45  ;;  %v1148_v46 = vsel %vm1133_vm6, %v7978_v22, %v13891_v27  ;;  %v1149_v1 = vsel %vm1133_vm6, %v7979_v45, %v13892_v47 }
 0x2a8   : > { %v1153_v18 = vpack.c.bf16 %v1148_v46, %v1134_v48  ;;  %v1157_v34 = vpack.c.bf16 %v1149_v1, %v1135_v59  ;;  %v942_v60 = vsel %vm729_vm4, %v7944_v63, %v7949_v42  ;;  %v13893_v61 = vunpack.i.h.bf16 %v9912_v37 }
 0x2a9   : > { %v941_v28 = vsel %vm729_vm4, %v7943_v53, %v7948_v11  ;;  %v943_v7 = vsel %vm729_vm4, %v13894_v40, %v7943_v53  ;;  %v7953_v33 = vunpack.i.l.bf16 %v10079_v17  ;;  %v6399_v16 = vor.u32 %v7353_v4, %v6398_v10 }
 0x2aa   : > { %v944_v2 = vsel %vm729_vm4, %v13893_v61, %v7944_v63  ;;  %1161 = vst [vmem:[#allocation2 + $0x198] sm:$0xff] %v1153_v18  ;;  %v957_v41 = vpack.c.bf16 %v941_v28, %v943_v7  ;;  %1817 = vmatpush.bf16.msrb.mxu1 %v6431_v14  ;;  %1845 = vmatpush.bf16.msrb.mxu0 %v6435_v44  ;;  %v7999_v37 = vunpack.i.h.bf16 %v10207_v23  ;;  %v7998_v21 = vunpack.i.l.bf16 %v10207_v23 }
 0x2ab   : > { %v961_v5 = vpack.c.bf16 %v942_v60, %v944_v2  ;;  %1165 = vst [vmem:[#allocation2 + $0x1b8] sm:$0xff] %v1157_v34  ;;  %v6403_v8 = vor.u32 %v7349_v50, %v6400_v62  ;;  %v7969_v25 = vunpack.i.h.bf16 %v10122_v31  ;;  %v7968_v45 = vunpack.i.l.bf16 %v10122_v31 }
 0x2ac   : > { %v7992_v51 = vpop.permute.xlu1 %7991  ;;  %965 = vst [vmem:[#allocation2 + $0xd0] sm:$0xff] %v957_v41  ;;  %v7386_v29 = vld [vmem:[#allocation2 + $0x12c] sm:$0xf0]  ;;  %v6536_v53 = vld [vmem:[#allocation2 + $0x130] sm:$0xf0]  ;;  %v13895_v48 = vunpack.i.l.bf16 %v10029_v35  ;;  %v13896_v27 = vunpack.i.h.bf16 %v10029_v35  ;;  %v880_v1 = vsel %vm874_vm9, %v7909_v20, %v7954_v19  ;;  %v879_v18 = vsel %vm874_vm9, %v7908_v0, %v7953_v33 }
 0x2ad   : > { %969 = vst [vmem:[#allocation2 + $0xf0] sm:$0xff] %v961_v5  ;;  %v7994_v24 = vunpack.i.h.bf16 %v7992_v51  ;;  %v7993_v58 = vunpack.i.l.bf16 %v7992_v51  ;;  %v7957_v54 = vpop.permute.xlu0 %7956  ;;  %v8012_v47 = vpop.permute.xlu2 %8011  ;;  %v815_v40 = vsel %vm664_vm3, %v7924_v38, %v7969_v25  ;;  %v814_v7 = vsel %vm664_vm3, %v7923_v3, %v7968_v45 }
 0x2ae   : > { %v7959_v22 = vunpack.i.h.bf16 %v7957_v54  ;;  %v7958_v12 = vunpack.i.l.bf16 %v7957_v54  ;;  %1818 = vmatpush.bf16.msrb.mxu1 %v6399_v16  ;;  %1846 = vmatpush.bf16.msrb.mxu0 %v6403_v8  ;;  %v6534_v17 = vld [vmem:[#allocation2 + $0x110] sm:$0xf]  ;;  %v7382_v63 = vld [vmem:[#allocation2 + $0x114] sm:$0xf]  ;;  %v8014_v5 = vunpack.i.h.bf16 %v8012_v47  ;;  %v13897_v8 = vunpack.i.h.bf16 %v9721_v15 }
 0x2af   : > { %v1266_v14 = vsel %vm1263_vm10, %v7993_v58, %v7998_v21  ;;  %v1267_v44 = vsel %vm1263_vm10, %v7994_v24, %v7999_v37  ;;  %v1268_v59 = vsel %vm1263_vm10, %v13895_v48, %v7993_v58  ;;  %v1269_v46 = vsel %vm1263_vm10, %v13896_v27, %v7994_v24  ;;  %v7407_v27 = vld [vmem:[#allocation2 + $0x1dc] sm:$0xf] }
 0x2b0   : > { %v1282_v34 = vpack.c.bf16 %v1266_v14, %v1268_v59  ;;  %v1286_v60 = vpack.c.bf16 %v1267_v44, %v1269_v46  ;;  %v878_v61 = vsel %vm874_vm9, %v7954_v19, %v7959_v22  ;;  %v877_v35 = vsel %vm874_vm9, %v7953_v33, %v7958_v12  ;;  %v7411_v59 = vld [vmem:[#allocation2 + $0x1f4] sm:$0xf0] }
 0x2b1   : > { %v6535_v2 = vor.u32 %v7386_v29, %v6534_v17  ;;  %v6539_v10 = vor.u32 %v7382_v63, %v6536_v53  ;;  %1819 = vmatmul.bf16.vlgmr.msrb.gmra.mxu1 %v9981_v36  ;;  %v893_v20 = vpack.c.bf16 %v877_v35, %v879_v18  ;;  %v897_v28 = vpack.c.bf16 %v878_v61, %v880_v1 }
 0x2b2   : > { %1290 = vst [vmem:[#allocation2 + $0x210] sm:$0xff] %v1282_v34  ;;  %1847 = vmatmul.bf16.vlgmr.msrb.gmra.mxu0 %v9981_v36  ;;  %v825_v38 = vsel %vm664_vm3, %v8014_v5, %v13897_v8  ;;  %v8013_v24 = vunpack.i.l.bf16 %v8012_v47  ;;  %v13898_v29 = vunpack.i.l.bf16 %v9594_v52  ;;  %v13899_v63 = vunpack.i.h.bf16 %v9594_v52 }
 0x2b3   : > { %1294 = vst [vmem:[#allocation2 + $0x230] sm:$0xff] %v1286_v60  ;;  %1870 = vmatpush.bf16.msra.mxu3 %v6535_v2  ;;  %1898 = vmatpush.bf16.msra.mxu2 %v6539_v10  ;;  %v6502_v50 = vld [vmem:[#allocation2 + $0xd0] sm:$0xf]  ;;  %v7374_v62 = vld [vmem:[#allocation2 + $0xd4] sm:$0xf]  ;;  %v13900_v61 = vunpack.i.l.bf16 %v9721_v15 }
 0x2b4   : > { %v7378_v6 = vld [vmem:[#allocation2 + $0xec] sm:$0xf0]  ;;  %v6504_v0 = vld [vmem:[#allocation2 + $0xf0] sm:$0xf0]  ;;  %901 = vst [vmem:[#allocation2 + $0x90] sm:$0xff] %v893_v20  ;;  %v8007_v4 = vpop.permute.xlu1 %8006 }
 0x2b5   : > { %905 = vst [vmem:[#allocation2 + $0xb0] sm:$0xff] %v897_v28  ;;  %v8009_v41 = vunpack.i.h.bf16 %v8007_v4  ;;  %v8008_v19 = vunpack.i.l.bf16 %v8007_v4  ;;  %v7972_v33 = vpop.permute.xlu0 %7971  ;;  %v6503_v51 = vor.u32 %v7378_v6, %v6502_v50  ;;  %v6507_v16 = vor.u32 %v7374_v62, %v6504_v0  ;;  %v6640_v60 = vld [vmem:[#allocation2 + $0x1f8] sm:$0xf0]  ;;  %v7403_v20 = vld [vmem:[#allocation2 + $0x1b4] sm:$0xf0] }
 0x2b6   : > { %v7974_v43 = vunpack.i.h.bf16 %v7972_v33  ;;  %v7973_v58 = vunpack.i.l.bf16 %v7972_v33  ;;  %v7399_v28 = vld [vmem:[#allocation2 + $0x19c] sm:$0xf]  ;;  %v6643_v15 = vor.u32 %v7407_v27, %v6640_v60 }
 0x2b7   : > { %v875_v3 = vsel %vm874_vm9, %v7958_v12, %v8008_v19  ;;  %v876_v54 = vsel %vm874_vm9, %v7959_v22, %v8009_v41  ;;  %v889_v17 = vsel %vm874_vm9, %v8008_v19, %v13898_v29  ;;  %v890_v53 = vsel %vm874_vm9, %v8009_v41, %v13899_v63  ;;  %1871 = vmatpush.bf16.msra.mxu3 %v6503_v51  ;;  %v6638_v22 = vld [vmem:[#allocation2 + $0x1d8] sm:$0xf]  ;;  %v6608_v6 = vld [vmem:[#allocation2 + $0x1b8] sm:$0xf0] }
 0x2b8   : > { %v894_v14 = vpack.c.bf16 %v889_v17, %v875_v3  ;;  %v898_v44 = vpack.c.bf16 %v890_v53, %v876_v54  ;;  %v811_v48 = vsel %vm664_vm3, %v7974_v43, %v8014_v5  ;;  %v813_v12 = vsel %vm664_vm3, %v7969_v25, %v7974_v43  ;;  %1899 = vmatpush.bf16.msra.mxu2 %v6507_v16  ;;  %v6606_v5 = vld [vmem:[#allocation2 + $0x198] sm:$0xf] }
 0x2b9   : > { %v832_v46 = vpack.c.bf16 %v813_v12, %v815_v40  ;;  %v833_v47 = vpack.c.bf16 %v825_v38, %v811_v48  ;;  %v810_v52 = vsel %vm664_vm3, %v7973_v58, %v8013_v24  ;;  %v812_v1 = vsel %vm664_vm3, %v7968_v45, %v7973_v58  ;;  %v6662_v18 = vld [vmem:[#allocation2 + $0x210] sm:$0xf]  ;;  %v7414_v34 = vld [vmem:[#allocation2 + $0x214] sm:$0xf]  ;;  %v6574_v17 = vld [vmem:[#allocation2 + $0x158] sm:$0xf] }
 0x2ba   : > { %v824_v25 = vsel %vm664_vm3, %v8013_v24, %v13900_v61  ;;  %902 = vst [vmem:[#allocation2 + $0x98] sm:$0xff] %v894_v14  ;;  %v828_v35 = vpack.c.bf16 %v812_v1, %v814_v7  ;;  %v7418_v2 = vld [vmem:[#allocation2 + $0x22c] sm:$0xf0]  ;;  %v6664_v10 = vld [vmem:[#allocation2 + $0x230] sm:$0xf0]  ;;  %v6639_v50 = vor.u32 %v7411_v59, %v6638_v22  ;;  %v6607_v8 = vor.u32 %v7403_v20, %v6606_v5 }
 0x2bb   : > { %906 = vst [vmem:[#allocation2 + $0xb8] sm:$0xff] %v898_v44  ;;  %v829_v31 = vpack.c.bf16 %v824_v25, %v810_v52  ;;  %v6663_v0 = vor.u32 %v7418_v2, %v6662_v18  ;;  %v6667_v45 = vor.u32 %v7414_v34, %v6664_v10  ;;  %v6470_v40 = vld [vmem:[#allocation2 + $0x90] sm:$0xf]  ;;  %v7366_v4 = vld [vmem:[#allocation2 + $0x94] sm:$0xf]  ;;  %v6611_v38 = vor.u32 %v7399_v28, %v6608_v6 }
 0x2bc   : > { %840 = vst [vmem:[#allocation2 + $0x70] sm:$0xff] %v832_v46  ;;  %v7370_v62 = vld [vmem:[#allocation2 + $0xac] sm:$0xf0]  ;;  %v6472_v41 = vld [vmem:[#allocation2 + $0xb0] sm:$0xf0]  ;;  %v13901_v58 = vunpack.i.l.bf16 %v9726_v39  ;;  %v13902_v54 = vunpack.i.h.bf16 %v9726_v39  ;;  %v13903_v61 = vunpack.i.l.bf16 %v9760_v26 }
 0x2bd   : > { %841 = vst [vmem:[#allocation2 + $0x78] sm:$0xff] %v833_v47  ;;  %1888 = vmatpush.bf16.msra.mxu1 %v6663_v0  ;;  %1916 = vmatpush.bf16.msra.mxu0 %v6667_v45  ;;  %v7987_v7 = vpop.permute.xlu0 %7986  ;;  %v6471_v19 = vor.u32 %v7370_v62, %v6470_v40  ;;  %v6475_v33 = vor.u32 %v7366_v4, %v6472_v41  ;;  %v7395_v14 = vld [vmem:[#allocation2 + $0x174] sm:$0xf0]  ;;  %v6576_v44 = vld [vmem:[#allocation2 + $0x178] sm:$0xf0]  ;;  %v13905_v41 = vunpack.i.l.bf16 %v9820_v30 }
 0x2be   : > { %836 = vst [vmem:[#allocation2 + $0x50] sm:$0xff] %v828_v35  ;;  %v7989_v51 = vunpack.i.h.bf16 %v7987_v7  ;;  %v7988_v16 = vunpack.i.l.bf16 %v7987_v7  ;;  %v6575_v39 = vor.u32 %v7395_v14, %v6574_v17  ;;  %v6406_v1 = vld [vmem:[#allocation2 + $0x10] sm:$0xf]  ;;  %v13904_v35 = vunpack.i.h.bf16 %v9760_v26  ;;  %v7350_v10 = vld [vmem:[#allocation2 + $0x14] sm:$0xf] }
 0x2bf   : > { %837 = vst [vmem:[#allocation2 + $0x58] sm:$0xff] %v829_v31  ;;  %1872 = vmatpush.bf16.msra.mxu3 %v6471_v19  ;;  %1900 = vmatpush.bf16.msra.mxu2 %v6475_v33  ;;  %v7354_v18 = vld [vmem:[#allocation2 + $0x2c] sm:$0xf0]  ;;  %v6408_v5 = vld [vmem:[#allocation2 + $0x30] sm:$0xf0]  ;;  %v13906_v19 = vunpack.i.h.bf16 %v9820_v30 }
 0x2c0   : > { %v1004_v24 = vsel %vm1003_vm8, %v7933_v57, %v7988_v16  ;;  %v1005_v43 = vsel %vm1003_vm8, %v7934_v55, %v7989_v51  ;;  %v1018_v3 = vsel %vm1003_vm8, %v7988_v16, %v13901_v58  ;;  %v1019_v29 = vsel %vm1003_vm8, %v7989_v51, %v13902_v54  ;;  %v7391_v57 = vld [vmem:[#allocation2 + $0x15c] sm:$0xf] }
 0x2c1   : > { %1923 = vmatpush.bf16.msrb.mxu1 %v6639_v50  ;;  %1951 = vmatpush.bf16.msrb.mxu0 %v6643_v15  ;;  %v1023_v63 = vpack.c.bf16 %v1018_v3, %v1004_v24  ;;  %v1027_v53 = vpack.c.bf16 %v1019_v29, %v1005_v43  ;;  %v6579_v48 = vor.u32 %v7391_v57, %v6576_v44  ;;  %v6478_v43 = vld [vmem:[#allocation2 + $0x98] sm:$0xf]  ;;  %v7367_v3 = vld [vmem:[#allocation2 + $0x9c] sm:$0xf] }
 0x2c2   : > { %6680 = vmatmul.msk.bf16.vlgmr.msra.gmra.mxu1 %vm1751_vm11, %v9881_v13  ;;  %6681 = vmatmul.msk.bf16.vlgmr.msra.gmra.mxu0 %vm1751_vm11, %v9881_v13  ;;  %v6407_v56 = vor.u32 %v7354_v18, %v6406_v1  ;;  %v7371_v58 = vld [vmem:[#allocation2 + $0xb4] sm:$0xf0]  ;;  %v6480_v54 = vld [vmem:[#allocation2 + $0xb8] sm:$0xf0] }
 0x2c3   : > { %1031 = vst [vmem:[#allocation2 + $0x118] sm:$0xff] %v1023_v63  ;;  %v7362_v49 = vld [vmem:[#allocation2 + $0x6c] sm:$0xf0]  ;;  %v6440_v55 = vld [vmem:[#allocation2 + $0x70] sm:$0xf0]  ;;  %v6479_v30 = vor.u32 %v7371_v58, %v6478_v43  ;;  %v6483_v29 = vor.u32 %v7367_v3, %v6480_v54 }
 0x2c4   : > { %1035 = vst [vmem:[#allocation2 + $0x138] sm:$0xff] %v1027_v53  ;;  %v7363_v63 = vld [vmem:[#allocation2 + $0x74] sm:$0xf0]  ;;  %v6448_v53 = vld [vmem:[#allocation2 + $0x78] sm:$0xf0] }
 0x2c5   : > { %1924 = vmatpush.bf16.msrb.mxu1 %v6607_v8  ;;  %1952 = vmatpush.bf16.msrb.mxu0 %v6611_v38  ;;  %v8002_v12 = vpop.permute.xlu0 %8001  ;;  %v6438_v22 = vld [vmem:[#allocation2 + $0x50] sm:$0xf]  ;;  %v7358_v59 = vld [vmem:[#allocation2 + $0x54] sm:$0xf] }
 0x2c6   : > { %v8004_v27 = vunpack.i.h.bf16 %v8002_v12  ;;  %v8003_v46 = vunpack.i.l.bf16 %v8002_v12  ;;  %v6439_v47 = vor.u32 %v7362_v49, %v6438_v22  ;;  %v6443_v52 = vor.u32 %v7358_v59, %v6440_v55  ;;  %v6446_v17 = vld [vmem:[#allocation2 + $0x58] sm:$0xf]  ;;  %v7359_v57 = vld [vmem:[#allocation2 + $0x5c] sm:$0xf] }
 0x2c7   : > { %v6451_v22 = vor.u32 %v7359_v57, %v6448_v53  ;;  %v6414_v59 = vld [vmem:[#allocation2 + $0x18] sm:$0xf] }
 0x2c8   : > { %v940_v34 = vsel %vm729_vm4, %v7949_v42, %v8004_v27  ;;  %v939_v60 = vsel %vm729_vm4, %v7948_v11, %v8003_v46  ;;  %v953_v25 = vsel %vm729_vm4, %v8003_v46, %v13903_v61  ;;  %v954_v2 = vsel %vm729_vm4, %v8004_v27, %v13904_v35  ;;  %1873 = vmatpush.bf16.msra.mxu3 %v6439_v47  ;;  %v7355_v27 = vld [vmem:[#allocation2 + $0x34] sm:$0xf0]  ;;  %v7351_v46 = vld [vmem:[#allocation2 + $0x1c] sm:$0xf] }
 0x2c9   : > { %1925 = vmatpush.bf16.msrb.mxu1 %v6575_v39  ;;  %1953 = vmatpush.bf16.msrb.mxu0 %v6579_v48  ;;  %v958_v20 = vpack.c.bf16 %v953_v25, %v939_v60  ;;  %v962_v42 = vpack.c.bf16 %v954_v2, %v940_v34  ;;  %v6411_v11 = vor.u32 %v7350_v10, %v6408_v5  ;;  %v6416_v47 = vld [vmem:[#allocation2 + $0x38] sm:$0xf0] }
 0x2ca   : > { %1901 = vmatpush.bf16.msra.mxu2 %v6443_v52  ;;  %v6542_v28 = vld [vmem:[#allocation2 + $0x118] sm:$0xf]  ;;  %v7383_v6 = vld [vmem:[#allocation2 + $0x11c] sm:$0xf]  ;;  %v6447_v39 = vor.u32 %v7363_v63, %v6446_v17  ;;  %v6415_v52 = vor.u32 %v7355_v27, %v6414_v59  ;;  %v6419_v1 = vor.u32 %v7351_v46, %v6416_v47 }
 0x2cb   : > { %966 = vst [vmem:[#allocation2 + $0xd8] sm:$0xff] %v958_v20  ;;  %v7387_v31 = vld [vmem:[#allocation2 + $0x134] sm:$0xf0]  ;;  %v6544_v0 = vld [vmem:[#allocation2 + $0x138] sm:$0xf0] }
 0x2cc   : > { %970 = vst [vmem:[#allocation2 + $0xf8] sm:$0xff] %v962_v42  ;;  %1874 = vmatpush.bf16.msra.mxu3 %v6407_v56  ;;  %v6543_v45 = vor.u32 %v7387_v31, %v6542_v28  ;;  %v6547_v26 = vor.u32 %v7383_v6, %v6544_v0 }
 0x2cd   : > { %v8017_v40 = vpop.permute.xlu0 %8016 }
 0x2ce   : > { %1902 = vmatpush.bf16.msra.mxu2 %v6411_v11  ;;  %v8019_v4 = vunpack.i.h.bf16 %v8017_v40  ;;  %v8018_v50 = vunpack.i.l.bf16 %v8017_v40  ;;  %1926 = vmatpush.bf16.msrb.mxu1 %v6543_v45 }
 0x2cf   : > { %1954 = vmatpush.bf16.msrb.mxu0 %v6547_v26  ;;  %1875 = vmatmul.bf16.vlgmr.msra.gmra.mxu3 %v9981_v36 }
 0x2d0   : > { %v1265_v15 = vsel %vm1263_vm10, %v7999_v37, %v8019_v4  ;;  %v1264_v62 = vsel %vm1263_vm10, %v7998_v21, %v8018_v50  ;;  %v1278_v7 = vsel %vm1263_vm10, %v8018_v50, %v13905_v41  ;;  %v1279_v33 = vsel %vm1263_vm10, %v8019_v4, %v13906_v19 }
 0x2d1   : > { %1903 = vmatmul.bf16.vlgmr.msra.gmra.mxu2 %v9981_v36  ;;  %v1283_v51 = vpack.c.bf16 %v1278_v7, %v1264_v62  ;;  %v1287_v16 = vpack.c.bf16 %v1279_v33, %v1265_v15 }
 0x2d2   : > { %v6510_v8 = vld [vmem:[#allocation2 + $0xd8] sm:$0xf]  ;;  %v7375_v38 = vld [vmem:[#allocation2 + $0xdc] sm:$0xf] }
 0x2d3   : > { %1291 = vst [vmem:[#allocation2 + $0x218] sm:$0xff] %v1283_v51  ;;  %v7379_v37 = vld [vmem:[#allocation2 + $0xf4] sm:$0xf0]  ;;  %v6512_v23 = vld [vmem:[#allocation2 + $0xf8] sm:$0xf0] }
 0x2d4   : > { %1295 = vst [vmem:[#allocation2 + $0x238] sm:$0xff] %v1287_v16  ;;  %v6511_v24 = vor.u32 %v7379_v37, %v6510_v8  ;;  %v6515_v21 = vor.u32 %v7375_v38, %v6512_v23 }
 0x2d6   : > { %1927 = vmatpush.bf16.msrb.mxu1 %v6511_v24  ;;  %1955 = vmatpush.bf16.msrb.mxu0 %v6515_v21 }
 0x2da   : > { %1928 = vmatpush.bf16.msrb.mxu1 %v6479_v30  ;;  %1956 = vmatpush.bf16.msrb.mxu0 %v6483_v29  ;;  %v6670_v14 = vld [vmem:[#allocation2 + $0x218] sm:$0xf]  ;;  %v7415_v44 = vld [vmem:[#allocation2 + $0x21c] sm:$0xf] }
 0x2db   : > { %v7419_v49 = vld [vmem:[#allocation2 + $0x234] sm:$0xf0]  ;;  %v6672_v55 = vld [vmem:[#allocation2 + $0x238] sm:$0xf0] }
 0x2dc   : > { %v6671_v48 = vor.u32 %v7419_v49, %v6670_v14  ;;  %v6675_v12 = vor.u32 %v7415_v44, %v6672_v55 }
 0x2de   : > { %1929 = vmatpush.bf16.msrb.mxu1 %v6447_v39  ;;  %1944 = vmatpush.bf16.msrb.mxu3 %v6671_v48 }
 0x2df   : > { %1957 = vmatpush.bf16.msrb.mxu0 %v6451_v22  ;;  %1972 = vmatpush.bf16.msrb.mxu2 %v6675_v12 }
 0x2e1   : > { %6682 = vmatmul.msk.bf16.vlgmr.msrb.gmra.mxu3 %vm1751_vm11, %v9881_v13 }
 0x2e2   : > { %6683 = vmatmul.msk.bf16.vlgmr.msrb.gmra.mxu2 %vm1751_vm11, %v9881_v13  ;;  %1930 = vmatpush.bf16.msrb.mxu1 %v6415_v52 }
 0x2e3   : > { %1958 = vmatpush.bf16.msrb.mxu0 %v6419_v1 }
 0x2e4   : > { %v10377_v60 = vpop.permute.xlu1 %1374 }
 0x2e5   : > { %1931 = vmatmul.bf16.vlgmr.msrb.gmra.mxu1 %v9981_v36 }
 0x2e6   : > { %1959 = vmatmul.bf16.vlgmr.msrb.gmra.mxu0 %v9981_v36  ;;  %v1778_v18 = vpop.f32.mrf.mxu1 }
 0x2ec   : > { %v1806_v25 = vpop.f32.mrf.mxu3 }
 0x2ed   : > { %v10380_v2 = vpop.permute.xlu2 %1379 }
 0x2ee   : > { %v1780_v13 = vpop.f32.mrf.mxu1 }
 0x2f4   : > { %v1808_v31 = vpop.f32.mrf.mxu3 }
 0x2fc   : > { %v1764_v34 = vpop.f32.mrf.mxu0 }
 0x2fd   : > { %v1765_v61 = vadd.f32 %v1764_v34, %v10377_v60 }
 0x2ff   : > { %v10382_v10 = vadd.f32 %v1778_v18, %v1765_v61 }
 0x300   : > { %v1792_v35 = vpop.f32.mrf.mxu2 }
 0x301   : > { %v1793_v42 = vadd.f32 %v1792_v35, %v10377_v60  ;;  %v1979_v36 = vmax.f32 %v10382_v10, 0.0 }
 0x303   : > { %v10390_v6 = vadd.f32 %v1806_v25, %v1793_v42 }
 0x304   : > { %v1766_v5 = vpop.f32.mrf.mxu0 }
 0x305   : > { %v1767_v20 = vadd.f32 %v1766_v5, %v10380_v2  ;;  %v1980_v40 = vmax.f32 %v10390_v6, 0.0 }
 0x307   : > { %v10386_v56 = vadd.f32 %v1780_v13, %v1767_v20 }
 0x308   : > { %v1794_v11 = vpop.f32.mrf.mxu2 }
 0x309   : > { %v1987_v28 = vmax.f32 %v10386_v56, 0.0  ;;  %v1795_v0 = vadd.f32 %v1794_v11, %v10380_v2 }
 0x30b   : > { %v8022_v45 = vpack.i.bf16 %v1987_v28, %v1979_v36  ;;  %v10397_v26 = vadd.f32 %v1808_v31, %v1795_v0 }
 0x30d   : > { %8023 = vrot.lane.b32.xlu0 %v8022_v45, %s13857_s17  ;;  %v1988_v4 = vmax.f32 %v10397_v26, 0.0 }
 0x30f   : > { %v8027_v50 = vpack.i.bf16 %v1988_v4, %v1980_v40 }
 0x311   : > { %8028 = vrot.lane.b32.xlu1 %v8027_v50, %s13857_s17 }
 0x31f   : > { %v1834_v15 = vpop.f32.mrf.mxu3  ;;  %v1862_v62 = vpop.f32.mrf.mxu2 }
 0x327   : > { %v1836_v38 = vpop.f32.mrf.mxu3  ;;  %v1864_v24 = vpop.f32.mrf.mxu2 }
 0x32e   : > { %v1820_v41 = vpop.f32.mrf.mxu1 }
 0x32f   : > { %v1848_v7 = vpop.f32.mrf.mxu0  ;;  %v1821_v19 = vadd.f32 %v1820_v41, %v10377_v60 }
 0x330   : > { %v1849_v33 = vadd.f32 %v1848_v7, %v10377_v60 }
 0x331   : > { %v10409_v51 = vadd.f32 %v1834_v15, %v1821_v19 }
 0x332   : > { %v10411_v16 = vadd.f32 %v1862_v62, %v1849_v33 }
 0x333   : > { %v1981_v43 = vmax.f32 %v10409_v51, 0.0 }
 0x334   : > { %v1982_v3 = vmax.f32 %v10411_v16, 0.0 }
 0x336   : > { %v1822_v8 = vpop.f32.mrf.mxu1 }
 0x337   : > { %v1823_v37 = vadd.f32 %v1822_v8, %v10380_v2  ;;  %v1850_v23 = vpop.f32.mrf.mxu0 }
 0x338   : > { %v1851_v21 = vadd.f32 %v1850_v23, %v10380_v2 }
 0x339   : > { %v10416_v58 = vadd.f32 %v1836_v38, %v1823_v37 }
 0x33a   : > { %v10419_v54 = vadd.f32 %v1864_v24, %v1851_v21 }
 0x33b   : > { %v1989_v30 = vmax.f32 %v10416_v58, 0.0 }
 0x33c   : > { %v1990_v29 = vmax.f32 %v10419_v54, 0.0 }
 0x33d   : > { %v8032_v17 = vpack.i.bf16 %v1989_v30, %v1981_v43 }
 0x33e   : > { %v8037_v63 = vpack.i.bf16 %v1990_v29, %v1982_v3 }
 0x33f   : > { %8033 = vrot.lane.b32.xlu2 %v8032_v17, %s13857_s17  ;;  %v1918_v53 = vpop.f32.mrf.mxu0  ;;  %v1890_v14 = vpop.f32.mrf.mxu1 }
 0x340   : > { %8038 = vrot.lane.b32.xlu0 %v8037_v63, %s13857_s17 }
 0x347   : > { %v1920_v39 = vpop.f32.mrf.mxu0  ;;  %v1892_v48 = vpop.f32.mrf.mxu1 }
 0x352   : > { %v1876_v57 = vpop.f32.mrf.mxu3 }
 0x353   : > { %v1877_v49 = vadd.f32 %v1876_v57, %v10377_v60 }
 0x354   : > { %v1904_v44 = vpop.f32.mrf.mxu2 }
 0x355   : > { %v1905_v55 = vadd.f32 %v1904_v44, %v10377_v60  ;;  %v10435_v22 = vadd.f32 %v1890_v14, %v1877_v49 }
 0x357   : > { %v10438_v46 = vadd.f32 %v1918_v53, %v1905_v55  ;;  %v1983_v18 = vmax.f32 %v10435_v22, 0.0 }
 0x359   : > { %v1984_v61 = vmax.f32 %v10438_v46, 0.0 }
 0x35a   : > { %v1878_v12 = vpop.f32.mrf.mxu3 }
 0x35b   : > { %v1879_v59 = vadd.f32 %v1878_v12, %v10380_v2 }
 0x35c   : > { %v1906_v27 = vpop.f32.mrf.mxu2 }
 0x35d   : > { %v1907_v47 = vadd.f32 %v1906_v27, %v10380_v2  ;;  %v10441_v52 = vadd.f32 %v1892_v48, %v1879_v59 }
 0x35f   : > { %v10443_v1 = vadd.f32 %v1920_v39, %v1907_v47  ;;  %v1991_v34 = vmax.f32 %v10441_v52, 0.0 }
 0x361   : > { %v1992_v25 = vmax.f32 %v10443_v1, 0.0  ;;  %v8042_v35 = vpack.i.bf16 %v1991_v34, %v1983_v18 }
 0x362   : > { %v1932_v13 = vpop.f32.mrf.mxu1 }
 0x363   : > { %v8047_v5 = vpack.i.bf16 %v1992_v25, %v1984_v61  ;;  %8043 = vrot.lane.b32.xlu1 %v8042_v35, %s13857_s17  ;;  %v1960_v20 = vpop.f32.mrf.mxu0  ;;  %v1933_v31 = vadd.f32 %v1932_v13, %v10377_v60 }
 0x364   : > { %v1946_v42 = vpop.f32.mrf.mxu3  ;;  %v1961_v0 = vadd.f32 %v1960_v20, %v10377_v60 }
 0x365   : > { %8048 = vrot.lane.b32.xlu2 %v8047_v5, %s13857_s17  ;;  %v1974_v11 = vpop.f32.mrf.mxu2  ;;  %v10461_v50 = vadd.f32 %v1946_v42, %v1933_v31 }
 0x366   : > { %v10464_v41 = vadd.f32 %v1974_v11, %v1961_v0 }
 0x367   : > { %v1985_v37 = vmax.f32 %v10461_v50, 0.0 }
 0x368   : > { %v1986_v23 = vmax.f32 %v10464_v41, 0.0  ;;  %v2132_v41 = vld [vmem:[%s13801_s6] sm:$0x7] }
 0x36a   : > { %v1934_v45 = vpop.f32.mrf.mxu1 }
 0x36b   : > { %v1935_v15 = vadd.f32 %v1934_v45, %v10380_v2  ;;  %v1962_v62 = vpop.f32.mrf.mxu0 }
 0x36c   : > { %v1963_v7 = vadd.f32 %v1962_v62, %v10380_v2  ;;  %v1948_v19 = vpop.f32.mrf.mxu3 }
 0x36d   : > { %v10467_v33 = vadd.f32 %v1948_v19, %v1935_v15  ;;  %v1976_v8 = vpop.f32.mrf.mxu2 }
 0x36e   : > { %v10469_v38 = vadd.f32 %v1976_v8, %v1963_v7 }
 0x36f   : > { %v1993_v60 = vmax.f32 %v10467_v33, 0.0 }
 0x370   : > { %v1994_v24 = vmax.f32 %v10469_v38, 0.0  ;;  %v2263_v38 = vld [vmem:[%s13797_s2] sm:$0xff] }
 0x371   : > { %v8052_v21 = vpack.i.bf16 %v1993_v60, %v1985_v37 }
 0x372   : > { %v8057_v2 = vpack.i.bf16 %v1994_v24, %v1986_v23 }
 0x373   : > { %8053 = vrot.lane.b32.xlu0 %v8052_v21, %s13857_s17 }
 0x374   : > { %8058 = vrot.lane.b32.xlu1 %v8057_v2, %s13857_s17 }
 0x37f   : > { %v10485_v17 = vpop.permute.xlu0 %8023 }
 0x380   : > { %v8026_v63 = vunpack.i.h.bf16 %v10485_v17  ;;  %v8025_v53 = vunpack.i.l.bf16 %v10485_v17 }
 0x383   : > { %v8029_v14 = vpop.permute.xlu1 %8028 }
 0x384   : > { %v8031_v57 = vunpack.i.h.bf16 %v8029_v14  ;;  %v8030_v44 = vunpack.i.l.bf16 %v8029_v14 }
 0x386   : > { %v2039_v49 = vsel %vm664_vm3, %v8025_v53, %v8030_v44  ;;  %v2040_v55 = vsel %vm664_vm3, %v8026_v63, %v8031_v57 }
 0x387   : > { %v10497_v39 = vmax.f32 %v1979_v36, %v2039_v49  ;;  %v10501_v48 = vmax.f32 %v1987_v28, %v2040_v55 }
 0x389   : > { %v8062_v12 = vpack.i.bf16 %v10501_v48, %v10497_v39 }
 0x38b   : > { %8063 = vrot.lane.b32.xlu2 %v8062_v12, %s13855_s18 }
 0x399   : > { %v8034_v59 = vpop.permute.xlu2 %8033 }
 0x39a   : > { %v8036_v27 = vunpack.i.h.bf16 %v8034_v59  ;;  %v8035_v47 = vunpack.i.l.bf16 %v8034_v59 }
 0x39c   : > { %v2037_v35 = vsel %vm664_vm3, %v8030_v44, %v8035_v47  ;;  %v2038_v10 = vsel %vm664_vm3, %v8031_v57, %v8036_v27 }
 0x39d   : > { %v10512_v36 = vmax.f32 %v1980_v40, %v2037_v35  ;;  %v10516_v56 = vmax.f32 %v1988_v4, %v2038_v10 }
 0x39f   : > { %v8067_v28 = vpack.i.bf16 %v10516_v56, %v10512_v36 }
 0x3a1   : > { %8068 = vrot.lane.b32.xlu0 %v8067_v28, %s13855_s18 }
 0x3b2   : > { %v8039_v5 = vpop.permute.xlu0 %8038 }
 0x3b3   : > { %v8041_v13 = vunpack.i.h.bf16 %v8039_v5  ;;  %v8040_v20 = vunpack.i.l.bf16 %v8039_v5 }
 0x3b5   : > { %v2035_v42 = vsel %vm664_vm3, %v8035_v47, %v8040_v20  ;;  %v2036_v6 = vsel %vm664_vm3, %v8036_v27, %v8041_v13 }
 0x3b6   : > { %v10527_v40 = vmax.f32 %v1981_v43, %v2035_v42  ;;  %v10531_v26 = vmax.f32 %v1989_v30, %v2036_v6 }
 0x3b8   : > { %v8072_v4 = vpack.i.bf16 %v10531_v26, %v10527_v40 }
 0x3ba   : > { %8073 = vrot.lane.b32.xlu1 %v8072_v4, %s13855_s18 }
 0x3bf   : > { %v8049_v11 = vpop.permute.xlu2 %8048 }
 0x3c0   : > { %v8051_v0 = vunpack.i.h.bf16 %v8049_v11  ;;  %v8050_v45 = vunpack.i.l.bf16 %v8049_v11 }
 0x3d5   : > { %v8044_v31 = vpop.permute.xlu1 %8043 }
 0x3d6   : > { %v8046_v15 = vunpack.i.h.bf16 %v8044_v31  ;;  %v8045_v62 = vunpack.i.l.bf16 %v8044_v31 }
 0x3d8   : > { %v2033_v51 = vsel %vm664_vm3, %v8040_v20, %v8045_v62  ;;  %v2034_v43 = vsel %vm664_vm3, %v8041_v13, %v8046_v15  ;;  %v2031_v58 = vsel %vm664_vm3, %v8045_v62, %v8050_v45  ;;  %v2032_v30 = vsel %vm664_vm3, %v8046_v15, %v8051_v0  ;;  %v10639_v13 = vld [vmem:[%s13800_s5] sm:$0x3] }
 0x3d9   : > { %v10546_v7 = vmax.f32 %v1982_v3, %v2033_v51  ;;  %v10550_v19 = vmax.f32 %v1990_v29, %v2034_v43  ;;  %v10554_v8 = vmax.f32 %v1983_v18, %v2031_v58  ;;  %v10558_v21 = vmax.f32 %v1991_v34, %v2032_v30 }
 0x3db   : > { %v8077_v2 = vpack.i.bf16 %v10550_v19, %v10546_v7  ;;  %v8082_v16 = vpack.i.bf16 %v10558_v21, %v10554_v8 }
 0x3dd   : > { %8078 = vrot.lane.b32.xlu2 %v8077_v2, %s13855_s18  ;;  %8083 = vrot.lane.b32.xlu0 %v8082_v16, %s13855_s18 }
 0x3e5   : > { %v8054_v3 = vpop.permute.xlu0 %8053 }
 0x3e6   : > { %v8056_v54 = vunpack.i.h.bf16 %v8054_v3  ;;  %v8055_v29 = vunpack.i.l.bf16 %v8054_v3  ;;  %v8059_v22 = vpop.permute.xlu1 %8058 }
 0x3e7   : > { %v8061_v18 = vunpack.i.h.bf16 %v8059_v22  ;;  %v8060_v14 = vunpack.i.l.bf16 %v8059_v22 }
 0x3e8   : > { %v2029_v52 = vsel %vm664_vm3, %v8050_v45, %v8055_v29  ;;  %v2030_v34 = vsel %vm664_vm3, %v8051_v0, %v8056_v54 }
 0x3e9   : > { %v10572_v57 = vmax.f32 %v1984_v61, %v2029_v52  ;;  %v10576_v44 = vmax.f32 %v1992_v25, %v2030_v34  ;;  %v2027_v49 = vsel %vm664_vm3, %v8055_v29, %v8060_v14  ;;  %v2028_v55 = vsel %vm664_vm3, %v8056_v54, %v8061_v18 }
 0x3ea   : > { %v10584_v12 = vmax.f32 %v1985_v37, %v2027_v49  ;;  %v10588_v59 = vmax.f32 %v1993_v60, %v2028_v55  ;;  %v2041_v46 = vsel %vm664_vm3, %v8060_v14, %v8025_v53  ;;  %v2042_v1 = vsel %vm664_vm3, %v8061_v18, %v8026_v63  ;;  %v2264_v60 = vld [vmem:[%s13797_s2 + $0x8] sm:$0xff] }
 0x3eb   : > { %v8087_v61 = vpack.i.bf16 %v10576_v44, %v10572_v57  ;;  %v10600_v25 = vmax.f32 %v1986_v23, %v2041_v46  ;;  %v10604_v50 = vmax.f32 %v1994_v24, %v2042_v1  ;;  %v10622_v23 = vpop.permute.xlu2 %8063 }
 0x3ec   : > { %v8092_v33 = vpack.i.bf16 %v10588_v59, %v10584_v12  ;;  %v8066_v17 = vunpack.i.h.bf16 %v10622_v23  ;;  %v8065_v63 = vunpack.i.l.bf16 %v10622_v23 }
 0x3ed   : > { %8088 = vrot.lane.b32.xlu1 %v8087_v61, %s13855_s18  ;;  %v8097_v37 = vpack.i.bf16 %v10604_v50, %v10600_v25 }
 0x3ee   : > { %8093 = vrot.lane.b32.xlu2 %v8092_v33, %s13855_s18 }
 0x3ef   : > { %8098 = vrot.lane.b32.xlu0 %v8097_v37, %s13855_s18 }
 0x3f5   : > { %2135 = vperm.xlu1 %8020, %v2132_v41  }
 0x3f6   : > { %2267 = vperm.xlu2 %8021, %v2263_v38  }
 0x3f7   : > { %2272 = vperm.xlu0 %7619, %v2264_v60  }
 0x413   : > { %v8069_v24 = vpop.permute.xlu0 %8068 }
 0x414   : > { %v8071_v53 = vunpack.i.h.bf16 %v8069_v24  ;;  %v8070_v27 = vunpack.i.l.bf16 %v8069_v24 }
 0x416   : > { %v2104_v47 = vsel %vm729_vm4, %v8066_v17, %v8071_v53  ;;  %v2103_v35 = vsel %vm729_vm4, %v8065_v63, %v8070_v27 }
 0x417   : > { %v2115_v10 = vmax.f32 %v10501_v48, %v2104_v47  ;;  %v2107_v28 = vmax.f32 %v10497_v39, %v2103_v35 }
 0x419   : > { %v2124_v5 = vpack.c.bf16 %v2115_v10, %v2107_v28  ;;  %v7420_v28 = vld [vmem:[%s13888_s1] sm:$0xff] }
 0x41b   : > { %2148 = vmatpush.bf16.msra.mxu3 %v2124_v5 }
 0x41e   : > { %6684 = vmatmul.msk.bf16.vlgmr.msra.gmra.mxu3 %vm1751_vm11, %v10639_v13 }
 0x42c   : > { %v8074_v20 = vpop.permute.xlu1 %8073 }
 0x42d   : > { %v8076_v42 = vunpack.i.h.bf16 %v8074_v20  ;;  %v8075_v6 = vunpack.i.l.bf16 %v8074_v20 }
 0x42f   : > { %v2101_v4 = vsel %vm729_vm4, %v8070_v27, %v8075_v6  ;;  %v2102_v48 = vsel %vm729_vm4, %v8071_v53, %v8076_v42 }
 0x430   : > { %v2108_v39 = vmax.f32 %v10512_v36, %v2101_v4  ;;  %v2116_v11 = vmax.f32 %v10516_v56, %v2102_v48 }
 0x432   : > { %v2125_v31 = vpack.c.bf16 %v2116_v11, %v2108_v39 }
 0x434   : > { %2161 = vmatpush.bf16.msra.mxu1 %v2125_v31 }
 0x437   : > { %v8079_v0 = vpop.permute.xlu2 %8078  ;;  %6685 = vmatmul.msk.bf16.vlgmr.msra.gmra.mxu1 %vm1751_vm11, %v10639_v13 }
 0x438   : > { %v8081_v45 = vunpack.i.h.bf16 %v8079_v0  ;;  %v8080_v15 = vunpack.i.l.bf16 %v8079_v0 }
 0x43a   : > { %v2100_v62 = vsel %vm729_vm4, %v8076_v42, %v8081_v45  ;;  %v2099_v51 = vsel %vm729_vm4, %v8075_v6, %v8080_v15 }
 0x43b   : > { %v2117_v43 = vmax.f32 %v10531_v26, %v2100_v62  ;;  %v2109_v36 = vmax.f32 %v10527_v40, %v2099_v51 }
 0x43d   : > { %v2126_v58 = vpack.c.bf16 %v2117_v43, %v2109_v36 }
 0x43f   : > { %2174 = vmatpush.bf16.msra.mxu2 %v2126_v58 }
 0x442   : > { %6686 = vmatmul.msk.bf16.vlgmr.msra.gmra.mxu2 %vm1751_vm11, %v10639_v13 }
 0x448   : > { %v8094_v40 = vpop.permute.xlu2 %8093 }
 0x449   : > { %v8096_v18 = vunpack.i.h.bf16 %v8094_v40  ;;  %v8095_v14 = vunpack.i.l.bf16 %v8094_v40 }
 0x44f   : > { %v8084_v56 = vpop.permute.xlu0 %8083 }
 0x450   : > { %v8086_v30 = vunpack.i.h.bf16 %v8084_v56  ;;  %v8085_v2 = vunpack.i.l.bf16 %v8084_v56 }
 0x452   : > { %v2098_v16 = vsel %vm729_vm4, %v8081_v45, %v8086_v30  ;;  %v2097_v3 = vsel %vm729_vm4, %v8080_v15, %v8085_v2 }
 0x453   : > { %v2118_v54 = vmax.f32 %v10550_v19, %v2098_v16  ;;  %v2110_v26 = vmax.f32 %v10546_v7, %v2097_v3 }
 0x455   : > { %v2127_v29 = vpack.c.bf16 %v2118_v54, %v2110_v26 }
 0x457   : > { %2187 = vmatpush.bf16.msrb.mxu3 %v2127_v29 }
 0x45a   : > { %6687 = vmatmul.msk.bf16.vlgmr.msrb.gmra.mxu3 %vm1751_vm11, %v10639_v13 }
 0x45f   : > { %v8089_v22 = vpop.permute.xlu1 %8088 }
 0x460   : > { %v8091_v52 = vunpack.i.h.bf16 %v8089_v22  ;;  %v8090_v34 = vunpack.i.l.bf16 %v8089_v22 }
 0x461   : > { %v8099_v49 = vpop.permute.xlu0 %8098 }
 0x462   : > { %v2093_v55 = vsel %vm729_vm4, %v8090_v34, %v8095_v14  ;;  %v2094_v19 = vsel %vm729_vm4, %v8091_v52, %v8096_v18  ;;  %v2095_v7 = vsel %vm729_vm4, %v8085_v2, %v8090_v34  ;;  %v2096_v46 = vsel %vm729_vm4, %v8086_v30, %v8091_v52 }
 0x463   : > { %v2111_v1 = vmax.f32 %v10554_v8, %v2095_v7  ;;  %v2112_v61 = vmax.f32 %v10572_v57, %v2093_v55  ;;  %v2119_v33 = vmax.f32 %v10558_v21, %v2096_v46  ;;  %v2120_v37 = vmax.f32 %v10576_v44, %v2094_v19 }
 0x464   : > { %v8101_v41 = vunpack.i.h.bf16 %v8099_v49  ;;  %v8100_v38 = vunpack.i.l.bf16 %v8099_v49 }
 0x465   : > { %v2128_v60 = vpack.c.bf16 %v2119_v33, %v2111_v1  ;;  %v2129_v24 = vpack.c.bf16 %v2120_v37, %v2112_v61 }
 0x466   : > { %v2092_v53 = vsel %vm729_vm4, %v8096_v18, %v8101_v41  ;;  %v2106_v27 = vsel %vm729_vm4, %v8101_v41, %v8066_v17  ;;  %v2091_v8 = vsel %vm729_vm4, %v8095_v14, %v8100_v38  ;;  %v2105_v21 = vsel %vm729_vm4, %v8100_v38, %v8065_v63 }
 0x467   : > { %v2121_v57 = vmax.f32 %v10588_v59, %v2092_v53  ;;  %v2122_v44 = vmax.f32 %v10604_v50, %v2106_v27  ;;  %v2113_v47 = vmax.f32 %v10584_v12, %v2091_v8  ;;  %v2114_v35 = vmax.f32 %v10600_v25, %v2105_v21  ;;  %2200 = vmatpush.bf16.msra.mxu0 %v2128_v60  ;;  %v2136_v12 = vpop.permute.xlu1 %2135 }
 0x468   : > { %2213 = vmatpush.bf16.msrb.mxu1 %v2129_v24  ;;  %v2268_v24 = vpop.permute.xlu2 %2267 }
 0x469   : > { %v2130_v10 = vpack.c.bf16 %v2121_v57, %v2113_v47  ;;  %v2131_v17 = vpack.c.bf16 %v2122_v44, %v2114_v35  ;;  %v2273_v27 = vpop.permute.xlu0 %2272 }
 0x46a   : > { %6688 = vmatmul.msk.bf16.vlgmr.msra.gmra.mxu0 %vm1751_vm11, %v10639_v13 }
 0x46b   : > { %2226 = vmatpush.bf16.msrb.mxu2 %v2130_v10  ;;  %2239 = vmatpush.bf16.msra.mxu3 %v2131_v17 }
 0x46c   : > { %6689 = vmatmul.msk.bf16.vlgmr.msrb.gmra.mxu1 %vm1751_vm11, %v10639_v13 }
 0x46e   : > { %6690 = vmatmul.msk.bf16.vlgmr.msrb.gmra.mxu2 %vm1751_vm11, %v10639_v13  ;;  %6691 = vmatmul.msk.bf16.vlgmr.msra.gmra.mxu3 %vm1751_vm11, %v10639_v13 }
 0x4a1   : > { %v2150_v59 = vpop.f32.mrf.mxu3 }
 0x4a2   : > { %v2151_v25 = vadd.f32 %v2150_v59, %v2136_v12 }
 0x4a4   : > { %v2245_v50 = vmax.f32 %v2151_v25, 0.0 }
 0x4a6   : > { %v2255_v23 = vpack.c.bf16 %v2245_v50, %v2245_v50 }
 0x4a8   : > { %v2284_v63 = vand.u32 %v2255_v23, %v9260_v9 }
 0x4a9   : > { %v2152_v5 = vpop.f32.mrf.mxu3 }
 0x4aa   : > { %2314 = vmatpush.bf16.msrb.mxu0 %v2284_v63 }
 0x4ad   : > { %6696 = vmatmul.msk.bf16.vlgmr.msrb.gmra.mxu0 %vm470_vm2, %v7420_v28 }
 0x4b4   : > { %v2163_v20 = vpop.f32.mrf.mxu1 }
 0x4b5   : > { %v2164_v42 = vadd.f32 %v2163_v20, %v2136_v12 }
 0x4b7   : > { %v2246_v6 = vmax.f32 %v2164_v42, 0.0 }
 0x4b9   : > { %v2256_v4 = vpack.c.bf16 %v2246_v6, %v2246_v6 }
 0x4bb   : > { %v2287_v13 = vand.u32 %v2256_v4, %v9260_v9 }
 0x4bc   : > { %v2165_v48 = vpop.f32.mrf.mxu1 }
 0x4bd   : > { %2328 = vmatpush.bf16.msra.mxu1 %v2287_v13 }
 0x4c0   : > { %6697 = vmatmul.msk.bf16.vlgmr.msra.gmra.mxu1 %vm470_vm2, %v7420_v28 }
 0x4c5   : > { %v2176_v39 = vpop.f32.mrf.mxu2 }
 0x4c6   : > { %v2177_v11 = vadd.f32 %v2176_v39, %v2136_v12 }
 0x4c8   : > { %v2247_v31 = vmax.f32 %v2177_v11, 0.0 }
 0x4ca   : > { %v2257_v0 = vpack.c.bf16 %v2247_v31, %v2247_v31 }
 0x4cc   : > { %v2290_v45 = vand.u32 %v2257_v0, %v9260_v9 }
 0x4cd   : > { %v2178_v15 = vpop.f32.mrf.mxu2 }
 0x4ce   : > { %2342 = vmatpush.bf16.msra.mxu2 %v2290_v45 }
 0x4d1   : > { %6698 = vmatmul.msk.bf16.vlgmr.msra.gmra.mxu2 %vm470_vm2, %v7420_v28 }
 0x4dd   : > { %v2189_v62 = vpop.f32.mrf.mxu3 }
 0x4de   : > { %v2190_v51 = vadd.f32 %v2189_v62, %v2136_v12 }
 0x4e0   : > { %v2248_v43 = vmax.f32 %v2190_v51, 0.0 }
 0x4e2   : > { %v2258_v36 = vpack.c.bf16 %v2248_v43, %v2248_v43 }
 0x4e4   : > { %v2293_v58 = vand.u32 %v2258_v36, %v9260_v9 }
 0x4e5   : > { %v2191_v56 = vpop.f32.mrf.mxu3 }
 0x4e6   : > { %2356 = vmatpush.bf16.msrb.mxu3 %v2293_v58 }
 0x4e7   : > { %v2202_v30 = vpop.f32.mrf.mxu0 }
 0x4e8   : > { %v2203_v2 = vadd.f32 %v2202_v30, %v2136_v12 }
 0x4e9   : > { %v2215_v16 = vpop.f32.mrf.mxu1  ;;  %6699 = vmatmul.msk.bf16.vlgmr.msrb.gmra.mxu3 %vm470_vm2, %v7420_v28 }
 0x4ea   : > { %v2249_v3 = vmax.f32 %v2203_v2, 0.0  ;;  %v2216_v54 = vadd.f32 %v2215_v16, %v2136_v12 }
 0x4ec   : > { %v2259_v26 = vpack.c.bf16 %v2249_v3, %v2249_v3  ;;  %v2250_v29 = vmax.f32 %v2216_v54, 0.0 }
 0x4ee   : > { %v2296_v40 = vand.u32 %v2259_v26, %v9260_v9  ;;  %v2260_v22 = vpack.c.bf16 %v2250_v29, %v2250_v29 }
 0x4ef   : > { %v2204_v18 = vpop.f32.mrf.mxu0 }
 0x4f0   : > { %v2299_v14 = vand.u32 %v2260_v22, %v9260_v9  ;;  %2370 = vmatpush.bf16.msra.mxu0 %v2296_v40 }
 0x4f1   : > { %v2228_v52 = vpop.f32.mrf.mxu2  ;;  %v2241_v34 = vpop.f32.mrf.mxu3 }
 0x4f2   : > { %v2229_v49 = vadd.f32 %v2228_v52, %v2136_v12  ;;  %v2242_v55 = vadd.f32 %v2241_v34, %v2136_v12  ;;  %2384 = vmatpush.bf16.msrb.mxu1 %v2299_v14  ;;  %v2217_v19 = vpop.f32.mrf.mxu1 }
 0x4f3   : > { %6700 = vmatmul.msk.bf16.vlgmr.msra.gmra.mxu0 %vm470_vm2, %v7420_v28 }
 0x4f4   : > { %v2251_v7 = vmax.f32 %v2229_v49, 0.0  ;;  %v2252_v46 = vmax.f32 %v2242_v55, 0.0 }
 0x4f5   : > { %6701 = vmatmul.msk.bf16.vlgmr.msrb.gmra.mxu1 %vm470_vm2, %v7420_v28 }
 0x4f6   : > { %v2261_v1 = vpack.c.bf16 %v2251_v7, %v2251_v7  ;;  %v2262_v61 = vpack.c.bf16 %v2252_v46, %v2252_v46 }
 0x4f8   : > { %v2302_v33 = vand.u32 %v2261_v1, %v9260_v9  ;;  %v2305_v37 = vand.u32 %v2262_v61, %v9260_v9 }
 0x4f9   : > { %v2230_v41 = vpop.f32.mrf.mxu2  ;;  %v2243_v38 = vpop.f32.mrf.mxu3 }
 0x4fa   : > { %2398 = vmatpush.bf16.msrb.mxu2 %v2302_v33  ;;  %2412 = vmatpush.bf16.msra.mxu3 %v2305_v37 }
 0x4fd   : > { %6702 = vmatmul.msk.bf16.vlgmr.msrb.gmra.mxu2 %vm470_vm2, %v7420_v28  ;;  %6703 = vmatmul.msk.bf16.vlgmr.msra.gmra.mxu3 %vm470_vm2, %v7420_v28 }
 0x52a   : > { %v2316_v60 = vpop.f32.mrf.mxu0 }
 0x52b   : > { %v10722_v53 = vadd.f32 %v2316_v60, %v2268_v24 }
 0x52d   : > { %v2419_v57 = vmax.f32 %v10722_v53, 0.0 }
 0x532   : > { %v2318_v8 = vpop.f32.mrf.mxu0 }
 0x533   : > { %v10724_v21 = vadd.f32 %v2318_v8, %v2273_v27 }
 0x535   : > { %v2427_v44 = vmax.f32 %v10724_v21, 0.0 }
 0x537   : > { %v8102_v47 = vpack.i.bf16 %v2427_v44, %v2419_v57 }
 0x539   : > { %8103 = vrot.lane.b32.xlu1 %v8102_v47, %s13857_s17 }
 0x53d   : > { %v2330_v35 = vpop.f32.mrf.mxu1 }
 0x53e   : > { %v10733_v10 = vadd.f32 %v2330_v35, %v2268_v24 }
 0x540   : > { %v2420_v59 = vmax.f32 %v10733_v10, 0.0 }
 0x545   : > { %v2332_v17 = vpop.f32.mrf.mxu1 }
 0x546   : > { %v10735_v12 = vadd.f32 %v2332_v17, %v2273_v27 }
 0x548   : > { %v2428_v25 = vmax.f32 %v10735_v12, 0.0 }
 0x54a   : > { %v8107_v50 = vpack.i.bf16 %v2428_v25, %v2420_v59 }
 0x54c   : > { %8108 = vrot.lane.b32.xlu2 %v8107_v50, %s13857_s17 }
 0x554   : > { %v2344_v23 = vpop.f32.mrf.mxu2 }
 0x555   : > { %v10744_v63 = vadd.f32 %v2344_v23, %v2268_v24 }
 0x557   : > { %v2421_v20 = vmax.f32 %v10744_v63, 0.0 }
 0x55c   : > { %v2346_v28 = vpop.f32.mrf.mxu2 }
 0x55d   : > { %v10746_v5 = vadd.f32 %v2346_v28, %v2273_v27 }
 0x55f   : > { %v2429_v42 = vmax.f32 %v10746_v5, 0.0 }
 0x561   : > { %v8112_v6 = vpack.i.bf16 %v2429_v42, %v2421_v20 }
 0x563   : > { %8113 = vrot.lane.b32.xlu0 %v8112_v6, %s13857_s17 }
 0x56c   : > { %v2358_v4 = vpop.f32.mrf.mxu3 }
 0x56d   : > { %v10755_v39 = vadd.f32 %v2358_v4, %v2268_v24 }
 0x56f   : > { %v2422_v0 = vmax.f32 %v10755_v39, 0.0 }
 0x570   : > { %v2372_v13 = vpop.f32.mrf.mxu0 }
 0x571   : > { %v10760_v45 = vadd.f32 %v2372_v13, %v2268_v24 }
 0x572   : > { %v2386_v48 = vpop.f32.mrf.mxu1 }
 0x573   : > { %v10763_v51 = vadd.f32 %v2386_v48, %v2268_v24  ;;  %v2423_v56 = vmax.f32 %v10760_v45, 0.0 }
 0x574   : > { %v2360_v11 = vpop.f32.mrf.mxu3 }
 0x575   : > { %v10757_v31 = vadd.f32 %v2360_v11, %v2273_v27  ;;  %v2424_v16 = vmax.f32 %v10763_v51, 0.0 }
 0x577   : > { %v2430_v15 = vmax.f32 %v10757_v31, 0.0 }
 0x578   : > { %v2374_v62 = vpop.f32.mrf.mxu0 }
 0x579   : > { %v10765_v43 = vadd.f32 %v2374_v62, %v2273_v27  ;;  %v8122_v36 = vpack.i.bf16 %v2430_v15, %v2422_v0 }
 0x57a   : > { %v2388_v58 = vpop.f32.mrf.mxu1 }
 0x57b   : > { %v2431_v30 = vmax.f32 %v10765_v43, 0.0  ;;  %v10773_v2 = vadd.f32 %v2388_v58, %v2273_v27  ;;  %8123 = vrot.lane.b32.xlu1 %v8122_v36, %s13857_s17 }
 0x57d   : > { %v2432_v3 = vmax.f32 %v10773_v2, 0.0  ;;  %v8117_v54 = vpack.i.bf16 %v2431_v30, %v2423_v56 }
 0x57f   : > { %v8127_v26 = vpack.i.bf16 %v2432_v3, %v2424_v16  ;;  %8118 = vrot.lane.b32.xlu2 %v8117_v54, %s13857_s17 }
 0x580   : > { %v2400_v29 = vpop.f32.mrf.mxu2  ;;  %v2414_v40 = vpop.f32.mrf.mxu3 }
 0x581   : > { %8128 = vrot.lane.b32.xlu0 %v8127_v26, %s13857_s17  ;;  %v10788_v22 = vadd.f32 %v2400_v29, %v2268_v24  ;;  %v10790_v18 = vadd.f32 %v2414_v40, %v2268_v24 }
 0x583   : > { %v2425_v55 = vmax.f32 %v10788_v22, 0.0  ;;  %v2426_v19 = vmax.f32 %v10790_v18, 0.0 }
 0x588   : > { %v2402_v14 = vpop.f32.mrf.mxu2  ;;  %v2416_v52 = vpop.f32.mrf.mxu3 }
 0x589   : > { %v10792_v34 = vadd.f32 %v2402_v14, %v2273_v27  ;;  %v10794_v49 = vadd.f32 %v2416_v52, %v2273_v27 }
 0x58b   : > { %v2433_v7 = vmax.f32 %v10792_v34, 0.0  ;;  %v2434_v46 = vmax.f32 %v10794_v49, 0.0 }
 0x58d   : > { %v8132_v1 = vpack.i.bf16 %v2433_v7, %v2425_v55  ;;  %v8137_v61 = vpack.i.bf16 %v2434_v46, %v2426_v19 }
 0x58f   : > { %8133 = vrot.lane.b32.xlu1 %v8132_v1, %s13857_s17  ;;  %8138 = vrot.lane.b32.xlu2 %v8137_v61, %s13857_s17 }
 0x5a6   : > { %v8109_v33 = vpop.permute.xlu2 %8108 }
 0x5a7   : > { %v8111_v41 = vunpack.i.h.bf16 %v8109_v33  ;;  %v8110_v38 = vunpack.i.l.bf16 %v8109_v33 }
 0x5ab   : > { %v8104_v37 = vpop.permute.xlu1 %8103 }
 0x5ac   : > { %v8106_v60 = vunpack.i.h.bf16 %v8104_v37  ;;  %v8105_v24 = vunpack.i.l.bf16 %v8104_v37 }
 0x5ae   : > { %v2479_v27 = vsel %vm664_vm3, %v8105_v24, %v8110_v38  ;;  %v2480_v8 = vsel %vm664_vm3, %v8106_v60, %v8111_v41 }
 0x5af   : > { %v10812_v47 = vmax.f32 %v2419_v57, %v2479_v27  ;;  %v10816_v35 = vmax.f32 %v2427_v44, %v2480_v8 }
 0x5b1   : > { %v8142_v17 = vpack.i.bf16 %v10816_v35, %v10812_v47 }
 0x5b3   : > { %8143 = vrot.lane.b32.xlu0 %v8142_v17, %s13855_s18 }
 0x5d5   : > { %v8114_v50 = vpop.permute.xlu0 %8113 }
 0x5d6   : > { %v8116_v23 = vunpack.i.h.bf16 %v8114_v50  ;;  %v8115_v28 = vunpack.i.l.bf16 %v8114_v50 }
 0x5d8   : > { %v2477_v6 = vsel %vm664_vm3, %v8110_v38, %v8115_v28  ;;  %v2478_v53 = vsel %vm664_vm3, %v8111_v41, %v8116_v23 }
 0x5d9   : > { %v10827_v57 = vmax.f32 %v2420_v59, %v2477_v6  ;;  %v10831_v21 = vmax.f32 %v2428_v25, %v2478_v53  ;;  %v8119_v4 = vpop.permute.xlu2 %8118 }
 0x5da   : > { %v8121_v48 = vunpack.i.h.bf16 %v8119_v4  ;;  %v8120_v11 = vunpack.i.l.bf16 %v8119_v4 }
 0x5db   : > { %v8147_v44 = vpack.i.bf16 %v10831_v21, %v10827_v57 }
 0x5dd   : > { %8148 = vrot.lane.b32.xlu1 %v8147_v44, %s13855_s18 }
 0x5e9   : > { %v8139_v40 = vpop.permute.xlu2 %8138 }
 0x5ea   : > { %v8140_v39 = vunpack.i.l.bf16 %v8139_v40 }
 0x5ec   : > { %v2481_v1 = vsel %vm664_vm3, %v8140_v39, %v8105_v24 }
 0x5ed   : > { %v8124_v13 = vpop.permute.xlu1 %8123  ;;  %v10885_v33 = vmax.f32 %v2426_v19, %v2481_v1 }
 0x5ee   : > { %v8126_v62 = vunpack.i.h.bf16 %v8124_v13  ;;  %v8125_v36 = vunpack.i.l.bf16 %v8124_v13 }
 0x5f0   : > { %v2475_v10 = vsel %vm664_vm3, %v8115_v28, %v8125_v36  ;;  %v2476_v59 = vsel %vm664_vm3, %v8116_v23, %v8126_v62  ;;  %v2473_v12 = vsel %vm664_vm3, %v8125_v36, %v8120_v11  ;;  %v2474_v25 = vsel %vm664_vm3, %v8126_v62, %v8121_v48 }
 0x5f1   : > { %v10846_v58 = vmax.f32 %v2421_v20, %v2475_v10  ;;  %v10850_v54 = vmax.f32 %v2429_v42, %v2476_v59  ;;  %v10854_v26 = vmax.f32 %v2422_v0, %v2473_v12  ;;  %v10858_v29 = vmax.f32 %v2430_v15, %v2474_v25 }
 0x5f2   : > { %v8141_v42 = vunpack.i.h.bf16 %v8139_v40 }
 0x5f3   : > { %v8129_v18 = vpop.permute.xlu0 %8128  ;;  %v8152_v14 = vpack.i.bf16 %v10850_v54, %v10846_v58  ;;  %v8157_v63 = vpack.i.bf16 %v10858_v29, %v10854_v26 }
 0x5f4   : > { %v8131_v20 = vunpack.i.h.bf16 %v8129_v18  ;;  %v8130_v5 = vunpack.i.l.bf16 %v8129_v18  ;;  %v2482_v61 = vsel %vm664_vm3, %v8141_v42, %v8106_v60 }
 0x5f5   : > { %8153 = vrot.lane.b32.xlu2 %v8152_v14, %s13855_s18  ;;  %8158 = vrot.lane.b32.xlu0 %v8157_v63, %s13855_s18  ;;  %v10887_v45 = vmax.f32 %v2434_v46, %v2482_v61 }
 0x5f6   : > { %v2471_v31 = vsel %vm664_vm3, %v8120_v11, %v8130_v5  ;;  %v2472_v0 = vsel %vm664_vm3, %v8121_v48, %v8131_v20 }
 0x5f7   : > { %v10872_v15 = vmax.f32 %v2423_v56, %v2471_v31  ;;  %v10876_v52 = vmax.f32 %v2431_v30, %v2472_v0  ;;  %v8177_v43 = vpack.i.bf16 %v10887_v45, %v10885_v33 }
 0x5f9   : > { %v8162_v49 = vpack.i.bf16 %v10876_v52, %v10872_v15 }
 0x5fb   : > { %8163 = vrot.lane.b32.xlu1 %v8162_v49, %s13855_s18 }
 0x601   : > { %v8134_v56 = vpop.permute.xlu1 %8133 }
 0x602   : > { %v8136_v30 = vunpack.i.h.bf16 %v8134_v56  ;;  %v8135_v37 = vunpack.i.l.bf16 %v8134_v56 }
 0x603   : > { %8178 = vrot.lane.b32.xlu1 %v8177_v43, %s13855_s18 }
 0x604   : > { %v2469_v41 = vsel %vm664_vm3, %v8130_v5, %v8135_v37  ;;  %v2470_v38 = vsel %vm664_vm3, %v8131_v20, %v8136_v30  ;;  %v2467_v19 = vsel %vm664_vm3, %v8135_v37, %v8140_v39  ;;  %v2468_v46 = vsel %vm664_vm3, %v8136_v30, %v8141_v42 }
 0x605   : > { %v10902_v60 = vmax.f32 %v2424_v16, %v2469_v41  ;;  %v10906_v24 = vmax.f32 %v2432_v3, %v2470_v38  ;;  %v10910_v27 = vmax.f32 %v2425_v55, %v2467_v19  ;;  %v10914_v8 = vmax.f32 %v2433_v7, %v2468_v46 }
 0x607   : > { %v8167_v17 = vpack.i.bf16 %v10906_v24, %v10902_v60  ;;  %v8172_v51 = vpack.i.bf16 %v10914_v8, %v10910_v27 }
 0x609   : > { %8168 = vrot.lane.b32.xlu2 %v8167_v17, %s13855_s18  ;;  %8173 = vrot.lane.b32.xlu0 %v8172_v51, %s13855_s18 }
 0x625   : > { %v10922_v2 = vpop.permute.xlu0 %8143 }
 0x626   : > { %v8146_v16 = vunpack.i.h.bf16 %v10922_v2  ;;  %v8145_v3 = vunpack.i.l.bf16 %v10922_v2 }
 0x64f   : > { %v8154_v22 = vpop.permute.xlu2 %8153  ;;  %v8149_v34 = vpop.permute.xlu1 %8148 }
 0x650   : > { %v8156_v55 = vunpack.i.h.bf16 %v8154_v22  ;;  %v8155_v7 = vunpack.i.l.bf16 %v8154_v22  ;;  %v8151_v50 = vunpack.i.h.bf16 %v8149_v34  ;;  %v8150_v23 = vunpack.i.l.bf16 %v8149_v34 }
 0x652   : > { %v2542_v28 = vsel %vm729_vm4, %v8151_v50, %v8156_v55  ;;  %v2544_v6 = vsel %vm729_vm4, %v8146_v16, %v8151_v50  ;;  %v2541_v53 = vsel %vm729_vm4, %v8150_v23, %v8155_v7  ;;  %v2543_v44 = vsel %vm729_vm4, %v8145_v3, %v8150_v23 }
 0x653   : > { %v2555_v4 = vmax.f32 %v10816_v35, %v2544_v6  ;;  %v2547_v13 = vmax.f32 %v10812_v47, %v2543_v44  ;;  %v2556_v48 = vmax.f32 %v10831_v21, %v2542_v28  ;;  %v2548_v11 = vmax.f32 %v10827_v57, %v2541_v53 }
 0x655   : > { %v10938_v62 = vpack.i.bf16 %v2555_v4, %v2547_v13  ;;  %v2563_v36 = vpack.c.bf16 %v2548_v11, %v2547_v13  ;;  %v2567_v10 = vpack.c.bf16 %v2556_v48, %v2555_v4  ;;  %v10946_v47 = vpack.i.bf16 %v2556_v48, %v2548_v11 }
 0x657   : > { %8213 = vrot.lane.b32.xlu0 %v10938_v62, %s13857_s17  ;;  %8208 = vrot.lane.b32.xlu1 %v10938_v62, %s13836_s28  ;;  %2571 = vst [vmem:[#allocation2] sm:$0xff] %v2563_v36 }
 0x658   : > { %8183 = vrot.lane.b32.xlu2 %v10938_v62, %s13907_s15  ;;  %2575 = vst [vmem:[#allocation2 + $0x20] sm:$0xff] %v2567_v10 }
 0x65f   : > { %8223 = vrot.lane.b32.xlu0 %v10946_v47, %s13907_s15 }
 0x660   : > { %8188 = vrot.lane.b32.xlu2 %v10938_v62, %s13908_s16 }
 0x663   : > { %v8169_v25 = vpop.permute.xlu2 %8168 }
 0x664   : > { %v8171_v20 = vunpack.i.h.bf16 %v8169_v25  ;;  %v8170_v5 = vunpack.i.l.bf16 %v8169_v25 }
 0x667   : > { %v8159_v35 = vpop.permute.xlu0 %8158  ;;  %8233 = vrot.lane.b32.xlu0 %v10946_v47, %s13908_s16 }
 0x668   : > { %v8161_v57 = vunpack.i.h.bf16 %v8159_v35  ;;  %v8160_v21 = vunpack.i.l.bf16 %v8159_v35  ;;  %8193 = vrot.lane.b32.xlu2 %v10938_v62, %s13909_s19 }
 0x66a   : > { %v2540_v59 = vsel %vm729_vm4, %v8156_v55, %v8161_v57  ;;  %v2539_v12 = vsel %vm729_vm4, %v8155_v7, %v8160_v21 }
 0x66b   : > { %v2557_v40 = vmax.f32 %v10850_v54, %v2540_v59  ;;  %v2549_v18 = vmax.f32 %v10846_v58, %v2539_v12 }
 0x66d   : > { %v8164_v14 = vpop.permute.xlu1 %8163  ;;  %v10962_v63 = vpack.i.bf16 %v2557_v40, %v2549_v18 }
 0x66e   : > { %v8166_v42 = vunpack.i.h.bf16 %v8164_v14  ;;  %v8165_v39 = vunpack.i.l.bf16 %v8164_v14 }
 0x66f   : > { %8228 = vrot.lane.b32.xlu1 %v10962_v63, %s13907_s15  ;;  %8243 = vrot.lane.b32.xlu0 %v10946_v47, %s13909_s19 }
 0x670   : > { %v2536_v31 = vsel %vm729_vm4, %v8166_v42, %v8171_v20  ;;  %v2535_v54 = vsel %vm729_vm4, %v8165_v39, %v8170_v5  ;;  %v2537_v58 = vsel %vm729_vm4, %v8160_v21, %v8165_v39  ;;  %8198 = vrot.lane.b32.xlu2 %v10938_v62, %s13910_s20  ;;  %v2538_v0 = vsel %vm729_vm4, %v8161_v57, %v8166_v42 }
 0x671   : > { %v2559_v49 = vmax.f32 %v10876_v52, %v2536_v31  ;;  %v2550_v1 = vmax.f32 %v10854_v26, %v2537_v58  ;;  %v2551_v61 = vmax.f32 %v10872_v15, %v2535_v54  ;;  %v2558_v56 = vmax.f32 %v10858_v29, %v2538_v0 }
 0x673   : > { %v8377_v41 = vpack.i.bf16 %v2559_v49, %v2551_v61  ;;  %v2564_v38 = vpack.c.bf16 %v2550_v1, %v2549_v18  ;;  %v2568_v29 = vpack.c.bf16 %v2558_v56, %v2557_v40 }
 0x675   : > { %v8179_v43 = vpop.permute.xlu1 %8178  ;;  %2572 = vst [vmem:[#allocation2 + $0x8] sm:$0xff] %v2564_v38 }
 0x676   : > { %v8181_v30 = vunpack.i.h.bf16 %v8179_v43  ;;  %v8180_v37 = vunpack.i.l.bf16 %v8179_v43  ;;  %2576 = vst [vmem:[#allocation2 + $0x28] sm:$0xff] %v2568_v29 }
 0x677   : > { %8238 = vrot.lane.b32.xlu1 %v10962_v63, %s13908_s16  ;;  %8253 = vrot.lane.b32.xlu0 %v10946_v47, %s13910_s20 }
 0x678   : > { %v2546_v52 = vsel %vm729_vm4, %v8181_v30, %v8146_v16  ;;  %v2545_v26 = vsel %vm729_vm4, %v8180_v37, %v8145_v3  ;;  %8203 = vrot.lane.b32.xlu2 %v10938_v62, %s13855_s18 }
 0x679   : > { %v2562_v15 = vmax.f32 %v10887_v45, %v2546_v52  ;;  %v2554_v19 = vmax.f32 %v10885_v33, %v2545_v26 }
 0x67b   : > { %v8174_v46 = vpop.permute.xlu0 %8173  ;;  %v10994_v17 = vpack.i.bf16 %v2562_v15, %v2554_v19 }
 0x67c   : > { %v8176_v51 = vunpack.i.h.bf16 %v8174_v46  ;;  %v8175_v2 = vunpack.i.l.bf16 %v8174_v46 }
 0x67e   : > { %v2534_v16 = vsel %vm729_vm4, %v8171_v20, %v8176_v51  ;;  %v2531_v3 = vsel %vm729_vm4, %v8175_v2, %v8180_v37  ;;  %v2532_v22 = vsel %vm729_vm4, %v8176_v51, %v8181_v30  ;;  %v2533_v45 = vsel %vm729_vm4, %v8170_v5, %v8175_v2 }
 0x67f   : > { %v2560_v33 = vmax.f32 %v10906_v24, %v2534_v16  ;;  %v2552_v34 = vmax.f32 %v10902_v60, %v2533_v45  ;;  %v2553_v55 = vmax.f32 %v10910_v27, %v2531_v3  ;;  %v2561_v7 = vmax.f32 %v10914_v8, %v2532_v22  ;;  %8248 = vrot.lane.b32.xlu1 %v10962_v63, %s13909_s19 }
 0x680   : > { %8218 = vrot.lane.b32.xlu2 %v10938_v62, %s13911_s26  ;;  %8263 = vrot.lane.b32.xlu0 %v10946_v47, %s13855_s18  ;;  %v8302_v27 = vpack.i.bf16 %v2558_v56, %v2550_v1 }
 0x681   : > { %v11014_v50 = vpack.i.bf16 %v2560_v33, %v2552_v34  ;;  %v11016_v23 = vpack.i.bf16 %v2561_v7, %v2553_v55  ;;  %v2565_v24 = vpack.c.bf16 %v2552_v34, %v2551_v61  ;;  %v2569_v28 = vpack.c.bf16 %v2560_v33, %v2559_v49 }
 0x682   : > { %v2566_v60 = vpack.c.bf16 %v2554_v19, %v2553_v55  ;;  %v2570_v6 = vpack.c.bf16 %v2562_v15, %v2561_v7 }
 0x683   : > { %2573 = vst [vmem:[#allocation2 + $0x10] sm:$0xff] %v2565_v24 }
 0x684   : > { %2577 = vst [vmem:[#allocation2 + $0x30] sm:$0xff] %v2569_v28 }
 0x685   : > { %2574 = vst [vmem:[#allocation2 + $0x18] sm:$0xff] %v2566_v60 }
 0x686   : > { %2578 = vst [vmem:[#allocation2 + $0x38] sm:$0xff] %v2570_v6 }
 0x687   : > { %8258 = vrot.lane.b32.xlu1 %v10962_v63, %s13910_s20 }
 0x688   : > { %8273 = vrot.lane.b32.xlu2 %v10946_v47, %s13836_s28  ;;  %8278 = vrot.lane.b32.xlu0 %v10962_v63, %s13836_s28 }
 0x68f   : > { %8268 = vrot.lane.b32.xlu1 %v10962_v63, %s13855_s18 }
 0x690   : > { %8288 = vrot.lane.b32.xlu2 %v10962_v63, %s13857_s17  ;;  %8293 = vrot.lane.b32.xlu0 %v10946_v47, %s13911_s26 }
 0x697   : > { %8283 = vrot.lane.b32.xlu1 %v10946_v47, %s13857_s17 }
 0x698   : > { %8303 = vrot.lane.b32.xlu2 %v8302_v27, %s13907_s15  ;;  %8313 = vrot.lane.b32.xlu0 %v8302_v27, %s13909_s19 }
 0x69f   : > { %8298 = vrot.lane.b32.xlu1 %v10962_v63, %s13911_s26 }
 0x6a0   : > { %8318 = vrot.lane.b32.xlu2 %v8302_v27, %s13910_s20  ;;  %8323 = vrot.lane.b32.xlu0 %v8302_v27, %s13855_s18 }
 0x6a7   : > { %8308 = vrot.lane.b32.xlu1 %v8302_v27, %s13908_s16 }
 0x6a8   : > { %8333 = vrot.lane.b32.xlu2 %v8302_v27, %s13857_s17  ;;  %8338 = vrot.lane.b32.xlu0 %v8302_v27, %s13911_s26 }
 0x6af   : > { %8328 = vrot.lane.b32.xlu1 %v8302_v27, %s13836_s28 }
 0x6b0   : > { %8348 = vrot.lane.b32.xlu2 %v8377_v41, %s13908_s16  ;;  %8343 = vrot.lane.b32.xlu0 %v8377_v41, %s13907_s15 }
 0x6b2   : > { %v11044_v8 = vpop.permute.xlu2 %8183 }
 0x6b3   : > { %v13849_v59 = vunpack.i.h.bf16 %v11044_v8  ;;  %v13847_v12 = vunpack.i.l.bf16 %v11044_v8 }
 0x6b7   : > { %8353 = vrot.lane.b32.xlu1 %v8377_v41, %s13909_s19 }
 0x6b8   : > { %8368 = vrot.lane.b32.xlu2 %v8377_v41, %s13836_s28  ;;  %8358 = vrot.lane.b32.xlu0 %v8377_v41, %s13910_s20 }
 0x6ba   : > { %v11049_v53 = vpop.permute.xlu2 %8188 }
 0x6bb   : > { %v13846_v49 = vunpack.i.h.bf16 %v11049_v53  ;;  %v13844_v1 = vunpack.i.l.bf16 %v11049_v53 }
 0x6bf   : > { %8363 = vrot.lane.b32.xlu1 %v8377_v41, %s13855_s18 }
 0x6c0   : > { %8388 = vrot.lane.b32.xlu2 %v11016_v23, %s13907_s15  ;;  %8373 = vrot.lane.b32.xlu0 %v8377_v41, %s13857_s17 }
 0x6c2   : > { %v11055_v44 = vpop.permute.xlu2 %8193 }
 0x6c3   : > { %v13843_v45 = vunpack.i.h.bf16 %v11055_v44  ;;  %v13842_v33 = vunpack.i.l.bf16 %v11055_v44 }
 0x6c7   : > { %8378 = vrot.lane.b32.xlu1 %v8377_v41, %s13911_s26 }
 0x6c8   : > { %8393 = vrot.lane.b32.xlu2 %v11014_v50, %s13908_s16  ;;  %8398 = vrot.lane.b32.xlu0 %v11016_v23, %s13908_s16 }
 0x6c9   : > { %v11062_v4 = vpop.permute.xlu0 %8213  ;;  %v11080_v62 = vpop.permute.xlu1 %8208 }
 0x6ca   : > { %v11064_v13 = vpop.permute.xlu2 %8198 }
 0x6cf   : > { %8383 = vrot.lane.b32.xlu1 %v11014_v50, %s13907_s15 }
 0x6d0   : > { %8418 = vrot.lane.b32.xlu2 %v11016_v23, %s13910_s20  ;;  %8403 = vrot.lane.b32.xlu0 %v11014_v50, %s13909_s19 }
 0x6d1   : > { %v8224_v48 = vpop.permute.xlu0 %8223 }
 0x6d2   : > { %v11072_v11 = vpop.permute.xlu2 %8203  ;;  %v8226_v47 = vunpack.i.h.bf16 %v8224_v48  ;;  %v8225_v35 = vunpack.i.l.bf16 %v8224_v48 }
 0x6d4   : > { %v3008_v14 = vsel %vm1198_vm5, %v13849_v59, %v8226_v47  ;;  %v3007_v63 = vsel %vm1198_vm5, %v13847_v12, %v8225_v35  ;;  %v6714_v12 = vld [vmem:[#allocation2] sm:$0xf] }
 0x6d7   : > { %8408 = vrot.lane.b32.xlu1 %v11016_v23, %s13909_s19 }
 0x6d8   : > { %8423 = vrot.lane.b32.xlu2 %v11014_v50, %s13855_s18  ;;  %8428 = vrot.lane.b32.xlu0 %v11016_v23, %s13855_s18 }
 0x6d9   : > { %v8234_v36 = vpop.permute.xlu0 %8233 }
 0x6da   : > { %v11082_v10 = vpop.permute.xlu2 %8218  ;;  %v8236_v31 = vunpack.i.h.bf16 %v8234_v36  ;;  %v8235_v54 = vunpack.i.l.bf16 %v8234_v36 }
 0x6dc   : > { %v2944_v30 = vsel %vm1133_vm6, %v13846_v49, %v8236_v31  ;;  %v2943_v37 = vsel %vm1133_vm6, %v13844_v1, %v8235_v54 }
 0x6df   : > { %8413 = vrot.lane.b32.xlu1 %v11014_v50, %s13910_s20 }
 0x6e0   : > { %8438 = vrot.lane.b32.xlu2 %v11016_v23, %s13836_s28  ;;  %8443 = vrot.lane.b32.xlu0 %v10994_v17, %s13907_s15 }
 0x6e1   : > { %v11090_v57 = vpop.permute.xlu1 %8228  ;;  %v8244_v21 = vpop.permute.xlu0 %8243 }
 0x6e2   : > { %v8231_v25 = vunpack.i.h.bf16 %v11090_v57  ;;  %v8230_v40 = vunpack.i.l.bf16 %v11090_v57  ;;  %v11096_v18 = vpop.permute.xlu2 %8273  ;;  %v8246_v51 = vunpack.i.h.bf16 %v8244_v21  ;;  %v8245_v2 = vunpack.i.l.bf16 %v8244_v21 }
 0x6e4   : > { %v3005_v20 = vsel %vm1198_vm5, %v8225_v35, %v8230_v40  ;;  %v3006_v5 = vsel %vm1198_vm5, %v8226_v47, %v8231_v25  ;;  %v2879_v28 = vsel %vm1068_vm7, %v13842_v33, %v8245_v2  ;;  %v13848_v33 = vunpack.i.l.bf16 %v11082_v10 }
 0x6e5   : > { %v3011_v42 = vpack.c.bf16 %v3005_v20, %v3007_v63  ;;  %v3015_v39 = vpack.c.bf16 %v3006_v5, %v3008_v14 }
 0x6e7   : > { %3019 = vst [vmem:[#allocation2 + $0x1c0] sm:$0xff] %v3011_v42  ;;  %8433 = vrot.lane.b32.xlu1 %v11014_v50, %s13836_s28  ;;  %v13853_v42 = vunpack.i.h.bf16 %v11064_v13 }
 0x6e8   : > { %3023 = vst [vmem:[#allocation2 + $0x1e0] sm:$0xff] %v3015_v39  ;;  %8453 = vrot.lane.b32.xlu2 %v11016_v23, %s13857_s17  ;;  %8458 = vrot.lane.b32.xlu0 %v10994_v17, %s13908_s16  ;;  %v13852_v39 = vunpack.i.l.bf16 %v11064_v13 }
 0x6e9   : > { %v11120_v58 = vpop.permute.xlu1 %8238  ;;  %v11122_v0 = vpop.permute.xlu0 %8253 }
 0x6ea   : > { %v8241_v61 = vunpack.i.h.bf16 %v11120_v58  ;;  %v8240_v56 = vunpack.i.l.bf16 %v11120_v58  ;;  %v11128_v43 = vpop.permute.xlu2 %8288  ;;  %v8256_v14 = vunpack.i.h.bf16 %v11122_v0  ;;  %v8255_v63 = vunpack.i.l.bf16 %v11122_v0 }
 0x6ec   : > { %v2941_v41 = vsel %vm1133_vm6, %v8235_v54, %v8240_v56  ;;  %v2942_v38 = vsel %vm1133_vm6, %v8236_v31, %v8241_v61  ;;  %v8276_v54 = vunpack.i.h.bf16 %v11096_v18 }
 0x6ed   : > { %v2947_v52 = vpack.c.bf16 %v2941_v41, %v2943_v37  ;;  %v2951_v26 = vpack.c.bf16 %v2942_v38, %v2944_v30  ;;  %v8275_v30 = vunpack.i.l.bf16 %v11096_v18  ;;  %v2816_v18 = vsel %vm1003_vm8, %v13853_v42, %v8256_v14  ;;  %v6716_v42 = vld [vmem:[#allocation2 + $0x20] sm:$0xf0] }
 0x6ee   : > { %v6938_v29 = vld [vmem:[#allocation2 + $0x1c0] sm:$0xf]  ;;  %v7479_v15 = vld [vmem:[#allocation2 + $0x1c4] sm:$0xf] }
 0x6ef   : > { %2955 = vst [vmem:[#allocation2 + $0x180] sm:$0xff] %v2947_v52  ;;  %8448 = vrot.lane.b32.xlu1 %v11014_v50, %s13857_s17  ;;  %v7483_v19 = vld [vmem:[#allocation2 + $0x1dc] sm:$0xf0]  ;;  %v6940_v46 = vld [vmem:[#allocation2 + $0x1e0] sm:$0xf0]  ;;  %v13840_v52 = vunpack.i.h.bf16 %v11080_v62 }
 0x6f0   : > { %2959 = vst [vmem:[#allocation2 + $0x1a0] sm:$0xff] %v2951_v26  ;;  %8468 = vrot.lane.b32.xlu2 %v10994_v17, %s13910_s20  ;;  %8473 = vrot.lane.b32.xlu0 %v11014_v50, %s13911_s26  ;;  %v6939_v16 = vor.u32 %v7483_v19, %v6938_v29  ;;  %v6943_v3 = vor.u32 %v7479_v15, %v6940_v46  ;;  %v13839_v26 = vunpack.i.l.bf16 %v11080_v62 }
 0x6f1   : > { %v11152_v22 = vpop.permute.xlu1 %8248  ;;  %v2880_v50 = vsel %vm1068_vm7, %v13843_v45, %v8246_v51  ;;  %v2815_v19 = vsel %vm1003_vm8, %v13852_v39, %v8255_v63  ;;  %v7427_v39 = vld [vmem:[#allocation2 + $0x1c] sm:$0xf0] }
 0x6f2   : > { %v8251_v34 = vunpack.i.h.bf16 %v11152_v22  ;;  %v8250_v55 = vunpack.i.l.bf16 %v11152_v22  ;;  %v11158_v7 = vpop.permute.xlu2 %8303  ;;  %v11160_v24 = vpop.permute.xlu0 %8263  ;;  %3549 = vmatpush.bf16.msrb.mxu0 %v6939_v16  ;;  %3577 = vmatpush.bf16.msra.mxu2 %v6943_v3  ;;  %v3165_v3 = vld [vmem:[%s13799_s4] sm:$0xff] }
 0x6f4   : > { %v2877_v60 = vsel %vm1068_vm7, %v8245_v2, %v8250_v55  ;;  %v2878_v6 = vsel %vm1068_vm7, %v8246_v51, %v8251_v34 }
 0x6f5   : > { %v2883_v27 = vpack.c.bf16 %v2877_v60, %v2879_v28  ;;  %v2887_v48 = vpack.c.bf16 %v2878_v6, %v2880_v50  ;;  %v2688_v50 = vsel %vm874_vm9, %v13840_v52, %v8276_v54  ;;  %v2687_v28 = vsel %vm874_vm9, %v13839_v26, %v8275_v30 }
 0x6f6   : > { %v6906_v36 = vld [vmem:[#allocation2 + $0x180] sm:$0xf]  ;;  %v7471_v47 = vld [vmem:[#allocation2 + $0x184] sm:$0xf] }
 0x6f7   : > { %2891 = vst [vmem:[#allocation2 + $0x140] sm:$0xff] %v2883_v27  ;;  %8463 = vrot.lane.b32.xlu1 %v10994_v17, %s13909_s19  ;;  %v7475_v35 = vld [vmem:[#allocation2 + $0x19c] sm:$0xf0]  ;;  %v6908_v21 = vld [vmem:[#allocation2 + $0x1a0] sm:$0xf0] }
 0x6f8   : > { %2895 = vst [vmem:[#allocation2 + $0x160] sm:$0xff] %v2887_v48  ;;  %8483 = vrot.lane.b32.xlu2 %v10994_v17, %s13855_s18  ;;  %8488 = vrot.lane.b32.xlu0 %v10994_v17, %s13836_s28  ;;  %v6907_v20 = vor.u32 %v7475_v35, %v6906_v36  ;;  %v6911_v5 = vor.u32 %v7471_v47, %v6908_v21  ;;  %s13936_s18 = smov 96  }
 0x6f9   : > { %v11188_v31 = vpop.permute.xlu1 %8258 }
 0x6fa   : > { %v8261_v0 = vunpack.i.h.bf16 %v11188_v31  ;;  %v8260_v37 = vunpack.i.l.bf16 %v11188_v31  ;;  %v11194_v41 = vpop.permute.xlu2 %8318  ;;  %v11196_v38 = vpop.permute.xlu0 %8278  ;;  %3550 = vmatpush.bf16.msrb.mxu0 %v6907_v20  ;;  %3578 = vmatpush.bf16.msra.mxu2 %v6911_v5 }
 0x6fb   : > { %v8281_v29 = vunpack.i.h.bf16 %v11196_v38  ;;  %v8280_v15 = vunpack.i.l.bf16 %v11196_v38  ;;  %v8320_v57 = vunpack.i.l.bf16 %v11194_v41 }
 0x6fc   : > { %v2813_v46 = vsel %vm1003_vm8, %v8255_v63, %v8260_v37  ;;  %v2814_v51 = vsel %vm1003_vm8, %v8256_v14, %v8261_v0  ;;  %v8266_v14 = vunpack.i.h.bf16 %v11160_v24  ;;  %v8265_v63 = vunpack.i.l.bf16 %v11160_v24 }
 0x6fd   : > { %v2819_v2 = vpack.c.bf16 %v2813_v46, %v2815_v19  ;;  %v2823_v16 = vpack.c.bf16 %v2814_v51, %v2816_v18  ;;  %v2686_v60 = vsel %vm874_vm9, %v8276_v54, %v8281_v29  ;;  %v2685_v6 = vsel %vm874_vm9, %v8275_v30, %v8280_v15 }
 0x6fe   : > { %v6874_v27 = vld [vmem:[#allocation2 + $0x140] sm:$0xf]  ;;  %v7463_v48 = vld [vmem:[#allocation2 + $0x144] sm:$0xf]  ;;  %v2695_v36 = vpack.c.bf16 %v2686_v60, %v2688_v50  ;;  %v2691_v47 = vpack.c.bf16 %v2685_v6, %v2687_v28  ;;  %v13851_v30 = vunpack.i.h.bf16 %v11072_v11 }
 0x6ff   : > { %2827 = vst [vmem:[#allocation2 + $0x100] sm:$0xff] %v2819_v2  ;;  %8478 = vrot.lane.b32.xlu1 %v11016_v23, %s13911_s26  ;;  %v7467_v35 = vld [vmem:[#allocation2 + $0x15c] sm:$0xf0]  ;;  %v6876_v21 = vld [vmem:[#allocation2 + $0x160] sm:$0xf0]  ;;  %v13850_v23 = vunpack.i.l.bf16 %v11072_v11 }
 0x700   : > { %2831 = vst [vmem:[#allocation2 + $0x120] sm:$0xff] %v2823_v16  ;;  %8498 = vrot.lane.b32.xlu2 %v10994_v17, %s13911_s26  ;;  %3169 = vperm.xlu0 %7619, %v3165_v3   ;;  %v6875_v20 = vor.u32 %v7467_v35, %v6874_v27  ;;  %v6879_v5 = vor.u32 %v7463_v48, %v6876_v21  ;;  %v13838_v35 = vunpack.i.h.bf16 %v11062_v4  ;;  %v13841_v21 = vunpack.i.l.bf16 %v11062_v4 }
 0x701   : > { %2703 = vst [vmem:[#allocation2 + $0xa0] sm:$0xff] %v2695_v36  ;;  %v11243_v54 = vpop.permute.xlu1 %8268  ;;  %v2752_v51 = vsel %vm729_vm4, %v13851_v30, %v8266_v14  ;;  %v2751_v2 = vsel %vm729_vm4, %v13850_v23, %v8265_v63 }
 0x702   : > { %2699 = vst [vmem:[#allocation2 + $0x80] sm:$0xff] %v2691_v47  ;;  %v8271_v18 = vunpack.i.h.bf16 %v11243_v54  ;;  %v8270_v19 = vunpack.i.l.bf16 %v11243_v54  ;;  %v11249_v24 = vpop.permute.xlu2 %8333  ;;  %v11251_v46 = vpop.permute.xlu0 %8293  ;;  %3551 = vmatpush.bf16.msrb.mxu0 %v6875_v20  ;;  %3579 = vmatpush.bf16.msra.mxu2 %v6879_v5  ;;  %v8290_v20 = vunpack.i.l.bf16 %v11128_v43 }
 0x704   : > { %v2749_v16 = vsel %vm729_vm4, %v8265_v63, %v8270_v19  ;;  %v2750_v3 = vsel %vm729_vm4, %v8266_v14, %v8271_v18  ;;  %v8291_v14 = vunpack.i.h.bf16 %v11128_v43 }
 0x705   : > { %v2755_v50 = vpack.c.bf16 %v2749_v16, %v2751_v2  ;;  %v2759_v28 = vpack.c.bf16 %v2750_v3, %v2752_v51 }
 0x706   : > { %v6842_v60 = vld [vmem:[#allocation2 + $0x100] sm:$0xf]  ;;  %v7455_v6 = vld [vmem:[#allocation2 + $0x104] sm:$0xf] }
 0x707   : > { %2763 = vst [vmem:[#allocation2 + $0xc0] sm:$0xff] %v2755_v50  ;;  %8493 = vrot.lane.b32.xlu1 %v10994_v17, %s13857_s17  ;;  %v7459_v27 = vld [vmem:[#allocation2 + $0x11c] sm:$0xf0]  ;;  %v6844_v48 = vld [vmem:[#allocation2 + $0x120] sm:$0xf0]  ;;  %s13935_s17 = smov 127  }
 0x708   : > { %2767 = vst [vmem:[#allocation2 + $0xe0] sm:$0xff] %v2759_v28  ;;  %v6843_v36 = vor.u32 %v7459_v27, %v6842_v60  ;;  %v6847_v47 = vor.u32 %v7455_v6, %v6844_v48  ;;  %v3166_v60 = vld [vmem:[%s13799_s4 + $0x8] sm:$0xff] }
 0x709   : > { %v8284_v63 = vpop.permute.xlu1 %8283 }
 0x70a   : > { %v8286_v5 = vunpack.i.h.bf16 %v8284_v63  ;;  %v8285_v51 = vunpack.i.l.bf16 %v8284_v63  ;;  %v11275_v2 = vpop.permute.xlu2 %8348  ;;  %v11277_v16 = vpop.permute.xlu0 %8313  ;;  %3552 = vmatpush.bf16.msrb.mxu0 %v6843_v36  ;;  %3580 = vmatpush.bf16.msra.mxu2 %v6847_v47  ;;  %v8296_v47 = vunpack.i.h.bf16 %v11251_v46  ;;  %v8295_v63 = vunpack.i.l.bf16 %v11251_v46 }
 0x70c   : > { %v2624_v17 = vsel %vm664_vm3, %v13838_v35, %v8286_v5  ;;  %v2621_v3 = vsel %vm664_vm3, %v8285_v51, %v8290_v20  ;;  %v2622_v50 = vsel %vm664_vm3, %v8286_v5, %v8291_v14  ;;  %v2623_v28 = vsel %vm664_vm3, %v13841_v21, %v8285_v51  ;;  %v7443_v51 = vld [vmem:[#allocation2 + $0x9c] sm:$0xf0] }
 0x70d   : > { %v2627_v6 = vpack.c.bf16 %v2621_v3, %v2623_v28  ;;  %v2631_v27 = vpack.c.bf16 %v2622_v50, %v2624_v17  ;;  %v13845_v21 = vunpack.i.h.bf16 %v11082_v10  ;;  %v6778_v17 = vld [vmem:[#allocation2 + $0x80] sm:$0xf]  ;;  %v7439_v50 = vld [vmem:[#allocation2 + $0x84] sm:$0xf] }
 0x70e   : > { %v6810_v48 = vld [vmem:[#allocation2 + $0xc0] sm:$0xf]  ;;  %v7447_v36 = vld [vmem:[#allocation2 + $0xc4] sm:$0xf] }
 0x70f   : > { %2635 = vst [vmem:[#allocation2 + $0x40] sm:$0xff] %v2627_v6  ;;  %3174 = vperm.xlu1 %8020, %v3166_v60   ;;  %v7451_v5 = vld [vmem:[#allocation2 + $0xdc] sm:$0xf0]  ;;  %v6812_v35 = vld [vmem:[#allocation2 + $0xe0] sm:$0xf0] }
 0x710   : > { %2639 = vst [vmem:[#allocation2 + $0x60] sm:$0xff] %v2631_v27  ;;  %v6811_v26 = vor.u32 %v7451_v5, %v6810_v48  ;;  %v6815_v52 = vor.u32 %v7447_v36, %v6812_v35  ;;  %v6780_v28 = vld [vmem:[#allocation2 + $0xa0] sm:$0xf0]  ;;  %v3072_v35 = vsel %vm1263_vm10, %v13845_v21, %v8296_v47  ;;  %v3071_v27 = vsel %vm1263_vm10, %v13848_v33, %v8295_v63 }
 0x711   : > { %v11302_v3 = vpop.permute.xlu1 %8298  ;;  %v6783_v36 = vor.u32 %v7439_v50, %v6780_v28  ;;  %v7423_v33 = vld [vmem:[#allocation2 + $0x4] sm:$0xf] }
 0x712   : > { %v8301_v45 = vunpack.i.h.bf16 %v11302_v3  ;;  %v13854_v46 = vunpack.i.l.bf16 %v11302_v3  ;;  %v11306_v60 = vpop.permute.xlu2 %8368  ;;  %v11308_v6 = vpop.permute.xlu0 %8323  ;;  %3553 = vmatpush.bf16.msrb.mxu0 %v6811_v26  ;;  %3581 = vmatpush.bf16.msra.mxu2 %v6815_v52  ;;  %v6779_v26 = vor.u32 %v7443_v51, %v6778_v17  ;;  %v8350_v51 = vunpack.i.l.bf16 %v11275_v2 }
 0x714   : > { %v3069_v48 = vsel %vm1263_vm10, %v8295_v63, %v13854_v46  ;;  %v3070_v52 = vsel %vm1263_vm10, %v8296_v47, %v8301_v45  ;;  %v8351_v47 = vunpack.i.h.bf16 %v11275_v2 }
 0x715   : > { %v3075_v5 = vpack.c.bf16 %v3069_v48, %v3071_v27  ;;  %v3079_v1 = vpack.c.bf16 %v3070_v52, %v3072_v35  ;;  %v6708_v52 = vld [vmem:[%s13798_s3 + $0x8] sm:$0xf0] }
 0x716   : > { %3554 = vmatpush.bf16.msrb.mxu0 %v6779_v26  ;;  %3582 = vmatpush.bf16.msra.mxu2 %v6783_v36  ;;  %v6746_v21 = vld [vmem:[#allocation2 + $0x40] sm:$0xf]  ;;  %v7431_v49 = vld [vmem:[#allocation2 + $0x44] sm:$0xf] }
 0x717   : > { %3083 = vst [vmem:[#allocation2 + $0x200] sm:$0xff] %v3075_v5  ;;  %v7435_v59 = vld [vmem:[#allocation2 + $0x5c] sm:$0xf0]  ;;  %v6748_v23 = vld [vmem:[#allocation2 + $0x60] sm:$0xf0]  ;;  %v8306_v5 = vunpack.i.h.bf16 %v11158_v7 }
 0x718   : > { %3087 = vst [vmem:[#allocation2 + $0x220] sm:$0xff] %v3079_v1  ;;  %v6747_v63 = vor.u32 %v7435_v59, %v6746_v21  ;;  %v6751_v30 = vor.u32 %v7431_v49, %v6748_v23  ;;  %v6706_v59 = vld [vmem:[%s13798_s3] sm:$0xf]  ;;  %v7422_v49 = vld [vmem:[%s13798_s3 + $0x4] sm:$0xf0]  ;;  %v6715_v1 = vor.u32 %v7427_v39, %v6714_v12  ;;  %v6719_v23 = vor.u32 %v7423_v33, %v6716_v42 }
 0x719   : > { %v8309_v46 = vpop.permute.xlu1 %8308  ;;  %v11354_v39 = vor.u32 %v7422_v49, %v6706_v59  ;;  %v8371_v59 = vunpack.i.h.bf16 %v11306_v60  ;;  %v8370_v49 = vunpack.i.l.bf16 %v11306_v60 }
 0x71a   : > { %v8311_v17 = vunpack.i.h.bf16 %v8309_v46  ;;  %v8310_v50 = vunpack.i.l.bf16 %v8309_v46  ;;  %v11328_v28 = vpop.permute.xlu2 %8388  ;;  %v11330_v35 = vpop.permute.xlu0 %8338  ;;  %3555 = vmatpush.bf16.msrb.mxu0 %v6747_v63  ;;  %3583 = vmatpush.bf16.msra.mxu2 %v6751_v30  ;;  %v8305_v63 = vunpack.i.l.bf16 %v11158_v7 }
 0x71c   : > { %v2940_v21 = vsel %vm1133_vm6, %v8241_v61, %v8311_v17  ;;  %v2937_v30 = vsel %vm1133_vm6, %v8310_v50, %v8350_v51  ;;  %v2938_v46 = vsel %vm1133_vm6, %v8311_v17, %v8351_v47  ;;  %v2939_v12 = vsel %vm1133_vm6, %v8240_v56, %v8310_v50  ;;  %v7421_v61 = vld [vmem:[%s13798_s3 + $0x4] sm:$0xf] }
 0x71d   : > { %v2948_v33 = vpack.c.bf16 %v2937_v30, %v2939_v12  ;;  %v2952_v42 = vpack.c.bf16 %v2938_v46, %v2940_v21  ;;  %v11366_v50 = vor.u32 %v7421_v61, %v6708_v52  ;;  %v3004_v52 = vsel %vm1198_vm5, %v8231_v25, %v8306_v5 }
 0x71e   : > { %3556 = vmatpush.bf16.msrb.mxu0 %v6715_v1  ;;  %3584 = vmatpush.bf16.msra.mxu2 %v6719_v23  ;;  %v6970_v27 = vld [vmem:[#allocation2 + $0x200] sm:$0xf]  ;;  %v7487_v48 = vld [vmem:[#allocation2 + $0x204] sm:$0xf]  ;;  %v8321_v25 = vunpack.i.h.bf16 %v11194_v41 }
 0x71f   : > { %2956 = vst [vmem:[#allocation2 + $0x188] sm:$0xff] %v2948_v33  ;;  %v7491_v58 = vld [vmem:[#allocation2 + $0x21c] sm:$0xf0]  ;;  %v6972_v26 = vld [vmem:[#allocation2 + $0x220] sm:$0xf0] }
 0x720   : > { %2960 = vst [vmem:[#allocation2 + $0x1a8] sm:$0xff] %v2952_v42  ;;  %v6971_v56 = vor.u32 %v7491_v58, %v6970_v27  ;;  %v6975_v36 = vor.u32 %v7487_v48, %v6972_v26  ;;  %v8316_v26 = vunpack.i.h.bf16 %v11277_v16  ;;  %v2812_v41 = vsel %vm1003_vm8, %v8261_v0, %v8321_v25 }
 0x721   : > { %3557 = vmatmul.bf16.vlgmr.msrb.gmra.mxu0 %v11354_v39  ;;  %3585 = vmatmul.bf16.vlgmr.msra.gmra.mxu2 %v11354_v39  ;;  %v8329_v17 = vpop.permute.xlu1 %8328 }
 0x722   : > { %v8331_v1 = vunpack.i.h.bf16 %v8329_v17  ;;  %v8330_v23 = vunpack.i.l.bf16 %v8329_v17  ;;  %v11370_v21 = vpop.permute.xlu2 %8393  ;;  %v11372_v30 = vpop.permute.xlu0 %8343  ;;  %3570 = vmatpush.bf16.msra.mxu1 %v6971_v56  ;;  %3598 = vmatpush.bf16.msrb.mxu3 %v6975_v36  ;;  %v8315_v56 = vunpack.i.l.bf16 %v11277_v16  ;;  %v2811_v16 = vsel %vm1003_vm8, %v8260_v37, %v8320_v57 }
 0x723   : > { %v8346_v7 = vunpack.i.h.bf16 %v11372_v30  ;;  %v8345_v46 = vunpack.i.l.bf16 %v11372_v30 }
 0x724   : > { %v2681_v12 = vsel %vm874_vm9, %v8330_v23, %v8370_v49  ;;  %v2682_v33 = vsel %vm874_vm9, %v8331_v1, %v8371_v59  ;;  %v2683_v42 = vsel %vm874_vm9, %v8280_v15, %v8330_v23  ;;  %v2684_v61 = vsel %vm874_vm9, %v8281_v29, %v8331_v1 }
 0x725   : > { %v2692_v27 = vpack.c.bf16 %v2681_v12, %v2683_v42  ;;  %v2696_v48 = vpack.c.bf16 %v2682_v33, %v2684_v61  ;;  %7000 = vmatmul.msk.bf16.vlgmr.msra.gmra.mxu1 %vm1751_vm11, %v11366_v50  ;;  %v3003_v15 = vsel %vm1198_vm5, %v8230_v40, %v8305_v63  ;;  %v3002_v38 = vsel %vm1198_vm5, %v8306_v5, %v8346_v7 }
 0x726   : > { %v3001_v29 = vsel %vm1198_vm5, %v8305_v63, %v8345_v46  ;;  %7001 = vmatmul.msk.bf16.vlgmr.msrb.gmra.mxu3 %vm1751_vm11, %v11366_v50  ;;  %v3016_v58 = vpack.c.bf16 %v3002_v38, %v3004_v52  ;;  %v2876_v33 = vsel %vm1068_vm7, %v8251_v34, %v8316_v26  ;;  %v2875_v42 = vsel %vm1068_vm7, %v8250_v55, %v8315_v56 }
 0x727   : > { %2700 = vst [vmem:[#allocation2 + $0x88] sm:$0xff] %v2692_v27  ;;  %v3012_v40 = vpack.c.bf16 %v3001_v29, %v3003_v15  ;;  %v8326_v52 = vunpack.i.h.bf16 %v11308_v6  ;;  %v8325_v15 = vunpack.i.l.bf16 %v11308_v6 }
 0x728   : > { %2704 = vst [vmem:[#allocation2 + $0xa8] sm:$0xff] %v2696_v48  ;;  %v8335_v48 = vunpack.i.l.bf16 %v11249_v24 }
 0x729   : > { %3024 = vst [vmem:[#allocation2 + $0x1e8] sm:$0xff] %v3016_v58  ;;  %v11416_v36 = vpop.permute.xlu1 %8353  ;;  %v8336_v58 = vunpack.i.h.bf16 %v11249_v24 }
 0x72a   : > { %3020 = vst [vmem:[#allocation2 + $0x1c8] sm:$0xff] %v3012_v40  ;;  %v8356_v5 = vunpack.i.h.bf16 %v11416_v36  ;;  %v8355_v63 = vunpack.i.l.bf16 %v11416_v36  ;;  %v11420_v17 = vpop.permute.xlu2 %8418  ;;  %v11422_v1 = vpop.permute.xlu0 %8358  ;;  %v2619_v24 = vsel %vm664_vm3, %v8290_v20, %v8335_v48 }
 0x72b   : > { %v8361_v23 = vunpack.i.h.bf16 %v11422_v1  ;;  %v8360_v12 = vunpack.i.l.bf16 %v11422_v1  ;;  %v2620_v54 = vsel %vm664_vm3, %v8291_v14, %v8336_v58  ;;  %v8340_v14 = vunpack.i.l.bf16 %v11330_v35 }
 0x72c   : > { %v2873_v31 = vsel %vm1068_vm7, %v8315_v56, %v8355_v63  ;;  %v2874_v0 = vsel %vm1068_vm7, %v8316_v26, %v8356_v5  ;;  %v13916_v1 = vunpack.i.l.bf16 %v11072_v11 }
 0x72d   : > { %v2884_v37 = vpack.c.bf16 %v2873_v31, %v2875_v42  ;;  %v2888_v61 = vpack.c.bf16 %v2874_v0, %v2876_v33  ;;  %v2810_v22 = vsel %vm1003_vm8, %v8321_v25, %v8361_v23  ;;  %v2809_v34 = vsel %vm1003_vm8, %v8320_v57, %v8360_v12  ;;  %v6914_v42 = vld [vmem:[#allocation2 + $0x188] sm:$0xf] }
 0x72e   : > { %v2824_v55 = vpack.c.bf16 %v2810_v22, %v2812_v41  ;;  %v2820_v27 = vpack.c.bf16 %v2809_v34, %v2811_v16  ;;  %v2748_v31 = vsel %vm729_vm4, %v8271_v18, %v8326_v52  ;;  %v7472_v22 = vld [vmem:[#allocation2 + $0x18c] sm:$0xf] }
 0x72f   : > { %2892 = vst [vmem:[#allocation2 + $0x148] sm:$0xff] %v2884_v37  ;;  %v6916_v34 = vld [vmem:[#allocation2 + $0x1a8] sm:$0xf0] }
 0x730   : > { %2896 = vst [vmem:[#allocation2 + $0x168] sm:$0xff] %v2888_v61  ;;  %v7484_v38 = vld [vmem:[#allocation2 + $0x1e4] sm:$0xf0]  ;;  %v6948_v29 = vld [vmem:[#allocation2 + $0x1e8] sm:$0xf0] }
 0x731   : > { %2832 = vst [vmem:[#allocation2 + $0x128] sm:$0xff] %v2824_v55  ;;  %v11462_v25 = vpop.permute.xlu1 %8363  ;;  %v6946_v40 = vld [vmem:[#allocation2 + $0x1c8] sm:$0xf]  ;;  %v7480_v26 = vld [vmem:[#allocation2 + $0x1cc] sm:$0xf]  ;;  %v2747_v55 = vsel %vm729_vm4, %v8270_v19, %v8325_v15 }
 0x732   : > { %2828 = vst [vmem:[#allocation2 + $0x108] sm:$0xff] %v2820_v27  ;;  %v8366_v57 = vunpack.i.h.bf16 %v11462_v25  ;;  %v8365_v56 = vunpack.i.l.bf16 %v11462_v25  ;;  %v11466_v41 = vpop.permute.xlu2 %8423  ;;  %v11468_v16 = vpop.permute.xlu0 %8373  ;;  %v6947_v6 = vor.u32 %v7484_v38, %v6946_v40  ;;  %v6951_v33 = vor.u32 %v7480_v26, %v6948_v29  ;;  %v7476_v61 = vld [vmem:[#allocation2 + $0x1a4] sm:$0xf0] }
 0x733   : > { %v13861_v0 = vunpack.i.h.bf16 %v11468_v16  ;;  %v13862_v37 = vunpack.i.l.bf16 %v11468_v16  ;;  %v8341_v27 = vunpack.i.h.bf16 %v11330_v35  ;;  %v6915_v29 = vor.u32 %v7476_v61, %v6914_v42 }
 0x734   : > { %v2745_v20 = vsel %vm729_vm4, %v8325_v15, %v8365_v56  ;;  %v2746_v18 = vsel %vm729_vm4, %v8326_v52, %v8366_v57  ;;  %3605 = vmatpush.bf16.msrb.mxu1 %v6947_v6  ;;  %3633 = vmatpush.bf16.msra.mxu0 %v6951_v33  ;;  %v6919_v40 = vor.u32 %v7472_v22, %v6916_v34  ;;  %v8395_v6 = vunpack.i.l.bf16 %v11370_v21 }
 0x735   : > { %v2756_v19 = vpack.c.bf16 %v2745_v20, %v2747_v55  ;;  %v2760_v38 = vpack.c.bf16 %v2746_v18, %v2748_v31  ;;  %v2618_v15 = vsel %vm664_vm3, %v8336_v58, %v13861_v0  ;;  %v2617_v52 = vsel %vm664_vm3, %v8335_v48, %v13862_v37 }
 0x736   : > { %v6882_v43 = vld [vmem:[#allocation2 + $0x148] sm:$0xf]  ;;  %v7464_v26 = vld [vmem:[#allocation2 + $0x14c] sm:$0xf]  ;;  %v2632_v33 = vpack.c.bf16 %v2618_v15, %v2620_v54  ;;  %v2628_v31 = vpack.c.bf16 %v2617_v52, %v2619_v24  ;;  %v8396_v58 = vunpack.i.h.bf16 %v11370_v21  ;;  %v3068_v35 = vsel %vm1263_vm10, %v8301_v45, %v8341_v27 }
 0x737   : > { %2764 = vst [vmem:[#allocation2 + $0xc8] sm:$0xff] %v2756_v19  ;;  %v7468_v55 = vld [vmem:[#allocation2 + $0x164] sm:$0xf0]  ;;  %v6884_v20 = vld [vmem:[#allocation2 + $0x168] sm:$0xf0]  ;;  %v13912_v54 = vunpack.i.l.bf16 %v11302_v3  ;;  %v2935_v45 = vsel %vm1133_vm6, %v8350_v51, %v8395_v6 }
 0x738   : > { %2768 = vst [vmem:[#allocation2 + $0xe8] sm:$0xff] %v2760_v38  ;;  %3606 = vmatpush.bf16.msrb.mxu1 %v6915_v29  ;;  %3634 = vmatpush.bf16.msra.mxu0 %v6919_v40  ;;  %v6883_v18 = vor.u32 %v7468_v55, %v6882_v43  ;;  %v6887_v48 = vor.u32 %v7464_v26, %v6884_v20  ;;  %v7460_v34 = vld [vmem:[#allocation2 + $0x124] sm:$0xf0]  ;;  %v6852_v40 = vld [vmem:[#allocation2 + $0x128] sm:$0xf0] }
 0x739   : > { %2640 = vst [vmem:[#allocation2 + $0x68] sm:$0xff] %v2632_v33  ;;  %v11508_v42 = vpop.permute.xlu1 %8378  ;;  %v3067_v19 = vsel %vm1263_vm10, %v13912_v54, %v8340_v14  ;;  %v6850_v52 = vld [vmem:[#allocation2 + $0x108] sm:$0xf]  ;;  %v7456_v29 = vld [vmem:[#allocation2 + $0x10c] sm:$0xf]  ;;  %v2936_v3 = vsel %vm1133_vm6, %v8351_v47, %v8396_v58 }
 0x73a   : > { %2636 = vst [vmem:[#allocation2 + $0x48] sm:$0xff] %v2628_v31  ;;  %v13860_v24 = vunpack.i.h.bf16 %v11508_v42  ;;  %v13859_v61 = vunpack.i.l.bf16 %v11508_v42  ;;  %v11516_v22 = vpop.permute.xlu2 %8438  ;;  %v11518_v21 = vpop.permute.xlu0 %8398  ;;  %v6851_v55 = vor.u32 %v7460_v34, %v6850_v52  ;;  %v6855_v20 = vor.u32 %v7456_v29, %v6852_v40  ;;  %v11554_v40 = vld [vmem:[#allocation2 + $0x8] sm:$0xf] }
 0x73b   : > { %v13863_v38 = vunpack.i.h.bf16 %v11518_v21  ;;  %v8400_v15 = vunpack.i.l.bf16 %v11518_v21 }
 0x73c   : > { %v3065_v43 = vsel %vm1263_vm10, %v8340_v14, %v13859_v61  ;;  %v3066_v51 = vsel %vm1263_vm10, %v8341_v27, %v13860_v24  ;;  %3607 = vmatpush.bf16.msrb.mxu1 %v6883_v18  ;;  %3635 = vmatpush.bf16.msra.mxu0 %v6887_v48 }
 0x73d   : > { %v3076_v26 = vpack.c.bf16 %v3065_v43, %v3067_v19  ;;  %v3080_v33 = vpack.c.bf16 %v3066_v51, %v3068_v35  ;;  %v2934_v2 = vsel %vm1133_vm6, %v8396_v58, %v13863_v38  ;;  %v2933_v47 = vsel %vm1133_vm6, %v8395_v6, %v8400_v15  ;;  %v6786_v51 = vld [vmem:[#allocation2 + $0x88] sm:$0xf] }
 0x73e   : > { %v2953_v14 = vpack.c.bf16 %v2934_v2, %v2936_v3  ;;  %v2949_v31 = vpack.c.bf16 %v2933_v47, %v2935_v45  ;;  %v6818_v54 = vld [vmem:[#allocation2 + $0xc8] sm:$0xf]  ;;  %v7448_v27 = vld [vmem:[#allocation2 + $0xcc] sm:$0xf]  ;;  %v8391_v43 = vunpack.i.h.bf16 %v11328_v28  ;;  %v8390_v6 = vunpack.i.l.bf16 %v11328_v28 }
 0x73f   : > { %3084 = vst [vmem:[#allocation2 + $0x208] sm:$0xff] %v3076_v26  ;;  %v7452_v18 = vld [vmem:[#allocation2 + $0xe4] sm:$0xf0]  ;;  %v6820_v48 = vld [vmem:[#allocation2 + $0xe8] sm:$0xf0]  ;;  %v8441_v28 = vunpack.i.h.bf16 %v11516_v22 }
 0x740   : > { %3088 = vst [vmem:[#allocation2 + $0x228] sm:$0xff] %v3080_v33  ;;  %3608 = vmatpush.bf16.msrb.mxu1 %v6851_v55  ;;  %3636 = vmatpush.bf16.msra.mxu0 %v6855_v20  ;;  %v6819_v35 = vor.u32 %v7452_v18, %v6818_v54  ;;  %v6823_v19 = vor.u32 %v7448_v27, %v6820_v48  ;;  %v11556_v3 = vld [vmem:[#allocation2 + $0xc] sm:$0xf]  ;;  %v7444_v26 = vld [vmem:[#allocation2 + $0xa4] sm:$0xf0]  ;;  %v8426_v27 = vunpack.i.h.bf16 %v11466_v41 }
 0x741   : > { %2961 = vst [vmem:[#allocation2 + $0x1b0] sm:$0xff] %v2953_v14  ;;  %v8384_v58 = vpop.permute.xlu1 %8383  ;;  %v11558_v33 = vld [vmem:[#allocation2 + $0x24] sm:$0xf0]  ;;  %v7440_v55 = vld [vmem:[#allocation2 + $0x8c] sm:$0xf]  ;;  %v6787_v0 = vor.u32 %v7444_v26, %v6786_v51  ;;  %v8421_v51 = vunpack.i.h.bf16 %v11420_v17  ;;  %v8420_v26 = vunpack.i.l.bf16 %v11420_v17 }
 0x742   : > { %2957 = vst [vmem:[#allocation2 + $0x190] sm:$0xff] %v2949_v31  ;;  %v8386_v45 = vunpack.i.h.bf16 %v8384_v58  ;;  %v8385_v34 = vunpack.i.l.bf16 %v8384_v58  ;;  %v11552_v52 = vpop.permute.xlu2 %8453  ;;  %v8404_v29 = vpop.permute.xlu0 %8403  ;;  %v6788_v20 = vld [vmem:[#allocation2 + $0xa8] sm:$0xf0]  ;;  %v6754_v58 = vld [vmem:[#allocation2 + $0x48] sm:$0xf] }
 0x743   : > { %v11576_v54 = vld [vmem:[#allocation2 + $0x28] sm:$0xf0]  ;;  %v7436_v61 = vld [vmem:[#allocation2 + $0x64] sm:$0xf0]  ;;  %v6791_v37 = vor.u32 %v7440_v55, %v6788_v20 }
 0x744   : > { %v2997_v2 = vsel %vm1198_vm5, %v8385_v34, %v8390_v6  ;;  %v2998_v47 = vsel %vm1198_vm5, %v8386_v45, %v8391_v43  ;;  %v2999_v14 = vsel %vm1198_vm5, %v8345_v46, %v8385_v34  ;;  %v3000_v31 = vsel %vm1198_vm5, %v8346_v7, %v8386_v45  ;;  %3609 = vmatpush.bf16.msrb.mxu1 %v6819_v35  ;;  %v6756_v24 = vld [vmem:[#allocation2 + $0x68] sm:$0xf0] }
 0x745   : > { %v3013_v18 = vpack.c.bf16 %v2997_v2, %v2999_v14  ;;  %v3017_v48 = vpack.c.bf16 %v2998_v47, %v3000_v31  ;;  %3637 = vmatpush.bf16.msra.mxu0 %v6823_v19  ;;  %v7432_v34 = vld [vmem:[#allocation2 + $0x4c] sm:$0xf]  ;;  %v6723_v45 = vor.u32 %v11558_v33, %v11554_v40  ;;  %v6727_v38 = vor.u32 %v11556_v3, %v11576_v54 }
 0x746   : > { %v6978_v46 = vld [vmem:[#allocation2 + $0x208] sm:$0xf]  ;;  %v7488_v30 = vld [vmem:[#allocation2 + $0x20c] sm:$0xf]  ;;  %v8406_v2 = vunpack.i.h.bf16 %v8404_v29  ;;  %v8405_v19 = vunpack.i.l.bf16 %v8404_v29  ;;  %v2744_v31 = vsel %vm729_vm4, %v8366_v57, %v8426_v27  ;;  %v8425_v40 = vunpack.i.l.bf16 %v11466_v41 }
 0x747   : > { %3021 = vst [vmem:[#allocation2 + $0x1d0] sm:$0xff] %v3013_v18  ;;  %v7492_v7 = vld [vmem:[#allocation2 + $0x224] sm:$0xf0]  ;;  %v6980_v35 = vld [vmem:[#allocation2 + $0x228] sm:$0xf0]  ;;  %v6755_v20 = vor.u32 %v7436_v61, %v6754_v58  ;;  %v6759_v54 = vor.u32 %v7432_v34, %v6756_v24 }
 0x748   : > { %3025 = vst [vmem:[#allocation2 + $0x1f0] sm:$0xff] %v3017_v48  ;;  %3610 = vmatpush.bf16.msrb.mxu1 %v6787_v0  ;;  %v6979_v47 = vor.u32 %v7492_v7, %v6978_v46  ;;  %v6983_v14 = vor.u32 %v7488_v30, %v6980_v35  ;;  %v2871_v46 = vsel %vm1068_vm7, %v8355_v63, %v8405_v19  ;;  %v7477_v7 = vld [vmem:[#allocation2 + $0x1ac] sm:$0xf0]  ;;  %v11622_v35 = vld [vmem:[#allocation2 + $0x1b0] sm:$0xf0] }
 0x749   : > { %3638 = vmatpush.bf16.msra.mxu0 %v6791_v37  ;;  %v11590_v33 = vpop.permute.xlu1 %8408  ;;  %v2872_v37 = vsel %vm1068_vm7, %v8356_v5, %v8406_v2  ;;  %v13913_v5 = vunpack.i.h.bf16 %v11064_v13  ;;  %v6922_v30 = vld [vmem:[#allocation2 + $0x190] sm:$0xf] }
 0x74a   : > { %v13864_v3 = vunpack.i.h.bf16 %v11590_v33  ;;  %v8410_v0 = vunpack.i.l.bf16 %v11590_v33  ;;  %v8469_v29 = vpop.permute.xlu2 %8468  ;;  %v11594_v55 = vpop.permute.xlu0 %8428  ;;  %3626 = vmatpush.bf16.msra.mxu3 %v6979_v47  ;;  %3654 = vmatpush.bf16.msrb.mxu2 %v6983_v14 }
 0x74b   : > { %v8471_v18 = vunpack.i.h.bf16 %v8469_v29  ;;  %v8470_v48 = vunpack.i.l.bf16 %v8469_v29  ;;  %v8431_v57 = vunpack.i.h.bf16 %v11594_v55  ;;  %v8430_v41 = vunpack.i.l.bf16 %v11594_v55 }
 0x74c   : > { %v2869_v24 = vsel %vm1068_vm7, %v8405_v19, %v8410_v0  ;;  %v2870_v61 = vsel %vm1068_vm7, %v8406_v2, %v13864_v3  ;;  %3611 = vmatpush.bf16.msrb.mxu1 %v6755_v20  ;;  %v13914_v19 = vunpack.i.l.bf16 %v11064_v13  ;;  %v2743_v13 = vsel %vm729_vm4, %v8365_v56, %v8425_v40 }
 0x74d   : > { %v2885_v58 = vpack.c.bf16 %v2869_v24, %v2871_v46  ;;  %v2889_v34 = vpack.c.bf16 %v2870_v61, %v2872_v37  ;;  %v2818_v36 = vsel %vm1003_vm8, %v8471_v18, %v13913_v5  ;;  %v2803_v63 = vsel %vm1003_vm8, %v8420_v26, %v8470_v48  ;;  %3639 = vmatpush.bf16.msra.mxu0 %v6759_v54  ;;  %v7473_v37 = vld [vmem:[#allocation2 + $0x194] sm:$0xf] }
 0x74e   : > { %v2804_v2 = vsel %vm1003_vm8, %v8421_v51, %v8471_v18  ;;  %v2817_v47 = vsel %vm1003_vm8, %v8470_v48, %v13914_v19  ;;  %v2742_v14 = vsel %vm729_vm4, %v8426_v27, %v8431_v57  ;;  %v2741_v29 = vsel %vm729_vm4, %v8425_v40, %v8430_v41  ;;  %7002 = vmatmul.msk.bf16.vlgmr.msra.gmra.mxu3 %vm1751_vm11, %v11366_v50  ;;  %v6954_v20 = vld [vmem:[#allocation2 + $0x1d0] sm:$0xf]  ;;  %v7481_v54 = vld [vmem:[#allocation2 + $0x1d4] sm:$0xf] }
 0x74f   : > { %2893 = vst [vmem:[#allocation2 + $0x150] sm:$0xff] %v2885_v58  ;;  %v2822_v18 = vpack.c.bf16 %v2817_v47, %v2803_v63  ;;  %v2826_v48 = vpack.c.bf16 %v2818_v36, %v2804_v2  ;;  %v2761_v46 = vpack.c.bf16 %v2742_v14, %v2744_v31  ;;  %v7485_v24 = vld [vmem:[#allocation2 + $0x1ec] sm:$0xf0]  ;;  %v6956_v27 = vld [vmem:[#allocation2 + $0x1f0] sm:$0xf0]  ;;  %v2757_v61 = vpack.c.bf16 %v2741_v29, %v2743_v13 }
 0x750   : > { %2897 = vst [vmem:[#allocation2 + $0x170] sm:$0xff] %v2889_v34  ;;  %7003 = vmatmul.msk.bf16.vlgmr.msrb.gmra.mxu2 %vm1751_vm11, %v11366_v50  ;;  %3612 = vmatpush.bf16.msrb.mxu1 %v6723_v45  ;;  %v6955_v5 = vor.u32 %v7485_v24, %v6954_v20  ;;  %v6959_v19 = vor.u32 %v7481_v54, %v6956_v27  ;;  %v13915_v14 = vunpack.i.h.bf16 %v11072_v11  ;;  %v13917_v55 = vunpack.i.h.bf16 %v11044_v8 }
 0x751   : > { %2830 = vst [vmem:[#allocation2 + $0x118] sm:$0xff] %v2822_v18  ;;  %3640 = vmatpush.bf16.msra.mxu0 %v6727_v38  ;;  %v8414_v25 = vpop.permute.xlu1 %8413  ;;  %v6923_v31 = vor.u32 %v7477_v7, %v6922_v30  ;;  %v6927_v34 = vor.u32 %v7473_v37, %v11622_v35  ;;  %v13918_v18 = vunpack.i.l.bf16 %v11044_v8 }
 0x752   : > { %2834 = vst [vmem:[#allocation2 + $0x138] sm:$0xff] %v2826_v48  ;;  %v8416_v3 = vunpack.i.h.bf16 %v8414_v25  ;;  %v8415_v56 = vunpack.i.l.bf16 %v8414_v25  ;;  %v8484_v40 = vpop.permute.xlu2 %8483  ;;  %v8444_v58 = vpop.permute.xlu0 %8443  ;;  %3661 = vmatpush.bf16.msrb.mxu3 %v6955_v5  ;;  %3689 = vmatpush.bf16.msra.mxu2 %v6959_v19  ;;  %v8440_v5 = vunpack.i.l.bf16 %v11516_v22 }
 0x753   : > { %2769 = vst [vmem:[#allocation2 + $0xf0] sm:$0xff] %v2761_v46  ;;  %3613 = vmatmul.bf16.vlgmr.msrb.gmra.mxu1 %v11354_v39  ;;  %v8486_v36 = vunpack.i.h.bf16 %v8484_v40  ;;  %v8485_v45 = vunpack.i.l.bf16 %v8484_v40  ;;  %v8446_v63 = vunpack.i.h.bf16 %v8444_v58  ;;  %v8445_v2 = vunpack.i.l.bf16 %v8444_v58 }
 0x754   : > { %2765 = vst [vmem:[#allocation2 + $0xd0] sm:$0xff] %v2757_v61  ;;  %3641 = vmatmul.bf16.vlgmr.msra.gmra.mxu0 %v11354_v39  ;;  %v2805_v38 = vsel %vm1003_vm8, %v8415_v56, %v8420_v26  ;;  %v2806_v30 = vsel %vm1003_vm8, %v8416_v3, %v8421_v51  ;;  %v2807_v7 = vsel %vm1003_vm8, %v8360_v12, %v8415_v56 }
 0x755   : > { %v2808_v35 = vsel %vm1003_vm8, %v8361_v23, %v8416_v3  ;;  %v2821_v47 = vpack.c.bf16 %v2805_v38, %v2807_v7  ;;  %v2754_v26 = vsel %vm729_vm4, %v8486_v36, %v13915_v14  ;;  %v2739_v17 = vsel %vm729_vm4, %v8430_v41, %v8485_v45 }
 0x756   : > { %v2825_v51 = vpack.c.bf16 %v2806_v30, %v2808_v35  ;;  %v2740_v12 = vsel %vm729_vm4, %v8431_v57, %v8486_v36  ;;  %v2753_v23 = vsel %vm729_vm4, %v8485_v45, %v13916_v1  ;;  %v2996_v3 = vsel %vm1198_vm5, %v8391_v43, %v8446_v63  ;;  %3662 = vmatpush.bf16.msrb.mxu3 %v6923_v31  ;;  %v6890_v29 = vld [vmem:[#allocation2 + $0x150] sm:$0xf]  ;;  %v7465_v20 = vld [vmem:[#allocation2 + $0x154] sm:$0xf] }
 0x757   : > { %2829 = vst [vmem:[#allocation2 + $0x110] sm:$0xff] %v2821_v47  ;;  %v2758_v41 = vpack.c.bf16 %v2753_v23, %v2739_v17  ;;  %v2762_v54 = vpack.c.bf16 %v2754_v26, %v2740_v12  ;;  %v3010_v57 = vsel %vm1198_vm5, %v8446_v63, %v13917_v55  ;;  %v2995_v11 = vsel %vm1198_vm5, %v8390_v6, %v8445_v2  ;;  %v7469_v37 = vld [vmem:[#allocation2 + $0x16c] sm:$0xf0]  ;;  %v6892_v13 = vld [vmem:[#allocation2 + $0x170] sm:$0xf0] }
 0x758   : > { %2833 = vst [vmem:[#allocation2 + $0x130] sm:$0xff] %v2825_v51  ;;  %v3018_v43 = vpack.c.bf16 %v3010_v57, %v2996_v3  ;;  %v3009_v48 = vsel %vm1198_vm5, %v8445_v2, %v13918_v18  ;;  %3690 = vmatpush.bf16.msra.mxu2 %v6927_v34  ;;  %v6891_v46 = vor.u32 %v7469_v37, %v6890_v29  ;;  %v13919_v63 = vunpack.i.h.bf16 %v11049_v53 }
 0x759   : > { %2766 = vst [vmem:[#allocation2 + $0xd8] sm:$0xff] %v2758_v41  ;;  %v3014_v24 = vpack.c.bf16 %v3009_v48, %v2995_v11  ;;  %v8434_v27 = vpop.permute.xlu1 %8433  ;;  %v6895_v61 = vor.u32 %v7465_v20, %v6892_v13  ;;  %v8455_v29 = vunpack.i.l.bf16 %v11552_v52  ;;  %v13922_v13 = vunpack.i.l.bf16 %v11468_v16 }
 0x75a   : > { %2770 = vst [vmem:[#allocation2 + $0xf8] sm:$0xff] %v2762_v54  ;;  %v8436_v6 = vunpack.i.h.bf16 %v8434_v27  ;;  %v8435_v19 = vunpack.i.l.bf16 %v8434_v27  ;;  %v8459_v25 = vpop.permute.xlu0 %8458  ;;  %3663 = vmatpush.bf16.msrb.mxu3 %v6891_v46  ;;  %v7453_v47 = vld [vmem:[#allocation2 + $0xec] sm:$0xf0]  ;;  %v6828_v14 = vld [vmem:[#allocation2 + $0xf0] sm:$0xf0]  ;;  %v13923_v18 = vunpack.i.h.bf16 %v11468_v16 }
 0x75b   : > { %3026 = vst [vmem:[#allocation2 + $0x1f8] sm:$0xff] %v3018_v43  ;;  %v8461_v8 = vunpack.i.h.bf16 %v8459_v25  ;;  %v8460_v56 = vunpack.i.l.bf16 %v8459_v25  ;;  %v6826_v1 = vld [vmem:[#allocation2 + $0xd0] sm:$0xf]  ;;  %v7449_v23 = vld [vmem:[#allocation2 + $0xd4] sm:$0xf] }
 0x75c   : > { %3022 = vst [vmem:[#allocation2 + $0x1d8] sm:$0xff] %v3014_v24  ;;  %v2677_v40 = vsel %vm874_vm9, %v8435_v19, %v8440_v5  ;;  %v2678_v58 = vsel %vm874_vm9, %v8436_v6, %v8441_v28  ;;  %v2679_v31 = vsel %vm874_vm9, %v8370_v49, %v8435_v19  ;;  %v2680_v34 = vsel %vm874_vm9, %v8371_v59, %v8436_v6 }
 0x75d   : > { %v2693_v36 = vpack.c.bf16 %v2677_v40, %v2679_v31  ;;  %v2697_v45 = vpack.c.bf16 %v2678_v58, %v2680_v34  ;;  %3691 = vmatpush.bf16.msra.mxu2 %v6895_v61  ;;  %v2946_v2 = vsel %vm1133_vm6, %v8461_v8, %v13919_v63  ;;  %v2931_v38 = vsel %vm1133_vm6, %v8400_v15, %v8460_v56 }
 0x75e   : > { %v13920_v49 = vunpack.i.h.bf16 %v11518_v21  ;;  %v13921_v59 = vunpack.i.l.bf16 %v11049_v53  ;;  %v6858_v7 = vld [vmem:[#allocation2 + $0x110] sm:$0xf]  ;;  %v7457_v35 = vld [vmem:[#allocation2 + $0x114] sm:$0xf]  ;;  %v8456_v53 = vunpack.i.h.bf16 %v11552_v52  ;;  %v6827_v55 = vor.u32 %v7453_v47, %v6826_v1 }
 0x75f   : > { %2701 = vst [vmem:[#allocation2 + $0x90] sm:$0xff] %v2693_v36  ;;  %v7461_v51 = vld [vmem:[#allocation2 + $0x12c] sm:$0xf0]  ;;  %v6860_v12 = vld [vmem:[#allocation2 + $0x130] sm:$0xf0]  ;;  %v6831_v57 = vor.u32 %v7449_v23, %v6828_v14  ;;  %v8499_v36 = vpop.permute.xlu2 %8498  ;;  %v13927_v47 = vunpack.i.h.bf16 %v11080_v62 }
 0x760   : > { %v2932_v60 = vsel %vm1133_vm6, %v13920_v49, %v8461_v8  ;;  %v2945_v30 = vsel %vm1133_vm6, %v8460_v56, %v13921_v59  ;;  %2705 = vst [vmem:[#allocation2 + $0xb0] sm:$0xff] %v2697_v45  ;;  %v6859_v15 = vor.u32 %v7461_v51, %v6858_v7  ;;  %v6863_v21 = vor.u32 %v7457_v35, %v6860_v12 }
 0x761   : > { %v2950_v26 = vpack.c.bf16 %v2945_v30, %v2931_v38  ;;  %v2954_v17 = vpack.c.bf16 %v2946_v2, %v2932_v60  ;;  %v8449_v3 = vpop.permute.xlu1 %8448  ;;  %v13924_v45 = vunpack.i.h.bf16 %v11055_v44  ;;  %v13925_v38 = vunpack.i.h.bf16 %v11590_v33 }
 0x762   : > { %v8451_v20 = vunpack.i.h.bf16 %v8449_v3  ;;  %v8450_v41 = vunpack.i.l.bf16 %v8449_v3  ;;  %v11731_v54 = vpop.permute.xlu0 %8473  ;;  %3664 = vmatpush.bf16.msrb.mxu3 %v6859_v15  ;;  %3692 = vmatpush.bf16.msra.mxu2 %v6863_v21  ;;  %v13926_v60 = vunpack.i.l.bf16 %v11055_v44  ;;  %v8500_v15 = vunpack.i.l.bf16 %v8499_v36 }
 0x763   : > { %2958 = vst [vmem:[#allocation2 + $0x198] sm:$0xff] %v2950_v26  ;;  %v13928_v26 = vunpack.i.l.bf16 %v11080_v62  ;;  %v8476_v21 = vunpack.i.h.bf16 %v11731_v54  ;;  %v8475_v1 = vunpack.i.l.bf16 %v11731_v54  ;;  %v6732_v62 = vld [vmem:[#allocation2 + $0x30] sm:$0xf0]  ;;  %v13929_v54 = vunpack.i.l.bf16 %v11082_v10 }
 0x764   : > { %2962 = vst [vmem:[#allocation2 + $0x1b8] sm:$0xff] %v2954_v17  ;;  %v2613_v11 = vsel %vm664_vm3, %v8450_v41, %v8455_v29  ;;  %v2614_v37 = vsel %vm664_vm3, %v8451_v20, %v8456_v53  ;;  %v2615_v43 = vsel %vm664_vm3, %v13922_v13, %v8450_v41  ;;  %v2616_v48 = vsel %vm664_vm3, %v13923_v18, %v8451_v20  ;;  %v7425_v41 = vld [vmem:[#allocation2 + $0x14] sm:$0xf] }
 0x765   : > { %v2629_v46 = vpack.c.bf16 %v2613_v11, %v2615_v43  ;;  %v2633_v24 = vpack.c.bf16 %v2614_v37, %v2616_v48  ;;  %v3073_v43 = vsel %vm1263_vm10, %v8500_v15, %v13929_v54  ;;  %v13930_v18 = vunpack.i.h.bf16 %v11508_v42  ;;  %v7458_v54 = vld [vmem:[#allocation2 + $0x11c] sm:$0xf] }
 0x766   : > { %3665 = vmatpush.bf16.msrb.mxu3 %v6827_v55  ;;  %3693 = vmatpush.bf16.msra.mxu2 %v6831_v57  ;;  %v6794_v27 = vld [vmem:[#allocation2 + $0x90] sm:$0xf]  ;;  %v7441_v61 = vld [vmem:[#allocation2 + $0x94] sm:$0xf]  ;;  %v8501_v55 = vunpack.i.h.bf16 %v8499_v36  ;;  %v13933_v36 = vunpack.i.h.bf16 %v11062_v4 }
 0x767   : > { %2637 = vst [vmem:[#allocation2 + $0x50] sm:$0xff] %v2629_v46  ;;  %v7445_v6 = vld [vmem:[#allocation2 + $0xac] sm:$0xf0]  ;;  %v6796_v19 = vld [vmem:[#allocation2 + $0xb0] sm:$0xf0]  ;;  %v3064_v48 = vsel %vm1263_vm10, %v13930_v18, %v8476_v21  ;;  %v13931_v46 = vunpack.i.l.bf16 %v11508_v42 }
 0x768   : > { %2641 = vst [vmem:[#allocation2 + $0x70] sm:$0xff] %v2633_v24  ;;  %v6795_v25 = vor.u32 %v7445_v6, %v6794_v27  ;;  %v6799_v8 = vor.u32 %v7441_v61, %v6796_v19  ;;  %v6735_v27 = vor.u32 %v7425_v41, %v6732_v62 }
 0x769   : > { %v8464_v56 = vpop.permute.xlu1 %8463  ;;  %v3063_v24 = vsel %vm1263_vm10, %v13931_v46, %v8475_v1  ;;  %v6834_v46 = vld [vmem:[#allocation2 + $0xd8] sm:$0xf] }
 0x76a   : > { %v8466_v40 = vunpack.i.h.bf16 %v8464_v56  ;;  %v8465_v58 = vunpack.i.l.bf16 %v8464_v56  ;;  %v8489_v31 = vpop.permute.xlu0 %8488  ;;  %3666 = vmatpush.bf16.msrb.mxu3 %v6795_v25  ;;  %3694 = vmatpush.bf16.msra.mxu2 %v6799_v8  ;;  %v13932_v8 = vunpack.i.h.bf16 %v11082_v10 }
 0x76b   : > { %v8491_v16 = vunpack.i.h.bf16 %v8489_v31  ;;  %v8490_v34 = vunpack.i.l.bf16 %v8489_v31 }
 0x76c   : > { %v2882_v63 = vsel %vm1068_vm7, %v8466_v40, %v13924_v45  ;;  %v2867_v2 = vsel %vm1068_vm7, %v8410_v0, %v8465_v58  ;;  %v2868_v49 = vsel %vm1068_vm7, %v13925_v38, %v8466_v40  ;;  %v2881_v59 = vsel %vm1068_vm7, %v8465_v58, %v13926_v60  ;;  %v6730_v0 = vld [vmem:[#allocation2 + $0x10] sm:$0xf] }
 0x76d   : > { %v2886_v30 = vpack.c.bf16 %v2881_v59, %v2867_v2  ;;  %v2890_v7 = vpack.c.bf16 %v2882_v63, %v2868_v49  ;;  %v2676_v35 = vsel %vm874_vm9, %v8441_v28, %v8491_v16  ;;  %v2690_v33 = vsel %vm874_vm9, %v8491_v16, %v13927_v47  ;;  %v7429_v28 = vld [vmem:[#allocation2 + $0x2c] sm:$0xf0]  ;;  %v7486_v47 = vld [vmem:[#allocation2 + $0x1f4] sm:$0xf0] }
 0x76e   : > { %v2698_v14 = vpack.c.bf16 %v2690_v33, %v2676_v35  ;;  %v2675_v44 = vsel %vm874_vm9, %v8440_v5, %v8490_v34  ;;  %v2689_v17 = vsel %vm874_vm9, %v8490_v34, %v13928_v26  ;;  %v6762_v51 = vld [vmem:[#allocation2 + $0x50] sm:$0xf]  ;;  %v7433_v12 = vld [vmem:[#allocation2 + $0x54] sm:$0xf]  ;;  %v6731_v13 = vor.u32 %v7429_v28, %v6730_v0  ;;  %v6962_v35 = vld [vmem:[#allocation2 + $0x1d8] sm:$0xf] }
 0x76f   : > { %2894 = vst [vmem:[#allocation2 + $0x158] sm:$0xff] %v2886_v30  ;;  %v2694_v23 = vpack.c.bf16 %v2689_v17, %v2675_v44  ;;  %v7437_v3 = vld [vmem:[#allocation2 + $0x6c] sm:$0xf0]  ;;  %v6764_v22 = vld [vmem:[#allocation2 + $0x70] sm:$0xf0]  ;;  %v3074_v42 = vsel %vm1263_vm10, %v8501_v55, %v13932_v8  ;;  %v13934_v38 = vunpack.i.l.bf16 %v11062_v4  ;;  %v6963_v28 = vor.u32 %v7486_v47, %v6962_v35 }
 0x770   : > { %2898 = vst [vmem:[#allocation2 + $0x178] sm:$0xff] %v2890_v7  ;;  %v6763_v20 = vor.u32 %v7437_v3, %v6762_v51  ;;  %v6767_v5 = vor.u32 %v7433_v12, %v6764_v22  ;;  %v7482_v33 = vld [vmem:[#allocation2 + $0x1dc] sm:$0xf] }
 0x771   : > { %2706 = vst [vmem:[#allocation2 + $0xb8] sm:$0xff] %v2698_v14  ;;  %v8479_v57 = vpop.permute.xlu1 %8478  ;;  %v6964_v0 = vld [vmem:[#allocation2 + $0x1f8] sm:$0xf0] }
 0x772   : > { %2702 = vst [vmem:[#allocation2 + $0x98] sm:$0xff] %v2694_v23  ;;  %v8481_v11 = vunpack.i.h.bf16 %v8479_v57  ;;  %v8480_v37 = vunpack.i.l.bf16 %v8479_v57  ;;  %3667 = vmatpush.bf16.msrb.mxu3 %v6763_v20  ;;  %3695 = vmatpush.bf16.msra.mxu2 %v6767_v5  ;;  %v7474_v23 = vld [vmem:[#allocation2 + $0x19c] sm:$0xf]  ;;  %v11835_v35 = vpop.permute.xlu0 %3169 }
 0x773   : > { %v6932_v3 = vld [vmem:[#allocation2 + $0x1b8] sm:$0xf0] }
 0x774   : > { %v3059_v61 = vsel %vm1263_vm10, %v8480_v37, %v8500_v15  ;;  %v3060_v6 = vsel %vm1263_vm10, %v8481_v11, %v8501_v55  ;;  %v3061_v19 = vsel %vm1263_vm10, %v8475_v1, %v8480_v37  ;;  %v3062_v25 = vsel %vm1263_vm10, %v8476_v21, %v8481_v11  ;;  %v6930_v21 = vld [vmem:[#allocation2 + $0x198] sm:$0xf] }
 0x775   : > { %v3077_v56 = vpack.c.bf16 %v3061_v19, %v3063_v24  ;;  %v3078_v40 = vpack.c.bf16 %v3073_v43, %v3059_v61  ;;  %v3081_v58 = vpack.c.bf16 %v3062_v25, %v3064_v48  ;;  %v3082_v31 = vpack.c.bf16 %v3074_v42, %v3060_v6  ;;  %v7478_v1 = vld [vmem:[#allocation2 + $0x1b4] sm:$0xf0]  ;;  %v6868_v43 = vld [vmem:[#allocation2 + $0x138] sm:$0xf0] }
 0x776   : > { %3668 = vmatpush.bf16.msrb.mxu3 %v6731_v13  ;;  %3696 = vmatpush.bf16.msra.mxu2 %v6735_v27  ;;  %v6967_v15 = vor.u32 %v7482_v33, %v6964_v0  ;;  %v6931_v22 = vor.u32 %v7478_v1, %v6930_v21  ;;  %v6935_v20 = vor.u32 %v7474_v23, %v6932_v3  ;;  %v6898_v5 = vld [vmem:[#allocation2 + $0x158] sm:$0xf]  ;;  %v7466_v62 = vld [vmem:[#allocation2 + $0x15c] sm:$0xf] }
 0x777   : > { %3085 = vst [vmem:[#allocation2 + $0x210] sm:$0xff] %v3077_v56  ;;  %v7470_v41 = vld [vmem:[#allocation2 + $0x174] sm:$0xf0]  ;;  %v6900_v55 = vld [vmem:[#allocation2 + $0x178] sm:$0xf0]  ;;  %v6871_v48 = vor.u32 %v7458_v54, %v6868_v43 }
 0x778   : > { %3086 = vst [vmem:[#allocation2 + $0x218] sm:$0xff] %v3078_v40  ;;  %v6899_v57 = vor.u32 %v7470_v41, %v6898_v5  ;;  %v6903_v11 = vor.u32 %v7466_v62, %v6900_v55  ;;  %v6866_v37 = vld [vmem:[#allocation2 + $0x118] sm:$0xf]  ;;  %v7450_v27 = vld [vmem:[#allocation2 + $0xdc] sm:$0xf] }
 0x779   : > { %3089 = vst [vmem:[#allocation2 + $0x230] sm:$0xff] %v3081_v58  ;;  %3669 = vmatmul.bf16.vlgmr.msrb.gmra.mxu3 %v11354_v39  ;;  %3697 = vmatmul.bf16.vlgmr.msra.gmra.mxu2 %v11354_v39  ;;  %v8494_v16 = vpop.permute.xlu1 %8493  ;;  %v7462_v13 = vld [vmem:[#allocation2 + $0x134] sm:$0xf0]  ;;  %v6836_v61 = vld [vmem:[#allocation2 + $0xf8] sm:$0xf0] }
 0x77a   : > { %3090 = vst [vmem:[#allocation2 + $0x238] sm:$0xff] %v3082_v31  ;;  %v8496_v34 = vunpack.i.h.bf16 %v8494_v16  ;;  %v8495_v10 = vunpack.i.l.bf16 %v8494_v16  ;;  %v6867_v18 = vor.u32 %v7462_v13, %v6866_v37  ;;  %v7454_v24 = vld [vmem:[#allocation2 + $0xf4] sm:$0xf0]  ;;  %v6839_v19 = vor.u32 %v7450_v27, %v6836_v61  ;;  %v7442_v8 = vld [vmem:[#allocation2 + $0x9c] sm:$0xf] }
 0x77b   : > { %v6835_v6 = vor.u32 %v7454_v24, %v6834_v46  ;;  %v7446_v25 = vld [vmem:[#allocation2 + $0xb4] sm:$0xf0]  ;;  %v6804_v42 = vld [vmem:[#allocation2 + $0xb8] sm:$0xf0] }
 0x77c   : > { %v2626_v45 = vsel %vm664_vm3, %v8496_v34, %v13933_v36  ;;  %v2611_v63 = vsel %vm664_vm3, %v8455_v29, %v8495_v10  ;;  %v2612_v2 = vsel %vm664_vm3, %v8456_v53, %v8496_v34  ;;  %v2625_v49 = vsel %vm664_vm3, %v8495_v10, %v13934_v38  ;;  %v6740_v38 = vld [vmem:[#allocation2 + $0x38] sm:$0xf0] }
 0x77d   : > { %v2630_v60 = vpack.c.bf16 %v2625_v49, %v2611_v63  ;;  %v2634_v59 = vpack.c.bf16 %v2626_v45, %v2612_v2  ;;  %v6807_v40 = vor.u32 %v7442_v8, %v6804_v42  ;;  %v6738_v45 = vld [vmem:[#allocation2 + $0x18] sm:$0xf]  ;;  %v7426_v2 = vld [vmem:[#allocation2 + $0x1c] sm:$0xf] }
 0x77e   : > { %v6986_v30 = vld [vmem:[#allocation2 + $0x210] sm:$0xf]  ;;  %v7489_v7 = vld [vmem:[#allocation2 + $0x214] sm:$0xf]  ;;  %v7430_v63 = vld [vmem:[#allocation2 + $0x34] sm:$0xf0] }
 0x77f   : > { %2638 = vst [vmem:[#allocation2 + $0x58] sm:$0xff] %v2630_v60  ;;  %v6994_v29 = vld [vmem:[#allocation2 + $0x218] sm:$0xf]  ;;  %v7490_v14 = vld [vmem:[#allocation2 + $0x21c] sm:$0xf]  ;;  %v6739_v60 = vor.u32 %v7430_v63, %v6738_v45 }
 0x780   : > { %2642 = vst [vmem:[#allocation2 + $0x78] sm:$0xff] %v2634_v59  ;;  %v7493_v52 = vld [vmem:[#allocation2 + $0x22c] sm:$0xf0]  ;;  %v6988_v44 = vld [vmem:[#allocation2 + $0x230] sm:$0xf0]  ;;  %v6743_v59 = vor.u32 %v7426_v2, %v6740_v38 }
 0x781   : > { %v6987_v53 = vor.u32 %v7493_v52, %v6986_v30  ;;  %v6991_v26 = vor.u32 %v7489_v7, %v6988_v44  ;;  %v7494_v4 = vld [vmem:[#allocation2 + $0x234] sm:$0xf0]  ;;  %v6996_v17 = vld [vmem:[#allocation2 + $0x238] sm:$0xf0]  ;;  %v11838_v0 = vpop.permute.xlu1 %3174 }
 0x782   : > { %v6995_v51 = vor.u32 %v7494_v4, %v6994_v29  ;;  %v6999_v12 = vor.u32 %v7490_v14, %v6996_v17 }
 0x783   : > { %3682 = vmatpush.bf16.msra.mxu1 %v6987_v53  ;;  %3710 = vmatpush.bf16.msrb.mxu0 %v6991_v26 }
 0x784   : > { %3738 = vmatpush.bf16.msra.mxu3 %v6995_v51  ;;  %3766 = vmatpush.bf16.msrb.mxu2 %v6999_v12 }
 0x786   : > { %7004 = vmatmul.msk.bf16.vlgmr.msra.gmra.mxu1 %vm1751_vm11, %v11366_v50  ;;  %7005 = vmatmul.msk.bf16.vlgmr.msrb.gmra.mxu0 %vm1751_vm11, %v11366_v50  ;;  %v6770_v58 = vld [vmem:[#allocation2 + $0x58] sm:$0xf]  ;;  %v7434_v16 = vld [vmem:[#allocation2 + $0x5c] sm:$0xf] }
 0x787   : > { %3717 = vmatpush.bf16.msrb.mxu1 %v6963_v28  ;;  %3745 = vmatpush.bf16.msra.mxu0 %v6967_v15  ;;  %v7438_v31 = vld [vmem:[#allocation2 + $0x74] sm:$0xf0]  ;;  %v6772_v34 = vld [vmem:[#allocation2 + $0x78] sm:$0xf0] }
 0x788   : > { %v6771_v10 = vor.u32 %v7438_v31, %v6770_v58  ;;  %v6775_v36 = vor.u32 %v7434_v16, %v6772_v34 }
 0x789   : > { %7006 = vmatmul.msk.bf16.vlgmr.msra.gmra.mxu3 %vm1751_vm11, %v11366_v50  ;;  %7007 = vmatmul.msk.bf16.vlgmr.msrb.gmra.mxu2 %vm1751_vm11, %v11366_v50  ;;  %v6802_v50 = vld [vmem:[#allocation2 + $0x98] sm:$0xf] }
 0x78a   : > { %v6803_v56 = vor.u32 %v7446_v25, %v6802_v50 }
 0x78b   : > { %3718 = vmatpush.bf16.msrb.mxu1 %v6931_v22  ;;  %3746 = vmatpush.bf16.msra.mxu0 %v6935_v20 }
 0x78f   : > { %3719 = vmatpush.bf16.msrb.mxu1 %v6899_v57  ;;  %3747 = vmatpush.bf16.msra.mxu0 %v6903_v11 }
 0x793   : > { %3720 = vmatpush.bf16.msrb.mxu1 %v6867_v18  ;;  %3748 = vmatpush.bf16.msra.mxu0 %v6871_v48 }
 0x797   : > { %3721 = vmatpush.bf16.msrb.mxu1 %v6835_v6  ;;  %3749 = vmatpush.bf16.msra.mxu0 %v6839_v19 }
 0x79b   : > { %3722 = vmatpush.bf16.msrb.mxu1 %v6803_v56  ;;  %3750 = vmatpush.bf16.msra.mxu0 %v6807_v40 }
 0x79e   : > { %v3558_v49 = vpop.f32.mrf.mxu0 }
 0x79f   : > { %3723 = vmatpush.bf16.msrb.mxu1 %v6771_v10  ;;  %3751 = vmatpush.bf16.msra.mxu0 %v6775_v36  ;;  %v3559_v33 = vadd.f32 %v3558_v49, %v11835_v35 }
 0x7a2   : > { %v3572_v30 = vpop.f32.mrf.mxu1 }
 0x7a3   : > { %3724 = vmatpush.bf16.msrb.mxu1 %v6739_v60  ;;  %3752 = vmatpush.bf16.msra.mxu0 %v6743_v59  ;;  %v11840_v29 = vadd.f32 %v3572_v30, %v3559_v33 }
 0x7a4   : > { %v3586_v7 = vpop.f32.mrf.mxu2 }
 0x7a5   : > { %v3773_v26 = vmax.f32 %v11840_v29, 0.0  ;;  %v3587_v17 = vadd.f32 %v3586_v7, %v11835_v35 }
 0x7a6   : > { %3725 = vmatmul.bf16.vlgmr.msrb.gmra.mxu1 %v11354_v39  ;;  %3753 = vmatmul.bf16.vlgmr.msra.gmra.mxu0 %v11354_v39  ;;  %v3560_v47 = vpop.f32.mrf.mxu0 }
 0x7a7   : > { %v3561_v14 = vadd.f32 %v3560_v47, %v11838_v0 }
 0x7a9   : > { %v3600_v52 = vpop.f32.mrf.mxu3 }
 0x7aa   : > { %v3574_v44 = vpop.f32.mrf.mxu1  ;;  %v11852_v12 = vadd.f32 %v3600_v52, %v3587_v17 }
 0x7ab   : > { %v11843_v53 = vadd.f32 %v3574_v44, %v3561_v14 }
 0x7ac   : > { %v3588_v4 = vpop.f32.mrf.mxu2  ;;  %v3774_v1 = vmax.f32 %v11852_v12, 0.0 }
 0x7ad   : > { %v3781_v39 = vmax.f32 %v11843_v53, 0.0  ;;  %v3589_v28 = vadd.f32 %v3588_v4, %v11838_v0 }
 0x7af   : > { %v8502_v51 = vpack.i.bf16 %v3781_v39, %v3773_v26 }
 0x7b1   : > { %v3602_v15 = vpop.f32.mrf.mxu3  ;;  %8503 = vrot.lane.b32.xlu2 %v8502_v51, %s13935_s17 }
 0x7b2   : > { %v11856_v21 = vadd.f32 %v3602_v15, %v3589_v28 }
 0x7b4   : > { %v3782_v23 = vmax.f32 %v11856_v21, 0.0 }
 0x7b6   : > { %v8507_v3 = vpack.i.bf16 %v3782_v23, %v3774_v1 }
 0x7b8   : > { %8508 = vrot.lane.b32.xlu0 %v8507_v3, %s13935_s17 }
 0x7d0   : > { %v3614_v22 = vpop.f32.mrf.mxu1 }
 0x7d1   : > { %v3642_v20 = vpop.f32.mrf.mxu0  ;;  %v3628_v5 = vpop.f32.mrf.mxu3  ;;  %v3615_v62 = vadd.f32 %v3614_v22, %v11835_v35 }
 0x7d2   : > { %v3643_v55 = vadd.f32 %v3642_v20, %v11835_v35 }
 0x7d3   : > { %v3656_v41 = vpop.f32.mrf.mxu2  ;;  %v11867_v11 = vadd.f32 %v3628_v5, %v3615_v62 }
 0x7d4   : > { %v11870_v43 = vadd.f32 %v3656_v41, %v3643_v55 }
 0x7d5   : > { %v3775_v27 = vmax.f32 %v11867_v11, 0.0 }
 0x7d6   : > { %v3776_v6 = vmax.f32 %v11870_v43, 0.0 }
 0x7d8   : > { %v3616_v57 = vpop.f32.mrf.mxu1 }
 0x7d9   : > { %v3617_v37 = vadd.f32 %v3616_v57, %v11838_v0  ;;  %v3644_v13 = vpop.f32.mrf.mxu0  ;;  %v3630_v54 = vpop.f32.mrf.mxu3 }
 0x7da   : > { %v3645_v18 = vadd.f32 %v3644_v13, %v11838_v0 }
 0x7db   : > { %v11873_v48 = vadd.f32 %v3630_v54, %v3617_v37  ;;  %v3658_v46 = vpop.f32.mrf.mxu2 }
 0x7dc   : > { %v11875_v24 = vadd.f32 %v3658_v46, %v3645_v18 }
 0x7dd   : > { %v3783_v61 = vmax.f32 %v11873_v48, 0.0 }
 0x7de   : > { %v3784_v19 = vmax.f32 %v11875_v24, 0.0 }
 0x7df   : > { %v8512_v25 = vpack.i.bf16 %v3783_v61, %v3775_v27 }
 0x7e0   : > { %v8517_v50 = vpack.i.bf16 %v3784_v19, %v3776_v6 }
 0x7e1   : > { %8513 = vrot.lane.b32.xlu1 %v8512_v25, %s13935_s17 }
 0x7e2   : > { %8518 = vrot.lane.b32.xlu2 %v8517_v50, %s13935_s17 }
 0x7fc   : > { %v3670_v8 = vpop.f32.mrf.mxu3  ;;  %v3698_v42 = vpop.f32.mrf.mxu2 }
 0x7fd   : > { %v3671_v16 = vadd.f32 %v3670_v8, %v11835_v35  ;;  %v3699_v34 = vadd.f32 %v3698_v42, %v11835_v35 }
 0x803   : > { %v3684_v56 = vpop.f32.mrf.mxu1  ;;  %v3712_v40 = vpop.f32.mrf.mxu0 }
 0x804   : > { %v3672_v58 = vpop.f32.mrf.mxu3  ;;  %v3700_v31 = vpop.f32.mrf.mxu2  ;;  %v11893_v10 = vadd.f32 %v3684_v56, %v3671_v16  ;;  %v11895_v36 = vadd.f32 %v3712_v40, %v3699_v34 }
 0x805   : > { %v3673_v45 = vadd.f32 %v3672_v58, %v11838_v0  ;;  %v3701_v63 = vadd.f32 %v3700_v31, %v11838_v0 }
 0x806   : > { %v3777_v59 = vmax.f32 %v11893_v10, 0.0  ;;  %v3778_v30 = vmax.f32 %v11895_v36, 0.0 }
 0x80b   : > { %v3686_v2 = vpop.f32.mrf.mxu1  ;;  %v3714_v38 = vpop.f32.mrf.mxu0 }
 0x80c   : > { %v11899_v49 = vadd.f32 %v3686_v2, %v3673_v45  ;;  %v11901_v60 = vadd.f32 %v3714_v38, %v3701_v63  ;;  %v3740_v52 = vpop.f32.mrf.mxu3  ;;  %v3768_v44 = vpop.f32.mrf.mxu2 }
 0x80d   : > { %v11919_v15 = vpop.permute.xlu2 %8503 }
 0x80e   : > { %v3785_v7 = vmax.f32 %v11899_v49, 0.0  ;;  %v3786_v47 = vmax.f32 %v11901_v60, 0.0  ;;  %v8506_v13 = vunpack.i.h.bf16 %v11919_v15  ;;  %v8505_v54 = vunpack.i.l.bf16 %v11919_v15 }
 0x810   : > { %v8522_v33 = vpack.i.bf16 %v3785_v7, %v3777_v59  ;;  %v8527_v14 = vpack.i.bf16 %v3786_v47, %v3778_v30 }
 0x812   : > { %8528 = vrot.lane.b32.xlu1 %v8527_v14, %s13935_s17  ;;  %8523 = vrot.lane.b32.xlu0 %v8522_v33, %s13935_s17 }
 0x814   : > { %v3742_v3 = vpop.f32.mrf.mxu3  ;;  %v3770_v22 = vpop.f32.mrf.mxu2 }
 0x823   : > { %v3726_v4 = vpop.f32.mrf.mxu1  ;;  %v3754_v17 = vpop.f32.mrf.mxu0 }
 0x824   : > { %v3727_v51 = vadd.f32 %v3726_v4, %v11835_v35  ;;  %v3755_v28 = vadd.f32 %v3754_v17, %v11835_v35 }
 0x826   : > { %v11921_v20 = vadd.f32 %v3740_v52, %v3727_v51  ;;  %v11923_v5 = vadd.f32 %v3768_v44, %v3755_v28 }
 0x828   : > { %v3779_v50 = vmax.f32 %v11921_v20, 0.0  ;;  %v3780_v8 = vmax.f32 %v11923_v5, 0.0  ;;  %v4057_v20 = vld [vmem:[%s13797_s2] sm:$0xff]  ;;  %v4058_v5 = vld [vmem:[%s13797_s2 + $0x8] sm:$0xff] }
 0x82a   : > { %v8509_v37 = vpop.permute.xlu0 %8508 }
 0x82b   : > { %v3728_v41 = vpop.f32.mrf.mxu1  ;;  %v3756_v62 = vpop.f32.mrf.mxu0  ;;  %v8511_v35 = vunpack.i.h.bf16 %v8509_v37  ;;  %v8510_v18 = vunpack.i.l.bf16 %v8509_v37 }
 0x82c   : > { %v3729_v55 = vadd.f32 %v3728_v41, %v11838_v0  ;;  %v3757_v57 = vadd.f32 %v3756_v62, %v11838_v0 }
 0x82d   : > { %v3834_v0 = vsel %vm664_vm3, %v8506_v13, %v8511_v35  ;;  %v3833_v42 = vsel %vm664_vm3, %v8505_v54, %v8510_v18 }
 0x82e   : > { %v11929_v46 = vadd.f32 %v3742_v3, %v3729_v55  ;;  %v11931_v25 = vadd.f32 %v3770_v22, %v3757_v57  ;;  %v11947_v58 = vmax.f32 %v3781_v39, %v3834_v0  ;;  %v11951_v31 = vmax.f32 %v3773_v26, %v3833_v42  ;;  %v3926_v0 = vld [vmem:[%s13801_s6] sm:$0x7] }
 0x830   : > { %v3787_v56 = vmax.f32 %v11929_v46, 0.0  ;;  %v3788_v40 = vmax.f32 %v11931_v25, 0.0  ;;  %v8542_v45 = vpack.i.bf16 %v11947_v58, %v11951_v31 }
 0x832   : > { %v8532_v16 = vpack.i.bf16 %v3787_v56, %v3779_v50  ;;  %v8537_v34 = vpack.i.bf16 %v3788_v40, %v3780_v8  ;;  %8543 = vrot.lane.b32.xlu1 %v8542_v45, %s13936_s18 }
 0x834   : > { %8533 = vrot.lane.b32.xlu2 %v8532_v16, %s13935_s17  ;;  %8538 = vrot.lane.b32.xlu0 %v8537_v34, %s13935_s17 }
 0x83c   : > { %v8519_v29 = vpop.permute.xlu2 %8518 }
 0x83d   : > { %v8521_v26 = vunpack.i.h.bf16 %v8519_v29  ;;  %v8520_v39 = vunpack.i.l.bf16 %v8519_v29 }
 0x853   : > { %v8514_v53 = vpop.permute.xlu1 %8513 }
 0x854   : > { %v8516_v63 = vunpack.i.h.bf16 %v8514_v53  ;;  %v8515_v2 = vunpack.i.l.bf16 %v8514_v53 }
 0x856   : > { %v3829_v38 = vsel %vm664_vm3, %v8515_v2, %v8520_v39  ;;  %v3830_v33 = vsel %vm664_vm3, %v8516_v63, %v8521_v26  ;;  %v3831_v14 = vsel %vm664_vm3, %v8510_v18, %v8515_v2  ;;  %v3832_v52 = vsel %vm664_vm3, %v8511_v35, %v8516_v63 }
 0x857   : > { %v11976_v44 = vmax.f32 %v3774_v1, %v3831_v14  ;;  %v11980_v4 = vmax.f32 %v3775_v27, %v3829_v38  ;;  %v11984_v17 = vmax.f32 %v3782_v23, %v3832_v52  ;;  %v11988_v51 = vmax.f32 %v3783_v61, %v3830_v33  ;;  %v12093_v33 = vld [vmem:[%s13800_s5] sm:$0x3] }
 0x859   : > { %v8552_v28 = vpack.i.bf16 %v11988_v51, %v11980_v4  ;;  %v8547_v12 = vpack.i.bf16 %v11984_v17, %v11976_v44 }
 0x85b   : > { %8553 = vrot.lane.b32.xlu0 %v8552_v28, %s13936_s18  ;;  %8548 = vrot.lane.b32.xlu2 %v8547_v12, %s13936_s18 }
 0x884   : > { %v8529_v1 = vpop.permute.xlu1 %8528  ;;  %v8524_v11 = vpop.permute.xlu0 %8523 }
 0x885   : > { %v8531_v27 = vunpack.i.h.bf16 %v8529_v1  ;;  %v8530_v21 = vunpack.i.l.bf16 %v8529_v1  ;;  %v8526_v23 = vunpack.i.h.bf16 %v8524_v11  ;;  %v8525_v3 = vunpack.i.l.bf16 %v8524_v11 }
 0x887   : > { %v3826_v48 = vsel %vm664_vm3, %v8526_v23, %v8531_v27  ;;  %v3828_v61 = vsel %vm664_vm3, %v8521_v26, %v8526_v23  ;;  %v3825_v22 = vsel %vm664_vm3, %v8525_v3, %v8530_v21  ;;  %v3827_v41 = vsel %vm664_vm3, %v8520_v39, %v8525_v3 }
 0x888   : > { %v12006_v62 = vmax.f32 %v3784_v19, %v3828_v61  ;;  %v12010_v55 = vmax.f32 %v3785_v7, %v3826_v48  ;;  %v12014_v57 = vmax.f32 %v3776_v6, %v3827_v41  ;;  %v12018_v37 = vmax.f32 %v3777_v59, %v3825_v22 }
 0x88a   : > { %v8557_v35 = vpack.i.bf16 %v12006_v62, %v12014_v57  ;;  %v8562_v24 = vpack.i.bf16 %v12010_v55, %v12018_v37 }
 0x88c   : > { %8558 = vrot.lane.b32.xlu1 %v8557_v35, %s13936_s18  ;;  %8563 = vrot.lane.b32.xlu2 %v8562_v24, %s13936_s18 }
 0x88e   : > { %v8534_v19 = vpop.permute.xlu2 %8533 }
 0x88f   : > { %v8536_v49 = vunpack.i.h.bf16 %v8534_v19  ;;  %v8535_v7 = vunpack.i.l.bf16 %v8534_v19 }
 0x891   : > { %v3824_v43 = vsel %vm664_vm3, %v8531_v27, %v8536_v49  ;;  %v3823_v6 = vsel %vm664_vm3, %v8530_v21, %v8535_v7 }
 0x892   : > { %v12032_v10 = vmax.f32 %v3786_v47, %v3824_v43  ;;  %v12036_v59 = vmax.f32 %v3778_v30, %v3823_v6 }
 0x894   : > { %v8567_v18 = vpack.i.bf16 %v12032_v10, %v12036_v59 }
 0x896   : > { %8568 = vrot.lane.b32.xlu0 %v8567_v18, %s13936_s18 }
 0x89e   : > { %3929 = vperm.xlu0 %7619, %v3926_v0  }
 0x8a4   : > { %v8544_v46 = vpop.permute.xlu1 %8543 }
 0x8a6   : > { %v8539_v42 = vpop.permute.xlu0 %8538 }
 0x8a7   : > { %v8541_v16 = vunpack.i.h.bf16 %v8539_v42  ;;  %v8540_v34 = vunpack.i.l.bf16 %v8539_v42 }
 0x8a9   : > { %v3822_v60 = vsel %vm664_vm3, %v8536_v49, %v8541_v16  ;;  %v3836_v36 = vsel %vm664_vm3, %v8541_v16, %v8506_v13  ;;  %v3821_v30 = vsel %vm664_vm3, %v8535_v7, %v8540_v34  ;;  %v3835_v47 = vsel %vm664_vm3, %v8540_v34, %v8505_v54 }
 0x8aa   : > { %v12058_v45 = vmax.f32 %v3787_v56, %v3822_v60  ;;  %v12062_v29 = vmax.f32 %v3788_v40, %v3836_v36  ;;  %v12066_v53 = vmax.f32 %v3779_v50, %v3821_v30  ;;  %v12070_v13 = vmax.f32 %v3780_v8, %v3835_v47 }
 0x8ab   : > { %v8546_v50 = vunpack.i.h.bf16 %v8544_v46  ;;  %v8545_v8 = vunpack.i.l.bf16 %v8544_v46 }
 0x8ac   : > { %v8572_v15 = vpack.i.bf16 %v12058_v45, %v12066_v53  ;;  %v8577_v54 = vpack.i.bf16 %v12062_v29, %v12070_v13 }
 0x8ae   : > { %8573 = vrot.lane.b32.xlu1 %v8572_v15, %s13936_s18  ;;  %8578 = vrot.lane.b32.xlu2 %v8577_v54, %s13936_s18 }
 0x8b5   : > { %v8549_v25 = vpop.permute.xlu2 %8548 }
 0x8b6   : > { %4061 = vperm.xlu1 %8020, %v4057_v20   ;;  %4066 = vperm.xlu2 %8021, %v4058_v5   ;;  %v8551_v56 = vunpack.i.h.bf16 %v8549_v25  ;;  %v8550_v40 = vunpack.i.l.bf16 %v8549_v25 }
 0x8b8   : > { %v3898_v26 = vsel %vm729_vm4, %v8546_v50, %v8551_v56  ;;  %v3897_v39 = vsel %vm729_vm4, %v8545_v8, %v8550_v40 }
 0x8b9   : > { %v3909_v63 = vmax.f32 %v11947_v58, %v3898_v26  ;;  %v3901_v2 = vmax.f32 %v11951_v31, %v3897_v39 }
 0x8bb   : > { %v3918_v38 = vpack.c.bf16 %v3909_v63, %v3901_v2 }
 0x8bd   : > { %3942 = vmatpush.bf16.msrb.mxu3 %v3918_v38 }
 0x8c0   : > { %7008 = vmatmul.msk.bf16.vlgmr.msrb.gmra.mxu3 %vm1751_vm11, %v12093_v33 }
 0x8cd   : > { %v8554_v14 = vpop.permute.xlu0 %8553 }
 0x8ce   : > { %v8556_v52 = vunpack.i.h.bf16 %v8554_v14  ;;  %v8555_v28 = vunpack.i.l.bf16 %v8554_v14 }
 0x8d0   : > { %v3895_v12 = vsel %vm729_vm4, %v8550_v40, %v8555_v28  ;;  %v3896_v58 = vsel %vm729_vm4, %v8551_v56, %v8556_v52 }
 0x8d1   : > { %v3902_v31 = vmax.f32 %v11976_v44, %v3895_v12  ;;  %v3910_v1 = vmax.f32 %v11984_v17, %v3896_v58 }
 0x8d3   : > { %v3919_v11 = vpack.c.bf16 %v3910_v1, %v3902_v31 }
 0x8d5   : > { %3955 = vmatpush.bf16.msra.mxu1 %v3919_v11 }
 0x8d8   : > { %7009 = vmatmul.msk.bf16.vlgmr.msra.gmra.mxu1 %vm1751_vm11, %v12093_v33 }
 0x8e6   : > { %v8564_v27 = vpop.permute.xlu2 %8563 }
 0x8e7   : > { %v8566_v23 = vunpack.i.h.bf16 %v8564_v27  ;;  %v8565_v3 = vunpack.i.l.bf16 %v8564_v27 }
 0x8fe   : > { %v8559_v21 = vpop.permute.xlu1 %8558 }
 0x8ff   : > { %v8561_v48 = vunpack.i.h.bf16 %v8559_v21  ;;  %v8560_v61 = vunpack.i.l.bf16 %v8559_v21 }
 0x901   : > { %v3894_v22 = vsel %vm729_vm4, %v8556_v52, %v8561_v48  ;;  %v3891_v41 = vsel %vm729_vm4, %v8560_v61, %v8565_v3  ;;  %v3892_v44 = vsel %vm729_vm4, %v8561_v48, %v8566_v23  ;;  %v3893_v17 = vsel %vm729_vm4, %v8555_v28, %v8560_v61 }
 0x902   : > { %v3911_v35 = vmax.f32 %v11988_v51, %v3894_v22  ;;  %v3903_v24 = vmax.f32 %v11980_v4, %v3893_v17  ;;  %v3904_v19 = vmax.f32 %v12014_v57, %v3891_v41  ;;  %v3912_v49 = vmax.f32 %v12006_v62, %v3892_v44 }
 0x904   : > { %v3920_v7 = vpack.c.bf16 %v3911_v35, %v3903_v24  ;;  %v3921_v43 = vpack.c.bf16 %v3912_v49, %v3904_v19 }
 0x906   : > { %3968 = vmatpush.bf16.msra.mxu2 %v3920_v7  ;;  %3981 = vmatpush.bf16.msra.mxu3 %v3921_v43 }
 0x908   : > { %v8569_v6 = vpop.permute.xlu0 %8568  ;;  %v8579_v18 = vpop.permute.xlu2 %8578 }
 0x909   : > { %v8571_v0 = vunpack.i.h.bf16 %v8569_v6  ;;  %v8570_v42 = vunpack.i.l.bf16 %v8569_v6  ;;  %v8581_v16 = vunpack.i.h.bf16 %v8579_v18  ;;  %v8580_v34 = vunpack.i.l.bf16 %v8579_v18  ;;  %7010 = vmatmul.msk.bf16.vlgmr.msra.gmra.mxu2 %vm1751_vm11, %v12093_v33  ;;  %7011 = vmatmul.msk.bf16.vlgmr.msra.gmra.mxu3 %vm1751_vm11, %v12093_v33 }
 0x90b   : > { %v3889_v60 = vsel %vm729_vm4, %v8565_v3, %v8570_v42  ;;  %v3890_v4 = vsel %vm729_vm4, %v8566_v23, %v8571_v0  ;;  %v3900_v51 = vsel %vm729_vm4, %v8581_v16, %v8546_v50  ;;  %v3899_v62 = vsel %vm729_vm4, %v8580_v34, %v8545_v8 }
 0x90c   : > { %v3905_v57 = vmax.f32 %v12018_v37, %v3889_v60  ;;  %v3913_v36 = vmax.f32 %v12010_v55, %v3890_v4  ;;  %v3916_v30 = vmax.f32 %v12062_v29, %v3900_v51  ;;  %v3908_v47 = vmax.f32 %v12070_v13, %v3899_v62 }
 0x90e   : > { %v3922_v15 = vpack.c.bf16 %v3913_v36, %v3905_v57  ;;  %v3925_v54 = vpack.c.bf16 %v3916_v30, %v3908_v47 }
 0x910   : > { %3994 = vmatpush.bf16.msrb.mxu0 %v3922_v15  ;;  %4033 = vmatpush.bf16.msrb.mxu3 %v3925_v54  ;;  %v3930_v39 = vpop.permute.xlu0 %3929 }
 0x913   : > { %7012 = vmatmul.msk.bf16.vlgmr.msrb.gmra.mxu0 %vm1751_vm11, %v12093_v33 }
 0x919   : > { %7015 = vmatmul.msk.bf16.vlgmr.msrb.gmra.mxu3 %vm1751_vm11, %v12093_v33 }
 0x920   : > { %v8574_v37 = vpop.permute.xlu1 %8573 }
 0x921   : > { %v8576_v20 = vunpack.i.h.bf16 %v8574_v37  ;;  %v8575_v55 = vunpack.i.l.bf16 %v8574_v37 }
 0x923   : > { %v3888_v29 = vsel %vm729_vm4, %v8571_v0, %v8576_v20  ;;  %v3885_v13 = vsel %vm729_vm4, %v8575_v55, %v8580_v34  ;;  %v3886_v5 = vsel %vm729_vm4, %v8576_v20, %v8581_v16  ;;  %v3887_v46 = vsel %vm729_vm4, %v8570_v42, %v8575_v55 }
 0x924   : > { %v3914_v25 = vmax.f32 %v12032_v10, %v3888_v29  ;;  %v3906_v50 = vmax.f32 %v12036_v59, %v3887_v46  ;;  %v3907_v8 = vmax.f32 %v12066_v53, %v3885_v13  ;;  %v3915_v56 = vmax.f32 %v12058_v45, %v3886_v5  ;;  %v7495_v45 = vld [vmem:[%s13888_s1] sm:$0xff]  ;;  %v4067_v13 = vpop.permute.xlu2 %4066 }
 0x926   : > { %v3923_v40 = vpack.c.bf16 %v3914_v25, %v3906_v50  ;;  %v3924_v26 = vpack.c.bf16 %v3915_v56, %v3907_v8 }
 0x928   : > { %4007 = vmatpush.bf16.msrb.mxu1 %v3923_v40  ;;  %4020 = vmatpush.bf16.msrb.mxu2 %v3924_v26  ;;  %v4062_v55 = vpop.permute.xlu1 %4061 }
 0x92b   : > { %7013 = vmatmul.msk.bf16.vlgmr.msrb.gmra.mxu1 %vm1751_vm11, %v12093_v33  ;;  %7014 = vmatmul.msk.bf16.vlgmr.msrb.gmra.mxu2 %vm1751_vm11, %v12093_v33 }
 0x943   : > { %v3944_v63 = vpop.f32.mrf.mxu3 }
 0x944   : > { %v3945_v2 = vadd.f32 %v3944_v63, %v3930_v39 }
 0x946   : > { %v4039_v10 = vmax.f32 %v3945_v2, 0.0 }
 0x948   : > { %v4049_v38 = vpack.c.bf16 %v4039_v10, %v4039_v10 }
 0x94a   : > { %v4078_v59 = vand.u32 %v4049_v38, %v9260_v9 }
 0x94b   : > { %v3946_v53 = vpop.f32.mrf.mxu3 }
 0x94c   : > { %4108 = vmatpush.bf16.msra.mxu0 %v4078_v59 }
 0x94f   : > { %7020 = vmatmul.msk.bf16.vlgmr.msra.gmra.mxu0 %vm470_vm2, %v7495_v45 }
 0x955   : > { %v3957_v14 = vpop.f32.mrf.mxu1 }
 0x956   : > { %v3958_v52 = vadd.f32 %v3957_v14, %v3930_v39 }
 0x958   : > { %v4040_v28 = vmax.f32 %v3958_v52, 0.0 }
 0x95a   : > { %v4050_v12 = vpack.c.bf16 %v4040_v28, %v4040_v28 }
 0x95c   : > { %v4081_v33 = vand.u32 %v4050_v12, %v9260_v9 }
 0x95d   : > { %v3959_v58 = vpop.f32.mrf.mxu1 }
 0x95e   : > { %4122 = vmatpush.bf16.msra.mxu1 %v4081_v33 }
 0x961   : > { %7021 = vmatmul.msk.bf16.vlgmr.msra.gmra.mxu1 %vm470_vm2, %v7495_v45 }
 0x98c   : > { %v3970_v31 = vpop.f32.mrf.mxu2  ;;  %v3983_v11 = vpop.f32.mrf.mxu3 }
 0x98d   : > { %v3971_v1 = vadd.f32 %v3970_v31, %v3930_v39  ;;  %v3984_v27 = vadd.f32 %v3983_v11, %v3930_v39 }
 0x98f   : > { %v4041_v23 = vmax.f32 %v3971_v1, 0.0  ;;  %v4042_v48 = vmax.f32 %v3984_v27, 0.0 }
 0x990   : > { %v3996_v21 = vpop.f32.mrf.mxu0 }
 0x991   : > { %v3997_v3 = vadd.f32 %v3996_v21, %v3930_v39  ;;  %v4051_v61 = vpack.c.bf16 %v4041_v23, %v4041_v23  ;;  %v4052_v41 = vpack.c.bf16 %v4042_v48, %v4042_v48 }
 0x993   : > { %v4043_v22 = vmax.f32 %v3997_v3, 0.0  ;;  %v4084_v44 = vand.u32 %v4051_v61, %v9260_v9  ;;  %v4087_v35 = vand.u32 %v4052_v41, %v9260_v9 }
 0x994   : > { %v3972_v24 = vpop.f32.mrf.mxu2  ;;  %v3985_v49 = vpop.f32.mrf.mxu3 }
 0x995   : > { %v4053_v17 = vpack.c.bf16 %v4043_v22, %v4043_v22  ;;  %4136 = vmatpush.bf16.msra.mxu2 %v4084_v44  ;;  %4150 = vmatpush.bf16.msra.mxu3 %v4087_v35 }
 0x997   : > { %v4090_v19 = vand.u32 %v4053_v17, %v9260_v9 }
 0x998   : > { %v3998_v7 = vpop.f32.mrf.mxu0  ;;  %7022 = vmatmul.msk.bf16.vlgmr.msra.gmra.mxu2 %vm470_vm2, %v7495_v45  ;;  %7023 = vmatmul.msk.bf16.vlgmr.msra.gmra.mxu3 %vm470_vm2, %v7495_v45 }
 0x999   : > { %4164 = vmatpush.bf16.msrb.mxu0 %v4090_v19 }
 0x99c   : > { %7024 = vmatmul.msk.bf16.vlgmr.msrb.gmra.mxu0 %vm470_vm2, %v7495_v45  ;;  %v4035_v43 = vpop.f32.mrf.mxu3 }
 0x99d   : > { %v4036_v6 = vadd.f32 %v4035_v43, %v3930_v39 }
 0x99f   : > { %v4046_v18 = vmax.f32 %v4036_v6, 0.0 }
 0x9a1   : > { %v4056_v0 = vpack.c.bf16 %v4046_v18, %v4046_v18 }
 0x9a3   : > { %v4099_v42 = vand.u32 %v4056_v0, %v9260_v9 }
 0x9a4   : > { %v4037_v16 = vpop.f32.mrf.mxu3 }
 0x9a5   : > { %4206 = vmatpush.bf16.msrb.mxu3 %v4099_v42 }
 0x9a8   : > { %v4009_v34 = vpop.f32.mrf.mxu1  ;;  %7027 = vmatmul.msk.bf16.vlgmr.msrb.gmra.mxu3 %vm470_vm2, %v7495_v45 }
 0x9a9   : > { %v4010_v60 = vadd.f32 %v4009_v34, %v3930_v39 }
 0x9ab   : > { %v4044_v4 = vmax.f32 %v4010_v60, 0.0 }
 0x9ad   : > { %v4054_v51 = vpack.c.bf16 %v4044_v4, %v4044_v4 }
 0x9ae   : > { %v4022_v62 = vpop.f32.mrf.mxu2 }
 0x9af   : > { %v4093_v57 = vand.u32 %v4054_v51, %v9260_v9  ;;  %v4023_v36 = vadd.f32 %v4022_v62, %v3930_v39 }
 0x9b0   : > { %v4011_v30 = vpop.f32.mrf.mxu1 }
 0x9b1   : > { %v4045_v47 = vmax.f32 %v4023_v36, 0.0  ;;  %4178 = vmatpush.bf16.msrb.mxu1 %v4093_v57 }
 0x9b3   : > { %v4055_v15 = vpack.c.bf16 %v4045_v47, %v4045_v47 }
 0x9b4   : > { %7025 = vmatmul.msk.bf16.vlgmr.msrb.gmra.mxu1 %vm470_vm2, %v7495_v45 }
 0x9b5   : > { %v4096_v54 = vand.u32 %v4055_v15, %v9260_v9 }
 0x9b6   : > { %v4024_v37 = vpop.f32.mrf.mxu2 }
 0x9b7   : > { %4192 = vmatpush.bf16.msrb.mxu2 %v4096_v54 }
 0x9ba   : > { %7026 = vmatmul.msk.bf16.vlgmr.msrb.gmra.mxu2 %vm470_vm2, %v7495_v45 }
 0x9cc   : > { %v4110_v20 = vpop.f32.mrf.mxu0 }
 0x9cd   : > { %v12172_v29 = vadd.f32 %v4110_v20, %v4062_v55 }
 0x9cf   : > { %v4213_v25 = vmax.f32 %v12172_v29, 0.0 }
 0x9d4   : > { %v4112_v5 = vpop.f32.mrf.mxu0 }
 0x9d5   : > { %v12174_v46 = vadd.f32 %v4112_v5, %v4067_v13 }
 0x9d7   : > { %v4221_v50 = vmax.f32 %v12174_v46, 0.0 }
 0x9d9   : > { %v8582_v9 = vpack.i.bf16 %v4221_v50, %v4213_v25 }
 0x9db   : > { %8583 = vrot.lane.b32.xlu0 %v8582_v9, %s13935_s17 }
 0x9de   : > { %v4124_v8 = vpop.f32.mrf.mxu1 }
 0x9df   : > { %v12183_v56 = vadd.f32 %v4124_v8, %v4062_v55 }
 0x9e1   : > { %v4214_v39 = vmax.f32 %v12183_v56, 0.0 }
 0x9e6   : > { %v4126_v40 = vpop.f32.mrf.mxu1 }
 0x9e7   : > { %v12185_v26 = vadd.f32 %v4126_v40, %v4067_v13 }
 0x9e9   : > { %v4222_v63 = vmax.f32 %v12185_v26, 0.0 }
 0x9eb   : > { %v8587_v2 = vpack.i.bf16 %v4222_v63, %v4214_v39 }
 0x9ed   : > { %8588 = vrot.lane.b32.xlu1 %v8587_v2, %s13935_s17 }
 0xa19   : > { %v4166_v10 = vpop.f32.mrf.mxu0 }
 0xa1a   : > { %v12194_v45 = vadd.f32 %v4166_v10, %v4062_v55 }
 0xa1b   : > { %v4138_v38 = vpop.f32.mrf.mxu2  ;;  %v4152_v59 = vpop.f32.mrf.mxu3 }
 0xa1c   : > { %v4217_v52 = vmax.f32 %v12194_v45, 0.0  ;;  %v12199_v28 = vadd.f32 %v4138_v38, %v4062_v55  ;;  %v12202_v33 = vadd.f32 %v4152_v59, %v4062_v55 }
 0xa1e   : > { %v4215_v21 = vmax.f32 %v12199_v28, 0.0  ;;  %v4216_v3 = vmax.f32 %v12202_v33, 0.0 }
 0xa21   : > { %v4168_v53 = vpop.f32.mrf.mxu0 }
 0xa22   : > { %v12196_v14 = vadd.f32 %v4168_v53, %v4067_v13 }
 0xa23   : > { %v4140_v58 = vpop.f32.mrf.mxu2  ;;  %v4154_v11 = vpop.f32.mrf.mxu3 }
 0xa24   : > { %v4225_v12 = vmax.f32 %v12196_v14, 0.0  ;;  %v12208_v1 = vadd.f32 %v4140_v58, %v4067_v13  ;;  %v12210_v27 = vadd.f32 %v4154_v11, %v4067_v13 }
 0xa26   : > { %v8597_v31 = vpack.i.bf16 %v4225_v12, %v4217_v52  ;;  %v4223_v23 = vmax.f32 %v12208_v1, 0.0  ;;  %v4224_v48 = vmax.f32 %v12210_v27, 0.0 }
 0xa28   : > { %8598 = vrot.lane.b32.xlu1 %v8597_v31, %s13935_s17  ;;  %v8592_v61 = vpack.i.bf16 %v4223_v23, %v4215_v21  ;;  %v8602_v22 = vpack.i.bf16 %v4224_v48, %v4216_v3 }
 0xa2a   : > { %8593 = vrot.lane.b32.xlu2 %v8592_v61, %s13935_s17  ;;  %8603 = vrot.lane.b32.xlu0 %v8602_v22, %s13935_s17 }
 0xa2b   : > { %v4208_v41 = vpop.f32.mrf.mxu3 }
 0xa2c   : > { %v12227_v17 = vadd.f32 %v4208_v41, %v4062_v55 }
 0xa2e   : > { %v4220_v49 = vmax.f32 %v12227_v17, 0.0 }
 0xa31   : > { %v4180_v44 = vpop.f32.mrf.mxu1 }
 0xa32   : > { %v12231_v19 = vadd.f32 %v4180_v44, %v4062_v55 }
 0xa33   : > { %v4210_v35 = vpop.f32.mrf.mxu3 }
 0xa34   : > { %v12229_v24 = vadd.f32 %v4210_v35, %v4067_v13  ;;  %v4218_v0 = vmax.f32 %v12231_v19, 0.0 }
 0xa36   : > { %v4228_v7 = vmax.f32 %v12229_v24, 0.0 }
 0xa38   : > { %v8617_v18 = vpack.i.bf16 %v4228_v7, %v4220_v49 }
 0xa39   : > { %v4182_v43 = vpop.f32.mrf.mxu1 }
 0xa3a   : > { %v12235_v6 = vadd.f32 %v4182_v43, %v4067_v13  ;;  %8618 = vrot.lane.b32.xlu1 %v8617_v18, %s13935_s17 }
 0xa3c   : > { %v4226_v42 = vmax.f32 %v12235_v6, 0.0 }
 0xa3d   : > { %v4194_v16 = vpop.f32.mrf.mxu2 }
 0xa3e   : > { %v8607_v34 = vpack.i.bf16 %v4226_v42, %v4218_v0  ;;  %v12249_v60 = vadd.f32 %v4194_v16, %v4062_v55 }
 0xa40   : > { %8608 = vrot.lane.b32.xlu2 %v8607_v34, %s13935_s17  ;;  %v4219_v62 = vmax.f32 %v12249_v60, 0.0 }
 0xa45   : > { %v4196_v4 = vpop.f32.mrf.mxu2 }
 0xa46   : > { %v12251_v51 = vadd.f32 %v4196_v4, %v4067_v13 }
 0xa48   : > { %v4227_v57 = vmax.f32 %v12251_v51, 0.0 }
 0xa4a   : > { %v8612_v36 = vpack.i.bf16 %v4227_v57, %v4219_v62 }
 0xa4c   : > { %8613 = vrot.lane.b32.xlu0 %v8612_v36, %s13935_s17 }
 0xa4d   : > { %v8584_v30 = vpop.permute.xlu0 %8583 }
 0xa4e   : > { %v8586_v15 = vunpack.i.h.bf16 %v8584_v30  ;;  %v8585_v54 = vunpack.i.l.bf16 %v8584_v30 }
 0xa5f   : > { %v8589_v47 = vpop.permute.xlu1 %8588 }
 0xa60   : > { %v8591_v37 = vunpack.i.h.bf16 %v8589_v47  ;;  %v8590_v20 = vunpack.i.l.bf16 %v8589_v47 }
 0xa62   : > { %v4274_v55 = vsel %vm664_vm3, %v8586_v15, %v8591_v37  ;;  %v4273_v13 = vsel %vm664_vm3, %v8585_v54, %v8590_v20 }
 0xa63   : > { %v12266_v5 = vmax.f32 %v4221_v50, %v4274_v55  ;;  %v12270_v9 = vmax.f32 %v4213_v25, %v4273_v13 }
 0xa65   : > { %v8622_v8 = vpack.i.bf16 %v12266_v5, %v12270_v9 }
 0xa67   : > { %8623 = vrot.lane.b32.xlu2 %v8622_v8, %s13936_s18 }
 0xa84   : > { %v8594_v40 = vpop.permute.xlu2 %8593 }
 0xa85   : > { %v8596_v2 = vunpack.i.h.bf16 %v8594_v40  ;;  %v8595_v10 = vunpack.i.l.bf16 %v8594_v40 }
 0xa87   : > { %v4271_v38 = vsel %vm664_vm3, %v8590_v20, %v8595_v10  ;;  %v4272_v46 = vsel %vm664_vm3, %v8591_v37, %v8596_v2 }
 0xa88   : > { %v12281_v50 = vmax.f32 %v4214_v39, %v4271_v38  ;;  %v12285_v29 = vmax.f32 %v4222_v63, %v4272_v46 }
 0xa8a   : > { %v8627_v25 = vpack.i.bf16 %v12285_v29, %v12281_v50 }
 0xa8c   : > { %8628 = vrot.lane.b32.xlu0 %v8627_v25, %s13936_s18 }
 0xa9a   : > { %v8609_v59 = vpop.permute.xlu2 %8608  ;;  %v8599_v53 = vpop.permute.xlu1 %8598 }
 0xa9b   : > { %v8611_v58 = vunpack.i.h.bf16 %v8609_v59  ;;  %v8610_v31 = vunpack.i.l.bf16 %v8609_v59  ;;  %v8601_v11 = vunpack.i.h.bf16 %v8599_v53  ;;  %v8600_v61 = vunpack.i.l.bf16 %v8599_v53 }
 0xa9c   : > { %v8604_v22 = vpop.permute.xlu0 %8603 }
 0xa9d   : > { %v4266_v56 = vsel %vm664_vm3, %v8601_v11, %v8611_v58  ;;  %v4265_v39 = vsel %vm664_vm3, %v8600_v61, %v8610_v31  ;;  %v8606_v41 = vunpack.i.h.bf16 %v8604_v22  ;;  %v8605_v44 = vunpack.i.l.bf16 %v8604_v22 }
 0xa9e   : > { %v12296_v26 = vmax.f32 %v4225_v12, %v4266_v56  ;;  %v12300_v63 = vmax.f32 %v4217_v52, %v4265_v39 }
 0xa9f   : > { %v4270_v43 = vsel %vm664_vm3, %v8596_v2, %v8606_v41  ;;  %v4267_v18 = vsel %vm664_vm3, %v8605_v44, %v8600_v61  ;;  %v4268_v14 = vsel %vm664_vm3, %v8606_v41, %v8601_v11  ;;  %v4269_v45 = vsel %vm664_vm3, %v8595_v10, %v8605_v44 }
 0xaa0   : > { %v8642_v35 = vpack.i.bf16 %v12296_v26, %v12300_v63  ;;  %v12315_v52 = vmax.f32 %v4223_v23, %v4270_v43  ;;  %v12319_v12 = vmax.f32 %v4215_v21, %v4269_v45  ;;  %v4280_v16 = vmax.f32 %v4216_v3, %v4267_v18 }
 0xaa1   : > { %v4288_v34 = vmax.f32 %v4224_v48, %v4268_v14 }
 0xaa2   : > { %8643 = vrot.lane.b32.xlu0 %v8642_v35, %s13936_s18  ;;  %v8632_v4 = vpack.i.bf16 %v12315_v52, %v12319_v12 }
 0xaa3   : > { %v8637_v36 = vpack.i.bf16 %v4288_v34, %v4280_v16 }
 0xaa4   : > { %8633 = vrot.lane.b32.xlu1 %v8632_v4, %s13936_s18 }
 0xaa5   : > { %8638 = vrot.lane.b32.xlu2 %v8637_v36, %s13936_s18 }
 0xaac   : > { %v8619_v1 = vpop.permute.xlu1 %8618 }
 0xaad   : > { %v8621_v23 = vunpack.i.h.bf16 %v8619_v1  ;;  %v8620_v30 = vunpack.i.l.bf16 %v8619_v1 }
 0xaaf   : > { %v4276_v28 = vsel %vm664_vm3, %v8621_v23, %v8586_v15  ;;  %v4275_v33 = vsel %vm664_vm3, %v8620_v30, %v8585_v54 }
 0xab0   : > { %v12335_v27 = vmax.f32 %v4228_v7, %v4276_v28  ;;  %v12339_v21 = vmax.f32 %v4220_v49, %v4275_v33 }
 0xab2   : > { %v8657_v3 = vpack.i.bf16 %v12335_v27, %v12339_v21 }
 0xab4   : > { %8658 = vrot.lane.b32.xlu0 %v8657_v3, %s13936_s18 }
 0xabe   : > { %v8614_v48 = vpop.permute.xlu0 %8613 }
 0xabf   : > { %v8616_v47 = vunpack.i.h.bf16 %v8614_v48  ;;  %v8615_v37 = vunpack.i.l.bf16 %v8614_v48 }
 0xac1   : > { %v4261_v15 = vsel %vm664_vm3, %v8615_v37, %v8620_v30  ;;  %v4262_v24 = vsel %vm664_vm3, %v8616_v47, %v8621_v23  ;;  %v4263_v7 = vsel %vm664_vm3, %v8610_v31, %v8615_v37  ;;  %v4264_v17 = vsel %vm664_vm3, %v8611_v58, %v8616_v47 }
 0xac2   : > { %v12354_v49 = vmax.f32 %v4218_v0, %v4263_v7  ;;  %v12358_v54 = vmax.f32 %v4219_v62, %v4261_v15  ;;  %v12362_v20 = vmax.f32 %v4226_v42, %v4264_v17  ;;  %v12366_v55 = vmax.f32 %v4227_v57, %v4262_v24  ;;  %v12374_v0 = vpop.permute.xlu2 %8623 }
 0xac3   : > { %v8626_v6 = vunpack.i.h.bf16 %v12374_v0  ;;  %v8625_v42 = vunpack.i.l.bf16 %v12374_v0 }
 0xac4   : > { %v8647_v13 = vpack.i.bf16 %v12362_v20, %v12354_v49  ;;  %v8652_v19 = vpack.i.bf16 %v12366_v55, %v12358_v54 }
 0xac6   : > { %8648 = vrot.lane.b32.xlu1 %v8647_v13, %s13936_s18  ;;  %8653 = vrot.lane.b32.xlu2 %v8652_v19, %s13936_s18 }
 0xafe   : > { %v8629_v60 = vpop.permute.xlu0 %8628 }
 0xaff   : > { %v8631_v51 = vunpack.i.h.bf16 %v8629_v60  ;;  %v8630_v62 = vunpack.i.l.bf16 %v8629_v60  ;;  %v8639_v38 = vpop.permute.xlu2 %8638 }
 0xb00   : > { %v8641_v25 = vunpack.i.h.bf16 %v8639_v38  ;;  %v8640_v59 = vunpack.i.l.bf16 %v8639_v38 }
 0xb01   : > { %v4338_v57 = vsel %vm729_vm4, %v8626_v6, %v8631_v51  ;;  %v4337_v8 = vsel %vm729_vm4, %v8625_v42, %v8630_v62 }
 0xb02   : > { %v4349_v40 = vmax.f32 %v12266_v5, %v4338_v57  ;;  %v4341_v2 = vmax.f32 %v12270_v9, %v4337_v8 }
 0xb04   : > { %v8697_v10 = vpack.i.bf16 %v4349_v40, %v4341_v2 }
 0xb06   : > { %8698 = vrot.lane.b32.xlu2 %v8697_v10, %s13911_s26  ;;  %8693 = vrot.lane.b32.xlu0 %v8697_v10, %s13935_s17 }
 0xb07   : > { %8663 = vrot.lane.b32.xlu1 %v8697_v10, %s13907_s15 }
 0xb0f   : > { %8668 = vrot.lane.b32.xlu1 %v8697_v10, %s13908_s16 }
 0xb14   : > { %v12388_v46 = vpop.permute.xlu0 %8643 }
 0xb15   : > { %v8646_v53 = vunpack.i.h.bf16 %v12388_v46  ;;  %v8645_v5 = vunpack.i.l.bf16 %v12388_v46 }
 0xb16   : > { %v8634_v31 = vpop.permute.xlu1 %8633 }
 0xb17   : > { %v4332_v9 = vsel %vm729_vm4, %v8641_v25, %v8646_v53  ;;  %v4331_v58 = vsel %vm729_vm4, %v8640_v59, %v8645_v5  ;;  %8673 = vrot.lane.b32.xlu1 %v8697_v10, %s13909_s19  ;;  %v8636_v56 = vunpack.i.h.bf16 %v8634_v31  ;;  %v8635_v39 = vunpack.i.l.bf16 %v8634_v31 }
 0xb18   : > { %v4352_v11 = vmax.f32 %v4288_v34, %v4332_v9  ;;  %v4344_v61 = vmax.f32 %v4280_v16, %v4331_v58 }
 0xb19   : > { %v4333_v22 = vsel %vm729_vm4, %v8635_v39, %v8640_v59  ;;  %v4334_v41 = vsel %vm729_vm4, %v8636_v56, %v8641_v25  ;;  %v4335_v44 = vsel %vm729_vm4, %v8630_v62, %v8635_v39  ;;  %v4336_v35 = vsel %vm729_vm4, %v8631_v51, %v8636_v56 }
 0xb1a   : > { %v4342_v43 = vmax.f32 %v12281_v50, %v4335_v44  ;;  %v4343_v18 = vmax.f32 %v12319_v12, %v4333_v22  ;;  %v4350_v14 = vmax.f32 %v12285_v29, %v4336_v35  ;;  %v4351_v45 = vmax.f32 %v12315_v52, %v4334_v41 }
 0xb1b   : > { %v12413_v16 = vpack.i.bf16 %v4352_v11, %v4344_v61 }
 0xb1c   : > { %v4357_v34 = vpack.c.bf16 %v4342_v43, %v4341_v2  ;;  %v4358_v4 = vpack.c.bf16 %v4344_v61, %v4343_v18  ;;  %v4361_v36 = vpack.c.bf16 %v4350_v14, %v4349_v40  ;;  %v4362_v1 = vpack.c.bf16 %v4352_v11, %v4351_v45 }
 0xb1d   : > { %v8707_v23 = vpack.i.bf16 %v4351_v45, %v4343_v18  ;;  %v8702_v30 = vpack.i.bf16 %v4350_v14, %v4342_v43 }
 0xb1e   : > { %4365 = vst [vmem:[#allocation2] sm:$0xff] %v4357_v34 }
 0xb1f   : > { %8678 = vrot.lane.b32.xlu1 %v8697_v10, %s13910_s20  ;;  %4366 = vst [vmem:[#allocation2 + $0x8] sm:$0xff] %v4358_v4  ;;  %8708 = vrot.lane.b32.xlu0 %v8707_v23, %s13907_s15 }
 0xb20   : > { %8703 = vrot.lane.b32.xlu2 %v8702_v30, %s13907_s15  ;;  %4369 = vst [vmem:[#allocation2 + $0x20] sm:$0xff] %v4361_v36  ;;  %v8654_v50 = vpop.permute.xlu2 %8653 }
 0xb21   : > { %4370 = vst [vmem:[#allocation2 + $0x28] sm:$0xff] %v4362_v1  ;;  %v8656_v52 = vunpack.i.h.bf16 %v8654_v50  ;;  %v8655_v12 = vunpack.i.l.bf16 %v8654_v50 }
 0xb26   : > { %v8659_v29 = vpop.permute.xlu0 %8658 }
 0xb27   : > { %8683 = vrot.lane.b32.xlu1 %v8697_v10, %s13936_s18  ;;  %v8661_v28 = vunpack.i.h.bf16 %v8659_v29  ;;  %v8660_v33 = vunpack.i.l.bf16 %v8659_v29  ;;  %8718 = vrot.lane.b32.xlu0 %v8707_v23, %s13908_s16 }
 0xb28   : > { %8713 = vrot.lane.b32.xlu2 %v8702_v30, %s13908_s16 }
 0xb29   : > { %v4326_v3 = vsel %vm729_vm4, %v8656_v52, %v8661_v28  ;;  %v4340_v48 = vsel %vm729_vm4, %v8661_v28, %v8626_v6  ;;  %v4325_v47 = vsel %vm729_vm4, %v8655_v12, %v8660_v33  ;;  %v4339_v37 = vsel %vm729_vm4, %v8660_v33, %v8625_v42 }
 0xb2a   : > { %v4355_v15 = vmax.f32 %v12366_v55, %v4326_v3  ;;  %v4356_v24 = vmax.f32 %v12335_v27, %v4340_v48  ;;  %v4347_v7 = vmax.f32 %v12358_v54, %v4325_v47  ;;  %v4348_v17 = vmax.f32 %v12339_v21, %v4339_v37 }
 0xb2c   : > { %v4364_v13 = vpack.c.bf16 %v4356_v24, %v4355_v15  ;;  %v4360_v19 = vpack.c.bf16 %v4348_v17, %v4347_v7  ;;  %v12433_v0 = vpack.i.bf16 %v4355_v15, %v4347_v7  ;;  %v12436_v60 = vpack.i.bf16 %v4356_v24, %v4348_v17 }
 0xb2e   : > { %4368 = vst [vmem:[#allocation2 + $0x18] sm:$0xff] %v4360_v19 }
 0xb2f   : > { %8688 = vrot.lane.b32.xlu1 %v8697_v10, %s13937_s0  ;;  %4372 = vst [vmem:[#allocation2 + $0x38] sm:$0xff] %v4364_v13  ;;  %8728 = vrot.lane.b32.xlu0 %v8707_v23, %s13909_s19 }
 0xb30   : > { %8723 = vrot.lane.b32.xlu2 %v8702_v30, %s13909_s19 }
 0xb37   : > { %8763 = vrot.lane.b32.xlu1 %v8702_v30, %s13935_s17  ;;  %8738 = vrot.lane.b32.xlu0 %v8707_v23, %s13910_s20 }
 0xb38   : > { %v8649_v55 = vpop.permute.xlu1 %8648  ;;  %8733 = vrot.lane.b32.xlu2 %v8702_v30, %s13910_s20 }
 0xb39   : > { %v8651_v27 = vunpack.i.h.bf16 %v8649_v55  ;;  %v8650_v6 = vunpack.i.l.bf16 %v8649_v55 }
 0xb3b   : > { %v4327_v21 = vsel %vm729_vm4, %v8650_v6, %v8655_v12  ;;  %v4328_v54 = vsel %vm729_vm4, %v8651_v27, %v8656_v52  ;;  %v4329_v42 = vsel %vm729_vm4, %v8645_v5, %v8650_v6  ;;  %v4330_v51 = vsel %vm729_vm4, %v8646_v53, %v8651_v27 }
 0xb3c   : > { %v4345_v62 = vmax.f32 %v12300_v63, %v4329_v42  ;;  %v4346_v57 = vmax.f32 %v12354_v49, %v4327_v21  ;;  %v4353_v8 = vmax.f32 %v12296_v26, %v4330_v51  ;;  %v4354_v40 = vmax.f32 %v12362_v20, %v4328_v54 }
 0xb3e   : > { %v4359_v2 = vpack.c.bf16 %v4346_v57, %v4345_v62  ;;  %v4363_v10 = vpack.c.bf16 %v4354_v40, %v4353_v8  ;;  %v8857_v38 = vpack.i.bf16 %v4353_v8, %v4345_v62  ;;  %v12459_v25 = vpack.i.bf16 %v4354_v40, %v4346_v57 }
 0xb3f   : > { %8778 = vrot.lane.b32.xlu1 %v8707_v23, %s13911_s26  ;;  %8748 = vrot.lane.b32.xlu0 %v8707_v23, %s13936_s18 }
 0xb40   : > { %4367 = vst [vmem:[#allocation2 + $0x10] sm:$0xff] %v4359_v2  ;;  %8743 = vrot.lane.b32.xlu2 %v8702_v30, %s13936_s18 }
 0xb41   : > { %4371 = vst [vmem:[#allocation2 + $0x30] sm:$0xff] %v4363_v10 }
 0xb47   : > { %8783 = vrot.lane.b32.xlu1 %v12413_v16, %s13907_s15  ;;  %8758 = vrot.lane.b32.xlu0 %v8707_v23, %s13937_s0 }
 0xb48   : > { %8753 = vrot.lane.b32.xlu2 %v8702_v30, %s13937_s0 }
 0xb4f   : > { %8803 = vrot.lane.b32.xlu1 %v12413_v16, %s13936_s18  ;;  %8773 = vrot.lane.b32.xlu0 %v8702_v30, %s13911_s26 }
 0xb50   : > { %8768 = vrot.lane.b32.xlu2 %v8707_v23, %s13935_s17 }
 0xb57   : > { %8828 = vrot.lane.b32.xlu1 %v8857_v38, %s13908_s16  ;;  %8788 = vrot.lane.b32.xlu0 %v12413_v16, %s13908_s16 }
 0xb58   : > { %8793 = vrot.lane.b32.xlu2 %v12413_v16, %s13909_s19 }
 0xb5f   : > { %8838 = vrot.lane.b32.xlu1 %v8857_v38, %s13910_s20  ;;  %8798 = vrot.lane.b32.xlu0 %v12413_v16, %s13910_s20 }
 0xb60   : > { %8808 = vrot.lane.b32.xlu2 %v12413_v16, %s13937_s0  ;;  %v12491_v26 = vpop.permute.xlu2 %8698 }
 0xb67   : > { %8853 = vrot.lane.b32.xlu1 %v8857_v38, %s13911_s26  ;;  %8813 = vrot.lane.b32.xlu0 %v12413_v16, %s13911_s26 }
 0xb68   : > { %8818 = vrot.lane.b32.xlu2 %v12413_v16, %s13935_s17 }
 0xb6f   : > { %8863 = vrot.lane.b32.xlu1 %v12459_v25, %s13907_s15  ;;  %8833 = vrot.lane.b32.xlu0 %v8857_v38, %s13909_s19 }
 0xb70   : > { %8823 = vrot.lane.b32.xlu2 %v8857_v38, %s13907_s15 }
 0xb77   : > { %8888 = vrot.lane.b32.xlu1 %v12433_v0, %s13909_s19  ;;  %8848 = vrot.lane.b32.xlu0 %v8857_v38, %s13937_s0 }
 0xb78   : > { %8843 = vrot.lane.b32.xlu2 %v8857_v38, %s13936_s18  ;;  %v12514_v53 = vpop.permute.xlu0 %8693 }
 0xb79   : > { %v12497_v63 = vpop.permute.xlu1 %8663 }
 0xb7a   : > { %v8704_v49 = vpop.permute.xlu2 %8703  ;;  %v13880_v9 = vunpack.i.h.bf16 %v12497_v63  ;;  %v13879_v58 = vunpack.i.l.bf16 %v12497_v63 }
 0xb7b   : > { %v8706_v31 = vunpack.i.h.bf16 %v8704_v49  ;;  %v8705_v11 = vunpack.i.l.bf16 %v8704_v49 }
 0xb7d   : > { %v4802_v44 = vsel %vm1198_vm5, %v13880_v9, %v8706_v31  ;;  %v4801_v35 = vsel %vm1198_vm5, %v13879_v58, %v8705_v11 }
 0xb7f   : > { %8893 = vrot.lane.b32.xlu1 %v12459_v25, %s13910_s20  ;;  %8858 = vrot.lane.b32.xlu0 %v8857_v38, %s13935_s17 }
 0xb80   : > { %8868 = vrot.lane.b32.xlu2 %v12433_v0, %s13907_s15 }
 0xb81   : > { %v12504_v20 = vpop.permute.xlu1 %8668 }
 0xb82   : > { %v8714_v46 = vpop.permute.xlu2 %8713  ;;  %v13878_v16 = vunpack.i.h.bf16 %v12504_v20  ;;  %v13877_v34 = vunpack.i.l.bf16 %v12504_v20 }
 0xb83   : > { %v8716_v4 = vunpack.i.h.bf16 %v8714_v46  ;;  %v8715_v36 = vunpack.i.l.bf16 %v8714_v46 }
 0xb85   : > { %v4738_v52 = vsel %vm1133_vm6, %v13878_v16, %v8716_v4  ;;  %v4737_v12 = vsel %vm1133_vm6, %v13877_v34, %v8715_v36 }
 0xb87   : > { %8903 = vrot.lane.b32.xlu1 %v12459_v25, %s13936_s18  ;;  %8878 = vrot.lane.b32.xlu0 %v12433_v0, %s13908_s16 }
 0xb88   : > { %8873 = vrot.lane.b32.xlu2 %v12459_v25, %s13908_s16 }
 0xb89   : > { %v12512_v59 = vpop.permute.xlu1 %8673 }
 0xb8a   : > { %v12516_v5 = vpop.permute.xlu2 %8723  ;;  %v13869_v15 = vunpack.i.h.bf16 %v12512_v59  ;;  %v13867_v24 = vunpack.i.l.bf16 %v12512_v59 }
 0xb8b   : > { %v8726_v13 = vunpack.i.h.bf16 %v12516_v5  ;;  %v8725_v19 = vunpack.i.l.bf16 %v12516_v5 }
 0xb8d   : > { %v4674_v62 = vsel %vm1068_vm7, %v13869_v15, %v8726_v13  ;;  %v4673_v57 = vsel %vm1068_vm7, %v13867_v24, %v8725_v19 }
 0xb8f   : > { %8918 = vrot.lane.b32.xlu1 %v12433_v0, %s13937_s0  ;;  %8883 = vrot.lane.b32.xlu0 %v12459_v25, %s13909_s19 }
 0xb90   : > { %8898 = vrot.lane.b32.xlu2 %v12433_v0, %s13910_s20 }
 0xb91   : > { %v12526_v61 = vpop.permute.xlu1 %8678  ;;  %v12528_v56 = vpop.permute.xlu0 %8708 }
 0xb92   : > { %v12530_v39 = vpop.permute.xlu2 %8733  ;;  %v8711_v22 = vunpack.i.h.bf16 %v12528_v56  ;;  %v8710_v41 = vunpack.i.l.bf16 %v12528_v56  ;;  %v13876_v46 = vunpack.i.h.bf16 %v12526_v61  ;;  %v13875_v5 = vunpack.i.l.bf16 %v12526_v61 }
 0xb94   : > { %v4799_v43 = vsel %vm1198_vm5, %v8705_v11, %v8710_v41  ;;  %v4800_v18 = vsel %vm1198_vm5, %v8706_v31, %v8711_v22  ;;  %v8736_v31 = vunpack.i.h.bf16 %v12530_v39  ;;  %v8735_v11 = vunpack.i.l.bf16 %v12530_v39 }
 0xb95   : > { %v4805_v14 = vpack.c.bf16 %v4799_v43, %v4801_v35  ;;  %v4809_v45 = vpack.c.bf16 %v4800_v18, %v4802_v44 }
 0xb97   : > { %8933 = vrot.lane.b32.xlu1 %v12433_v0, %s13935_s17  ;;  %4813 = vst [vmem:[#allocation2 + $0x1c0] sm:$0xff] %v4805_v14  ;;  %8913 = vrot.lane.b32.xlu0 %v12459_v25, %s13937_s0 }
 0xb98   : > { %8908 = vrot.lane.b32.xlu2 %v12433_v0, %s13936_s18  ;;  %4817 = vst [vmem:[#allocation2 + $0x1e0] sm:$0xff] %v4809_v45  ;;  %v13866_v45 = vunpack.i.h.bf16 %v12514_v53 }
 0xb99   : > { %v12558_v1 = vpop.permute.xlu1 %8683  ;;  %v12560_v23 = vpop.permute.xlu0 %8718 }
 0xb9a   : > { %v12562_v30 = vpop.permute.xlu2 %8743  ;;  %v8721_v50 = vunpack.i.h.bf16 %v12560_v23  ;;  %v8720_v29 = vunpack.i.l.bf16 %v12560_v23 }
 0xb9c   : > { %v4735_v28 = vsel %vm1133_vm6, %v8715_v36, %v8720_v29  ;;  %v4736_v33 = vsel %vm1133_vm6, %v8716_v4, %v8721_v50  ;;  %v13865_v4 = vunpack.i.l.bf16 %v12514_v53 }
 0xb9d   : > { %v4741_v3 = vpack.c.bf16 %v4735_v28, %v4737_v12  ;;  %v4745_v48 = vpack.c.bf16 %v4736_v33, %v4738_v52 }
 0xb9e   : > { %v7262_v47 = vld [vmem:[#allocation2 + $0x1c0] sm:$0xf]  ;;  %v7554_v37 = vld [vmem:[#allocation2 + $0x1c4] sm:$0xf] }
 0xb9f   : > { %8948 = vrot.lane.b32.xlu1 %v12436_v60, %s13910_s20  ;;  %4749 = vst [vmem:[#allocation2 + $0x180] sm:$0xff] %v4741_v3  ;;  %8928 = vrot.lane.b32.xlu0 %v12459_v25, %s13935_s17  ;;  %v7558_v7 = vld [vmem:[#allocation2 + $0x1dc] sm:$0xf0]  ;;  %v7264_v17 = vld [vmem:[#allocation2 + $0x1e0] sm:$0xf0]  ;;  %s9082_s20 = scalar_lea.hbm %s13807_s12, 2 }
 0xba0   : > { %8923 = vrot.lane.b32.xlu2 %v12436_v60, %s13907_s15  ;;  %4753 = vst [vmem:[#allocation2 + $0x1a0] sm:$0xff] %v4745_v48  ;;  %v7263_v27 = vor.u32 %v7558_v7, %v7262_v47  ;;  %v7267_v6 = vor.u32 %v7554_v37, %v7264_v17  ;;  %v4610_v47 = vsel %vm1003_vm8, %v13876_v46, %v8736_v31 }
 0xba1   : > { %v12592_v55 = vpop.permute.xlu1 %8688  ;;  %v12594_v21 = vpop.permute.xlu0 %8728  ;;  %v4609_v37 = vsel %vm1003_vm8, %v13875_v5, %v8735_v11 }
 0xba2   : > { %v12596_v54 = vpop.permute.xlu2 %8753  ;;  %v8731_v42 = vunpack.i.h.bf16 %v12594_v21  ;;  %v8730_v51 = vunpack.i.l.bf16 %v12594_v21  ;;  %5343 = vmatpush.bf16.msra.mxu0 %v7263_v27  ;;  %5371 = vmatpush.bf16.msra.mxu2 %v7267_v6 }
 0xba4   : > { %v4671_v8 = vsel %vm1068_vm7, %v8725_v19, %v8730_v51  ;;  %v4672_v40 = vsel %vm1068_vm7, %v8726_v13, %v8731_v42 }
 0xba5   : > { %v4677_v2 = vpack.c.bf16 %v4671_v8, %v4673_v57  ;;  %v4681_v10 = vpack.c.bf16 %v4672_v40, %v4674_v62 }
 0xba6   : > { %v7230_v38 = vld [vmem:[#allocation2 + $0x180] sm:$0xf]  ;;  %v7546_v49 = vld [vmem:[#allocation2 + $0x184] sm:$0xf] }
 0xba7   : > { %8963 = vrot.lane.b32.xlu1 %v12436_v60, %s13936_s18  ;;  %4685 = vst [vmem:[#allocation2 + $0x140] sm:$0xff] %v4677_v2  ;;  %8943 = vrot.lane.b32.xlu0 %v12436_v60, %s13909_s19  ;;  %v7550_v44 = vld [vmem:[#allocation2 + $0x19c] sm:$0xf0]  ;;  %v7232_v35 = vld [vmem:[#allocation2 + $0x1a0] sm:$0xf0]  ;;  %s404_s19 = sand.u32 1, %s9116_s22  }
 0xba8   : > { %8938 = vrot.lane.b32.xlu2 %v12436_v60, %s13908_s16  ;;  %4689 = vst [vmem:[#allocation2 + $0x160] sm:$0xff] %v4681_v10  ;;  %v7231_v18 = vor.u32 %v7550_v44, %v7230_v38  ;;  %v7235_v14 = vor.u32 %v7546_v49, %v7232_v35  ;;  %v13871_v38 = vunpack.i.h.bf16 %v12558_v1  ;;  %v13870_v49 = vunpack.i.l.bf16 %v12558_v1  ;;  %s405_s28 = scalar_lea.vmem [#allocation3], %s404_s19  ;;  %s6295_s15 = scalar_lea.sflag [#allocation4], %s404_s19 }
 0xba9   : > { %v8764_v43 = vpop.permute.xlu1 %8763  ;;  %v12628_v36 = vpop.permute.xlu0 %8738  ;;  %v8746_v44 = vunpack.i.h.bf16 %v12562_v30  ;;  %v8745_v35 = vunpack.i.l.bf16 %v12562_v30  ;;  %s6305_s29 = sshll.u32 %s405_s28, 4  ;;  %s6306_s29 = int_to_ptr.vmem [resolvable:$true] %s6305_s29 }
 0xbaa   : > { %v8766_v39 = vunpack.i.h.bf16 %v8764_v43  ;;  %v8765_v52 = vunpack.i.l.bf16 %v8764_v43  ;;  %v12630_v12 = vpop.permute.xlu2 %8768  ;;  %v8741_v28 = vunpack.i.h.bf16 %v12628_v36  ;;  %v8740_v33 = vunpack.i.l.bf16 %v12628_v36  ;;  %5344 = vmatpush.bf16.msra.mxu0 %v7231_v18  ;;  %5372 = vmatpush.bf16.msra.mxu2 %v7235_v14 }
 0xbab   : > { %v8771_v3 = vunpack.i.h.bf16 %v12630_v12  ;;  %v8770_v48 = vunpack.i.l.bf16 %v12630_v12  ;;  %v4546_v30 = vsel %vm729_vm4, %v13871_v38, %v8746_v44 }
 0xbac   : > { %v4418_v7 = vsel %vm664_vm3, %v13866_v45, %v8766_v39  ;;  %v4417_v17 = vsel %vm664_vm3, %v13865_v4, %v8765_v52  ;;  %v4607_v13 = vsel %vm1003_vm8, %v8735_v11, %v8740_v33  ;;  %v4608_v19 = vsel %vm1003_vm8, %v8736_v31, %v8741_v28 }
 0xbad   : > { %v4416_v27 = vsel %vm664_vm3, %v8766_v39, %v8771_v3  ;;  %v4415_v6 = vsel %vm664_vm3, %v8765_v52, %v8770_v48  ;;  %v4613_v62 = vpack.c.bf16 %v4607_v13, %v4609_v37  ;;  %v4617_v57 = vpack.c.bf16 %v4608_v19, %v4610_v47 }
 0xbae   : > { %v4425_v8 = vpack.c.bf16 %v4416_v27, %v4418_v7  ;;  %v4421_v40 = vpack.c.bf16 %v4415_v6, %v4417_v17  ;;  %v7198_v2 = vld [vmem:[#allocation2 + $0x140] sm:$0xf]  ;;  %v7538_v10 = vld [vmem:[#allocation2 + $0x144] sm:$0xf]  ;;  %v4545_v47 = vsel %vm729_vm4, %v13870_v49, %v8745_v35  ;;  %v13873_v6 = vunpack.i.h.bf16 %v12592_v55 }
 0xbaf   : > { %8978 = vrot.lane.b32.xlu1 %v12436_v60, %s13911_s26  ;;  %4621 = vst [vmem:[#allocation2 + $0x100] sm:$0xff] %v4613_v62  ;;  %8958 = vrot.lane.b32.xlu0 %v12433_v0, %s13911_s26  ;;  %v7542_v31 = vld [vmem:[#allocation2 + $0x15c] sm:$0xf0]  ;;  %v7200_v11 = vld [vmem:[#allocation2 + $0x160] sm:$0xf0]  ;;  %v13872_v62 = vunpack.i.l.bf16 %v12592_v55  ;;  %v13874_v4 = vunpack.i.l.bf16 %v12491_v26 }
 0xbb0   : > { %8953 = vrot.lane.b32.xlu2 %v12459_v25, %s13911_s26  ;;  %4625 = vst [vmem:[#allocation2 + $0x120] sm:$0xff] %v4617_v57  ;;  %v7199_v18 = vor.u32 %v7542_v31, %v7198_v2  ;;  %v7203_v14 = vor.u32 %v7538_v10, %v7200_v11  ;;  %v8755_v2 = vunpack.i.l.bf16 %v12596_v54 }
 0xbb1   : > { %v12678_v43 = vpop.permute.xlu1 %8778  ;;  %4433 = vst [vmem:[#allocation2 + $0x60] sm:$0xff] %v4425_v8  ;;  %v12680_v39 = vpop.permute.xlu0 %8748 }
 0xbb2   : > { %v12682_v52 = vpop.permute.xlu2 %8793  ;;  %4429 = vst [vmem:[#allocation2 + $0x40] sm:$0xff] %v4421_v40  ;;  %v8751_v0 = vunpack.i.h.bf16 %v12680_v39  ;;  %v8750_v25 = vunpack.i.l.bf16 %v12680_v39  ;;  %5345 = vmatpush.bf16.msra.mxu0 %v7199_v18  ;;  %5373 = vmatpush.bf16.msra.mxu2 %v7203_v14  ;;  %v8756_v40 = vunpack.i.h.bf16 %v12596_v54  ;;  %v4481_v54 = vsel %vm874_vm9, %v13872_v62, %v8755_v2 }
 0xbb4   : > { %v4543_v37 = vsel %vm729_vm4, %v8745_v35, %v8750_v25  ;;  %v4544_v7 = vsel %vm729_vm4, %v8746_v44, %v8751_v0 }
 0xbb5   : > { %v4549_v17 = vpack.c.bf16 %v4543_v37, %v4545_v47  ;;  %v4553_v13 = vpack.c.bf16 %v4544_v7, %v4546_v30  ;;  %v4960_v37 = vld [vmem:[%s13799_s4 + $0x8] sm:$0xff]  ;;  %v4959_v7 = vld [vmem:[%s13799_s4] sm:$0xff] }
 0xbb6   : > { %v7166_v19 = vld [vmem:[#allocation2 + $0x100] sm:$0xf]  ;;  %v7530_v27 = vld [vmem:[#allocation2 + $0x104] sm:$0xf] }
 0xbb7   : > { %4557 = vst [vmem:[#allocation2 + $0xc0] sm:$0xff] %v4549_v17  ;;  %8973 = vrot.lane.b32.xlu0 %v12436_v60, %s13935_s17  ;;  %v7534_v57 = vld [vmem:[#allocation2 + $0x11c] sm:$0xf0]  ;;  %v7168_v8 = vld [vmem:[#allocation2 + $0x120] sm:$0xf0] }
 0xbb8   : > { %8968 = vrot.lane.b32.xlu2 %v12436_v60, %s13937_s0  ;;  %4561 = vst [vmem:[#allocation2 + $0xe0] sm:$0xff] %v4553_v13  ;;  %v7167_v31 = vor.u32 %v7534_v57, %v7166_v19  ;;  %v7171_v11 = vor.u32 %v7530_v27, %v7168_v8  ;;  %v4482_v60 = vsel %vm874_vm9, %v13873_v6, %v8756_v40 }
 0xbb9   : > { %v12710_v10 = vpop.permute.xlu1 %8783  ;;  %v12712_v44 = vpop.permute.xlu0 %8758  ;;  %v7070_v6 = vld [vmem:[#allocation2 + $0x40] sm:$0xf] }
 0xbba   : > { %v12714_v35 = vpop.permute.xlu2 %8808  ;;  %v8761_v18 = vunpack.i.h.bf16 %v12712_v44  ;;  %v8760_v14 = vunpack.i.l.bf16 %v12712_v44  ;;  %5346 = vmatpush.bf16.msra.mxu0 %v7167_v31  ;;  %5374 = vmatpush.bf16.msra.mxu2 %v7171_v11  ;;  %v13868_v11 = vunpack.i.h.bf16 %v12491_v26 }
 0xbbc   : > { %v4479_v30 = vsel %vm874_vm9, %v8755_v2, %v8760_v14  ;;  %v4480_v47 = vsel %vm874_vm9, %v8756_v40, %v8761_v18 }
 0xbbd   : > { %v4485_v17 = vpack.c.bf16 %v4479_v30, %v4481_v54  ;;  %v4489_v13 = vpack.c.bf16 %v4480_v47, %v4482_v60  ;;  %v8781_v60 = vunpack.i.h.bf16 %v12678_v43  ;;  %v8780_v54 = vunpack.i.l.bf16 %v12678_v43 }
 0xbbe   : > { %v7134_v19 = vld [vmem:[#allocation2 + $0xc0] sm:$0xf]  ;;  %v7522_v27 = vld [vmem:[#allocation2 + $0xc4] sm:$0xf]  ;;  %v8796_v43 = vunpack.i.h.bf16 %v12682_v52 }
 0xbbf   : > { %4493 = vst [vmem:[#allocation2 + $0x80] sm:$0xff] %v4485_v17  ;;  %4968 = vperm.xlu0 %7619, %v4960_v37   ;;  %v7526_v57 = vld [vmem:[#allocation2 + $0xdc] sm:$0xf0]  ;;  %v7136_v8 = vld [vmem:[#allocation2 + $0xe0] sm:$0xf0] }
 0xbc0   : > { %4963 = vperm.xlu2 %8021, %v4959_v7   ;;  %4497 = vst [vmem:[#allocation2 + $0xa0] sm:$0xff] %v4489_v13  ;;  %v7135_v40 = vor.u32 %v7526_v57, %v7134_v19  ;;  %v7139_v31 = vor.u32 %v7522_v27, %v7136_v8  ;;  %v7510_v8 = vld [vmem:[#allocation2 + $0x5c] sm:$0xf0] }
 0xbc1   : > { %v12740_v2 = vpop.permute.xlu1 %8803  ;;  %v8774_v45 = vpop.permute.xlu0 %8773 }
 0xbc2   : > { %v12744_v24 = vpop.permute.xlu2 %8818  ;;  %v8776_v30 = vunpack.i.h.bf16 %v8774_v45  ;;  %v8775_v47 = vunpack.i.l.bf16 %v8774_v45  ;;  %5347 = vmatpush.bf16.msra.mxu0 %v7135_v40  ;;  %5375 = vmatpush.bf16.msra.mxu2 %v7139_v31  ;;  %v7072_v40 = vld [vmem:[#allocation2 + $0x60] sm:$0xf0]  ;;  %v8786_v31 = vunpack.i.h.bf16 %v12710_v10 }
 0xbc4   : > { %v4866_v37 = vsel %vm1263_vm10, %v13868_v11, %v8776_v30  ;;  %v4863_v7 = vsel %vm1263_vm10, %v8775_v47, %v8780_v54  ;;  %v4864_v17 = vsel %vm1263_vm10, %v8776_v30, %v8781_v60  ;;  %v4865_v45 = vsel %vm1263_vm10, %v13874_v4, %v8775_v47  ;;  %v7506_v47 = vld [vmem:[#allocation2 + $0x44] sm:$0xf] }
 0xbc5   : > { %v4869_v13 = vpack.c.bf16 %v4863_v7, %v4865_v45  ;;  %v4873_v19 = vpack.c.bf16 %v4864_v17, %v4866_v37  ;;  %v8785_v11 = vunpack.i.l.bf16 %v12710_v10 }
 0xbc6   : > { %v7102_v27 = vld [vmem:[#allocation2 + $0x80] sm:$0xf]  ;;  %v7514_v57 = vld [vmem:[#allocation2 + $0x84] sm:$0xf] }
 0xbc7   : > { %4877 = vst [vmem:[#allocation2 + $0x200] sm:$0xff] %v4869_v13  ;;  %v7518_v15 = vld [vmem:[#allocation2 + $0x9c] sm:$0xf0]  ;;  %v7104_v49 = vld [vmem:[#allocation2 + $0xa0] sm:$0xf0] }
 0xbc8   : > { %4881 = vst [vmem:[#allocation2 + $0x220] sm:$0xff] %v4873_v19  ;;  %v7103_v38 = vor.u32 %v7518_v15, %v7102_v27  ;;  %v7107_v62 = vor.u32 %v7514_v57, %v7104_v49  ;;  %v4798_v15 = vsel %vm1198_vm5, %v8711_v22, %v8786_v31  ;;  %v4797_v49 = vsel %vm1198_vm5, %v8710_v41, %v8785_v11  ;;  %v7038_v57 = vld [vmem:[#allocation2] sm:$0xf] }
 0xbc9   : > { %v12766_v30 = vpop.permute.xlu1 %8828  ;;  %v8789_v7 = vpop.permute.xlu0 %8788  ;;  %v7071_v19 = vor.u32 %v7510_v8, %v7070_v6  ;;  %v7075_v27 = vor.u32 %v7506_v47, %v7072_v40  ;;  %v7502_v41 = vld [vmem:[#allocation2 + $0x1c] sm:$0xf0]  ;;  %v7498_v6 = vld [vmem:[#allocation2 + $0x4] sm:$0xf]  ;;  %v7496_v40 = vld [vmem:[%s13798_s3 + $0x4] sm:$0xf] }
 0xbca   : > { %v8831_v37 = vunpack.i.h.bf16 %v12766_v30  ;;  %v13881_v17 = vunpack.i.l.bf16 %v12766_v30  ;;  %v12770_v45 = vpop.permute.xlu2 %8823  ;;  %v8791_v4 = vunpack.i.h.bf16 %v8789_v7  ;;  %v8790_v5 = vunpack.i.l.bf16 %v8789_v7  ;;  %5348 = vmatpush.bf16.msra.mxu0 %v7103_v38  ;;  %5376 = vmatpush.bf16.msra.mxu2 %v7107_v62  ;;  %v7040_v62 = vld [vmem:[#allocation2 + $0x20] sm:$0xf0] }
 0xbcb   : > { %v8826_v10 = vunpack.i.h.bf16 %v12770_v45  ;;  %v8825_v13 = vunpack.i.l.bf16 %v12770_v45 }
 0xbcc   : > { %v4734_v7 = vsel %vm1133_vm6, %v8721_v50, %v8791_v4  ;;  %v4733_v38 = vsel %vm1133_vm6, %v8720_v29, %v8790_v5  ;;  %v4732_v56 = vsel %vm1133_vm6, %v8791_v4, %v8831_v37  ;;  %v4731_v22 = vsel %vm1133_vm6, %v8790_v5, %v13881_v17  ;;  %v7030_v4 = vld [vmem:[%s13798_s3] sm:$0xf]  ;;  %v7497_v5 = vld [vmem:[%s13798_s3 + $0x4] sm:$0xf0] }
 0xbcd   : > { %v4746_v8 = vpack.c.bf16 %v4732_v56, %v4734_v7  ;;  %v4742_v50 = vpack.c.bf16 %v4731_v22, %v4733_v38  ;;  %v4796_v23 = vsel %vm1198_vm5, %v8786_v31, %v8826_v10  ;;  %v4795_v29 = vsel %vm1198_vm5, %v8785_v11, %v8825_v13  ;;  %v7032_v11 = vld [vmem:[%s13798_s3 + $0x8] sm:$0xf0] }
 0xbce   : > { %v4810_v47 = vpack.c.bf16 %v4796_v23, %v4798_v15  ;;  %v4806_v7 = vpack.c.bf16 %v4795_v29, %v4797_v49  ;;  %5349 = vmatpush.bf16.msra.mxu0 %v7071_v19  ;;  %5377 = vmatpush.bf16.msra.mxu2 %v7075_v27  ;;  %v7294_v31 = vld [vmem:[#allocation2 + $0x200] sm:$0xf]  ;;  %v7562_v38 = vld [vmem:[#allocation2 + $0x204] sm:$0xf]  ;;  %v8806_v56 = vunpack.i.h.bf16 %v12740_v2  ;;  %v8805_v22 = vunpack.i.l.bf16 %v12740_v2 }
 0xbcf   : > { %4754 = vst [vmem:[#allocation2 + $0x1a8] sm:$0xff] %v4746_v8  ;;  %v7566_v46 = vld [vmem:[#allocation2 + $0x21c] sm:$0xf0]  ;;  %v7296_v34 = vld [vmem:[#allocation2 + $0x220] sm:$0xf0]  ;;  %v7039_v19 = vor.u32 %v7502_v41, %v7038_v57  ;;  %v7043_v27 = vor.u32 %v7498_v6, %v7040_v62  ;;  %v12826_v17 = vor.u32 %v7497_v5, %v7030_v4  ;;  %v12828_v2 = vor.u32 %v7496_v40, %v7032_v11 }
 0xbd0   : > { %4750 = vst [vmem:[#allocation2 + $0x188] sm:$0xff] %v4742_v50  ;;  %v7295_v15 = vor.u32 %v7566_v46, %v7294_v31  ;;  %v7299_v49 = vor.u32 %v7562_v38, %v7296_v34  ;;  %v4542_v57 = vsel %vm729_vm4, %v8751_v0, %v8806_v56  ;;  %v4541_v41 = vsel %vm729_vm4, %v8750_v25, %v8805_v22 }
 0xbd1   : > { %v12820_v16 = vpop.permute.xlu1 %8838  ;;  %4818 = vst [vmem:[#allocation2 + $0x1e8] sm:$0xff] %v4810_v47  ;;  %v8799_v23 = vpop.permute.xlu0 %8798 }
 0xbd2   : > { %v8841_v29 = vunpack.i.h.bf16 %v12820_v16  ;;  %v8840_v58 = vunpack.i.l.bf16 %v12820_v16  ;;  %v12824_v9 = vpop.permute.xlu2 %8843  ;;  %4814 = vst [vmem:[#allocation2 + $0x1c8] sm:$0xff] %v4806_v7  ;;  %v8801_v8 = vunpack.i.h.bf16 %v8799_v23  ;;  %v8800_v50 = vunpack.i.l.bf16 %v8799_v23  ;;  %5364 = vmatpush.bf16.msra.mxu1 %v7295_v15  ;;  %5392 = vmatpush.bf16.msra.mxu3 %v7299_v49 }
 0xbd3   : > { %v8846_v34 = vunpack.i.h.bf16 %v12824_v9  ;;  %v8845_v46 = vunpack.i.l.bf16 %v12824_v9  ;;  %5350 = vmatpush.bf16.msra.mxu0 %v7039_v19  ;;  %5378 = vmatpush.bf16.msra.mxu2 %v7043_v27 }
 0xbd4   : > { %v4606_v6 = vsel %vm1003_vm8, %v8741_v28, %v8801_v8  ;;  %v4605_v62 = vsel %vm1003_vm8, %v8740_v33, %v8800_v50  ;;  %v4604_v39 = vsel %vm1003_vm8, %v8801_v8, %v8841_v29  ;;  %v4603_v0 = vsel %vm1003_vm8, %v8800_v50, %v8840_v58 }
 0xbd5   : > { %v4618_v25 = vpack.c.bf16 %v4604_v39, %v4606_v6  ;;  %v4614_v4 = vpack.c.bf16 %v4603_v0, %v4605_v62  ;;  %v4540_v36 = vsel %vm729_vm4, %v8806_v56, %v8846_v34  ;;  %v4539_v28 = vsel %vm729_vm4, %v8805_v22, %v8845_v46  ;;  %7324 = vmatmul.msk.bf16.vlgmr.msra.gmra.mxu1 %vm1751_vm11, %v12828_v2 }
 0xbd6   : > { %v4554_v33 = vpack.c.bf16 %v4540_v36, %v4542_v57  ;;  %v4550_v5 = vpack.c.bf16 %v4539_v28, %v4541_v41  ;;  %5351 = vmatmul.bf16.vlgmr.msra.gmra.mxu0 %v12826_v17  ;;  %5379 = vmatmul.bf16.vlgmr.msra.gmra.mxu2 %v12826_v17  ;;  %v7551_v8 = vld [vmem:[#allocation2 + $0x1a4] sm:$0xf0]  ;;  %v7240_v0 = vld [vmem:[#allocation2 + $0x1a8] sm:$0xf0]  ;;  %v8795_v36 = vunpack.i.l.bf16 %v12682_v52 }
 0xbd7   : > { %4626 = vst [vmem:[#allocation2 + $0x128] sm:$0xff] %v4618_v25  ;;  %7325 = vmatmul.msk.bf16.vlgmr.msra.gmra.mxu3 %vm1751_vm11, %v12828_v2  ;;  %v7238_v62 = vld [vmem:[#allocation2 + $0x188] sm:$0xf]  ;;  %v7547_v39 = vld [vmem:[#allocation2 + $0x18c] sm:$0xf] }
 0xbd8   : > { %4622 = vst [vmem:[#allocation2 + $0x108] sm:$0xff] %v4614_v4  ;;  %v7559_v47 = vld [vmem:[#allocation2 + $0x1e4] sm:$0xf0]  ;;  %v7272_v7 = vld [vmem:[#allocation2 + $0x1e8] sm:$0xf0]  ;;  %v7243_v4 = vor.u32 %v7547_v39, %v7240_v0  ;;  %v8811_v39 = vunpack.i.h.bf16 %v12714_v35  ;;  %v8810_v0 = vunpack.i.l.bf16 %v12714_v35  ;;  %v8820_v35 = vunpack.i.l.bf16 %v12744_v24 }
 0xbd9   : > { %v12870_v40 = vpop.permute.xlu1 %8853  ;;  %4562 = vst [vmem:[#allocation2 + $0xe8] sm:$0xff] %v4554_v33  ;;  %v8814_v31 = vpop.permute.xlu0 %8813  ;;  %v7270_v22 = vld [vmem:[#allocation2 + $0x1c8] sm:$0xf]  ;;  %v7555_v15 = vld [vmem:[#allocation2 + $0x1cc] sm:$0xf] }
 0xbda   : > { %v8856_v38 = vunpack.i.h.bf16 %v12870_v40  ;;  %v8855_v11 = vunpack.i.l.bf16 %v12870_v40  ;;  %v12874_v56 = vpop.permute.xlu2 %8868  ;;  %4558 = vst [vmem:[#allocation2 + $0xc8] sm:$0xff] %v4550_v5  ;;  %v8816_v49 = vunpack.i.h.bf16 %v8814_v31  ;;  %v8815_v19 = vunpack.i.l.bf16 %v8814_v31 }
 0xbdb   : > { %v7271_v27 = vor.u32 %v7559_v47, %v7270_v22  ;;  %v7275_v23 = vor.u32 %v7555_v15, %v7272_v7  ;;  %v8871_v33 = vunpack.i.h.bf16 %v12874_v56  ;;  %v8870_v5 = vunpack.i.l.bf16 %v12874_v56 }
 0xbdc   : > { %v4861_v50 = vsel %vm1263_vm10, %v8780_v54, %v8815_v19  ;;  %v4862_v57 = vsel %vm1263_vm10, %v8781_v60, %v8816_v49  ;;  %v4860_v41 = vsel %vm1263_vm10, %v8816_v49, %v8856_v38  ;;  %v4859_v6 = vsel %vm1263_vm10, %v8815_v19, %v8855_v11 }
 0xbdd   : > { %v4870_v25 = vpack.c.bf16 %v4859_v6, %v4861_v50  ;;  %v4874_v54 = vpack.c.bf16 %v4860_v41, %v4862_v57  ;;  %5399 = vmatpush.bf16.msrb.mxu1 %v7271_v27  ;;  %5427 = vmatpush.bf16.msrb.mxu0 %v7275_v23  ;;  %v7239_v60 = vor.u32 %v7551_v8, %v7238_v62 }
 0xbde   : > { %v4670_v15 = vsel %vm1068_vm7, %v8731_v42, %v8796_v43  ;;  %v4669_v8 = vsel %vm1068_vm7, %v8730_v51, %v8795_v36 }
 0xbdf   : > { %4878 = vst [vmem:[#allocation2 + $0x208] sm:$0xff] %v4870_v25 }
 0xbe0   : > { %4882 = vst [vmem:[#allocation2 + $0x228] sm:$0xff] %v4874_v54 }
 0xbe1   : > { %v8864_v28 = vpop.permute.xlu1 %8863  ;;  %5400 = vmatpush.bf16.msrb.mxu1 %v7239_v60  ;;  %5428 = vmatpush.bf16.msrb.mxu0 %v7243_v4  ;;  %v12896_v47 = vpop.permute.xlu0 %8833 }
 0xbe2   : > { %v8866_v7 = vunpack.i.h.bf16 %v8864_v28  ;;  %v8865_v31 = vunpack.i.l.bf16 %v8864_v28  ;;  %v12898_v22 = vpop.permute.xlu2 %8873  ;;  %v8836_v52 = vunpack.i.h.bf16 %v12896_v47  ;;  %v8835_v49 = vunpack.i.l.bf16 %v12896_v47 }
 0xbe4   : > { %v4791_v19 = vsel %vm1198_vm5, %v8865_v31, %v8870_v5  ;;  %v4792_v27 = vsel %vm1198_vm5, %v8866_v7, %v8871_v33  ;;  %v4793_v23 = vsel %vm1198_vm5, %v8825_v13, %v8865_v31  ;;  %v4794_v42 = vsel %vm1198_vm5, %v8826_v10, %v8866_v7 }
 0xbe5   : > { %v4667_v50 = vsel %vm1068_vm7, %v8795_v36, %v8835_v49  ;;  %v4668_v13 = vsel %vm1068_vm7, %v8796_v43, %v8836_v52  ;;  %v4807_v57 = vpack.c.bf16 %v4791_v19, %v4793_v23  ;;  %v4811_v6 = vpack.c.bf16 %v4792_v27, %v4794_v42  ;;  %v7174_v27 = vld [vmem:[#allocation2 + $0x108] sm:$0xf] }
 0xbe6   : > { %v4678_v45 = vpack.c.bf16 %v4667_v50, %v4669_v8  ;;  %v4682_v41 = vpack.c.bf16 %v4668_v13, %v4670_v15  ;;  %v7302_v10 = vld [vmem:[#allocation2 + $0x208] sm:$0xf]  ;;  %v7563_v21 = vld [vmem:[#allocation2 + $0x20c] sm:$0xf]  ;;  %v8821_v7 = vunpack.i.h.bf16 %v12744_v24  ;;  %v4478_v31 = vsel %vm874_vm9, %v8761_v18, %v8811_v39 }
 0xbe7   : > { %4815 = vst [vmem:[#allocation2 + $0x1d0] sm:$0xff] %v4807_v57  ;;  %v7567_v62 = vld [vmem:[#allocation2 + $0x224] sm:$0xf0]  ;;  %v7304_v51 = vld [vmem:[#allocation2 + $0x228] sm:$0xf0]  ;;  %v4477_v15 = vsel %vm874_vm9, %v8760_v14, %v8810_v0  ;;  %v4413_v13 = vsel %vm664_vm3, %v8770_v48, %v8820_v35 }
 0xbe8   : > { %4686 = vst [vmem:[#allocation2 + $0x148] sm:$0xff] %v4678_v45  ;;  %v7303_v54 = vor.u32 %v7567_v62, %v7302_v10  ;;  %v7307_v60 = vor.u32 %v7563_v21, %v7304_v51  ;;  %v7535_v23 = vld [vmem:[#allocation2 + $0x124] sm:$0xf0]  ;;  %v4414_v57 = vsel %vm664_vm3, %v8771_v3, %v8821_v7 }
 0xbe9   : > { %4690 = vst [vmem:[#allocation2 + $0x168] sm:$0xff] %v4682_v41  ;;  %v12936_v25 = vpop.permute.xlu1 %8888  ;;  %v12938_v43 = vpop.permute.xlu0 %8848 }
 0xbea   : > { %4819 = vst [vmem:[#allocation2 + $0x1f0] sm:$0xff] %v4811_v6  ;;  %v12940_v4 = vpop.permute.xlu2 %8898  ;;  %v8851_v36 = vunpack.i.h.bf16 %v12938_v43  ;;  %v8850_v28 = vunpack.i.l.bf16 %v12938_v43  ;;  %5420 = vmatpush.bf16.msrb.mxu3 %v7303_v54  ;;  %5448 = vmatpush.bf16.msrb.mxu2 %v7307_v60  ;;  %v7175_v6 = vor.u32 %v7535_v23, %v7174_v27  ;;  %v8876_v27 = vunpack.i.h.bf16 %v12898_v22 }
 0xbeb   : > { %v8901_v10 = vunpack.i.h.bf16 %v12940_v4  ;;  %v8900_v21 = vunpack.i.l.bf16 %v12940_v4  ;;  %v8875_v23 = vunpack.i.l.bf16 %v12898_v22 }
 0xbec   : > { %v4475_v19 = vsel %vm874_vm9, %v8810_v0, %v8850_v28  ;;  %v4476_v24 = vsel %vm874_vm9, %v8811_v39, %v8851_v36 }
 0xbed   : > { %v4486_v42 = vpack.c.bf16 %v4475_v19, %v4477_v15  ;;  %v4490_v8 = vpack.c.bf16 %v4476_v24, %v4478_v31  ;;  %7326 = vmatmul.msk.bf16.vlgmr.msrb.gmra.mxu3 %vm1751_vm11, %v12828_v2  ;;  %7327 = vmatmul.msk.bf16.vlgmr.msrb.gmra.mxu2 %vm1751_vm11, %v12828_v2  ;;  %v7531_v19 = vld [vmem:[#allocation2 + $0x10c] sm:$0xf] }
 0xbee   : > { %v7278_v18 = vld [vmem:[#allocation2 + $0x1d0] sm:$0xf]  ;;  %v7556_v50 = vld [vmem:[#allocation2 + $0x1d4] sm:$0xf]  ;;  %v7176_v24 = vld [vmem:[#allocation2 + $0x128] sm:$0xf0] }
 0xbef   : > { %v7206_v44 = vld [vmem:[#allocation2 + $0x148] sm:$0xf]  ;;  %v7539_v14 = vld [vmem:[#allocation2 + $0x14c] sm:$0xf]  ;;  %4494 = vst [vmem:[#allocation2 + $0x88] sm:$0xff] %v4486_v42 }
 0xbf0   : > { %v7543_v45 = vld [vmem:[#allocation2 + $0x164] sm:$0xf0]  ;;  %v7208_v41 = vld [vmem:[#allocation2 + $0x168] sm:$0xf0]  ;;  %4498 = vst [vmem:[#allocation2 + $0xa8] sm:$0xff] %v4490_v8 }
 0xbf1   : > { %v8894_v62 = vpop.permute.xlu1 %8893  ;;  %v7207_v51 = vor.u32 %v7543_v45, %v7206_v44  ;;  %v7211_v39 = vor.u32 %v7539_v14, %v7208_v41  ;;  %v7560_v0 = vld [vmem:[#allocation2 + $0x1ec] sm:$0xf0]  ;;  %v7280_v54 = vld [vmem:[#allocation2 + $0x1f0] sm:$0xf0]  ;;  %v12976_v48 = vpop.permute.xlu0 %8858 }
 0xbf2   : > { %v8896_v12 = vunpack.i.h.bf16 %v8894_v62  ;;  %v8895_v60 = vunpack.i.l.bf16 %v8894_v62  ;;  %v12978_v31 = vpop.permute.xlu2 %8908  ;;  %v7279_v3 = vor.u32 %v7560_v0, %v7278_v18  ;;  %v7283_v15 = vor.u32 %v7556_v50, %v7280_v54  ;;  %v7142_v0 = vld [vmem:[#allocation2 + $0xc8] sm:$0xf]  ;;  %v7144_v54 = vld [vmem:[#allocation2 + $0xe8] sm:$0xf0] }
 0xbf3   : > { %v8861_v42 = vunpack.i.h.bf16 %v12976_v48  ;;  %v8860_v8 = vunpack.i.l.bf16 %v12976_v48  ;;  %5401 = vmatpush.bf16.msrb.mxu1 %v7207_v51  ;;  %5429 = vmatpush.bf16.msrb.mxu0 %v7211_v39  ;;  %v7179_v62 = vor.u32 %v7531_v19, %v7176_v24 }
 0xbf4   : > { %v4599_v44 = vsel %vm1003_vm8, %v8895_v60, %v8900_v21  ;;  %v4600_v18 = vsel %vm1003_vm8, %v8896_v12, %v8901_v10  ;;  %v4601_v22 = vsel %vm1003_vm8, %v8840_v58, %v8895_v60  ;;  %v4602_v14 = vsel %vm1003_vm8, %v8841_v29, %v8896_v12  ;;  %5455 = vmatpush.bf16.msra.mxu3 %v7279_v3  ;;  %v7527_v58 = vld [vmem:[#allocation2 + $0xe4] sm:$0xf0]  ;;  %v7523_v29 = vld [vmem:[#allocation2 + $0xcc] sm:$0xf] }
 0xbf5   : > { %v4411_v50 = vsel %vm664_vm3, %v8820_v35, %v8860_v8  ;;  %v4412_v45 = vsel %vm664_vm3, %v8821_v7, %v8861_v42  ;;  %v4615_v41 = vpack.c.bf16 %v4599_v44, %v4601_v22  ;;  %5483 = vmatpush.bf16.msra.mxu2 %v7283_v15  ;;  %v4619_v39 = vpack.c.bf16 %v4600_v18, %v4602_v14 }
 0xbf6   : > { %v4422_v51 = vpack.c.bf16 %v4411_v50, %v4413_v13  ;;  %v4426_v16 = vpack.c.bf16 %v4412_v45, %v4414_v57  ;;  %v7110_v12 = vld [vmem:[#allocation2 + $0x88] sm:$0xf]  ;;  %v7515_v35 = vld [vmem:[#allocation2 + $0x8c] sm:$0xf]  ;;  %v4730_v7 = vsel %vm1133_vm6, %v8831_v37, %v8876_v27  ;;  %v13938_v60 = vunpack.i.l.bf16 %v12766_v30 }
 0xbf7   : > { %4623 = vst [vmem:[#allocation2 + $0x110] sm:$0xff] %v4615_v41  ;;  %5402 = vmatpush.bf16.msrb.mxu1 %v7175_v6  ;;  %5430 = vmatpush.bf16.msrb.mxu0 %v7179_v62  ;;  %v7519_v57 = vld [vmem:[#allocation2 + $0xa4] sm:$0xf0]  ;;  %v7112_v3 = vld [vmem:[#allocation2 + $0xa8] sm:$0xf0]  ;;  %v8911_v15 = vunpack.i.h.bf16 %v12978_v31  ;;  %v8910_v6 = vunpack.i.l.bf16 %v12978_v31  ;;  %v7143_v24 = vor.u32 %v7527_v58, %v7142_v0  ;;  %v7147_v44 = vor.u32 %v7523_v29, %v7144_v54 }
 0xbf8   : > { %v4729_v13 = vsel %vm1133_vm6, %v13938_v60, %v8875_v23  ;;  %4430 = vst [vmem:[#allocation2 + $0x48] sm:$0xff] %v4422_v51  ;;  %v7111_v14 = vor.u32 %v7519_v57, %v7110_v12  ;;  %v7115_v50 = vor.u32 %v7515_v35, %v7112_v3  ;;  %v13939_v3 = vunpack.i.h.bf16 %v12497_v63 }
 0xbf9   : > { %4434 = vst [vmem:[#allocation2 + $0x68] sm:$0xff] %v4426_v16  ;;  %v8904_v19 = vpop.permute.xlu1 %8903  ;;  %v13018_v18 = vpop.permute.xlu0 %8878 }
 0xbfa   : > { %4627 = vst [vmem:[#allocation2 + $0x130] sm:$0xff] %v4619_v39  ;;  %v8906_v37 = vunpack.i.h.bf16 %v8904_v19  ;;  %v8905_v22 = vunpack.i.l.bf16 %v8904_v19  ;;  %v8924_v30 = vpop.permute.xlu2 %8923  ;;  %v8881_v45 = vunpack.i.h.bf16 %v13018_v18  ;;  %v8880_v41 = vunpack.i.l.bf16 %v13018_v18  ;;  %v7046_v19 = vld [vmem:[#allocation2 + $0x8] sm:$0xf] }
 0xbfb   : > { %v8926_v62 = vunpack.i.h.bf16 %v8924_v30  ;;  %v8925_v51 = vunpack.i.l.bf16 %v8924_v30  ;;  %5403 = vmatpush.bf16.msrb.mxu1 %v7143_v24  ;;  %5431 = vmatpush.bf16.msrb.mxu0 %v7147_v44  ;;  %v7499_v24 = vld [vmem:[#allocation2 + $0xc] sm:$0xf] }
 0xbfc   : > { %v4535_v58 = vsel %vm729_vm4, %v8905_v22, %v8910_v6  ;;  %v4536_v16 = vsel %vm729_vm4, %v8906_v37, %v8911_v15  ;;  %v4537_v39 = vsel %vm729_vm4, %v8845_v46, %v8905_v22  ;;  %v4538_v0 = vsel %vm729_vm4, %v8846_v34, %v8906_v37  ;;  %v7048_v30 = vld [vmem:[#allocation2 + $0x28] sm:$0xf0] }
 0xbfd   : > { %v4727_v29 = vsel %vm1133_vm6, %v8875_v23, %v8880_v41  ;;  %v4728_v54 = vsel %vm1133_vm6, %v8876_v27, %v8881_v45  ;;  %v4551_v12 = vpack.c.bf16 %v4535_v58, %v4537_v39  ;;  %v4555_v35 = vpack.c.bf16 %v4536_v16, %v4538_v0 }
 0xbfe   : > { %v4743_v60 = vpack.c.bf16 %v4727_v29, %v4729_v13  ;;  %v4747_v57 = vpack.c.bf16 %v4728_v54, %v4730_v7  ;;  %v4804_v46 = vsel %vm1198_vm5, %v8926_v62, %v13939_v3  ;;  %v4789_v9 = vsel %vm1198_vm5, %v8870_v5, %v8925_v51 }
 0xbff   : > { %4559 = vst [vmem:[#allocation2 + $0xd0] sm:$0xff] %v4551_v12  ;;  %v4790_v34 = vsel %vm1198_vm5, %v8871_v33, %v8926_v62  ;;  %v13940_v27 = vunpack.i.l.bf16 %v12497_v63  ;;  %5404 = vmatpush.bf16.msrb.mxu1 %v7111_v14  ;;  %5432 = vmatpush.bf16.msrb.mxu0 %v7115_v50  ;;  %v7078_v7 = vld [vmem:[#allocation2 + $0x48] sm:$0xf]  ;;  %v7507_v13 = vld [vmem:[#allocation2 + $0x4c] sm:$0xf]  ;;  %v8891_v62 = vunpack.i.h.bf16 %v12936_v25  ;;  %v8890_v14 = vunpack.i.l.bf16 %v12936_v25 }
 0xc00   : > { %4751 = vst [vmem:[#allocation2 + $0x190] sm:$0xff] %v4743_v60  ;;  %v4812_v5 = vpack.c.bf16 %v4804_v46, %v4790_v34  ;;  %v7511_v18 = vld [vmem:[#allocation2 + $0x64] sm:$0xf0]  ;;  %v7080_v37 = vld [vmem:[#allocation2 + $0x68] sm:$0xf0]  ;;  %v7051_v54 = vor.u32 %v7499_v24, %v7048_v30  ;;  %v13941_v34 = vunpack.i.h.bf16 %v12504_v20 }
 0xc01   : > { %v4803_v23 = vsel %vm1198_vm5, %v8925_v51, %v13940_v27  ;;  %4755 = vst [vmem:[#allocation2 + $0x1b0] sm:$0xff] %v4747_v57  ;;  %v13058_v56 = vpop.permute.xlu1 %8918  ;;  %v7079_v33 = vor.u32 %v7511_v18, %v7078_v7  ;;  %v7083_v22 = vor.u32 %v7507_v13, %v7080_v37  ;;  %v7503_v63 = vld [vmem:[#allocation2 + $0x24] sm:$0xf0]  ;;  %v8884_v50 = vpop.permute.xlu0 %8883  ;;  %v7504_v25 = vld [vmem:[#allocation2 + $0x2c] sm:$0xf0] }
 0xc02   : > { %v4808_v44 = vpack.c.bf16 %v4803_v23, %v4789_v9  ;;  %4563 = vst [vmem:[#allocation2 + $0xf0] sm:$0xff] %v4555_v35  ;;  %v8939_v51 = vpop.permute.xlu2 %8938  ;;  %v8886_v58 = vunpack.i.h.bf16 %v8884_v50  ;;  %v8885_v16 = vunpack.i.l.bf16 %v8884_v50  ;;  %v7047_v29 = vor.u32 %v7503_v63, %v7046_v19 }
 0xc03   : > { %v8941_v39 = vunpack.i.h.bf16 %v8939_v51  ;;  %v8940_v0 = vunpack.i.l.bf16 %v8939_v51  ;;  %5405 = vmatpush.bf16.msrb.mxu1 %v7079_v33  ;;  %5433 = vmatpush.bf16.msrb.mxu0 %v7083_v22  ;;  %4820 = vst [vmem:[#allocation2 + $0x1f8] sm:$0xff] %v4812_v5  ;;  %v8921_v37 = vunpack.i.h.bf16 %v13058_v56  ;;  %v8920_v33 = vunpack.i.l.bf16 %v13058_v56 }
 0xc04   : > { %4816 = vst [vmem:[#allocation2 + $0x1d8] sm:$0xff] %v4808_v44  ;;  %v4663_v12 = vsel %vm1068_vm7, %v8885_v16, %v8890_v14  ;;  %v4664_v35 = vsel %vm1068_vm7, %v8886_v58, %v8891_v62  ;;  %v4665_v60 = vsel %vm1068_vm7, %v8835_v49, %v8885_v16  ;;  %v4666_v57 = vsel %vm1068_vm7, %v8836_v52, %v8886_v58  ;;  %v7182_v58 = vld [vmem:[#allocation2 + $0x110] sm:$0xf] }
 0xc05   : > { %v4679_v3 = vpack.c.bf16 %v4663_v12, %v4665_v60  ;;  %v4683_v46 = vpack.c.bf16 %v4664_v35, %v4666_v57  ;;  %v4726_v9 = vsel %vm1133_vm6, %v8881_v45, %v8941_v39  ;;  %v4740_v27 = vsel %vm1133_vm6, %v8941_v39, %v13941_v34 }
 0xc06   : > { %v4748_v23 = vpack.c.bf16 %v4740_v27, %v4726_v9  ;;  %v4725_v7 = vsel %vm1133_vm6, %v8880_v41, %v8940_v0  ;;  %v13942_v49 = vunpack.i.l.bf16 %v12504_v20 }
 0xc07   : > { %5406 = vmatpush.bf16.msrb.mxu1 %v7047_v29  ;;  %5434 = vmatpush.bf16.msrb.mxu0 %v7051_v54  ;;  %v7246_v52 = vld [vmem:[#allocation2 + $0x190] sm:$0xf]  ;;  %v7548_v13 = vld [vmem:[#allocation2 + $0x194] sm:$0xf]  ;;  %4687 = vst [vmem:[#allocation2 + $0x150] sm:$0xff] %v4679_v3 }
 0xc08   : > { %v4739_v47 = vsel %vm1133_vm6, %v8940_v0, %v13942_v49  ;;  %v7552_v19 = vld [vmem:[#allocation2 + $0x1ac] sm:$0xf0]  ;;  %v7248_v24 = vld [vmem:[#allocation2 + $0x1b0] sm:$0xf0]  ;;  %4691 = vst [vmem:[#allocation2 + $0x170] sm:$0xff] %v4683_v46 }
 0xc09   : > { %v4744_v45 = vpack.c.bf16 %v4739_v47, %v4725_v7  ;;  %v13090_v44 = vpop.permute.xlu1 %8933  ;;  %v7247_v5 = vor.u32 %v7552_v19, %v7246_v52  ;;  %v7251_v18 = vor.u32 %v7548_v13, %v7248_v24  ;;  %4756 = vst [vmem:[#allocation2 + $0x1b8] sm:$0xff] %v4748_v23  ;;  %v8914_v20 = vpop.permute.xlu0 %8913  ;;  %v7536_v0 = vld [vmem:[#allocation2 + $0x12c] sm:$0xf0]  ;;  %v7532_v29 = vld [vmem:[#allocation2 + $0x114] sm:$0xf]  ;;  %v13943_v19 = vunpack.i.h.bf16 %v12526_v61 }
 0xc0a   : > { %5407 = vmatmul.bf16.vlgmr.msrb.gmra.mxu1 %v12826_v17  ;;  %5435 = vmatmul.bf16.vlgmr.msrb.gmra.mxu0 %v12826_v17  ;;  %v13094_v41 = vpop.permute.xlu2 %8953  ;;  %v8916_v22 = vunpack.i.h.bf16 %v8914_v20  ;;  %v8915_v63 = vunpack.i.l.bf16 %v8914_v20  ;;  %v7184_v54 = vld [vmem:[#allocation2 + $0x130] sm:$0xf0]  ;;  %v7183_v9 = vor.u32 %v7536_v0, %v7182_v58  ;;  %v8936_v34 = vunpack.i.h.bf16 %v13090_v44  ;;  %v7528_v58 = vld [vmem:[#allocation2 + $0xec] sm:$0xf0] }
 0xc0b   : > { %4752 = vst [vmem:[#allocation2 + $0x198] sm:$0xff] %v4744_v45  ;;  %5456 = vmatpush.bf16.msra.mxu3 %v7247_v5  ;;  %5484 = vmatpush.bf16.msra.mxu2 %v7251_v18  ;;  %v7187_v43 = vor.u32 %v7532_v29, %v7184_v54  ;;  %v13944_v20 = vunpack.i.l.bf16 %v12526_v61  ;;  %v7524_v29 = vld [vmem:[#allocation2 + $0xd4] sm:$0xf] }
 0xc0c   : > { %v4471_v30 = vsel %vm874_vm9, %v8915_v63, %v8920_v33  ;;  %v4472_v50 = vsel %vm874_vm9, %v8916_v22, %v8921_v37  ;;  %v4473_v51 = vsel %vm874_vm9, %v8850_v28, %v8915_v63  ;;  %v4474_v56 = vsel %vm874_vm9, %v8851_v36, %v8916_v22  ;;  %v7152_v54 = vld [vmem:[#allocation2 + $0xf0] sm:$0xf0] }
 0xc0d   : > { %v4487_v16 = vpack.c.bf16 %v4471_v30, %v4473_v51  ;;  %v4491_v39 = vpack.c.bf16 %v4472_v50, %v4474_v56  ;;  %v8935_v36 = vunpack.i.l.bf16 %v13090_v44  ;;  %v7150_v56 = vld [vmem:[#allocation2 + $0xd0] sm:$0xf] }
 0xc0e   : > { %v7214_v12 = vld [vmem:[#allocation2 + $0x150] sm:$0xf]  ;;  %v7540_v35 = vld [vmem:[#allocation2 + $0x154] sm:$0xf] }
 0xc0f   : > { %4495 = vst [vmem:[#allocation2 + $0x90] sm:$0xff] %v4487_v16  ;;  %v7544_v60 = vld [vmem:[#allocation2 + $0x16c] sm:$0xf0]  ;;  %v7216_v57 = vld [vmem:[#allocation2 + $0x170] sm:$0xf0] }
 0xc10   : > { %4499 = vst [vmem:[#allocation2 + $0xb0] sm:$0xff] %v4491_v39  ;;  %v7215_v46 = vor.u32 %v7544_v60, %v7214_v12  ;;  %v7219_v28 = vor.u32 %v7540_v35, %v7216_v57  ;;  %v13945_v39 = vunpack.i.h.bf16 %v12592_v55 }
 0xc11   : > { %v8949_v3 = vpop.permute.xlu1 %8948  ;;  %v8929_v27 = vpop.permute.xlu0 %8928 }
 0xc12   : > { %v8951_v23 = vunpack.i.h.bf16 %v8949_v3  ;;  %v8950_v7 = vunpack.i.l.bf16 %v8949_v3  ;;  %v8969_v49 = vpop.permute.xlu2 %8968  ;;  %v8931_v47 = vunpack.i.h.bf16 %v8929_v27  ;;  %v8930_v52 = vunpack.i.l.bf16 %v8929_v27  ;;  %5457 = vmatpush.bf16.msra.mxu3 %v7215_v46  ;;  %5485 = vmatpush.bf16.msra.mxu2 %v7219_v28 }
 0xc13   : > { %v8971_v13 = vunpack.i.h.bf16 %v8969_v49  ;;  %v8970_v45 = vunpack.i.l.bf16 %v8969_v49  ;;  %v7151_v3 = vor.u32 %v7528_v58, %v7150_v56 }
 0xc14   : > { %v4612_v24 = vsel %vm1003_vm8, %v8951_v23, %v13943_v19  ;;  %v4597_v5 = vsel %vm1003_vm8, %v8900_v21, %v8950_v7  ;;  %v4598_v18 = vsel %vm1003_vm8, %v8901_v10, %v8951_v23  ;;  %v4611_v22 = vsel %vm1003_vm8, %v8950_v7, %v13944_v20 }
 0xc15   : > { %v4407_v63 = vsel %vm664_vm3, %v8930_v52, %v8935_v36  ;;  %v4408_v21 = vsel %vm664_vm3, %v8931_v47, %v8936_v34  ;;  %v4409_v4 = vsel %vm664_vm3, %v8860_v8, %v8930_v52  ;;  %v4410_v61 = vsel %vm664_vm3, %v8861_v42, %v8931_v47 }
 0xc16   : > { %v4423_v10 = vpack.c.bf16 %v4407_v63, %v4409_v4  ;;  %v4427_v30 = vpack.c.bf16 %v4408_v21, %v4410_v61  ;;  %v4616_v50 = vpack.c.bf16 %v4611_v22, %v4597_v5  ;;  %v4620_v51 = vpack.c.bf16 %v4612_v24, %v4598_v18  ;;  %5458 = vmatpush.bf16.msra.mxu3 %v7183_v9  ;;  %v7516_v24 = vld [vmem:[#allocation2 + $0x94] sm:$0xf]  ;;  %v7054_v63 = vld [vmem:[#allocation2 + $0x10] sm:$0xf] }
 0xc17   : > { %v4470_v16 = vsel %vm874_vm9, %v8921_v37, %v8971_v13  ;;  %v4484_v0 = vsel %vm874_vm9, %v8971_v13, %v13945_v39  ;;  %v4469_v48 = vsel %vm874_vm9, %v8920_v33, %v8970_v45  ;;  %v13946_v8 = vunpack.i.l.bf16 %v12592_v55  ;;  %5486 = vmatpush.bf16.msra.mxu2 %v7187_v43  ;;  %v7118_v37 = vld [vmem:[#allocation2 + $0x90] sm:$0xf]  ;;  %v7120_v5 = vld [vmem:[#allocation2 + $0xb0] sm:$0xf0] }
 0xc18   : > { %4431 = vst [vmem:[#allocation2 + $0x50] sm:$0xff] %v4423_v10  ;;  %v4492_v12 = vpack.c.bf16 %v4484_v0, %v4470_v16  ;;  %v7520_v35 = vld [vmem:[#allocation2 + $0xac] sm:$0xf0]  ;;  %v7155_v9 = vor.u32 %v7524_v29, %v7152_v54  ;;  %v13947_v7 = vunpack.i.h.bf16 %v12558_v1  ;;  %v13948_v52 = vunpack.i.l.bf16 %v12558_v1 }
 0xc19   : > { %v4483_v42 = vsel %vm874_vm9, %v8970_v45, %v13946_v8  ;;  %4435 = vst [vmem:[#allocation2 + $0x70] sm:$0xff] %v4427_v30  ;;  %v8964_v57 = vpop.permute.xlu1 %8963  ;;  %v8944_v46 = vpop.permute.xlu0 %8943  ;;  %v7119_v23 = vor.u32 %v7520_v35, %v7118_v37  ;;  %v13949_v45 = vunpack.i.h.bf16 %v12512_v59  ;;  %v13950_v1 = vunpack.i.l.bf16 %v12512_v59 }
 0xc1a   : > { %v4488_v60 = vpack.c.bf16 %v4483_v42, %v4469_v48  ;;  %4624 = vst [vmem:[#allocation2 + $0x118] sm:$0xff] %v4616_v50  ;;  %v8966_v33 = vunpack.i.h.bf16 %v8964_v57  ;;  %v8965_v28 = vunpack.i.l.bf16 %v8964_v57  ;;  %v8946_v55 = vunpack.i.h.bf16 %v8944_v46  ;;  %5459 = vmatpush.bf16.msra.mxu3 %v7151_v3  ;;  %v7056_v57 = vld [vmem:[#allocation2 + $0x30] sm:$0xf0] }
 0xc1b   : > { %4628 = vst [vmem:[#allocation2 + $0x138] sm:$0xff] %v4620_v51  ;;  %v8945_v27 = vunpack.i.l.bf16 %v8944_v46  ;;  %5487 = vmatpush.bf16.msra.mxu2 %v7155_v9  ;;  %v8956_v61 = vunpack.i.h.bf16 %v13094_v41  ;;  %v7123_v59 = vor.u32 %v7516_v24, %v7120_v5  ;;  %v7055_v8 = vor.u32 %v7504_v25, %v7054_v63  ;;  %v7288_v24 = vld [vmem:[#allocation2 + $0x1f8] sm:$0xf0] }
 0xc1c   : > { %4500 = vst [vmem:[#allocation2 + $0xb8] sm:$0xff] %v4492_v12  ;;  %v4548_v43 = vsel %vm729_vm4, %v8966_v33, %v13947_v7  ;;  %v4533_v49 = vsel %vm729_vm4, %v8910_v6, %v8965_v28  ;;  %v4534_v47 = vsel %vm729_vm4, %v8911_v15, %v8966_v33  ;;  %v4547_v13 = vsel %vm729_vm4, %v8965_v28, %v13948_v52 }
 0xc1d   : > { %4496 = vst [vmem:[#allocation2 + $0x98] sm:$0xff] %v4488_v60  ;;  %v4676_v19 = vsel %vm1068_vm7, %v8946_v55, %v13949_v45  ;;  %v4661_v6 = vsel %vm1068_vm7, %v8890_v14, %v8945_v27  ;;  %v4662_v31 = vsel %vm1068_vm7, %v8891_v62, %v8946_v55  ;;  %v4675_v15 = vsel %vm1068_vm7, %v8945_v27, %v13950_v1  ;;  %v7500_v60 = vld [vmem:[#allocation2 + $0x14] sm:$0xf] }
 0xc1e   : > { %v4680_v18 = vpack.c.bf16 %v4675_v15, %v4661_v6  ;;  %v4684_v20 = vpack.c.bf16 %v4676_v19, %v4662_v31  ;;  %v4552_v22 = vpack.c.bf16 %v4547_v13, %v4533_v49  ;;  %v4556_v21 = vpack.c.bf16 %v4548_v43, %v4534_v47  ;;  %5460 = vmatpush.bf16.msra.mxu3 %v7119_v23  ;;  %v7286_v19 = vld [vmem:[#allocation2 + $0x1d8] sm:$0xf]  ;;  %v7557_v31 = vld [vmem:[#allocation2 + $0x1dc] sm:$0xf] }
 0xc1f   : > { %v7086_v14 = vld [vmem:[#allocation2 + $0x50] sm:$0xf]  ;;  %v7508_v4 = vld [vmem:[#allocation2 + $0x54] sm:$0xf]  ;;  %v8955_v62 = vunpack.i.l.bf16 %v13094_v41  ;;  %5488 = vmatpush.bf16.msra.mxu2 %v7123_v59  ;;  %v4858_v41 = vsel %vm1263_vm10, %v8856_v38, %v8956_v61  ;;  %v13951_v29 = vunpack.i.h.bf16 %v12491_v26  ;;  %v13952_v12 = vunpack.i.l.bf16 %v12491_v26  ;;  %v7561_v6 = vld [vmem:[#allocation2 + $0x1f4] sm:$0xf0] }
 0xc20   : > { %4688 = vst [vmem:[#allocation2 + $0x158] sm:$0xff] %v4680_v18  ;;  %v7512_v10 = vld [vmem:[#allocation2 + $0x6c] sm:$0xf0]  ;;  %v7088_v30 = vld [vmem:[#allocation2 + $0x70] sm:$0xf0]  ;;  %v7059_v28 = vor.u32 %v7500_v60, %v7056_v57  ;;  %v13953_v23 = vunpack.i.h.bf16 %v12514_v53  ;;  %v13954_v47 = vunpack.i.l.bf16 %v12514_v53  ;;  %v7287_v63 = vor.u32 %v7561_v6, %v7286_v19  ;;  %v13242_v19 = vpop.permute.xlu2 %4963 }
 0xc21   : > { %4692 = vst [vmem:[#allocation2 + $0x178] sm:$0xff] %v4684_v20  ;;  %v8979_v50 = vpop.permute.xlu1 %8978  ;;  %v7087_v51 = vor.u32 %v7512_v10, %v7086_v14  ;;  %v8959_v56 = vpop.permute.xlu0 %8958  ;;  %v7091_v39 = vor.u32 %v7508_v4, %v7088_v30  ;;  %v4857_v42 = vsel %vm1263_vm10, %v8855_v11, %v8955_v62  ;;  %v7553_v14 = vld [vmem:[#allocation2 + $0x1b4] sm:$0xf0]  ;;  %v7256_v59 = vld [vmem:[#allocation2 + $0x1b8] sm:$0xf0] }
 0xc22   : > { %4560 = vst [vmem:[#allocation2 + $0xd8] sm:$0xff] %v4552_v22  ;;  %v8981_v58 = vunpack.i.h.bf16 %v8979_v50  ;;  %v8980_v16 = vunpack.i.l.bf16 %v8979_v50  ;;  %v8961_v0 = vunpack.i.h.bf16 %v8959_v56  ;;  %v8960_v48 = vunpack.i.l.bf16 %v8959_v56 }
 0xc23   : > { %4564 = vst [vmem:[#allocation2 + $0xf8] sm:$0xff] %v4556_v21  ;;  %5461 = vmatpush.bf16.msra.mxu3 %v7087_v51  ;;  %5489 = vmatpush.bf16.msra.mxu2 %v7091_v39  ;;  %v7291_v21 = vor.u32 %v7557_v31, %v7288_v24 }
 0xc24   : > { %v4868_v54 = vsel %vm1263_vm10, %v8981_v58, %v13951_v29  ;;  %v4867_v37 = vsel %vm1263_vm10, %v8980_v16, %v13952_v12  ;;  %v4855_v35 = vsel %vm1263_vm10, %v8955_v62, %v8960_v48  ;;  %v4856_v38 = vsel %vm1263_vm10, %v8956_v61, %v8961_v0  ;;  %v7254_v61 = vld [vmem:[#allocation2 + $0x198] sm:$0xf]  ;;  %v7549_v62 = vld [vmem:[#allocation2 + $0x19c] sm:$0xf] }
 0xc25   : > { %v4854_v40 = vsel %vm1263_vm10, %v8961_v0, %v8981_v58  ;;  %v4853_v11 = vsel %vm1263_vm10, %v8960_v48, %v8980_v16  ;;  %v4871_v3 = vpack.c.bf16 %v4855_v35, %v4857_v42  ;;  %v4875_v46 = vpack.c.bf16 %v4856_v38, %v4858_v41  ;;  %v7190_v0 = vld [vmem:[#allocation2 + $0x118] sm:$0xf]  ;;  %v7192_v41 = vld [vmem:[#allocation2 + $0x138] sm:$0xf0] }
 0xc26   : > { %v4876_v26 = vpack.c.bf16 %v4868_v54, %v4854_v40  ;;  %v4872_v33 = vpack.c.bf16 %v4867_v37, %v4853_v11  ;;  %v7255_v10 = vor.u32 %v7553_v14, %v7254_v61  ;;  %v7259_v30 = vor.u32 %v7549_v62, %v7256_v59  ;;  %v7537_v48 = vld [vmem:[#allocation2 + $0x134] sm:$0xf0]  ;;  %v7517_v57 = vld [vmem:[#allocation2 + $0x9c] sm:$0xf] }
 0xc27   : > { %5462 = vmatpush.bf16.msra.mxu3 %v7055_v8  ;;  %4879 = vst [vmem:[#allocation2 + $0x210] sm:$0xff] %v4871_v3  ;;  %5490 = vmatpush.bf16.msra.mxu2 %v7059_v28  ;;  %v7222_v50 = vld [vmem:[#allocation2 + $0x158] sm:$0xf]  ;;  %v7541_v56 = vld [vmem:[#allocation2 + $0x15c] sm:$0xf]  ;;  %v7191_v42 = vor.u32 %v7537_v48, %v7190_v0 }
 0xc28   : > { %4883 = vst [vmem:[#allocation2 + $0x230] sm:$0xff] %v4875_v46  ;;  %v7545_v51 = vld [vmem:[#allocation2 + $0x174] sm:$0xf0]  ;;  %v7224_v58 = vld [vmem:[#allocation2 + $0x178] sm:$0xf0] }
 0xc29   : > { %4884 = vst [vmem:[#allocation2 + $0x238] sm:$0xff] %v4876_v26  ;;  %v8974_v55 = vpop.permute.xlu0 %8973  ;;  %v7223_v16 = vor.u32 %v7545_v51, %v7222_v50  ;;  %v7227_v39 = vor.u32 %v7541_v56, %v7224_v58  ;;  %v7533_v8 = vld [vmem:[#allocation2 + $0x11c] sm:$0xf]  ;;  %v7158_v54 = vld [vmem:[#allocation2 + $0xd8] sm:$0xf] }
 0xc2a   : > { %5463 = vmatmul.bf16.vlgmr.msra.gmra.mxu3 %v12826_v17  ;;  %4880 = vst [vmem:[#allocation2 + $0x218] sm:$0xff] %v4872_v33  ;;  %v8976_v27 = vunpack.i.h.bf16 %v8974_v55  ;;  %v8975_v9 = vunpack.i.l.bf16 %v8974_v55  ;;  %5491 = vmatmul.bf16.vlgmr.msra.gmra.mxu2 %v12826_v17  ;;  %v7195_v29 = vor.u32 %v7533_v8, %v7192_v41  ;;  %v7529_v12 = vld [vmem:[#allocation2 + $0xf4] sm:$0xf0]  ;;  %v7525_v37 = vld [vmem:[#allocation2 + $0xdc] sm:$0xf] }
 0xc2b   : > { %v7160_v35 = vld [vmem:[#allocation2 + $0xf8] sm:$0xf0]  ;;  %v7159_v38 = vor.u32 %v7529_v12, %v7158_v54  ;;  %v7521_v11 = vld [vmem:[#allocation2 + $0xb4] sm:$0xf0] }
 0xc2c   : > { %v4420_v7 = vsel %vm664_vm3, %v8976_v27, %v13953_v23  ;;  %v4405_v43 = vsel %vm664_vm3, %v8935_v36, %v8975_v9  ;;  %v4406_v49 = vsel %vm664_vm3, %v8936_v34, %v8976_v27  ;;  %v4419_v52 = vsel %vm664_vm3, %v8975_v9, %v13954_v47  ;;  %v7126_v60 = vld [vmem:[#allocation2 + $0x98] sm:$0xf]  ;;  %v7128_v3 = vld [vmem:[#allocation2 + $0xb8] sm:$0xf0] }
 0xc2d   : > { %v4424_v13 = vpack.c.bf16 %v4419_v52, %v4405_v43  ;;  %v4428_v45 = vpack.c.bf16 %v4420_v7, %v4406_v49  ;;  %v7163_v40 = vor.u32 %v7525_v37, %v7160_v35  ;;  %v7127_v46 = vor.u32 %v7521_v11, %v7126_v60  ;;  %v7062_v23 = vld [vmem:[#allocation2 + $0x18] sm:$0xf]  ;;  %v7501_v43 = vld [vmem:[#allocation2 + $0x1c] sm:$0xf] }
 0xc2e   : > { %v7310_v1 = vld [vmem:[#allocation2 + $0x210] sm:$0xf]  ;;  %v7564_v15 = vld [vmem:[#allocation2 + $0x214] sm:$0xf]  ;;  %v7131_v26 = vor.u32 %v7517_v57, %v7128_v3  ;;  %v7505_v7 = vld [vmem:[#allocation2 + $0x34] sm:$0xf0] }
 0xc2f   : > { %4432 = vst [vmem:[#allocation2 + $0x58] sm:$0xff] %v4424_v13  ;;  %v7568_v36 = vld [vmem:[#allocation2 + $0x22c] sm:$0xf0]  ;;  %v7312_v5 = vld [vmem:[#allocation2 + $0x230] sm:$0xf0]  ;;  %v7063_v47 = vor.u32 %v7505_v7, %v7062_v23 }
 0xc30   : > { %4436 = vst [vmem:[#allocation2 + $0x78] sm:$0xff] %v4428_v45  ;;  %v7311_v44 = vor.u32 %v7568_v36, %v7310_v1  ;;  %v7315_v18 = vor.u32 %v7564_v15, %v7312_v5  ;;  %v7569_v34 = vld [vmem:[#allocation2 + $0x234] sm:$0xf0]  ;;  %v7320_v20 = vld [vmem:[#allocation2 + $0x238] sm:$0xf0] }
 0xc31   : > { %v7318_v53 = vld [vmem:[#allocation2 + $0x218] sm:$0xf]  ;;  %v7565_v22 = vld [vmem:[#allocation2 + $0x21c] sm:$0xf]  ;;  %v13245_v1 = vpop.permute.xlu0 %4968 }
 0xc32   : > { %5476 = vmatpush.bf16.msra.mxu1 %v7311_v44  ;;  %5504 = vmatpush.bf16.msra.mxu0 %v7315_v18  ;;  %v7319_v4 = vor.u32 %v7569_v34, %v7318_v53  ;;  %v7323_v25 = vor.u32 %v7565_v22, %v7320_v20  ;;  %v7064_v49 = vld [vmem:[#allocation2 + $0x38] sm:$0xf0] }
 0xc33   : > { %v7067_v52 = vor.u32 %v7501_v43, %v7064_v49 }
 0xc34   : > { %5532 = vmatpush.bf16.msrb.mxu3 %v7319_v4  ;;  %5560 = vmatpush.bf16.msrb.mxu2 %v7323_v25 }
 0xc35   : > { %7328 = vmatmul.msk.bf16.vlgmr.msra.gmra.mxu1 %vm1751_vm11, %v12828_v2  ;;  %7329 = vmatmul.msk.bf16.vlgmr.msra.gmra.mxu0 %vm1751_vm11, %v12828_v2 }
 0xc36   : > { %5511 = vmatpush.bf16.msrb.mxu1 %v7287_v63  ;;  %5539 = vmatpush.bf16.msrb.mxu0 %v7291_v21  ;;  %v7094_v33 = vld [vmem:[#allocation2 + $0x58] sm:$0xf]  ;;  %v7509_v28 = vld [vmem:[#allocation2 + $0x5c] sm:$0xf] }
 0xc37   : > { %v7096_v55 = vld [vmem:[#allocation2 + $0x78] sm:$0xf0] }
 0xc38   : > { %v7099_v9 = vor.u32 %v7509_v28, %v7096_v55 }
 0xc3a   : > { %5512 = vmatpush.bf16.msrb.mxu1 %v7255_v10  ;;  %5540 = vmatpush.bf16.msrb.mxu0 %v7259_v30 }
 0xc3b   : > { %7330 = vmatmul.msk.bf16.vlgmr.msrb.gmra.mxu3 %vm1751_vm11, %v12828_v2  ;;  %7331 = vmatmul.msk.bf16.vlgmr.msrb.gmra.mxu2 %vm1751_vm11, %v12828_v2  ;;  %v7513_v2 = vld [vmem:[#allocation2 + $0x74] sm:$0xf0] }
 0xc3c   : > { %v7095_v27 = vor.u32 %v7513_v2, %v7094_v33 }
 0xc3e   : > { %5513 = vmatpush.bf16.msrb.mxu1 %v7223_v16  ;;  %5541 = vmatpush.bf16.msrb.mxu0 %v7227_v39 }
 0xc42   : > { %5514 = vmatpush.bf16.msrb.mxu1 %v7191_v42  ;;  %5542 = vmatpush.bf16.msrb.mxu0 %v7195_v29 }
 0xc46   : > { %5515 = vmatpush.bf16.msrb.mxu1 %v7159_v38  ;;  %5543 = vmatpush.bf16.msrb.mxu0 %v7163_v40 }
 0xc4a   : > { %5516 = vmatpush.bf16.msrb.mxu1 %v7127_v46  ;;  %5544 = vmatpush.bf16.msrb.mxu0 %v7131_v26 }
 0xc4e   : > { %5517 = vmatpush.bf16.msrb.mxu1 %v7095_v27  ;;  %5545 = vmatpush.bf16.msrb.mxu0 %v7099_v9 }
 0xc52   : > { %5518 = vmatpush.bf16.msrb.mxu1 %v7063_v47  ;;  %5546 = vmatpush.bf16.msrb.mxu0 %v7067_v52  ;;  %v5366_v13 = vpop.f32.mrf.mxu1 }
 0xc53   : > { %v5352_v45 = vpop.f32.mrf.mxu0 }
 0xc54   : > { %v5353_v6 = vadd.f32 %v5352_v45, %v13242_v19 }
 0xc55   : > { %5519 = vmatmul.bf16.vlgmr.msrb.gmra.mxu1 %v12826_v17  ;;  %5547 = vmatmul.bf16.vlgmr.msrb.gmra.mxu0 %v12826_v17 }
 0xc56   : > { %v13247_v5 = vadd.f32 %v5366_v13, %v5353_v6 }
 0xc58   : > { %v5567_v17 = vmax.f32 %v13247_v5, 0.0 }
 0xc59   : > { %v5380_v31 = vpop.f32.mrf.mxu2 }
 0xc5a   : > { %v5394_v15 = vpop.f32.mrf.mxu3  ;;  %v5368_v36 = vpop.f32.mrf.mxu1  ;;  %v5381_v18 = vadd.f32 %v5380_v31, %v13242_v19 }
 0xc5b   : > { %v5354_v24 = vpop.f32.mrf.mxu0 }
 0xc5c   : > { %v5355_v44 = vadd.f32 %v5354_v24, %v13245_v1  ;;  %v13255_v22 = vadd.f32 %v5394_v15, %v5381_v18 }
 0xc5e   : > { %v13251_v34 = vadd.f32 %v5368_v36, %v5355_v44  ;;  %v5568_v25 = vmax.f32 %v13255_v22, 0.0 }
 0xc60   : > { %v5575_v20 = vmax.f32 %v13251_v34, 0.0 }
 0xc61   : > { %v5382_v53 = vpop.f32.mrf.mxu2 }
 0xc62   : > { %v8982_v63 = vpack.i.bf16 %v5575_v20, %v5567_v17  ;;  %v5383_v21 = vadd.f32 %v5382_v53, %v13245_v1  ;;  %v5396_v14 = vpop.f32.mrf.mxu3 }
 0xc64   : > { %v13262_v4 = vadd.f32 %v5396_v14, %v5383_v21  ;;  %8983 = vrot.lane.b32.xlu1 %v8982_v63, %s13935_s17 }
 0xc66   : > { %v5576_v61 = vmax.f32 %v13262_v4, 0.0 }
 0xc68   : > { %v8987_v62 = vpack.i.bf16 %v5576_v61, %v5568_v25 }
 0xc6a   : > { %8988 = vrot.lane.b32.xlu2 %v8987_v62, %s13935_s17 }
 0xc70   : > { %v5422_v59 = vpop.f32.mrf.mxu3  ;;  %v5450_v10 = vpop.f32.mrf.mxu2 }
 0xc78   : > { %v5424_v58 = vpop.f32.mrf.mxu3  ;;  %v5452_v16 = vpop.f32.mrf.mxu2 }
 0xc87   : > { %v5408_v30 = vpop.f32.mrf.mxu1  ;;  %v5436_v50 = vpop.f32.mrf.mxu0 }
 0xc88   : > { %v5409_v51 = vadd.f32 %v5408_v30, %v13242_v19  ;;  %v5437_v56 = vadd.f32 %v5436_v50, %v13242_v19 }
 0xc8a   : > { %v13274_v48 = vadd.f32 %v5422_v59, %v5409_v51  ;;  %v13276_v8 = vadd.f32 %v5450_v10, %v5437_v56 }
 0xc8c   : > { %v5569_v12 = vmax.f32 %v13274_v48, 0.0  ;;  %v5570_v37 = vmax.f32 %v13276_v8, 0.0 }
 0xc8f   : > { %v5410_v39 = vpop.f32.mrf.mxu1  ;;  %v5438_v0 = vpop.f32.mrf.mxu0 }
 0xc90   : > { %v5411_v41 = vadd.f32 %v5410_v39, %v13245_v1  ;;  %v5439_v42 = vadd.f32 %v5438_v0, %v13245_v1 }
 0xc92   : > { %v13280_v29 = vadd.f32 %v5424_v58, %v5411_v41  ;;  %v13282_v54 = vadd.f32 %v5452_v16, %v5439_v42 }
 0xc94   : > { %v5577_v35 = vmax.f32 %v13280_v29, 0.0  ;;  %v5578_v38 = vmax.f32 %v13282_v54, 0.0 }
 0xc96   : > { %v8992_v40 = vpack.i.bf16 %v5577_v35, %v5569_v12  ;;  %v8997_v11 = vpack.i.bf16 %v5578_v38, %v5570_v37 }
 0xc98   : > { %8993 = vrot.lane.b32.xlu0 %v8992_v40, %s13935_s17  ;;  %8998 = vrot.lane.b32.xlu1 %v8997_v11, %s13935_s17 }
 0xcad   : > { %v5464_v60 = vpop.f32.mrf.mxu3  ;;  %v5492_v57 = vpop.f32.mrf.mxu2 }
 0xcae   : > { %v5465_v33 = vadd.f32 %v5464_v60, %v13242_v19  ;;  %v5493_v2 = vadd.f32 %v5492_v57, %v13242_v19 }
 0xcb2   : > { %v5478_v3 = vpop.f32.mrf.mxu1  ;;  %v5506_v46 = vpop.f32.mrf.mxu0 }
 0xcb3   : > { %v13300_v55 = vadd.f32 %v5478_v3, %v5465_v33  ;;  %v13302_v27 = vadd.f32 %v5506_v46, %v5493_v2 }
 0xcb5   : > { %v5466_v26 = vpop.f32.mrf.mxu3  ;;  %v5494_v28 = vpop.f32.mrf.mxu2  ;;  %v5571_v52 = vmax.f32 %v13300_v55, 0.0  ;;  %v5572_v13 = vmax.f32 %v13302_v27, 0.0  ;;  %v5720_v27 = vld [vmem:[%s13801_s6] sm:$0x7] }
 0xcb6   : > { %v5467_v9 = vadd.f32 %v5466_v26, %v13245_v1  ;;  %v5495_v23 = vadd.f32 %v5494_v28, %v13245_v1 }
 0xcba   : > { %v5480_v7 = vpop.f32.mrf.mxu1  ;;  %v5508_v43 = vpop.f32.mrf.mxu0 }
 0xcbb   : > { %v13306_v49 = vadd.f32 %v5480_v7, %v5467_v9  ;;  %v13308_v47 = vadd.f32 %v5508_v43, %v5495_v23 }
 0xcbd   : > { %v5579_v45 = vmax.f32 %v13306_v49, 0.0  ;;  %v5580_v6 = vmax.f32 %v13308_v47, 0.0 }
 0xcbe   : > { %v5562_v24 = vpop.f32.mrf.mxu2  ;;  %v5534_v36 = vpop.f32.mrf.mxu3 }
 0xcbf   : > { %v9002_v31 = vpack.i.bf16 %v5579_v45, %v5571_v52  ;;  %v9007_v15 = vpack.i.bf16 %v5580_v6, %v5572_v13 }
 0xcc1   : > { %9008 = vrot.lane.b32.xlu0 %v9007_v15, %s13935_s17  ;;  %9003 = vrot.lane.b32.xlu2 %v9002_v31, %s13935_s17 }
 0xcc4   : > { %v8989_v53 = vpop.permute.xlu2 %8988 }
 0xcc5   : > { %v8991_v14 = vunpack.i.h.bf16 %v8989_v53  ;;  %v8990_v10 = vunpack.i.l.bf16 %v8989_v53 }
 0xcc6   : > { %v5564_v59 = vpop.f32.mrf.mxu2 }
 0xcd2   : > { %v5520_v44 = vpop.f32.mrf.mxu1  ;;  %v5548_v18 = vpop.f32.mrf.mxu0 }
 0xcd3   : > { %v5521_v63 = vadd.f32 %v5520_v44, %v13242_v19  ;;  %v5549_v21 = vadd.f32 %v5548_v18, %v13242_v19  ;;  %v5536_v19 = vpop.f32.mrf.mxu3 }
 0xcd5   : > { %v13328_v30 = vadd.f32 %v5534_v36, %v5521_v63  ;;  %v13332_v16 = vadd.f32 %v5562_v24, %v5549_v21 }
 0xcd6   : > { %v13326_v62 = vpop.permute.xlu1 %8983 }
 0xcd7   : > { %v8986_v50 = vunpack.i.h.bf16 %v13326_v62  ;;  %v8985_v51 = vunpack.i.l.bf16 %v13326_v62  ;;  %v5573_v57 = vmax.f32 %v13328_v30, 0.0  ;;  %v5574_v3 = vmax.f32 %v13332_v16, 0.0 }
 0xcd9   : > { %v5627_v41 = vsel %vm664_vm3, %v8985_v51, %v8990_v10  ;;  %v5628_v42 = vsel %vm664_vm3, %v8986_v50, %v8991_v14 }
 0xcda   : > { %v5522_v56 = vpop.f32.mrf.mxu1  ;;  %v5550_v58 = vpop.f32.mrf.mxu0  ;;  %v13346_v40 = vmax.f32 %v5567_v17, %v5627_v41  ;;  %v13350_v11 = vmax.f32 %v5575_v20, %v5628_v42 }
 0xcdb   : > { %v5523_v39 = vadd.f32 %v5522_v56, %v13245_v1  ;;  %v5551_v0 = vadd.f32 %v5550_v58, %v13245_v1 }
 0xcdc   : > { %v9022_v33 = vpack.i.bf16 %v13350_v11, %v13346_v40 }
 0xcdd   : > { %v13352_v1 = vadd.f32 %v5536_v19, %v5523_v39  ;;  %v5565_v60 = vadd.f32 %v5564_v59, %v5551_v0 }
 0xcde   : > { %9023 = vrot.lane.b32.xlu0 %v9022_v33, %s13936_s18 }
 0xcdf   : > { %v5581_v46 = vmax.f32 %v13352_v1, 0.0  ;;  %v5582_v26 = vmax.f32 %v5565_v60, 0.0 }
 0xce1   : > { %v9012_v5 = vpack.i.bf16 %v5581_v46, %v5573_v57  ;;  %v9017_v34 = vpack.i.bf16 %v5582_v26, %v5574_v3 }
 0xce3   : > { %9013 = vrot.lane.b32.xlu1 %v9012_v5, %s13935_s17  ;;  %9018 = vrot.lane.b32.xlu2 %v9017_v34, %s13935_s17 }
 0xd0a   : > { %v8994_v17 = vpop.permute.xlu0 %8993  ;;  %v8999_v20 = vpop.permute.xlu1 %8998 }
 0xd0b   : > { %v8996_v2 = vunpack.i.h.bf16 %v8994_v17  ;;  %v8995_v28 = vunpack.i.l.bf16 %v8994_v17  ;;  %v9001_v9 = vunpack.i.h.bf16 %v8999_v20  ;;  %v9000_v23 = vunpack.i.l.bf16 %v8999_v20 }
 0xd0d   : > { %v5625_v7 = vsel %vm664_vm3, %v8990_v10, %v8995_v28  ;;  %v5626_v43 = vsel %vm664_vm3, %v8991_v14, %v8996_v2  ;;  %v5624_v31 = vsel %vm664_vm3, %v8996_v2, %v9001_v9  ;;  %v5623_v15 = vsel %vm664_vm3, %v8995_v28, %v9000_v23 }
 0xd0e   : > { %v13376_v24 = vmax.f32 %v5568_v25, %v5625_v7  ;;  %v13380_v36 = vmax.f32 %v5576_v61, %v5626_v43  ;;  %v13384_v44 = vmax.f32 %v5577_v35, %v5624_v31  ;;  %v13388_v18 = vmax.f32 %v5569_v12, %v5623_v15 }
 0xd10   : > { %v9032_v53 = vpack.i.bf16 %v13384_v44, %v13388_v18  ;;  %v9027_v22 = vpack.i.bf16 %v13380_v36, %v13376_v24 }
 0xd12   : > { %9033 = vrot.lane.b32.xlu2 %v9032_v53, %s13936_s18  ;;  %9028 = vrot.lane.b32.xlu1 %v9027_v22, %s13936_s18 }
 0xd1b   : > { %v9004_v4 = vpop.permute.xlu2 %9003 }
 0xd1c   : > { %v9006_v25 = vunpack.i.h.bf16 %v9004_v4  ;;  %v9005_v61 = vunpack.i.l.bf16 %v9004_v4  ;;  %v13489_v4 = vld [vmem:[%s13800_s5] sm:$0x3] }
 0xd1e   : > { %v5622_v29 = vsel %vm664_vm3, %v9001_v9, %v9006_v25  ;;  %v5621_v48 = vsel %vm664_vm3, %v9000_v23, %v9005_v61 }
 0xd1f   : > { %v13402_v12 = vmax.f32 %v5578_v38, %v5622_v29  ;;  %v13406_v35 = vmax.f32 %v5570_v37, %v5621_v48 }
 0xd21   : > { %v9037_v63 = vpack.i.bf16 %v13402_v12, %v13406_v35 }
 0xd23   : > { %9038 = vrot.lane.b32.xlu0 %v9037_v63, %s13936_s18 }
 0xd33   : > { %v9009_v21 = vpop.permute.xlu0 %9008 }
 0xd34   : > { %v9011_v14 = vunpack.i.h.bf16 %v9009_v21  ;;  %v9010_v59 = vunpack.i.l.bf16 %v9009_v21 }
 0xd36   : > { %v5619_v10 = vsel %vm664_vm3, %v9005_v61, %v9010_v59  ;;  %v5620_v54 = vsel %vm664_vm3, %v9006_v25, %v9011_v14 }
 0xd37   : > { %v13417_v38 = vmax.f32 %v5571_v52, %v5619_v10  ;;  %v13421_v8 = vmax.f32 %v5579_v45, %v5620_v54 }
 0xd39   : > { %v9042_v37 = vpack.i.bf16 %v13421_v8, %v13417_v38 }
 0xd3b   : > { %9043 = vrot.lane.b32.xlu1 %v9042_v37, %s13936_s18 }
 0xd3d   : > { %v9019_v56 = vpop.permute.xlu2 %9018 }
 0xd3e   : > { %v9021_v58 = vunpack.i.h.bf16 %v9019_v56  ;;  %v9020_v16 = vunpack.i.l.bf16 %v9019_v56 }
 0xd40   : > { %v5630_v39 = vsel %vm664_vm3, %v9021_v58, %v8986_v50  ;;  %v5629_v55 = vsel %vm664_vm3, %v9020_v16, %v8985_v51 }
 0xd41   : > { %v13434_v49 = vmax.f32 %v5582_v26, %v5630_v39  ;;  %v13436_v52 = vmax.f32 %v5574_v3, %v5629_v55 }
 0xd43   : > { %v9052_v45 = vpack.i.bf16 %v13434_v49, %v13436_v52 }
 0xd45   : > { %9053 = vrot.lane.b32.xlu0 %v9052_v45, %s13936_s18 }
 0xd55   : > { %v9014_v0 = vpop.permute.xlu1 %9013 }
 0xd56   : > { %v9016_v19 = vunpack.i.h.bf16 %v9014_v0  ;;  %v9015_v41 = vunpack.i.l.bf16 %v9014_v0 }
 0xd58   : > { %v5618_v50 = vsel %vm664_vm3, %v9011_v14, %v9016_v19  ;;  %v5615_v62 = vsel %vm664_vm3, %v9015_v41, %v9020_v16  ;;  %v5616_v51 = vsel %vm664_vm3, %v9016_v19, %v9021_v58  ;;  %v5617_v42 = vsel %vm664_vm3, %v9010_v59, %v9015_v41 }
 0xd59   : > { %v13451_v60 = vmax.f32 %v5580_v6, %v5618_v50  ;;  %v13455_v3 = vmax.f32 %v5572_v13, %v5617_v42  ;;  %v13459_v26 = vmax.f32 %v5573_v57, %v5615_v62  ;;  %v13463_v33 = vmax.f32 %v5581_v46, %v5616_v51  ;;  %v9024_v13 = vpop.permute.xlu0 %9023 }
 0xd5a   : > { %v9026_v30 = vunpack.i.h.bf16 %v9024_v13  ;;  %v9025_v1 = vunpack.i.l.bf16 %v9024_v13  ;;  %v5903_v13 = vld [vmem:[%s13803_s8 + $0xf0] sm:$0x3f] }
 0xd5b   : > { %v9047_v5 = vpack.i.bf16 %v13463_v33, %v13459_v26  ;;  %v9057_v47 = vpack.i.bf16 %v13451_v60, %v13455_v3 }
 0xd5d   : > { %9048 = vrot.lane.b32.xlu2 %v9047_v5, %s13936_s18  ;;  %9058 = vrot.lane.b32.xlu1 %v9057_v47, %s13936_s18  ;;  %v5899_v5 = vld [vmem:[%s13803_s8 + $0xd0] sm:$0x3f]  ;;  %v5884_v47 = vld [vmem:[%s13803_s8 + $0x58] sm:$0xff]  ;;  %s6303_s18 = scalar_lea.hbm %s13807_s12, %s9222_s25 }
 0xd5e   : > { %s6307_s0 = sshll.u32 %s6303_s18, 4  ;;  %s6308_s0 = int_to_ptr.hbm [resolvable:$true] %s6307_s0 }
 0xd5f   : > { %s9076_s16 = sshra.s32 %s6308_s0, 4  ;;  %s9077_s16 = int_to_ptr.hbm [resolvable:$true] %s9076_s16 }
 0xd60   : > { %s9078_s1 = scalar_lea.hbm %s9077_s16, 1  ;;  %p9083_p0 = scmp.lt.s32.totalorder %s9077_s16, %s13807_s12 }
 0xd61   : > { %p9079_p11 = scmp.ne.s32.totalorder %s9077_s16, %s9078_s1  ;;  %p9084_p1 = scmp.lt.s32.totalorder %s9082_s20, %s9078_s1 }
 0xd63   : > { %p9080_p12 = pnand %p9079_p11, %p9239_p5  ;;  %p9085_p2 = por %p9084_p1, %p9083_p0 }
 0xd65   : > { %5723 = vperm.xlu2 %8021, %v5720_v27   ;;  %v5875_v27 = vld [vmem:[%s13803_s8 + $0x10] sm:$0xff]  ;;  %p9081_p13 = pneg %p9080_p12 }
 0xd67   : > { %p9086_p3 = pnand %p9085_p2, %p9081_p13 }
 0xd6c   : > { %v9034_v6 = vpop.permute.xlu2 %9033 }
 0xd6d   : > { %v9036_v46 = vunpack.i.h.bf16 %v9034_v6  ;;  %v9035_v34 = vunpack.i.l.bf16 %v9034_v6  ;;  %v5876_v6 = vld [vmem:[%s13803_s8 + $0x18] sm:$0xff] }
 0xd84   : > { %v9029_v57 = vpop.permute.xlu1 %9028 }
 0xd85   : > { %v9031_v17 = vunpack.i.h.bf16 %v9029_v57  ;;  %v9030_v20 = vunpack.i.l.bf16 %v9029_v57 }
 0xd87   : > { %v5690_v2 = vsel %vm729_vm4, %v9031_v17, %v9036_v46  ;;  %v5692_v28 = vsel %vm729_vm4, %v9026_v30, %v9031_v17  ;;  %v5689_v9 = vsel %vm729_vm4, %v9030_v20, %v9035_v34  ;;  %v5691_v23 = vsel %vm729_vm4, %v9025_v1, %v9030_v20 }
 0xd88   : > { %v5703_v7 = vmax.f32 %v13350_v11, %v5692_v28  ;;  %v5704_v43 = vmax.f32 %v13380_v36, %v5690_v2  ;;  %v5695_v31 = vmax.f32 %v13346_v40, %v5691_v23  ;;  %v5696_v15 = vmax.f32 %v13376_v24, %v5689_v9  ;;  %v5896_v9 = vld [vmem:[%s13803_s8 + $0xb8] sm:$0xff]  ;;  %v5914_v23 = vld.sshfl [vmem:[#allocation1 + $0x10] sm:$0xff pattern:$0x75316420] }
 0xd8a   : > { %v5712_v53 = vpack.c.bf16 %v5703_v7, %v5695_v31  ;;  %v5713_v22 = vpack.c.bf16 %v5704_v43, %v5696_v15 }
 0xd8c   : > { %5736 = vmatpush.bf16.msra.mxu3 %v5712_v53  ;;  %5749 = vmatpush.bf16.msra.mxu1 %v5713_v22 }
 0xd8f   : > { %7332 = vmatmul.msk.bf16.vlgmr.msra.gmra.mxu3 %vm1751_vm11, %v13489_v4  ;;  %7333 = vmatmul.msk.bf16.vlgmr.msra.gmra.mxu1 %vm1751_vm11, %v13489_v4 }
 0xd95   : > { %v9039_v11 = vpop.permute.xlu0 %9038 }
 0xd96   : > { %v9041_v36 = vunpack.i.h.bf16 %v9039_v11  ;;  %v9040_v40 = vunpack.i.l.bf16 %v9039_v11  ;;  %v5898_v11 = vld [vmem:[%s13803_s8 + $0xc8] sm:$0x3f] }
 0xd98   : > { %v5688_v24 = vsel %vm729_vm4, %v9036_v46, %v9041_v36  ;;  %v5687_v25 = vsel %vm729_vm4, %v9035_v34, %v9040_v40  ;;  %v5895_v34 = vld [vmem:[%s13803_s8 + $0xb0] sm:$0xff] }
 0xd99   : > { %v5705_v61 = vmax.f32 %v13384_v44, %v5688_v24  ;;  %v5697_v29 = vmax.f32 %v13388_v18, %v5687_v25  ;;  %v5882_v24 = vld [vmem:[%s13803_s8 + $0x48] sm:$0xff]  ;;  %v5881_v25 = vld [vmem:[%s13803_s8 + $0x40] sm:$0xff] }
 0xd9b   : > { %v5714_v48 = vpack.c.bf16 %v5705_v61, %v5697_v29  ;;  %v5874_v61 = vld [vmem:[%s13803_s8 + $0x8] sm:$0xff] }
 0xd9c   : > { %v5902_v29 = vld [vmem:[%s13803_s8 + $0xe8] sm:$0x3f] }
 0xd9d   : > { %5762 = vmatpush.bf16.msra.mxu2 %v5714_v48  ;;  %v5901_v48 = vld [vmem:[%s13803_s8 + $0xe0] sm:$0x3f] }
 0xda0   : > { %7334 = vmatmul.msk.bf16.vlgmr.msra.gmra.mxu2 %vm1751_vm11, %v13489_v4 }
 0xdad   : > { %v9044_v63 = vpop.permute.xlu1 %9043 }
 0xdae   : > { %v9046_v21 = vunpack.i.h.bf16 %v9044_v63  ;;  %v9045_v14 = vunpack.i.l.bf16 %v9044_v63  ;;  %v5894_v63 = vld [vmem:[%s13803_s8 + $0xa8] sm:$0xff] }
 0xdb0   : > { %v5686_v59 = vsel %vm729_vm4, %v9041_v36, %v9046_v21  ;;  %v5685_v10 = vsel %vm729_vm4, %v9040_v40, %v9045_v14  ;;  %v5890_v36 = vld [vmem:[%s13803_s8 + $0x88] sm:$0xff]  ;;  %v5889_v40 = vld [vmem:[%s13803_s8 + $0x80] sm:$0xff] }
 0xdb1   : > { %v5706_v54 = vmax.f32 %v13402_v12, %v5686_v59  ;;  %v5698_v44 = vmax.f32 %v13406_v35, %v5685_v10  ;;  %v5912_v59 = vld.sshfl [vmem:[#allocation1] sm:$0xff pattern:$0x75316420]  ;;  %v5886_v10 = vld [vmem:[%s13803_s8 + $0x68] sm:$0xff] }
 0xdb3   : > { %v5715_v37 = vpack.c.bf16 %v5706_v54, %v5698_v44  ;;  %v5885_v54 = vld [vmem:[%s13803_s8 + $0x60] sm:$0xff]  ;;  %v5878_v44 = vld [vmem:[%s13803_s8 + $0x28] sm:$0xff] }
 0xdb5   : > { %5775 = vmatpush.bf16.msrb.mxu3 %v5715_v37  ;;  %v5877_v37 = vld [vmem:[%s13803_s8 + $0x20] sm:$0xff] }
 0xdb7   : > { %v9049_v18 = vpop.permute.xlu2 %9048  ;;  %v9054_v56 = vpop.permute.xlu0 %9053 }
 0xdb8   : > { %v9051_v58 = vunpack.i.h.bf16 %v9049_v18  ;;  %v9050_v16 = vunpack.i.l.bf16 %v9049_v18  ;;  %v9056_v39 = vunpack.i.h.bf16 %v9054_v56  ;;  %v9055_v55 = vunpack.i.l.bf16 %v9054_v56  ;;  %7335 = vmatmul.msk.bf16.vlgmr.msrb.gmra.mxu3 %vm1751_vm11, %v13489_v4  ;;  %v5866_v18 = vld [vmem:[%s13802_s7 + $0xc8] sm:$0x3f]  ;;  %v5865_v56 = vld [vmem:[%s13802_s7 + $0xc0] sm:$0x3f] }
 0xdba   : > { %v5680_v45 = vsel %vm729_vm4, %v9051_v58, %v9056_v39  ;;  %v5679_v0 = vsel %vm729_vm4, %v9050_v16, %v9055_v55  ;;  %v5693_v19 = vsel %vm729_vm4, %v9055_v55, %v9025_v1  ;;  %v5694_v12 = vsel %vm729_vm4, %v9056_v39, %v9026_v30  ;;  %v5904_v30 = vld [vmem:[%s13803_s8 + $0xf8] sm:$0x3f]  ;;  %v5918_v39 = vld.sshfl [vmem:[#allocation1 + $0x30] sm:$0xff pattern:$0x75316420] }
 0xdbb   : > { %v5709_v35 = vmax.f32 %v13463_v33, %v5680_v45  ;;  %v5701_v41 = vmax.f32 %v13459_v26, %v5679_v0  ;;  %v5702_v50 = vmax.f32 %v13436_v52, %v5693_v19  ;;  %v5710_v62 = vmax.f32 %v13434_v49, %v5694_v12  ;;  %v5900_v33 = vld [vmem:[%s13803_s8 + $0xd8] sm:$0x3f]  ;;  %v5891_v49 = vld [vmem:[%s13803_s8 + $0x90] sm:$0xff]  ;;  %v5916_v55 = vld.sshfl [vmem:[#allocation1 + $0x20] sm:$0xff pattern:$0x75316420] }
 0xdbc   : > { %v5892_v52 = vld [vmem:[%s13803_s8 + $0x98] sm:$0xff]  ;;  %v5883_v26 = vld [vmem:[%s13803_s8 + $0x50] sm:$0xff]  ;;  %v5858_v45 = vld [vmem:[%s13802_s7 + $0x88] sm:$0xff] }
 0xdbd   : > { %v5718_v51 = vpack.c.bf16 %v5709_v35, %v5701_v41  ;;  %v5719_v42 = vpack.c.bf16 %v5710_v62, %v5702_v50  ;;  %v5857_v0 = vld [vmem:[%s13802_s7 + $0x80] sm:$0xff]  ;;  %v5919_v19 = vld.sshfl [vmem:[#allocation1 + $0x38] sm:$0xff pattern:$0x75316420]  ;;  %v5850_v12 = vld [vmem:[%s13802_s7 + $0x48] sm:$0xff] }
 0xdbe   : > { %v5849_v35 = vld [vmem:[%s13802_s7 + $0x40] sm:$0xff]  ;;  %v5867_v41 = vld [vmem:[%s13802_s7 + $0xd0] sm:$0x3f]  ;;  %v5842_v50 = vld [vmem:[%s13802_s7 + $0x8] sm:$0xff] }
 0xdbf   : > { %5814 = vmatpush.bf16.msrb.mxu2 %v5718_v51  ;;  %5827 = vmatpush.bf16.msra.mxu3 %v5719_v42  ;;  %v5841_v62 = vld [vmem:[%s13802_s7] sm:$0xff]  ;;  %v5859_v51 = vld [vmem:[%s13802_s7 + $0x90] sm:$0xff] }
 0xdc0   : > { %v5851_v42 = vld [vmem:[%s13802_s7 + $0x50] sm:$0xff] }
 0xdc2   : > { %7338 = vmatmul.msk.bf16.vlgmr.msrb.gmra.mxu2 %vm1751_vm11, %v13489_v4 }
 0xdc3   : > { %5980 = vmatpush.xpose.msra.mxu2 %v5899_v5  ;;  %6000 = vmatpush.xpose.msrb.mxu3 %v5900_v33  ;;  %v5843_v5 = vld [vmem:[%s13802_s7 + $0x10] sm:$0xff]  ;;  %v5868_v33 = vld [vmem:[%s13802_s7 + $0xd8] sm:$0x3f] }
 0xdc7   : > { %5981 = vmatpush.xpose.msra.mxu2 %v5891_v49  ;;  %6001 = vmatpush.xpose.msrb.mxu3 %v5892_v52  ;;  %v5871_v49 = vld [vmem:[%s13802_s7 + $0xf0] sm:$0x3f]  ;;  %v5860_v52 = vld [vmem:[%s13802_s7 + $0x98] sm:$0xff] }
 0xdc8   : > { %7339 = vmatmul.msk.bf16.vlgmr.msra.gmra.mxu3 %vm1751_vm11, %v13489_v4 }
 0xdcb   : > { %5982 = vmatpush.xpose.msra.mxu2 %v5883_v26  ;;  %6002 = vmatpush.xpose.msrb.mxu3 %v5884_v47  ;;  %v13684_v26 = vpop.permute.xlu2 %5723 }
 0xdcf   : > { %5983 = vmatpush.xpose.msra.mxu2 %v5875_v27  ;;  %6003 = vmatpush.xpose.msrb.mxu3 %v5876_v6  ;;  %v9059_v1 = vpop.permute.xlu1 %9058  ;;  %v5852_v6 = vld [vmem:[%s13802_s7 + $0x58] sm:$0xff] }
 0xdd0   : > { %v9061_v57 = vunpack.i.h.bf16 %v9059_v1  ;;  %v9060_v46 = vunpack.i.l.bf16 %v9059_v1 }
 0xdd2   : > { %v5682_v17 = vsel %vm729_vm4, %v9061_v57, %v9051_v58  ;;  %v5681_v20 = vsel %vm729_vm4, %v9060_v46, %v9050_v16  ;;  %v5683_v2 = vsel %vm729_vm4, %v9045_v14, %v9060_v46  ;;  %v5684_v28 = vsel %vm729_vm4, %v9046_v21, %v9061_v57  ;;  %5984 = vmatmul.f32.vlgmr.msra.gmra.mxu2 %v5914_v23  ;;  %v5893_v21 = vld [vmem:[%s13803_s8 + $0xa0] sm:$0xff]  ;;  %v5913_v14 = vld.sshfl [vmem:[#allocation1 + $0x8] sm:$0xff pattern:$0x75316420]  ;;  %v5880_v16 = vld [vmem:[%s13803_s8 + $0x38] sm:$0xff] }
 0xdd3   : > { %6060 = vmatpush.xpose.msrb.mxu2 %v5903_v13  ;;  %6080 = vmatpush.xpose.msra.mxu3 %v5904_v30  ;;  %v5708_v7 = vmax.f32 %v13451_v60, %v5682_v17  ;;  %v5699_v43 = vmax.f32 %v13417_v38, %v5683_v2  ;;  %v5700_v31 = vmax.f32 %v13455_v3, %v5681_v20  ;;  %v5897_v38 = vld [vmem:[%s13803_s8 + $0xc0] sm:$0x3f]  ;;  %v5915_v60 = vld.sshfl [vmem:[#allocation1 + $0x18] sm:$0xff pattern:$0x75316420]  ;;  %v5879_v3 = vld [vmem:[%s13803_s8 + $0x30] sm:$0xff] }
 0xdd4   : > { %v5707_v15 = vmax.f32 %v13421_v8, %v5684_v28  ;;  %v5888_v8 = vld [vmem:[%s13803_s8 + $0x78] sm:$0xff]  ;;  %v5917_v58 = vld.sshfl [vmem:[#allocation1 + $0x28] sm:$0xff pattern:$0x75316420]  ;;  %v5863_v17 = vld [vmem:[%s13802_s7 + $0xb0] sm:$0xff] }
 0xdd5   : > { %v5717_v22 = vpack.c.bf16 %v5708_v7, %v5700_v31  ;;  %v5844_v20 = vld [vmem:[%s13802_s7 + $0x18] sm:$0xff]  ;;  %v5855_v2 = vld [vmem:[%s13802_s7 + $0x70] sm:$0xff] }
 0xdd6   : > { %v5716_v53 = vpack.c.bf16 %v5707_v15, %v5699_v43  ;;  %v5872_v28 = vld [vmem:[%s13802_s7 + $0xf8] sm:$0x3f]  ;;  %v5847_v7 = vld [vmem:[%s13802_s7 + $0x30] sm:$0xff] }
 0xdd7   : > { %6061 = vmatpush.xpose.msrb.mxu2 %v5895_v34  ;;  %6081 = vmatpush.xpose.msra.mxu3 %v5896_v9  ;;  %v5864_v43 = vld [vmem:[%s13802_s7 + $0xb8] sm:$0xff] }
 0xdd8   : > { %5788 = vmatpush.bf16.msra.mxu0 %v5716_v53  ;;  %5801 = vmatpush.bf16.msrb.mxu1 %v5717_v22  ;;  %v5856_v15 = vld [vmem:[%s13802_s7 + $0x78] sm:$0xff]  ;;  %v5870_v53 = vld [vmem:[%s13802_s7 + $0xe8] sm:$0x3f] }
 0xdd9   : > { %6004 = vmatmul.f32.vlgmr.msrb.gmra.mxu3 %v5915_v60  ;;  %v5853_v60 = vld [vmem:[%s13802_s7 + $0x60] sm:$0xff] }
 0xddb   : > { %6062 = vmatpush.xpose.msrb.mxu2 %v5887_v32  ;;  %6082 = vmatpush.xpose.msra.mxu3 %v5888_v8  ;;  %v5869_v32 = vld [vmem:[%s13802_s7 + $0xe0] sm:$0x3f]  ;;  %v5862_v8 = vld [vmem:[%s13802_s7 + $0xa8] sm:$0xff] }
 0xddc   : > { %5960 = vmatpush.xpose.msra.mxu1 %v5898_v11  ;;  %5940 = vmatpush.xpose.msrb.mxu0 %v5897_v38  ;;  %v5848_v11 = vld [vmem:[%s13802_s7 + $0x38] sm:$0xff]  ;;  %v5861_v38 = vld [vmem:[%s13802_s7 + $0xa0] sm:$0xff] }
 0xddd   : > { %7336 = vmatmul.msk.bf16.vlgmr.msra.gmra.mxu0 %vm1751_vm11, %v13489_v4  ;;  %7337 = vmatmul.msk.bf16.vlgmr.msrb.gmra.mxu1 %vm1751_vm11, %v13489_v4  ;;  %v5873_v4 = vld [vmem:[%s13803_s8] sm:$0xff] }
 0xddf   : > { %6063 = vmatpush.xpose.msrb.mxu2 %v5879_v3  ;;  %6083 = vmatpush.xpose.msra.mxu3 %v5880_v16  ;;  %v5854_v3 = vld [vmem:[%s13802_s7 + $0x68] sm:$0xff] }
 0xde0   : > { %5961 = vmatpush.xpose.msra.mxu1 %v5890_v36  ;;  %5941 = vmatpush.xpose.msrb.mxu0 %v5889_v40  ;;  %v5845_v36 = vld [vmem:[%s13802_s7 + $0x20] sm:$0xff]  ;;  %v5846_v40 = vld [vmem:[%s13802_s7 + $0x28] sm:$0xff] }
 0xde2   : > { %6064 = vmatmul.f32.vlgmr.msrb.gmra.mxu2 %v5918_v39  ;;  %6084 = vmatmul.f32.vlgmr.msra.gmra.mxu3 %v5919_v19 }
 0xde3   : > { %6140 = vmatpush.xpose.msra.mxu2 %v5867_v41  ;;  %6160 = vmatpush.xpose.msrb.mxu3 %v5868_v33 }
 0xde4   : > { %5962 = vmatpush.xpose.msra.mxu1 %v5882_v24  ;;  %5942 = vmatpush.xpose.msrb.mxu0 %v5881_v25 }
 0xde7   : > { %6141 = vmatpush.xpose.msra.mxu2 %v5859_v51  ;;  %6161 = vmatpush.xpose.msrb.mxu3 %v5860_v52 }
 0xde8   : > { %5963 = vmatpush.xpose.msra.mxu1 %v5874_v61  ;;  %5943 = vmatpush.xpose.msrb.mxu0 %v5873_v4 }
 0xdeb   : > { %6142 = vmatpush.xpose.msra.mxu2 %v5851_v42  ;;  %6162 = vmatpush.xpose.msrb.mxu3 %v5852_v6 }
 0xdec   : > { %6040 = vmatpush.xpose.msrb.mxu1 %v5902_v29  ;;  %6020 = vmatpush.xpose.msra.mxu0 %v5901_v48 }
 0xded   : > { %5964 = vmatmul.f32.vlgmr.msra.gmra.mxu1 %v5913_v14  ;;  %5944 = vmatmul.f32.vlgmr.msrb.gmra.mxu0 %v5912_v59 }
 0xdef   : > { %6143 = vmatpush.xpose.msra.mxu2 %v5843_v5  ;;  %6163 = vmatpush.xpose.msrb.mxu3 %v5844_v20 }
 0xdf0   : > { %6041 = vmatpush.xpose.msrb.mxu1 %v5894_v63  ;;  %6021 = vmatpush.xpose.msra.mxu0 %v5893_v21 }
 0xdf3   : > { %6220 = vmatpush.xpose.msrb.mxu2 %v5871_v49  ;;  %6240 = vmatpush.xpose.msra.mxu3 %v5872_v28 }
 0xdf4   : > { %6042 = vmatpush.xpose.msrb.mxu1 %v5886_v10  ;;  %6022 = vmatpush.xpose.msra.mxu0 %v5885_v54 }
 0xdf7   : > { %6221 = vmatpush.xpose.msrb.mxu2 %v5863_v17  ;;  %6241 = vmatpush.xpose.msra.mxu3 %v5864_v43 }
 0xdf8   : > { %6043 = vmatpush.xpose.msrb.mxu1 %v5878_v44  ;;  %6023 = vmatpush.xpose.msra.mxu0 %v5877_v37 }
 0xdfb   : > { %6044 = vmatmul.f32.vlgmr.msrb.gmra.mxu1 %v5917_v58  ;;  %6024 = vmatmul.f32.vlgmr.msra.gmra.mxu0 %v5916_v55 }
 0xdfc   : > { %6120 = vmatpush.xpose.msra.mxu1 %v5866_v18  ;;  %6100 = vmatpush.xpose.msrb.mxu0 %v5865_v56 }
 0xdfd   : > { %6222 = vmatpush.xpose.msrb.mxu2 %v5855_v2  ;;  %6242 = vmatpush.xpose.msra.mxu3 %v5856_v15 }
 0xe00   : > { %6121 = vmatpush.xpose.msra.mxu1 %v5858_v45  ;;  %6101 = vmatpush.xpose.msrb.mxu0 %v5857_v0 }
 0xe01   : > { %6223 = vmatpush.xpose.msrb.mxu2 %v5847_v7  ;;  %6243 = vmatpush.xpose.msra.mxu3 %v5848_v11 }
 0xe04   : > { %6122 = vmatpush.xpose.msra.mxu1 %v5850_v12  ;;  %6102 = vmatpush.xpose.msrb.mxu0 %v5849_v35 }
 0xe08   : > { %6123 = vmatpush.xpose.msra.mxu1 %v5842_v50  ;;  %6103 = vmatpush.xpose.msrb.mxu0 %v5841_v62 }
 0xe0c   : > { %v5751_v47 = vpop.f32.mrf.mxu1  ;;  %6180 = vmatpush.xpose.msra.mxu0 %v5869_v32  ;;  %6200 = vmatpush.xpose.msrb.mxu1 %v5870_v53  ;;  %v6248_v32 = vld [vmem:[%s13804_s9] sm:$0x7] }
 0xe0d   : > { %v5752_v27 = vadd.f32 %v5751_v47, %v13684_v26 }
 0xe0f   : > { %v5834_v13 = vmax.f32 %v5752_v27, 0.0  ;;  %v6262_v27 = vld [vmem:[%s13805_s10 + $0x18] sm:$0x3f] }
 0xe10   : > { %6181 = vmatpush.xpose.msra.mxu0 %v5861_v38  ;;  %6201 = vmatpush.xpose.msrb.mxu1 %v5862_v8 }
 0xe11   : > { %6124 = vmatmul.f32.vlgmr.msra.gmra.mxu1 %v5834_v13  ;;  %v6261_v13 = vld [vmem:[%s13805_s10 + $0x10] sm:$0xff] }
 0xe12   : > { %v5738_v30 = vpop.f32.mrf.mxu3 }
 0xe13   : > { %v5739_v1 = vadd.f32 %v5738_v30, %v13684_v26  ;;  %v6260_v30 = vld [vmem:[%s13805_s10 + $0x8] sm:$0xff] }
 0xe14   : > { %v5753_v57 = vpop.f32.mrf.mxu1  ;;  %6182 = vmatpush.xpose.msra.mxu0 %v5853_v60  ;;  %6202 = vmatpush.xpose.msrb.mxu1 %v5854_v3 }
 0xe15   : > { %v5833_v46 = vmax.f32 %v5739_v1, 0.0 }
 0xe17   : > { %6104 = vmatmul.f32.vlgmr.msrb.gmra.mxu0 %v5833_v46  ;;  %v6259_v46 = vld [vmem:[%s13805_s10] sm:$0xff] }
 0xe18   : > { %6183 = vmatpush.xpose.msra.mxu0 %v5845_v36  ;;  %6203 = vmatpush.xpose.msrb.mxu1 %v5846_v40 }
 0xe1a   : > { %v5740_v34 = vpop.f32.mrf.mxu3 }
 0xe1c   : > { %7340 = vmatpush.msk.msrb.mxu0 %vm6267_vm12, %v6262_v27 }
 0xe1e   : > { %6284 = vmatpush.msrb.mxu0 %v6261_v13 }
 0xe20   : > { %6285 = vmatpush.msrb.mxu0 %v6260_v30 }
 0xe22   : > { %6286 = vmatpush.msrb.mxu0 %v6259_v46 }
 0xe23   : > { %v5764_v9 = vpop.f32.mrf.mxu2 }
 0xe24   : > { %v5765_v23 = vadd.f32 %v5764_v9, %v13684_v26 }
 0xe26   : > { %v5835_v31 = vmax.f32 %v5765_v23, 0.0 }
 0xe28   : > { %6144 = vmatmul.f32.vlgmr.msra.gmra.mxu2 %v5835_v31 }
 0xe2b   : > { %v5766_v22 = vpop.f32.mrf.mxu2 }
 0xe3b   : > { %v5777_v24 = vpop.f32.mrf.mxu3 }
 0xe3c   : > { %v5778_v25 = vadd.f32 %v5777_v24, %v13684_v26  ;;  %v6258_v24 = vld [vmem:[%s13806_s11] sm:$0x1] }
 0xe3e   : > { %v5836_v61 = vmax.f32 %v5778_v25, 0.0 }
 0xe40   : > { %6164 = vmatmul.f32.vlgmr.msrb.gmra.mxu3 %v5836_v61 }
 0xe43   : > { %v5779_v48 = vpop.f32.mrf.mxu3 }
 0xe45   : > { %v5816_v4 = vpop.f32.mrf.mxu2 }
 0xe46   : > { %v5817_v29 = vadd.f32 %v5816_v4, %v13684_v26 }
 0xe48   : > { %v5839_v63 = vmax.f32 %v5817_v29, 0.0 }
 0xe4a   : > { %6224 = vmatmul.f32.vlgmr.msrb.gmra.mxu2 %v5839_v63 }
 0xe4b   : > { %v5829_v14 = vpop.f32.mrf.mxu3 }
 0xe4c   : > { %v5830_v59 = vadd.f32 %v5829_v14, %v13684_v26 }
 0xe4d   : > { %v5818_v21 = vpop.f32.mrf.mxu2 }
 0xe4e   : > { %v5840_v10 = vmax.f32 %v5830_v59, 0.0 }
 0xe50   : > { %6244 = vmatmul.f32.vlgmr.msra.gmra.mxu3 %v5840_v10 }
 0xe53   : > { %v5831_v54 = vpop.f32.mrf.mxu3 }
 0xe55   : > { %v5985_v12 = vpop.f32.mrf.mxu2 }
 0xe5a   : > { %v5790_v44 = vpop.f32.mrf.mxu0  ;;  %v5803_v37 = vpop.f32.mrf.mxu1 }
 0xe5b   : > { %v5791_v18 = vadd.f32 %v5790_v44, %v13684_v26  ;;  %v5804_v56 = vadd.f32 %v5803_v37, %v13684_v26 }
 0xe5c   : > { %v6005_v41 = vpop.f32.mrf.mxu3 }
 0xe5d   : > { %v5837_v58 = vmax.f32 %v5791_v18, 0.0  ;;  %v5838_v16 = vmax.f32 %v5804_v56, 0.0 }
 0xe5f   : > { %6184 = vmatmul.f32.vlgmr.msra.gmra.mxu0 %v5837_v58  ;;  %6204 = vmatmul.f32.vlgmr.msrb.gmra.mxu1 %v5838_v16 }
 0xe62   : > { %v5792_v39 = vpop.f32.mrf.mxu0  ;;  %v5805_v55 = vpop.f32.mrf.mxu1 }
 0xe65   : > { %v6065_v33 = vpop.f32.mrf.mxu2  ;;  %v6085_v52 = vpop.f32.mrf.mxu3 }
 0xe6a   : > { %v5965_v45 = vpop.f32.mrf.mxu1  ;;  %v5945_v0 = vpop.f32.mrf.mxu0 }
 0xe6b   : > { %v5966_v19 = vadd.f32 %v5965_v45, %v5945_v0 }
 0xe6d   : > { %v5986_v35 = vadd.f32 %v5985_v12, %v5966_v19 }
 0xe6f   : > { %v6006_v50 = vadd.f32 %v6005_v41, %v5986_v35 }
 0xe78   : > { %v6025_v62 = vpop.f32.mrf.mxu0  ;;  %v6045_v42 = vpop.f32.mrf.mxu1 }
 0xe79   : > { %v6026_v51 = vadd.f32 %v6025_v62, %v6006_v50 }
 0xe7b   : > { %v6046_v5 = vadd.f32 %v6045_v42, %v6026_v51 }
 0xe7d   : > { %v6066_v49 = vadd.f32 %v6065_v33, %v6046_v5 }
 0xe7f   : > { %v6086_v26 = vadd.f32 %v6085_v52, %v6066_v49 }
 0xe8e   : > { %v6125_v1 = vpop.f32.mrf.mxu1 }
 0xe94   : > { %v6105_v47 = vpop.f32.mrf.mxu0 }
 0xe95   : > { %v6106_v6 = vadd.f32 %v6105_v47, %v6086_v26 }
 0xe97   : > { %v6126_v34 = vadd.f32 %v6125_v1, %v6106_v6 }
 0xeab   : > { %v6145_v57 = vpop.f32.mrf.mxu2 }
 0xeac   : > { %v6146_v20 = vadd.f32 %v6145_v57, %v6126_v34 }
 0xec3   : > { %v6165_v17 = vpop.f32.mrf.mxu3 }
 0xec4   : > { %v6166_v2 = vadd.f32 %v6165_v17, %v6146_v20 }
 0xecd   : > { %v6225_v43 = vpop.f32.mrf.mxu2 }
 0xed3   : > { %v6245_v15 = vpop.f32.mrf.mxu3 }
 0xedc   : > { %v6185_v28 = vpop.f32.mrf.mxu0  ;;  %v6205_v23 = vpop.f32.mrf.mxu1 }
 0xedd   : > { %v6186_v9 = vadd.f32 %v6185_v28, %v6166_v2 }
 0xedf   : > { %v6206_v7 = vadd.f32 %v6205_v23, %v6186_v9 }
 0xee1   : > { %v6226_v31 = vadd.f32 %v6225_v43, %v6206_v7 }
 0xee3   : > { %v6246_v53 = vadd.f32 %v6245_v15, %v6226_v31 }
 0xee5   : > { %v6249_v22 = vmul.f32 %v6248_v32, %v6246_v53 }
 0xee7   : > { %v6251_v11 = vsel %vm6250_vm13, %v6249_v22, 0.0 }
 0xee8   : > { %v6252_v38 = vrot.slane %v6251_v11, 4 }
 0xeea   : > { %v6253_v8 = vadd.f32 %v6252_v38, %v6251_v11 }
 0xeec   : > { %v6254_v60 = vrot.slane %v6253_v8, 2 }
 0xeee   : > { %v6255_v3 = vadd.f32 %v6254_v60, %v6253_v8 }
 0xef0   : > { %v6256_v36 = vrot.slane %v6255_v3, 1 }
 0xef2   : > { %v6257_v40 = vadd.f32 %v6256_v36, %v6255_v3 }
 0xef4   : > { %7341 = vmatmul.msk.f32.vlgmr.msrb.gmra.mxu0 %vm6263_vm14, %v6257_v40 }
 0xf71   : > { %v6288_v25 = vpop.f32.mrf.mxu0 }
 0xf72   : > { %v6291_v61 = vadd.f32 %v6288_v25, %v6258_v24 }
 0xf74   : > { %6293 = vst.msk [vmem:[%s405_s28] sm:$0x1] %vm6292_vm15, %v6291_v61 }
 0xf75   : > { %9089 = shalt.err (!%p9086_p3)
}
 0xf76   : > { %7570 = dma.vmem_to_hbm [thread:$0]  (%p9239_p5), %s6306_s29, 16, %s6308_s0, %s6295_s15  }
 0xf77 PF: > { %p7576_p4 = scmp.ge.s32.totalorder %s9124_s24, 2  ;;  %s6319_s19 = sand.u32 1, %s9112_s21  }
 0xf78   : > { %s6320_s30 = scalar_lea.sflag [#allocation4], %s6319_s19 }
 0xf79   : > { %p7573_p7 = pnand %p7576_p4, %p9243_p6 }
 0xf7b   : > { %p7574_p8 = pneg %p7573_p7 }
 0xf7d   : > { %9107 = dma.done.wait (%p7574_p8), %s6320_s30, 16  }
 0xf7e   : > { %9109 = vsyncadd (%p7574_p8), %s6320_s30, 4294967280  ;;  %s13955_s1 = sld [smem:[#allocation6_spill]]  ;;  %p22_p9 = scmp.ge.s32.totalorder %s9226_s27, 4  }
 0xf7f   : > { %s13956_s21 = smov %s9116_s22  ;;  %s13957_s22 = smov %s9120_s23 }
 0xf80   : > { %s13959_s24 = smov %s9226_s27  ;;  %24 = sbr.rel (!%p22_p9) target bundleno = 6 (0x6), region = 109 }
 0xf84   : > { %s13958_s23 = smov %s13955_s1 }
 0xf85   :  { %6325 = vsyncpa [#allocation4], 1 }
 0xf86   :  { %6327 = vsyncpa [#allocation4 + $0x1], 1 }

</bundles_post_ra>
